<compile_context>
chip_gen: v5e
topology: v5e:2x2
jax: 0.10.0
libtpu: 0.0.40
codegen_flags: <defaults>
</compile_context>

<pallas_src>
import functools

import jax
import jax.numpy as jnp
from jax.experimental import pallas as pl
from jax.experimental.pallas import tpu as pltpu

_EPS = 1e-07
_LANE_WIDTHS = (512, 256, 128)     # preferred slab widths (multiples of 128)
_SMALL_INPUT_BYTES = 2 << 20       # below this, pure jnp beats kernel setup


def _round_up(x, m):
    return ((x + m - 1) // m) * m


def _device_kind():
    try:
        return jax.devices()[0].device_kind.lower()
    except Exception:
        return ""


def _num_tensorcores():
    kind = _device_kind()
    # 2 TensorCores per device on v4 / v5p (megacore) and v7x; 1 on v5e / v6e.
    return 2 if any(tag in kind for tag in ("v4", "v5p", "v7")) else 1


def _block_budget_bytes():
    kind = _device_kind()
    # Larger tiles amortize the ~0.35us per-grid-step overhead; v6e/v7x have
    # the HBM bandwidth to make 8 MiB blocks worth it, v5e stays at 4 MiB.
    return (8 << 20) if ("v6" in kind or "v7" in kind) else (4 << 20)


def _nll_sum_kernel(x_ref, t_ref, part_ref, *, steps, rows_per_step, acc_rows,
                    valid_rows, masked):
    """Accumulates sum(log(x + eps) * t) into a (1, acc_rows, W) f32 block.

    The output block index is constant along the last ("arbitrary") grid axis,
    so it stays VMEM-resident and acts as the accumulator directly.
    """
    c = pl.program_id(0)
    s = pl.program_id(1)

    @pl.when(s == 0)
    def _():
        part_ref[...] = jnp.zeros_like(part_ref)

    x = x_ref[...].astype(jnp.float32)
    t = t_ref[...].astype(jnp.float32)

    if masked:
        # Logical (unclamped) row ids of this block; rows >= valid_rows are the
        # ragged tail / duplicated trailing blocks and must contribute exactly
        # 0. Mask x before the log (not just the product) so OOB data never
        # reaches the transcendental.
        start = (c * steps + s) * rows_per_step
        row_ids = start + jax.lax.broadcasted_iota(jnp.int32, x.shape, 0)
        valid = row_ids < valid_rows
        x = jnp.where(valid, x, 1.0)
        t = jnp.where(valid, t, 0.0)

    v = jnp.log(x + _EPS) * t          # EUP log + VPU mul; sign folded outside
    w = v.shape[-1]
    # (R, W) -> (R//acc, acc, W) splits only the sublane axis on a multiple of
    # 8, so the axis-0 sum lowers to plain elementwise vreg adds (no XLU).
    part_ref[...] += jnp.sum(
        v.reshape(rows_per_step // acc_rows, acc_rows, w), axis=0)[None]


def _nll_jnp(output, target):
    x = output.astype(jnp.float32)
    t = target.astype(jnp.float32)
    return jnp.mean(jnp.sum(-jnp.log(x + _EPS) * t, axis=1))


def nll_loss_onehot(output, target, *, min_pallas_bytes=_SMALL_INPUT_BYTES):
    """Pallas TPU implementation of NLL_loss_onehot.forward.

    output, target: arrays of identical shape (N, C, ...). Returns scalar f32.
    """
    output = jnp.asarray(output)
    target = jnp.asarray(target)
    assert output.shape == target.shape, "output and target must match"
    assert output.ndim >= 2, "module sums over dim=1, need rank >= 2"

    ne = output.size
    # .sum(dim=1).mean(): the mean runs over numel/shape[1] elements.
    scale = -(output.shape[1] / ne)

    total_bytes = ne * (output.dtype.itemsize + target.dtype.itemsize)
    if total_bytes < min_pallas_bytes:
        return _nll_jnp(output, target)          # kernel setup would dominate

    # Zero-copy 2-D view: a lane-dense slab when a 512/256/128 width tiles
    # numel exactly, otherwise rows of the native trailing dim. No pad, no
    # dtype cast in the wrapper.
    width = next((w for w in _LANE_WIDTHS if ne % w == 0), output.shape[-1])
    rows = ne // width
    x2d = output.reshape(rows, width)
    t2d = target.reshape(rows, width)

    itemsize_max = max(output.dtype.itemsize, target.dtype.itemsize)
    itemsize_min = min(output.dtype.itemsize, target.dtype.itemsize)
    row_align = max(8, 32 // itemsize_min)   # 8 f32 / 16 bf16 / 32 int8 rows

    budget = _block_budget_bytes()
    if min(rows, row_align) * width * itemsize_max > budget:
        # TODO(synk): also tile the class/width axis for extremely wide rows.
        return _nll_jnp(output, target)

    if rows <= row_align:
        splits, steps, rows_per_step, total_blocks = 1, 1, rows, 1
    else:
        splits = max(1, min(_num_tensorcores(), rows // row_align))
        max_rows = max(row_align,
                       (budget // (width * itemsize_max)) // row_align * row_align)
        # First guess, then rebalance so blocks are evenly sized (minimizes the
        # masked waste in the final partial block).
        rows_per_step = min(max_rows, _round_up(pl.cdiv(rows, splits), row_align))
        total_blocks = pl.cdiv(rows, rows_per_step)
        rows_per_step = _round_up(pl.cdiv(rows, total_blocks), row_align)
        total_blocks = pl.cdiv(rows, rows_per_step)
        splits = max(1, min(splits, total_blocks))
        steps = pl.cdiv(total_blocks, splits)

    masked = splits * steps * rows_per_step != rows
    if rows_per_step % 32 == 0:
        acc_rows = 32
    elif rows_per_step % 16 == 0:
        acc_rows = 16
    elif rows_per_step % 8 == 0:
        acc_rows = 8
    else:
        acc_rows = rows_per_step          # tiny full-dim block (rows < 8)

    last_block = total_blocks - 1

    def in_index(c, s):
        # Clamp so duplicated grid positions (c*steps + s >= total_blocks)
        # re-read the last real (in-bounds) block; their logical rows are all
        # >= rows and get fully masked in the kernel.
        return (jnp.minimum(c * steps + s, last_block), 0)

    kernel = functools.partial(
        _nll_sum_kernel, steps=steps, rows_per_step=rows_per_step,
        acc_rows=acc_rows, valid_rows=rows, masked=masked)

    block_bytes = rows_per_step * width * (output.dtype.itemsize
                                           + target.dtype.itemsize)
    out_bytes = splits * acc_rows * width * 4
    vmem_limit = int(min(100 << 20,
                         max(32 << 20, 2 * block_bytes + 2 * out_bytes + (4 << 20))))

    partials = pl.pallas_call(
        kernel,
        out_shape=jax.ShapeDtypeStruct((splits, acc_rows, width), jnp.float32),
        grid_spec=pltpu.PrefetchScalarGridSpec(
            num_scalar_prefetch=0,
            grid=(splits, steps),
            in_specs=[
                pl.BlockSpec((rows_per_step, width), in_index),
                pl.BlockSpec((rows_per_step, width), in_index),
            ],
            out_specs=pl.BlockSpec((1, acc_rows, width), lambda c, s: (c, 0, 0)),
        ),
        compiler_params=pltpu.CompilerParams(
            # Axis 0 splits the batch across TensorCores where there are two;
            # axis 1 is the running reduction into the resident output block.
            dimension_semantics=("parallel", "arbitrary"),
            vmem_limit_bytes=vmem_limit,
        ),
        cost_estimate=pl.CostEstimate(
            flops=6 * ne, transcendentals=ne,
            bytes_accessed=int(output.nbytes + target.nbytes + out_bytes)),
    )(x2d, t2d)

    # Tiny epilogue: reduce the per-split vector partials and apply -shape[1]/numel.
    return jnp.sum(partials) * jnp.float32(scale)


if __name__ == "__main__":
    key = jax.random.PRNGKey(0)
    k1, k2, k3, k4, k5 = jax.random.split(key, 5)

    # 1) Small shape typical of the module: (batch=8, classes=32) probabilities
    #    with one-hot targets -> small-input jnp path.
    n1, c1 = 8, 32
    out1 = jax.nn.softmax(jax.random.normal(k1, (n1, c1), jnp.float32), axis=1)
    tgt1 = jax.nn.one_hot(jax.random.randint(k2, (n1,), 0, c1), c1,
                          dtype=jnp.float32)
    loss1 = jax.block_until_ready(nll_loss_onehot(out1, tgt1))
    ref1 = _nll_jnp(out1, tgt1)
    assert jnp.allclose(loss1, ref1, rtol=1e-5, atol=1e-6), (loss1, ref1)

    # 2) f32 soft-target case through the Pallas kernel: numel % 512 == 0 so the
    #    lane-dense 512-wide slab view is used, no masking needed.
    n2, c2 = 1024, 384
    out2 = jax.nn.softmax(jax.random.normal(k3, (n2, c2), jnp.float32), axis=1)
    tgt2 = jax.nn.softmax(jax.random.normal(k4, (n2, c2), jnp.float32), axis=1)
    loss2 = jax.block_until_ready(nll_loss_onehot(out2, tgt2, min_pallas_bytes=0))
    ref2 = _nll_jnp(out2, tgt2)
    assert jnp.allclose(loss2, ref2, rtol=1e-4, atol=1e-6), (loss2, ref2)

    # 3) bf16 inputs with an awkward shape: native-dtype blocks (no wrapper
    #    upcast), width = C view, in-kernel masking of the ragged last block.
    n3, c3 = 533, 100
    out3 = jax.nn.softmax(jax.random.normal(k5, (n3, c3), jnp.float32),
                          axis=1).astype(jnp.bfloat16)
    tgt3 = jax.nn.one_hot(jax.random.randint(k2, (n3,), 0, c3), c3,
                          dtype=jnp.bfloat16)
    loss3 = jax.block_until_ready(nll_loss_onehot(out3, tgt3, min_pallas_bytes=0))
    ref3 = _nll_jnp(out3, tgt3)
    assert jnp.allclose(loss3, ref3, rtol=1e-4, atol=1e-5), (loss3, ref3)

    print("KERNEL_OK")
</pallas_src>

<mosaic_0001>
module attributes {stable_mosaic.version = 11 : i64} {
  func.func @_nll_sum_kernel(%arg0: i32, %arg1: i32, %arg2: memref<768x512xf32, #tpu.memory_space<vmem>>, %arg3: memref<768x512xf32, #tpu.memory_space<vmem>>, %arg4: memref<1x32x512xf32, #tpu.memory_space<vmem>>) attributes {dimension_semantics = [#tpu.dimension_semantics<parallel>, #tpu.dimension_semantics<arbitrary>], iteration_bounds = array<i64: 1, 1>, scalar_prefetch = 0 : i64, scratch_operands = 0 : i64, tpu.core_type = #tpu.core_type<tc>, window_params = [{transform_indices = @transform_0, window_bounds = array<i64: 768, 512>}, {transform_indices = @transform_1, window_bounds = array<i64: 768, 512>}, {transform_indices = @transform_2, window_bounds = array<i64: 1, 32, 512>}]} {
    %c0_i32 = arith.constant 0 : i32
    %0 = arith.cmpi eq, %arg1, %c0_i32 : i32
    %1 = arith.extui %0 : i1 to i32
    %c0_i32_0 = arith.constant 0 : i32
    %2 = arith.cmpi ne, %1, %c0_i32_0 : i32
    scf.if %2 {
      %cst_11 = arith.constant 0.000000e+00 : f32
      %15 = vector.broadcast %cst_11 : f32 to vector<1x32x512xf32>
      %c0_12 = arith.constant 0 : index
      %c0_13 = arith.constant 0 : index
      %c0_14 = arith.constant 0 : index
      %16 = vector.load %arg4[%c0_12, %c0_13, %c0_14] : memref<1x32x512xf32, #tpu.memory_space<vmem>>, vector<1x32x512xf32>
      tpu.vector_store %arg4[%c0_12, %c0_13, %c0_14], %15 {strides = array<i32>} : memref<1x32x512xf32, #tpu.memory_space<vmem>>, vector<1x32x512xf32>,
    } else {
    }
    %c0 = arith.constant 0 : index
    %c0_1 = arith.constant 0 : index
    %3 = vector.load %arg2[%c0, %c0_1] : memref<768x512xf32, #tpu.memory_space<vmem>>, vector<768x512xf32>
    %c0_2 = arith.constant 0 : index
    %c0_3 = arith.constant 0 : index
    %4 = vector.load %arg3[%c0_2, %c0_3] : memref<768x512xf32, #tpu.memory_space<vmem>>, vector<768x512xf32>
    %cst = arith.constant 1.000000e-07 : f32
    %5 = vector.broadcast %cst : f32 to vector<768x512xf32>
    %6 = arith.addf %3, %5 : vector<768x512xf32>
    %7 = math.log %6 : vector<768x512xf32>
    %8 = arith.mulf %7, %4 : vector<768x512xf32>
    %c0_4 = arith.constant 0 : index
    %c0_5 = arith.constant 0 : index
    %c0_6 = arith.constant 0 : index
    %9 = vector.load %arg4[%c0_4, %c0_5, %c0_6] : memref<1x32x512xf32, #tpu.memory_space<vmem>>, vector<1x32x512xf32>
    %10 = vector.shape_cast %8 : vector<768x512xf32> to vector<24x32x512xf32>
    %cst_7 = arith.constant dense<0.000000e+00> : vector<32x512xf32>
    %11 = vector.multi_reduction <add>, %10, %cst_7 [0] : vector<24x32x512xf32> to vector<32x512xf32>
    %12 = vector.shape_cast %11 : vector<32x512xf32> to vector<1x32x512xf32>
    %13 = arith.addf %9, %12 : vector<1x32x512xf32>
    %c0_8 = arith.constant 0 : index
    %c0_9 = arith.constant 0 : index
    %c0_10 = arith.constant 0 : index
    %14 = vector.load %arg4[%c0_8, %c0_9, %c0_10] : memref<1x32x512xf32, #tpu.memory_space<vmem>>, vector<1x32x512xf32>
    tpu.vector_store %arg4[%c0_8, %c0_9, %c0_10], %13 {strides = array<i32>} : memref<1x32x512xf32, #tpu.memory_space<vmem>>, vector<1x32x512xf32>,
    return
  }
  func.func @transform_0(%arg0: i32, %arg1: i32) -> (i32, i32) {
    %c1_i32 = arith.constant 1 : i32
    %0 = arith.muli %arg0, %c1_i32 : i32
    %1 = arith.addi %0, %arg1 : i32
    %c0_i32 = arith.constant 0 : i32
    %2 = arith.minsi %1, %c0_i32 : i32
    %c0_i32_0 = arith.constant 0 : i32
    %c0_i32_1 = arith.constant 0 : i32
    return %2, %c0_i32_0 : i32, i32
  }
  func.func @transform_1(%arg0: i32, %arg1: i32) -> (i32, i32) {
    %c1_i32 = arith.constant 1 : i32
    %0 = arith.muli %arg0, %c1_i32 : i32
    %1 = arith.addi %0, %arg1 : i32
    %c0_i32 = arith.constant 0 : i32
    %2 = arith.minsi %1, %c0_i32 : i32
    %c0_i32_0 = arith.constant 0 : i32
    %c0_i32_1 = arith.constant 0 : i32
    return %2, %c0_i32_0 : i32, i32
  }
  func.func @transform_2(%arg0: i32, %arg1: i32) -> (i32, i32, i32) {
    %c0_i32 = arith.constant 0 : i32
    %c0_i32_0 = arith.constant 0 : i32
    %c0_i32_1 = arith.constant 0 : i32
    return %arg0, %c0_i32, %c0_i32_0 : i32, i32, i32
  }
}

</mosaic_0001>

<bundles_post_ra>
// kernel: tpu_custom_call.1
= control target key start
LH: loop header
LB: loop body
LE: loop exit
PB: predicated region body
PF: predicated region fallthrough
CT: control target
= control target key end

     0   :  { %7 = vsyncpa [#allocation3], 0  ;;  %s7653_s0 = inlined_call_operand.hbm [shape: f32[768,512], index: 0, kind: input, shape index: {}]   ;;  %s7654_s1 = inlined_call_operand.hbm [shape: f32[768,512], index: 1, kind: input, shape index: {}]   ;;  %s7655_s2 = inlined_call_operand.hbm [shape: f32[1,32,512], index: 2, kind: output, shape index: {}]  }
   0x1   :  { %8 = vsyncpa [#allocation6], 0 }
   0x2   :  { %9 = vsyncpa [#allocation4], 0  ;;  %s21_s11 = sshll.u32 %s7653_s0, 4  ;;  %s3682_s12 = smov [#allocation2]   ;;  %s22_s11 = int_to_ptr.hbm [resolvable:$true] %s21_s11 }
   0x3   :  { %s23_s13 = sshll.u32 %s3682_s12, 4  ;;  %s41_s16 = sshll.u32 %s7654_s1, 4  ;;  %s24_s13 = int_to_ptr.vmem [resolvable:$true] %s23_s13  ;;  %s42_s16 = int_to_ptr.hbm [resolvable:$true] %s41_s16 }
   0x4   :  { %s3683_s17 = smov 512   ;;  %s3684_s18 = smov 32  }
   0x5   :  { %29 = dma.hbm_to_vmem [thread:$0]  %s22_s11, 49152, %s24_s13, [#allocation3], %s3683_s17, %s3683_s17, %s3684_s18  }
   0x6   :  { %s3685_s19 = smov [#allocation5]  }
   0x7   :  { %s43_s20 = sshll.u32 %s3685_s19, 4  ;;  %s44_s20 = int_to_ptr.vmem [resolvable:$true] %s43_s20 }
   0x8   :  { %49 = dma.hbm_to_vmem [thread:$0]  %s42_s16, 49152, %s44_s20, [#allocation6], %s3683_s17, %s3683_s17, %s3684_s18  }
   0x9   :  { %3676 = dma.done.wait [#allocation3], 49152  }
   0xa   :  { %3677 = vsyncadd [#allocation3], 4294918144 }
   0xb   :  { %3678 = dma.done.wait [#allocation6], 49152  }
   0xc   :  { %3679 = vsyncadd [#allocation6], 4294918144  ;;  %v86_v0 = vld [vmem:[#allocation2] sm:$0xff]  ;;  %v87_v1 = vld [vmem:[#allocation2 + $0x8] sm:$0xff]  ;;  %s3686_s0 = smov [#allocation7]   ;;  %s2812_s23 = sshll.u32 %s7655_s2, 4  ;;  %s2813_s23 = int_to_ptr.hbm [resolvable:$true] %s2812_s23 }
   0xd   :  { %v88_v2 = vld [vmem:[#allocation2 + $0x10] sm:$0xff]  ;;  %v89_v3 = vld [vmem:[#allocation2 + $0x18] sm:$0xff]  ;;  %v854_v4 = vadd.f32 1e-07, %v86_v0  ;;  %v90_v5 = vld [vmem:[#allocation2 + $0x20] sm:$0xff]  ;;  %s2810_s1 = sshll.u32 %s3686_s0, 4  ;;  %s2811_s1 = int_to_ptr.vmem [resolvable:$true] %s2810_s1 }
   0xe   :  { %v855_v6 = vadd.f32 1e-07, %v87_v1  ;;  %v91_v7 = vld [vmem:[#allocation2 + $0x28] sm:$0xff]  ;;  %v856_v8 = vadd.f32 1e-07, %v88_v2  ;;  %v92_v9 = vld [vmem:[#allocation2 + $0x30] sm:$0xff] }
   0xf   :  { %v857_v10 = vadd.f32 1e-07, %v89_v3  ;;  %v93_v11 = vld [vmem:[#allocation2 + $0x38] sm:$0xff]  ;;  %v858_v12 = vadd.f32 1e-07, %v90_v5  ;;  %2836 = vlog2.f32 %v854_v4  ;;  %v94_v13 = vld [vmem:[#allocation2 + $0x40] sm:$0xff] }
  0x10   :  { %v859_v14 = vadd.f32 1e-07, %v91_v7  ;;  %2838 = vlog2.f32 %v855_v6  ;;  %v95_v15 = vld [vmem:[#allocation2 + $0x48] sm:$0xff]  ;;  %v860_v16 = vadd.f32 1e-07, %v92_v9  ;;  %v96_v17 = vld [vmem:[#allocation2 + $0x50] sm:$0xff] }
  0x11   :  { %2840 = vlog2.f32 %v856_v8  ;;  %v861_v18 = vadd.f32 1e-07, %v93_v11  ;;  %v97_v19 = vld [vmem:[#allocation2 + $0x58] sm:$0xff]  ;;  %v862_v20 = vadd.f32 1e-07, %v94_v13  ;;  %v98_v21 = vld [vmem:[#allocation2 + $0x60] sm:$0xff] }
  0x12   :  { %2842 = vlog2.f32 %v857_v10  ;;  %v863_v22 = vadd.f32 1e-07, %v95_v15  ;;  %v99_v24 = vld [vmem:[#allocation2 + $0x68] sm:$0xff]  ;;  %v864_v25 = vadd.f32 1e-07, %v96_v17  ;;  %v100_v27 = vld [vmem:[#allocation2 + $0x70] sm:$0xff] }
  0x13   :  { %2844 = vlog2.f32 %v858_v12  ;;  %v865_v28 = vadd.f32 1e-07, %v97_v19  ;;  %v101_v30 = vld [vmem:[#allocation2 + $0x78] sm:$0xff]  ;;  %v866_v31 = vadd.f32 1e-07, %v98_v21  ;;  %v102_v33 = vld [vmem:[#allocation2 + $0x80] sm:$0xff] }
  0x14   :  { %2846 = vlog2.f32 %v859_v14  ;;  %v867_v34 = vadd.f32 1e-07, %v99_v24  ;;  %v103_v36 = vld [vmem:[#allocation2 + $0x88] sm:$0xff]  ;;  %v868_v37 = vadd.f32 1e-07, %v100_v27  ;;  %v104_v39 = vld [vmem:[#allocation2 + $0x90] sm:$0xff] }
  0x15   :  { %v3714_v23 = vpop.eup %2836  ;;  %2848 = vlog2.f32 %v860_v16  ;;  %v869_v40 = vadd.f32 1e-07, %v101_v30  ;;  %v105_v42 = vld [vmem:[#allocation2 + $0x98] sm:$0xff]  ;;  %v870_v43 = vadd.f32 1e-07, %v102_v33  ;;  %v106_v45 = vld [vmem:[#allocation2 + $0xa0] sm:$0xff] }
  0x16   :  { %7656 = vst [vmem:[#allocation11_spill] sm:$0xff] %v3714_v23  ;;  %v3716_v26 = vpop.eup %2838  ;;  %2850 = vlog2.f32 %v861_v18  ;;  %v871_v46 = vadd.f32 1e-07, %v103_v36  ;;  %v107_v48 = vld [vmem:[#allocation2 + $0xa8] sm:$0xff]  ;;  %v872_v49 = vadd.f32 1e-07, %v104_v39 }
  0x17   :  { %7657 = vst [vmem:[#allocation12_spill] sm:$0xff] %v3716_v26  ;;  %v3718_v29 = vpop.eup %2840  ;;  %2852 = vlog2.f32 %v862_v20  ;;  %v108_v51 = vld [vmem:[#allocation2 + $0xb0] sm:$0xff]  ;;  %v873_v52 = vadd.f32 1e-07, %v105_v42  ;;  %v109_v54 = vld [vmem:[#allocation2 + $0xb8] sm:$0xff]  ;;  %v110_v57 = vld [vmem:[#allocation2 + $0xc0] sm:$0xff] }
  0x18   :  { %7658 = vst [vmem:[#allocation13_spill] sm:$0xff] %v3718_v29  ;;  %v3720_v32 = vpop.eup %2842  ;;  %2854 = vlog2.f32 %v863_v22  ;;  %v874_v55 = vadd.f32 1e-07, %v106_v45  ;;  %v875_v58 = vadd.f32 1e-07, %v107_v48  ;;  %v111_v60 = vld [vmem:[#allocation2 + $0xc8] sm:$0xff] }
  0x19   :  { %7659 = vst [vmem:[#allocation14_spill] sm:$0xff] %v3720_v32  ;;  %v3722_v35 = vpop.eup %2844  ;;  %2856 = vlog2.f32 %v864_v25  ;;  %v876_v61 = vadd.f32 1e-07, %v108_v51  ;;  %v112_v63 = vld [vmem:[#allocation2 + $0xd0] sm:$0xff]  ;;  %v877_v0 = vadd.f32 1e-07, %v109_v54 }
  0x1a   :  { %7660 = vst [vmem:[#allocation15_spill] sm:$0xff] %v3722_v35  ;;  %v3724_v38 = vpop.eup %2846  ;;  %2858 = vlog2.f32 %v865_v28  ;;  %v113_v2 = vld [vmem:[#allocation2 + $0xd8] sm:$0xff]  ;;  %v878_v3 = vadd.f32 1e-07, %v110_v57  ;;  %v114_v5 = vld [vmem:[#allocation2 + $0xe0] sm:$0xff]  ;;  %v115_v8 = vld [vmem:[#allocation2 + $0xe8] sm:$0xff] }
  0x1b   :  { %7661 = vst [vmem:[#allocation16_spill] sm:$0xff] %v3724_v38  ;;  %v3726_v41 = vpop.eup %2848  ;;  %2860 = vlog2.f32 %v866_v31  ;;  %v879_v6 = vadd.f32 1e-07, %v111_v60  ;;  %v880_v9 = vadd.f32 1e-07, %v112_v63  ;;  %v116_v11 = vld [vmem:[#allocation2 + $0xf0] sm:$0xff] }
  0x1c   :  { %7662 = vst [vmem:[#allocation17_spill] sm:$0xff] %v3726_v41  ;;  %v3728_v44 = vpop.eup %2850  ;;  %2862 = vlog2.f32 %v867_v34  ;;  %v881_v12 = vadd.f32 1e-07, %v113_v2  ;;  %v117_v14 = vld [vmem:[#allocation2 + $0xf8] sm:$0xff]  ;;  %v882_v15 = vadd.f32 1e-07, %v114_v5 }
  0x1d   :  { %7663 = vst [vmem:[#allocation18_spill] sm:$0xff] %v3728_v44  ;;  %v3730_v47 = vpop.eup %2852  ;;  %2864 = vlog2.f32 %v868_v37  ;;  %v118_v17 = vld [vmem:[#allocation2 + $0x100] sm:$0xff]  ;;  %v883_v18 = vadd.f32 1e-07, %v115_v8  ;;  %v119_v20 = vld [vmem:[#allocation2 + $0x108] sm:$0xff]  ;;  %v120_v24 = vld [vmem:[#allocation2 + $0x110] sm:$0xff] }
  0x1e   :  { %7664 = vst [vmem:[#allocation19_spill] sm:$0xff] %v3730_v47  ;;  %v3732_v50 = vpop.eup %2854  ;;  %2866 = vlog2.f32 %v869_v40  ;;  %v884_v21 = vadd.f32 1e-07, %v116_v11  ;;  %v885_v25 = vadd.f32 1e-07, %v117_v14  ;;  %v121_v28 = vld [vmem:[#allocation2 + $0x118] sm:$0xff] }
  0x1f   :  { %7665 = vst [vmem:[#allocation20_spill] sm:$0xff] %v3732_v50  ;;  %v3734_v53 = vpop.eup %2856  ;;  %2868 = vlog2.f32 %v870_v43  ;;  %v886_v30 = vadd.f32 1e-07, %v118_v17  ;;  %v122_v33 = vld [vmem:[#allocation2 + $0x120] sm:$0xff]  ;;  %v887_v34 = vadd.f32 1e-07, %v119_v20 }
  0x20   :  { %7666 = vst [vmem:[#allocation21_spill] sm:$0xff] %v3734_v53  ;;  %v3736_v56 = vpop.eup %2858  ;;  %2870 = vlog2.f32 %v871_v46  ;;  %v123_v37 = vld [vmem:[#allocation2 + $0x128] sm:$0xff]  ;;  %v888_v39 = vadd.f32 1e-07, %v120_v24  ;;  %v124_v42 = vld [vmem:[#allocation2 + $0x130] sm:$0xff]  ;;  %v125_v46 = vld [vmem:[#allocation2 + $0x138] sm:$0xff] }
  0x21   :  { %7667 = vst [vmem:[#allocation22_spill] sm:$0xff] %v3736_v56  ;;  %v3738_v59 = vpop.eup %2860  ;;  %2872 = vlog2.f32 %v872_v49  ;;  %v889_v43 = vadd.f32 1e-07, %v121_v28  ;;  %v890_v48 = vadd.f32 1e-07, %v122_v33  ;;  %v126_v51 = vld [vmem:[#allocation2 + $0x140] sm:$0xff] }
  0x22   :  { %7668 = vst [vmem:[#allocation23_spill] sm:$0xff] %v3738_v59  ;;  %v3740_v62 = vpop.eup %2862  ;;  %2874 = vlog2.f32 %v873_v52  ;;  %v891_v52 = vadd.f32 1e-07, %v123_v37  ;;  %v892_v57 = vadd.f32 1e-07, %v124_v42  ;;  %v128_v60 = vld [vmem:[#allocation2 + $0x150] sm:$0xff] }
  0x23   :  { %7669 = vst [vmem:[#allocation24_spill] sm:$0xff] %v3740_v62  ;;  %v3742_v1 = vpop.eup %2864  ;;  %2876 = vlog2.f32 %v874_v55  ;;  %v127_v55 = vld [vmem:[#allocation2 + $0x148] sm:$0xff]  ;;  %v894_v2 = vadd.f32 1e-07, %v126_v51  ;;  %v130_v5 = vld [vmem:[#allocation2 + $0x160] sm:$0xff]  ;;  %v132_v14 = vld [vmem:[#allocation2 + $0x170] sm:$0xff] }
  0x24   :  { %7670 = vst [vmem:[#allocation25_spill] sm:$0xff] %v3742_v1  ;;  %v3744_v4 = vpop.eup %2866  ;;  %2878 = vlog2.f32 %v875_v58  ;;  %v896_v11 = vadd.f32 1e-07, %v128_v60  ;;  %v898_v20 = vadd.f32 1e-07, %v130_v5  ;;  %v134_v24 = vld [vmem:[#allocation2 + $0x180] sm:$0xff] }
  0x25   :  { %7671 = vst [vmem:[#allocation26_spill] sm:$0xff] %v3744_v4  ;;  %v3746_v7 = vpop.eup %2868  ;;  %2880 = vlog2.f32 %v876_v61  ;;  %v893_v61 = vadd.f32 1e-07, %v125_v46  ;;  %v900_v33 = vadd.f32 1e-07, %v132_v14  ;;  %v136_v37 = vld [vmem:[#allocation2 + $0x190] sm:$0xff] }
  0x26   :  { %7672 = vst [vmem:[#allocation27_spill] sm:$0xff] %v3746_v7  ;;  %v3748_v10 = vpop.eup %2870  ;;  %2882 = vlog2.f32 %v877_v0  ;;  %v129_v0 = vld [vmem:[#allocation2 + $0x158] sm:$0xff]  ;;  %v902_v46 = vadd.f32 1e-07, %v134_v24  ;;  %v138_v51 = vld [vmem:[#allocation2 + $0x1a0] sm:$0xff]  ;;  %v268_v7 = vld [vmem:[#allocation2 + $0x5b0] sm:$0xff] }
  0x27   :  { %7673 = vst [vmem:[#allocation28_spill] sm:$0xff] %v3748_v10  ;;  %v3750_v13 = vpop.eup %2872  ;;  %2884 = vlog2.f32 %v878_v3  ;;  %v904_v60 = vadd.f32 1e-07, %v136_v37  ;;  %v142_v14 = vld [vmem:[#allocation2 + $0x1c0] sm:$0xff]  ;;  %v277_v56 = vld [vmem:[#allocation2 + $0x5f8] sm:$0xff]  ;;  %v280_v50 = vld [vmem:[#allocation2 + $0x610] sm:$0xff] }
  0x28   :  { %7674 = vst [vmem:[#allocation29_spill] sm:$0xff] %v3750_v13  ;;  %v3752_v16 = vpop.eup %2874  ;;  %2886 = vlog2.f32 %v879_v6  ;;  %v895_v6 = vadd.f32 1e-07, %v127_v55  ;;  %v265_v13 = vld [vmem:[#allocation2 + $0x598] sm:$0xff]  ;;  %v270_v4 = vld [vmem:[#allocation2 + $0x5c0] sm:$0xff]  ;;  %v283_v44 = vld [vmem:[#allocation2 + $0x628] sm:$0xff] }
  0x29   :  { %7675 = vst [vmem:[#allocation30_spill] sm:$0xff] %v3752_v16  ;;  %v3754_v19 = vpop.eup %2876  ;;  %2888 = vlog2.f32 %v880_v9  ;;  %v131_v9 = vld [vmem:[#allocation2 + $0x168] sm:$0xff]  ;;  %v274_v62 = vld [vmem:[#allocation2 + $0x5e0] sm:$0xff]  ;;  %v289_v32 = vld [vmem:[#allocation2 + $0x658] sm:$0xff] }
  0x2a   :  { %7676 = vst [vmem:[#allocation31_spill] sm:$0xff] %v3754_v19  ;;  %v3756_v22 = vpop.eup %2878  ;;  %2890 = vlog2.f32 %v881_v12  ;;  %v262_v19 = vld [vmem:[#allocation2 + $0x580] sm:$0xff]  ;;  %v292_v26 = vld [vmem:[#allocation2 + $0x670] sm:$0xff] }
  0x2b   :  { %7677 = vst [vmem:[#allocation32_spill] sm:$0xff] %v3756_v22  ;;  %v3758_v27 = vpop.eup %2880  ;;  %2892 = vlog2.f32 %v882_v15  ;;  %v897_v15 = vadd.f32 1e-07, %v129_v0  ;;  %v140_v0 = vld [vmem:[#allocation2 + $0x1b0] sm:$0xff]  ;;  %v286_v38 = vld [vmem:[#allocation2 + $0x640] sm:$0xff] }
  0x2c   :  { %7678 = vst [vmem:[#allocation33_spill] sm:$0xff] %v3758_v27  ;;  %v3760_v31 = vpop.eup %2882  ;;  %2894 = vlog2.f32 %v883_v18  ;;  %v133_v18 = vld [vmem:[#allocation2 + $0x178] sm:$0xff]  ;;  %v908_v24 = vadd.f32 1e-07, %v140_v0  ;;  %v259_v27 = vld [vmem:[#allocation2 + $0x568] sm:$0xff] }
  0x2d   :  { %7679 = vst [vmem:[#allocation34_spill] sm:$0xff] %v3760_v31  ;;  %v3762_v36 = vpop.eup %2884  ;;  %2896 = vlog2.f32 %v884_v21 }
  0x2e   :  { %7680 = vst [vmem:[#allocation35_spill] sm:$0xff] %v3762_v36  ;;  %v3764_v40 = vpop.eup %2886  ;;  %2898 = vlog2.f32 %v885_v25  ;;  %v899_v25 = vadd.f32 1e-07, %v131_v9  ;;  %v906_v9 = vadd.f32 1e-07, %v138_v51  ;;  %v146_v51 = vld [vmem:[#allocation2 + $0x1e0] sm:$0xff] }
  0x2f   :  { %7681 = vst [vmem:[#allocation36_spill] sm:$0xff] %v3764_v40  ;;  %v3766_v45 = vpop.eup %2888  ;;  %2900 = vlog2.f32 %v886_v30  ;;  %v135_v30 = vld [vmem:[#allocation2 + $0x188] sm:$0xff]  ;;  %v256_v36 = vld [vmem:[#allocation2 + $0x550] sm:$0xff] }
  0x30   :  { %7682 = vst [vmem:[#allocation37_spill] sm:$0xff] %v3766_v45  ;;  %v3768_v49 = vpop.eup %2890  ;;  %2902 = vlog2.f32 %v887_v34  ;;  %v253_v45 = vld [vmem:[#allocation2 + $0x538] sm:$0xff] }
  0x31   :  { %7683 = vst [vmem:[#allocation38_spill] sm:$0xff] %v3768_v49  ;;  %v3770_v54 = vpop.eup %2892  ;;  %2904 = vlog2.f32 %v888_v39  ;;  %v901_v39 = vadd.f32 1e-07, %v133_v18 }
  0x32   :  { %7684 = vst [vmem:[#allocation39_spill] sm:$0xff] %v3770_v54  ;;  %v3772_v58 = vpop.eup %2894  ;;  %2906 = vlog2.f32 %v889_v43  ;;  %v137_v43 = vld [vmem:[#allocation2 + $0x198] sm:$0xff]  ;;  %v247_v54 = vld [vmem:[#allocation2 + $0x508] sm:$0xff] }
  0x33   :  { %7685 = vst [vmem:[#allocation40_spill] sm:$0xff] %v3772_v58  ;;  %v3774_v63 = vpop.eup %2896  ;;  %2908 = vlog2.f32 %v890_v48 }
  0x34   :  { %7686 = vst [vmem:[#allocation41_spill] sm:$0xff] %v3774_v63  ;;  %v3776_v3 = vpop.eup %2898  ;;  %2910 = vlog2.f32 %v891_v52  ;;  %v903_v52 = vadd.f32 1e-07, %v135_v30  ;;  %v144_v30 = vld [vmem:[#allocation2 + $0x1d0] sm:$0xff] }
  0x35   :  { %7687 = vst [vmem:[#allocation42_spill] sm:$0xff] %v3776_v3  ;;  %v3778_v8 = vpop.eup %2900  ;;  %2912 = vlog2.f32 %v892_v57  ;;  %v139_v57 = vld [vmem:[#allocation2 + $0x1a8] sm:$0xff]  ;;  %v912_v0 = vadd.f32 1e-07, %v144_v30  ;;  %v244_v3 = vld [vmem:[#allocation2 + $0x4f0] sm:$0xff] }
  0x36   :  { %7688 = vst [vmem:[#allocation43_spill] sm:$0xff] %v3778_v8  ;;  %v3780_v12 = vpop.eup %2902  ;;  %2914 = vlog2.f32 %v893_v61 }
  0x37   :  { %7689 = vst [vmem:[#allocation44_spill] sm:$0xff] %v3780_v12  ;;  %v3782_v17 = vpop.eup %2904  ;;  %2916 = vlog2.f32 %v894_v2  ;;  %v905_v2 = vadd.f32 1e-07, %v137_v43  ;;  %v910_v43 = vadd.f32 1e-07, %v142_v14 }
  0x38   :  { %7690 = vst [vmem:[#allocation45_spill] sm:$0xff] %v3782_v17  ;;  %v3784_v21 = vpop.eup %2906  ;;  %2918 = vlog2.f32 %v895_v6  ;;  %v141_v6 = vld [vmem:[#allocation2 + $0x1b8] sm:$0xff]  ;;  %v914_v14 = vadd.f32 1e-07, %v146_v51  ;;  %v240_v17 = vld [vmem:[#allocation2 + $0x4d0] sm:$0xff] }
  0x39   :  { %7691 = vst [vmem:[#allocation46_spill] sm:$0xff] %v3784_v21  ;;  %v3786_v28 = vpop.eup %2908  ;;  %2920 = vlog2.f32 %v896_v11  ;;  %v239_v21 = vld [vmem:[#allocation2 + $0x4c8] sm:$0xff] }
  0x3a   :  { %7692 = vst [vmem:[#allocation47_spill] sm:$0xff] %v3786_v28  ;;  %v3788_v34 = vpop.eup %2910  ;;  %2922 = vlog2.f32 %v897_v15  ;;  %v907_v15 = vadd.f32 1e-07, %v139_v57  ;;  %v237_v28 = vld [vmem:[#allocation2 + $0x4b8] sm:$0xff] }
  0x3b   :  { %7693 = vst [vmem:[#allocation48_spill] sm:$0xff] %v3788_v34  ;;  %v3790_v42 = vpop.eup %2912  ;;  %2924 = vlog2.f32 %v898_v20  ;;  %v143_v20 = vld [vmem:[#allocation2 + $0x1c8] sm:$0xff]  ;;  %v236_v34 = vld [vmem:[#allocation2 + $0x4b0] sm:$0xff] }
  0x3c   :  { %7694 = vst [vmem:[#allocation49_spill] sm:$0xff] %v3790_v42  ;;  %v3792_v48 = vpop.eup %2914  ;;  %2926 = vlog2.f32 %v899_v25  ;;  %v911_v57 = vadd.f32 1e-07, %v143_v20  ;;  %v234_v42 = vld [vmem:[#allocation2 + $0x4a0] sm:$0xff] }
  0x3d   :  { %7695 = vst [vmem:[#allocation50_spill] sm:$0xff] %v3792_v48  ;;  %v3794_v55 = vpop.eup %2916  ;;  %2928 = vlog2.f32 %v900_v33  ;;  %v909_v33 = vadd.f32 1e-07, %v141_v6  ;;  %v233_v48 = vld [vmem:[#allocation2 + $0x498] sm:$0xff] }
  0x3e   :  { %7696 = vst [vmem:[#allocation51_spill] sm:$0xff] %v3794_v55  ;;  %v3796_v61 = vpop.eup %2918  ;;  %2930 = vlog2.f32 %v901_v39  ;;  %v145_v39 = vld [vmem:[#allocation2 + $0x1d8] sm:$0xff]  ;;  %v231_v55 = vld [vmem:[#allocation2 + $0x488] sm:$0xff] }
  0x3f   :  { %7697 = vst [vmem:[#allocation52_spill] sm:$0xff] %v3796_v61  ;;  %v3798_v5 = vpop.eup %2920  ;;  %2932 = vlog2.f32 %v902_v46  ;;  %v913_v6 = vadd.f32 1e-07, %v145_v39  ;;  %v230_v61 = vld [vmem:[#allocation2 + $0x480] sm:$0xff] }
  0x40   :  { %7698 = vst [vmem:[#allocation53_spill] sm:$0xff] %v3798_v5  ;;  %v3800_v11 = vpop.eup %2922  ;;  %2934 = vlog2.f32 %v903_v52  ;;  %v3978_v49 = vadd.f32 1e-07, %v230_v61  ;;  %v251_v61 = vld [vmem:[#allocation2 + $0x528] sm:$0xff] }
  0x41   :  { %7699 = vst [vmem:[#allocation54_spill] sm:$0xff] %v3800_v11  ;;  %v3802_v18 = vpop.eup %2924  ;;  %2936 = vlog2.f32 %v904_v60 }
  0x42   :  { %7700 = vst [vmem:[#allocation55_spill] sm:$0xff] %v3802_v18  ;;  %v3804_v25 = vpop.eup %2926  ;;  %2938 = vlog2.f32 %v905_v2  ;;  %v147_v18 = vld [vmem:[#allocation2 + $0x1e8] sm:$0xff] }
  0x43   :  { %7701 = vst [vmem:[#allocation56_spill] sm:$0xff] %v3804_v25  ;;  %v3806_v37 = vpop.eup %2928  ;;  %2940 = vlog2.f32 %v906_v9  ;;  %v148_v25 = vld [vmem:[#allocation2 + $0x1f0] sm:$0xff]  ;;  %v915_v20 = vadd.f32 1e-07, %v147_v18 }
  0x44   :  { %7702 = vst [vmem:[#allocation57_spill] sm:$0xff] %v3806_v37  ;;  %v3808_v46 = vpop.eup %2930  ;;  %2942 = vlog2.f32 %v907_v15  ;;  %v149_v37 = vld [vmem:[#allocation2 + $0x1f8] sm:$0xff]  ;;  %v916_v30 = vadd.f32 1e-07, %v148_v25 }
  0x45   :  { %7703 = vst [vmem:[#allocation58_spill] sm:$0xff] %v3808_v46  ;;  %v3810_v52 = vpop.eup %2932  ;;  %2944 = vlog2.f32 %v908_v24  ;;  %v150_v46 = vld [vmem:[#allocation2 + $0x200] sm:$0xff]  ;;  %v917_v39 = vadd.f32 1e-07, %v149_v37 }
  0x46   :  { %7704 = vst [vmem:[#allocation59_spill] sm:$0xff] %v3810_v52  ;;  %v3812_v60 = vpop.eup %2934  ;;  %2946 = vlog2.f32 %v909_v33  ;;  %v151_v52 = vld [vmem:[#allocation2 + $0x208] sm:$0xff]  ;;  %v918_v51 = vadd.f32 1e-07, %v150_v46 }
  0x47   :  { %7705 = vst [vmem:[#allocation60_spill] sm:$0xff] %v3812_v60  ;;  %v3814_v2 = vpop.eup %2936  ;;  %2948 = vlog2.f32 %v910_v43  ;;  %v152_v60 = vld [vmem:[#allocation2 + $0x210] sm:$0xff]  ;;  %v919_v18 = vadd.f32 1e-07, %v151_v52 }
  0x48   :  { %7706 = vst [vmem:[#allocation61_spill] sm:$0xff] %v3814_v2  ;;  %v3816_v9 = vpop.eup %2938  ;;  %2950 = vlog2.f32 %v911_v57  ;;  %v153_v2 = vld [vmem:[#allocation2 + $0x218] sm:$0xff]  ;;  %v920_v25 = vadd.f32 1e-07, %v152_v60 }
  0x49   :  { %7707 = vst [vmem:[#allocation62_spill] sm:$0xff] %v3816_v9  ;;  %v3818_v15 = vpop.eup %2940  ;;  %2952 = vlog2.f32 %v912_v0  ;;  %v154_v9 = vld [vmem:[#allocation2 + $0x220] sm:$0xff]  ;;  %v921_v37 = vadd.f32 1e-07, %v153_v2 }
  0x4a   :  { %7708 = vst [vmem:[#allocation63_spill] sm:$0xff] %v3818_v15  ;;  %v3820_v24 = vpop.eup %2942  ;;  %2954 = vlog2.f32 %v913_v6  ;;  %v155_v15 = vld [vmem:[#allocation2 + $0x228] sm:$0xff]  ;;  %v922_v46 = vadd.f32 1e-07, %v154_v9 }
  0x4b   :  { %7709 = vst [vmem:[#allocation64_spill] sm:$0xff] %v3820_v24  ;;  %v3822_v33 = vpop.eup %2944  ;;  %2956 = vlog2.f32 %v914_v14  ;;  %v156_v24 = vld [vmem:[#allocation2 + $0x230] sm:$0xff]  ;;  %v923_v52 = vadd.f32 1e-07, %v155_v15 }
  0x4c   :  { %7710 = vst [vmem:[#allocation65_spill] sm:$0xff] %v3822_v33  ;;  %v3824_v43 = vpop.eup %2946  ;;  %2958 = vlog2.f32 %v915_v20  ;;  %v157_v33 = vld [vmem:[#allocation2 + $0x238] sm:$0xff]  ;;  %v924_v60 = vadd.f32 1e-07, %v156_v24 }
  0x4d   :  { %7711 = vst [vmem:[#allocation66_spill] sm:$0xff] %v3824_v43  ;;  %v3826_v57 = vpop.eup %2948  ;;  %2960 = vlog2.f32 %v916_v30  ;;  %v158_v43 = vld [vmem:[#allocation2 + $0x240] sm:$0xff]  ;;  %v925_v2 = vadd.f32 1e-07, %v157_v33 }
  0x4e   :  { %7712 = vst [vmem:[#allocation67_spill] sm:$0xff] %v3826_v57  ;;  %v3828_v0 = vpop.eup %2950  ;;  %2962 = vlog2.f32 %v917_v39  ;;  %v159_v57 = vld [vmem:[#allocation2 + $0x248] sm:$0xff]  ;;  %v926_v9 = vadd.f32 1e-07, %v158_v43 }
  0x4f   :  { %7713 = vst [vmem:[#allocation68_spill] sm:$0xff] %v3828_v0  ;;  %v3830_v6 = vpop.eup %2952  ;;  %2964 = vlog2.f32 %v918_v51  ;;  %v160_v0 = vld [vmem:[#allocation2 + $0x250] sm:$0xff]  ;;  %v927_v15 = vadd.f32 1e-07, %v159_v57 }
  0x50   :  { %7714 = vst [vmem:[#allocation69_spill] sm:$0xff] %v3830_v6  ;;  %v3832_v14 = vpop.eup %2954  ;;  %2966 = vlog2.f32 %v919_v18  ;;  %v161_v6 = vld [vmem:[#allocation2 + $0x258] sm:$0xff]  ;;  %v928_v24 = vadd.f32 1e-07, %v160_v0 }
  0x51   :  { %7715 = vst [vmem:[#allocation70_spill] sm:$0xff] %v3832_v14  ;;  %v3834_v20 = vpop.eup %2956  ;;  %2968 = vlog2.f32 %v920_v25  ;;  %v162_v14 = vld [vmem:[#allocation2 + $0x260] sm:$0xff]  ;;  %v929_v33 = vadd.f32 1e-07, %v161_v6 }
  0x52   :  { %7716 = vst [vmem:[#allocation71_spill] sm:$0xff] %v3834_v20  ;;  %v3836_v30 = vpop.eup %2958  ;;  %2970 = vlog2.f32 %v921_v37  ;;  %v163_v20 = vld [vmem:[#allocation2 + $0x268] sm:$0xff]  ;;  %v930_v43 = vadd.f32 1e-07, %v162_v14 }
  0x53   :  { %7717 = vst [vmem:[#allocation72_spill] sm:$0xff] %v3836_v30  ;;  %v3838_v39 = vpop.eup %2960  ;;  %2972 = vlog2.f32 %v922_v46  ;;  %v164_v30 = vld [vmem:[#allocation2 + $0x270] sm:$0xff]  ;;  %v931_v57 = vadd.f32 1e-07, %v163_v20 }
  0x54   :  { %7718 = vst [vmem:[#allocation73_spill] sm:$0xff] %v3838_v39  ;;  %v3840_v51 = vpop.eup %2962  ;;  %2974 = vlog2.f32 %v923_v52  ;;  %v165_v39 = vld [vmem:[#allocation2 + $0x278] sm:$0xff]  ;;  %v932_v0 = vadd.f32 1e-07, %v164_v30 }
  0x55   :  { %7719 = vst [vmem:[#allocation74_spill] sm:$0xff] %v3840_v51  ;;  %v3842_v18 = vpop.eup %2964  ;;  %2976 = vlog2.f32 %v924_v60  ;;  %v166_v51 = vld [vmem:[#allocation2 + $0x280] sm:$0xff]  ;;  %v933_v6 = vadd.f32 1e-07, %v165_v39 }
  0x56   :  { %7720 = vst [vmem:[#allocation75_spill] sm:$0xff] %v3842_v18  ;;  %v3844_v25 = vpop.eup %2966  ;;  %2978 = vlog2.f32 %v925_v2  ;;  %v167_v18 = vld [vmem:[#allocation2 + $0x288] sm:$0xff]  ;;  %v934_v14 = vadd.f32 1e-07, %v166_v51 }
  0x57   :  { %7721 = vst [vmem:[#allocation76_spill] sm:$0xff] %v3844_v25  ;;  %v3846_v37 = vpop.eup %2968  ;;  %2980 = vlog2.f32 %v926_v9  ;;  %v168_v25 = vld [vmem:[#allocation2 + $0x290] sm:$0xff]  ;;  %v935_v20 = vadd.f32 1e-07, %v167_v18 }
  0x58   :  { %7722 = vst [vmem:[#allocation77_spill] sm:$0xff] %v3846_v37  ;;  %v3848_v46 = vpop.eup %2970  ;;  %2982 = vlog2.f32 %v927_v15  ;;  %v169_v37 = vld [vmem:[#allocation2 + $0x298] sm:$0xff]  ;;  %v936_v30 = vadd.f32 1e-07, %v168_v25 }
  0x59   :  { %7723 = vst [vmem:[#allocation78_spill] sm:$0xff] %v3848_v46  ;;  %v3850_v52 = vpop.eup %2972  ;;  %2984 = vlog2.f32 %v928_v24  ;;  %v170_v46 = vld [vmem:[#allocation2 + $0x2a0] sm:$0xff]  ;;  %v937_v39 = vadd.f32 1e-07, %v169_v37 }
  0x5a   :  { %7724 = vst [vmem:[#allocation79_spill] sm:$0xff] %v3850_v52  ;;  %v3852_v60 = vpop.eup %2974  ;;  %2986 = vlog2.f32 %v929_v33  ;;  %v171_v52 = vld [vmem:[#allocation2 + $0x2a8] sm:$0xff]  ;;  %v938_v51 = vadd.f32 1e-07, %v170_v46 }
  0x5b   :  { %7725 = vst [vmem:[#allocation80_spill] sm:$0xff] %v3852_v60  ;;  %v3854_v2 = vpop.eup %2976  ;;  %2988 = vlog2.f32 %v930_v43  ;;  %v172_v60 = vld [vmem:[#allocation2 + $0x2b0] sm:$0xff]  ;;  %v939_v18 = vadd.f32 1e-07, %v171_v52 }
  0x5c   :  { %7726 = vst [vmem:[#allocation81_spill] sm:$0xff] %v3854_v2  ;;  %v3856_v9 = vpop.eup %2978  ;;  %2990 = vlog2.f32 %v931_v57  ;;  %v173_v2 = vld [vmem:[#allocation2 + $0x2b8] sm:$0xff]  ;;  %v940_v25 = vadd.f32 1e-07, %v172_v60 }
  0x5d   :  { %7727 = vst [vmem:[#allocation82_spill] sm:$0xff] %v3856_v9  ;;  %v3858_v15 = vpop.eup %2980  ;;  %2992 = vlog2.f32 %v932_v0  ;;  %v174_v9 = vld [vmem:[#allocation2 + $0x2c0] sm:$0xff]  ;;  %v941_v37 = vadd.f32 1e-07, %v173_v2 }
  0x5e   :  { %7728 = vst [vmem:[#allocation83_spill] sm:$0xff] %v3858_v15  ;;  %v3860_v24 = vpop.eup %2982  ;;  %2994 = vlog2.f32 %v933_v6  ;;  %v175_v15 = vld [vmem:[#allocation2 + $0x2c8] sm:$0xff]  ;;  %v942_v46 = vadd.f32 1e-07, %v174_v9 }
  0x5f   :  { %7729 = vst [vmem:[#allocation84_spill] sm:$0xff] %v3860_v24  ;;  %v3862_v33 = vpop.eup %2984  ;;  %2996 = vlog2.f32 %v934_v14  ;;  %v176_v24 = vld [vmem:[#allocation2 + $0x2d0] sm:$0xff]  ;;  %v943_v52 = vadd.f32 1e-07, %v175_v15 }
  0x60   :  { %7730 = vst [vmem:[#allocation85_spill] sm:$0xff] %v3862_v33  ;;  %v3864_v43 = vpop.eup %2986  ;;  %2998 = vlog2.f32 %v935_v20  ;;  %v177_v33 = vld [vmem:[#allocation2 + $0x2d8] sm:$0xff]  ;;  %v944_v60 = vadd.f32 1e-07, %v176_v24 }
  0x61   :  { %7731 = vst [vmem:[#allocation86_spill] sm:$0xff] %v3864_v43  ;;  %v3866_v57 = vpop.eup %2988  ;;  %3000 = vlog2.f32 %v936_v30  ;;  %v178_v43 = vld [vmem:[#allocation2 + $0x2e0] sm:$0xff]  ;;  %v945_v2 = vadd.f32 1e-07, %v177_v33 }
  0x62   :  { %7732 = vst [vmem:[#allocation87_spill] sm:$0xff] %v3866_v57  ;;  %v3868_v0 = vpop.eup %2990  ;;  %3002 = vlog2.f32 %v937_v39  ;;  %v179_v57 = vld [vmem:[#allocation2 + $0x2e8] sm:$0xff]  ;;  %v946_v9 = vadd.f32 1e-07, %v178_v43 }
  0x63   :  { %7733 = vst [vmem:[#allocation88_spill] sm:$0xff] %v3868_v0  ;;  %v3870_v6 = vpop.eup %2992  ;;  %3004 = vlog2.f32 %v938_v51  ;;  %v180_v0 = vld [vmem:[#allocation2 + $0x2f0] sm:$0xff]  ;;  %v947_v15 = vadd.f32 1e-07, %v179_v57 }
  0x64   :  { %7734 = vst [vmem:[#allocation89_spill] sm:$0xff] %v3870_v6  ;;  %v3872_v14 = vpop.eup %2994  ;;  %3006 = vlog2.f32 %v939_v18  ;;  %v181_v6 = vld [vmem:[#allocation2 + $0x2f8] sm:$0xff]  ;;  %v948_v24 = vadd.f32 1e-07, %v180_v0 }
  0x65   :  { %7735 = vst [vmem:[#allocation90_spill] sm:$0xff] %v3872_v14  ;;  %v3874_v20 = vpop.eup %2996  ;;  %3008 = vlog2.f32 %v940_v25  ;;  %v182_v14 = vld [vmem:[#allocation2 + $0x300] sm:$0xff]  ;;  %v949_v33 = vadd.f32 1e-07, %v181_v6 }
  0x66   :  { %7736 = vst [vmem:[#allocation91_spill] sm:$0xff] %v3874_v20  ;;  %v3876_v30 = vpop.eup %2998  ;;  %3010 = vlog2.f32 %v941_v37  ;;  %v183_v20 = vld [vmem:[#allocation2 + $0x308] sm:$0xff]  ;;  %v950_v43 = vadd.f32 1e-07, %v182_v14 }
  0x67   :  { %7737 = vst [vmem:[#allocation92_spill] sm:$0xff] %v3876_v30  ;;  %v3878_v39 = vpop.eup %3000  ;;  %3012 = vlog2.f32 %v942_v46  ;;  %v184_v30 = vld [vmem:[#allocation2 + $0x310] sm:$0xff]  ;;  %v951_v57 = vadd.f32 1e-07, %v183_v20 }
  0x68   :  { %7738 = vst [vmem:[#allocation93_spill] sm:$0xff] %v3878_v39  ;;  %v3880_v51 = vpop.eup %3002  ;;  %3014 = vlog2.f32 %v943_v52  ;;  %v185_v39 = vld [vmem:[#allocation2 + $0x318] sm:$0xff]  ;;  %v952_v0 = vadd.f32 1e-07, %v184_v30 }
  0x69   :  { %7739 = vst [vmem:[#allocation94_spill] sm:$0xff] %v3880_v51  ;;  %v3882_v18 = vpop.eup %3004  ;;  %3016 = vlog2.f32 %v944_v60  ;;  %v186_v51 = vld [vmem:[#allocation2 + $0x320] sm:$0xff]  ;;  %v953_v6 = vadd.f32 1e-07, %v185_v39 }
  0x6a   :  { %7740 = vst [vmem:[#allocation95_spill] sm:$0xff] %v3882_v18  ;;  %v3884_v25 = vpop.eup %3006  ;;  %3018 = vlog2.f32 %v945_v2  ;;  %v187_v18 = vld [vmem:[#allocation2 + $0x328] sm:$0xff]  ;;  %v954_v14 = vadd.f32 1e-07, %v186_v51 }
  0x6b   :  { %7741 = vst [vmem:[#allocation96_spill] sm:$0xff] %v3884_v25  ;;  %v3886_v37 = vpop.eup %3008  ;;  %3020 = vlog2.f32 %v946_v9  ;;  %v188_v25 = vld [vmem:[#allocation2 + $0x330] sm:$0xff]  ;;  %v955_v20 = vadd.f32 1e-07, %v187_v18 }
  0x6c   :  { %7742 = vst [vmem:[#allocation97_spill] sm:$0xff] %v3886_v37  ;;  %v3888_v46 = vpop.eup %3010  ;;  %3022 = vlog2.f32 %v947_v15  ;;  %v189_v37 = vld [vmem:[#allocation2 + $0x338] sm:$0xff]  ;;  %v956_v30 = vadd.f32 1e-07, %v188_v25 }
  0x6d   :  { %7743 = vst [vmem:[#allocation98_spill] sm:$0xff] %v3888_v46  ;;  %v3890_v52 = vpop.eup %3012  ;;  %3024 = vlog2.f32 %v948_v24  ;;  %v190_v46 = vld [vmem:[#allocation2 + $0x340] sm:$0xff]  ;;  %v957_v39 = vadd.f32 1e-07, %v189_v37 }
  0x6e   :  { %7744 = vst [vmem:[#allocation99_spill] sm:$0xff] %v3890_v52  ;;  %v3892_v60 = vpop.eup %3014  ;;  %3026 = vlog2.f32 %v949_v33  ;;  %v191_v52 = vld [vmem:[#allocation2 + $0x348] sm:$0xff]  ;;  %v958_v51 = vadd.f32 1e-07, %v190_v46 }
  0x6f   :  { %7745 = vst [vmem:[#allocation100_spill] sm:$0xff] %v3892_v60  ;;  %v3894_v2 = vpop.eup %3016  ;;  %3028 = vlog2.f32 %v950_v43  ;;  %v192_v60 = vld [vmem:[#allocation2 + $0x350] sm:$0xff]  ;;  %v959_v18 = vadd.f32 1e-07, %v191_v52 }
  0x70   :  { %7746 = vst [vmem:[#allocation101_spill] sm:$0xff] %v3894_v2  ;;  %v3896_v9 = vpop.eup %3018  ;;  %3030 = vlog2.f32 %v951_v57  ;;  %v193_v2 = vld [vmem:[#allocation2 + $0x358] sm:$0xff]  ;;  %v960_v25 = vadd.f32 1e-07, %v192_v60 }
  0x71   :  { %7747 = vst [vmem:[#allocation102_spill] sm:$0xff] %v3896_v9  ;;  %v3898_v15 = vpop.eup %3020  ;;  %3032 = vlog2.f32 %v952_v0  ;;  %v194_v9 = vld [vmem:[#allocation2 + $0x360] sm:$0xff]  ;;  %v961_v37 = vadd.f32 1e-07, %v193_v2 }
  0x72   :  { %7748 = vst [vmem:[#allocation103_spill] sm:$0xff] %v3898_v15  ;;  %v3900_v24 = vpop.eup %3022  ;;  %3034 = vlog2.f32 %v953_v6  ;;  %v195_v15 = vld [vmem:[#allocation2 + $0x368] sm:$0xff]  ;;  %v962_v46 = vadd.f32 1e-07, %v194_v9 }
  0x73   :  { %7749 = vst [vmem:[#allocation104_spill] sm:$0xff] %v3900_v24  ;;  %v3902_v33 = vpop.eup %3024  ;;  %3036 = vlog2.f32 %v954_v14  ;;  %v196_v24 = vld [vmem:[#allocation2 + $0x370] sm:$0xff]  ;;  %v963_v52 = vadd.f32 1e-07, %v195_v15 }
  0x74   :  { %7750 = vst [vmem:[#allocation105_spill] sm:$0xff] %v3902_v33  ;;  %v3904_v43 = vpop.eup %3026  ;;  %3038 = vlog2.f32 %v955_v20  ;;  %v197_v33 = vld [vmem:[#allocation2 + $0x378] sm:$0xff]  ;;  %v964_v60 = vadd.f32 1e-07, %v196_v24 }
  0x75   :  { %7751 = vst [vmem:[#allocation106_spill] sm:$0xff] %v3904_v43  ;;  %v3906_v57 = vpop.eup %3028  ;;  %3040 = vlog2.f32 %v956_v30  ;;  %v198_v43 = vld [vmem:[#allocation2 + $0x380] sm:$0xff]  ;;  %v965_v2 = vadd.f32 1e-07, %v197_v33 }
  0x76   :  { %7752 = vst [vmem:[#allocation107_spill] sm:$0xff] %v3906_v57  ;;  %v3908_v0 = vpop.eup %3030  ;;  %3042 = vlog2.f32 %v957_v39  ;;  %v199_v57 = vld [vmem:[#allocation2 + $0x388] sm:$0xff]  ;;  %v966_v9 = vadd.f32 1e-07, %v198_v43 }
  0x77   :  { %7753 = vst [vmem:[#allocation108_spill] sm:$0xff] %v3908_v0  ;;  %v3910_v6 = vpop.eup %3032  ;;  %3044 = vlog2.f32 %v958_v51  ;;  %v200_v0 = vld [vmem:[#allocation2 + $0x390] sm:$0xff]  ;;  %v967_v15 = vadd.f32 1e-07, %v199_v57 }
  0x78   :  { %7754 = vst [vmem:[#allocation109_spill] sm:$0xff] %v3910_v6  ;;  %v3912_v14 = vpop.eup %3034  ;;  %3046 = vlog2.f32 %v959_v18  ;;  %v201_v6 = vld [vmem:[#allocation2 + $0x398] sm:$0xff]  ;;  %v968_v24 = vadd.f32 1e-07, %v200_v0 }
  0x79   :  { %7755 = vst [vmem:[#allocation110_spill] sm:$0xff] %v3912_v14  ;;  %v3914_v20 = vpop.eup %3036  ;;  %3048 = vlog2.f32 %v960_v25  ;;  %v202_v14 = vld [vmem:[#allocation2 + $0x3a0] sm:$0xff]  ;;  %v969_v33 = vadd.f32 1e-07, %v201_v6 }
  0x7a   :  { %7756 = vst [vmem:[#allocation111_spill] sm:$0xff] %v3914_v20  ;;  %v3916_v30 = vpop.eup %3038  ;;  %3050 = vlog2.f32 %v961_v37  ;;  %v203_v20 = vld [vmem:[#allocation2 + $0x3a8] sm:$0xff]  ;;  %v970_v43 = vadd.f32 1e-07, %v202_v14 }
  0x7b   :  { %7757 = vst [vmem:[#allocation112_spill] sm:$0xff] %v3916_v30  ;;  %v3918_v39 = vpop.eup %3040  ;;  %3052 = vlog2.f32 %v962_v46  ;;  %v204_v30 = vld [vmem:[#allocation2 + $0x3b0] sm:$0xff]  ;;  %v971_v57 = vadd.f32 1e-07, %v203_v20 }
  0x7c   :  { %7758 = vst [vmem:[#allocation113_spill] sm:$0xff] %v3918_v39  ;;  %v3920_v51 = vpop.eup %3042  ;;  %3054 = vlog2.f32 %v963_v52  ;;  %v205_v39 = vld [vmem:[#allocation2 + $0x3b8] sm:$0xff]  ;;  %v972_v0 = vadd.f32 1e-07, %v204_v30 }
  0x7d   :  { %7759 = vst [vmem:[#allocation114_spill] sm:$0xff] %v3920_v51  ;;  %v3922_v18 = vpop.eup %3044  ;;  %3056 = vlog2.f32 %v964_v60  ;;  %v206_v51 = vld [vmem:[#allocation2 + $0x3c0] sm:$0xff]  ;;  %v973_v6 = vadd.f32 1e-07, %v205_v39 }
  0x7e   :  { %7760 = vst [vmem:[#allocation115_spill] sm:$0xff] %v3922_v18  ;;  %v3924_v25 = vpop.eup %3046  ;;  %3058 = vlog2.f32 %v965_v2  ;;  %v207_v18 = vld [vmem:[#allocation2 + $0x3c8] sm:$0xff]  ;;  %v974_v14 = vadd.f32 1e-07, %v206_v51 }
  0x7f   :  { %7761 = vst [vmem:[#allocation116_spill] sm:$0xff] %v3924_v25  ;;  %v3926_v37 = vpop.eup %3048  ;;  %3060 = vlog2.f32 %v966_v9  ;;  %v208_v25 = vld [vmem:[#allocation2 + $0x3d0] sm:$0xff]  ;;  %v975_v20 = vadd.f32 1e-07, %v207_v18 }
  0x80   :  { %7762 = vst [vmem:[#allocation117_spill] sm:$0xff] %v3926_v37  ;;  %v3928_v46 = vpop.eup %3050  ;;  %3062 = vlog2.f32 %v967_v15  ;;  %v209_v37 = vld [vmem:[#allocation2 + $0x3d8] sm:$0xff]  ;;  %v976_v30 = vadd.f32 1e-07, %v208_v25 }
  0x81   :  { %7763 = vst [vmem:[#allocation118_spill] sm:$0xff] %v3928_v46  ;;  %v3930_v52 = vpop.eup %3052  ;;  %3064 = vlog2.f32 %v968_v24  ;;  %v210_v46 = vld [vmem:[#allocation2 + $0x3e0] sm:$0xff]  ;;  %v977_v39 = vadd.f32 1e-07, %v209_v37 }
  0x82   :  { %7764 = vst [vmem:[#allocation119_spill] sm:$0xff] %v3930_v52  ;;  %v3932_v60 = vpop.eup %3054  ;;  %3066 = vlog2.f32 %v969_v33  ;;  %v211_v52 = vld [vmem:[#allocation2 + $0x3e8] sm:$0xff]  ;;  %v978_v51 = vadd.f32 1e-07, %v210_v46 }
  0x83   :  { %7765 = vst [vmem:[#allocation120_spill] sm:$0xff] %v3932_v60  ;;  %v3934_v2 = vpop.eup %3056  ;;  %3068 = vlog2.f32 %v970_v43  ;;  %v212_v60 = vld [vmem:[#allocation2 + $0x3f0] sm:$0xff]  ;;  %v979_v18 = vadd.f32 1e-07, %v211_v52 }
  0x84   :  { %7766 = vst [vmem:[#allocation121_spill] sm:$0xff] %v3934_v2  ;;  %v3936_v9 = vpop.eup %3058  ;;  %3070 = vlog2.f32 %v971_v57  ;;  %v213_v2 = vld [vmem:[#allocation2 + $0x3f8] sm:$0xff]  ;;  %v980_v25 = vadd.f32 1e-07, %v212_v60 }
  0x85   :  { %7767 = vst [vmem:[#allocation122_spill] sm:$0xff] %v3936_v9  ;;  %v3938_v15 = vpop.eup %3060  ;;  %3072 = vlog2.f32 %v972_v0  ;;  %v214_v9 = vld [vmem:[#allocation2 + $0x400] sm:$0xff]  ;;  %v981_v37 = vadd.f32 1e-07, %v213_v2 }
  0x86   :  { %7768 = vst [vmem:[#allocation123_spill] sm:$0xff] %v3938_v15  ;;  %v3940_v24 = vpop.eup %3062  ;;  %3074 = vlog2.f32 %v973_v6  ;;  %v215_v15 = vld [vmem:[#allocation2 + $0x408] sm:$0xff]  ;;  %v982_v46 = vadd.f32 1e-07, %v214_v9  ;;  %v222_v9 = vld [vmem:[#allocation2 + $0x440] sm:$0xff] }
  0x87   :  { %7769 = vst [vmem:[#allocation124_spill] sm:$0xff] %v3940_v24  ;;  %v3942_v33 = vpop.eup %3064  ;;  %3076 = vlog2.f32 %v974_v14  ;;  %v216_v24 = vld [vmem:[#allocation2 + $0x410] sm:$0xff]  ;;  %v983_v52 = vadd.f32 1e-07, %v215_v15 }
  0x88   :  { %7770 = vst [vmem:[#allocation125_spill] sm:$0xff] %v3942_v33  ;;  %v3944_v43 = vpop.eup %3066  ;;  %3078 = vlog2.f32 %v975_v20  ;;  %v217_v33 = vld [vmem:[#allocation2 + $0x418] sm:$0xff]  ;;  %v984_v60 = vadd.f32 1e-07, %v216_v24  ;;  %v224_v15 = vld [vmem:[#allocation2 + $0x450] sm:$0xff] }
  0x89   :  { %7771 = vst [vmem:[#allocation126_spill] sm:$0xff] %v3944_v43  ;;  %v3946_v57 = vpop.eup %3068  ;;  %3080 = vlog2.f32 %v976_v30  ;;  %v218_v43 = vld [vmem:[#allocation2 + $0x420] sm:$0xff]  ;;  %v985_v2 = vadd.f32 1e-07, %v217_v33  ;;  %v229_v33 = vld [vmem:[#allocation2 + $0x478] sm:$0xff] }
  0x8a   :  { %7772 = vst [vmem:[#allocation127_spill] sm:$0xff] %v3946_v57  ;;  %v3948_v0 = vpop.eup %3070  ;;  %3082 = vlog2.f32 %v977_v39  ;;  %v219_v57 = vld [vmem:[#allocation2 + $0x428] sm:$0xff]  ;;  %v986_v11 = vadd.f32 1e-07, %v218_v43  ;;  %v232_v43 = vld [vmem:[#allocation2 + $0x490] sm:$0xff] }
  0x8b   :  { %7773 = vst [vmem:[#allocation128_spill] sm:$0xff] %v3948_v0  ;;  %v3950_v6 = vpop.eup %3072  ;;  %3084 = vlog2.f32 %v978_v51  ;;  %v220_v0 = vld [vmem:[#allocation2 + $0x430] sm:$0xff]  ;;  %v223_v51 = vld [vmem:[#allocation2 + $0x448] sm:$0xff]  ;;  %v987_v5 = vadd.f32 1e-07, %v219_v57 }
  0x8c   :  { %7774 = vst [vmem:[#allocation129_spill] sm:$0xff] %v3950_v6  ;;  %v3952_v14 = vpop.eup %3074  ;;  %3086 = vlog2.f32 %v979_v18  ;;  %v221_v6 = vld [vmem:[#allocation2 + $0x438] sm:$0xff]  ;;  %v235_v57 = vld [vmem:[#allocation2 + $0x4a8] sm:$0xff]  ;;  %v3974_v58 = vadd.f32 1e-07, %v229_v33 }
  0x8d   :  { %7775 = vst [vmem:[#allocation130_spill] sm:$0xff] %v3952_v14  ;;  %v3954_v20 = vpop.eup %3076  ;;  %3088 = vlog2.f32 %v980_v25  ;;  %v225_v18 = vld [vmem:[#allocation2 + $0x458] sm:$0xff]  ;;  %v227_v25 = vld [vmem:[#allocation2 + $0x468] sm:$0xff]  ;;  %v3986_v33 = vadd.f32 1e-07, %v233_v48  ;;  %v254_v48 = vld [vmem:[#allocation2 + $0x540] sm:$0xff] }
  0x8e   :  { %7776 = vst [vmem:[#allocation131_spill] sm:$0xff] %v3954_v20  ;;  %v3956_v30 = vpop.eup %3078  ;;  %3090 = vlog2.f32 %v981_v37  ;;  %v226_v20 = vld [vmem:[#allocation2 + $0x460] sm:$0xff]  ;;  %v988_v37 = vadd.f32 1e-07, %v220_v0  ;;  %v993_v12 = vadd.f32 1e-07, %v225_v18 }
  0x8f   :  { %7777 = vst [vmem:[#allocation132_spill] sm:$0xff] %v3956_v30  ;;  %v3958_v39 = vpop.eup %3080  ;;  %3092 = vlog2.f32 %v982_v46  ;;  %v228_v30 = vld [vmem:[#allocation2 + $0x470] sm:$0xff]  ;;  %v989_v46 = vadd.f32 1e-07, %v221_v6  ;;  %v238_v0 = vld [vmem:[#allocation2 + $0x4c0] sm:$0xff]  ;;  %v241_v6 = vld [vmem:[#allocation2 + $0x4d8] sm:$0xff] }
  0x90   :  { %7778 = vst [vmem:[#allocation133_spill] sm:$0xff] %v3958_v39  ;;  %v3960_v14 = vpop.eup %3082  ;;  %3094 = vlog2.f32 %v983_v52  ;;  %v990_v52 = vadd.f32 1e-07, %v222_v9  ;;  %v242_v9 = vld [vmem:[#allocation2 + $0x4e0] sm:$0xff]  ;;  %v996_v63 = vadd.f32 1e-07, %v228_v30 }
  0x91   :  { %7779 = vst [vmem:[#allocation134_spill] sm:$0xff] %v3960_v14  ;;  %v3962_v24 = vpop.eup %3084  ;;  %3096 = vlog2.f32 %v984_v60  ;;  %v991_v60 = vadd.f32 1e-07, %v223_v51  ;;  %v245_v51 = vld [vmem:[#allocation2 + $0x4f8] sm:$0xff]  ;;  %v250_v30 = vld [vmem:[#allocation2 + $0x520] sm:$0xff] }
  0x92   :  { %7780 = vst [vmem:[#allocation135_spill] sm:$0xff] %v3962_v24  ;;  %v3964_v39 = vpop.eup %3086  ;;  %3098 = vlog2.f32 %v985_v2  ;;  %v992_v2 = vadd.f32 1e-07, %v224_v15  ;;  %v3980_v15 = vadd.f32 1e-07, %v231_v55  ;;  %v252_v55 = vld [vmem:[#allocation2 + $0x530] sm:$0xff] }
  0x93   :  { %7781 = vst [vmem:[#allocation136_spill] sm:$0xff] %v3964_v39  ;;  %v3966_v14 = vpop.eup %3088  ;;  %3100 = vlog2.f32 %v986_v11  ;;  %v243_v11 = vld [vmem:[#allocation2 + $0x4e8] sm:$0xff]  ;;  %v4043_v1 = vadd.f32 1e-07, %v254_v48 }
  0x94   :  { %7782 = vst [vmem:[#allocation137_spill] sm:$0xff] %v3966_v14  ;;  %v3968_v24 = vpop.eup %3090  ;;  %3102 = vlog2.f32 %v987_v5  ;;  %v994_v14 = vadd.f32 1e-07, %v226_v20  ;;  %v3982_v20 = vadd.f32 1e-07, %v232_v43 }
  0x95   :  { %7783 = vst [vmem:[#allocation138_spill] sm:$0xff] %v3968_v24  ;;  %v3970_v39 = vpop.eup %3092  ;;  %3104 = vlog2.f32 %v988_v37  ;;  %v995_v24 = vadd.f32 1e-07, %v227_v25  ;;  %v248_v37 = vld [vmem:[#allocation2 + $0x510] sm:$0xff]  ;;  %v249_v25 = vld [vmem:[#allocation2 + $0x518] sm:$0xff] }
  0x96   :  { %7784 = vst [vmem:[#allocation139_spill] sm:$0xff] %v3970_v39  ;;  %v3972_v8 = vpop.eup %3094  ;;  %3106 = vlog2.f32 %v989_v46  ;;  %v246_v39 = vld [vmem:[#allocation2 + $0x500] sm:$0xff]  ;;  %v3988_v46 = vadd.f32 1e-07, %v234_v42  ;;  %v3994_v43 = vadd.f32 1e-07, %v236_v34 }
  0x97   :  { %7785 = vst [vmem:[#allocation140_spill] sm:$0xff] %v3972_v8  ;;  %v3976_v5 = vpop.eup %3096  ;;  %3108 = vlog2.f32 %v990_v52  ;;  %v3996_v52 = vadd.f32 1e-07, %v237_v28  ;;  %v255_v42 = vld [vmem:[#allocation2 + $0x548] sm:$0xff]  ;;  %v257_v34 = vld [vmem:[#allocation2 + $0x558] sm:$0xff]  ;;  %v258_v28 = vld [vmem:[#allocation2 + $0x560] sm:$0xff] }
  0x98   :  { %7786 = vst [vmem:[#allocation141_spill] sm:$0xff] %v3976_v5  ;;  %v3984_v18 = vpop.eup %3098  ;;  %v3990_v5 = vadd.f32 1e-07, %v235_v57  ;;  %3110 = vlog2.f32 %v991_v60  ;;  %v4002_v57 = vadd.f32 1e-07, %v239_v21  ;;  %v260_v21 = vld [vmem:[#allocation2 + $0x570] sm:$0xff] }
  0x99   :  { %7787 = vst [vmem:[#allocation142_spill] sm:$0xff] %v3984_v18  ;;  %v3992_v8 = vpop.eup %3100  ;;  %v3998_v18 = vadd.f32 1e-07, %v238_v0  ;;  %3112 = vlog2.f32 %v992_v2  ;;  %v4004_v60 = vadd.f32 1e-07, %v240_v17  ;;  %v261_v17 = vld [vmem:[#allocation2 + $0x578] sm:$0xff] }
  0x9a   :  { %7788 = vst [vmem:[#allocation143_spill] sm:$0xff] %v3992_v8  ;;  %v4000_v40 = vpop.eup %3102  ;;  %v4006_v8 = vadd.f32 1e-07, %v241_v6  ;;  %3114 = vlog2.f32 %v993_v12  ;;  %v4010_v0 = vadd.f32 1e-07, %v242_v9  ;;  %v263_v9 = vld [vmem:[#allocation2 + $0x588] sm:$0xff] }
  0x9b   :  { %7789 = vst [vmem:[#allocation144_spill] sm:$0xff] %v4000_v40  ;;  %v4008_v31 = vpop.eup %3104  ;;  %v4012_v2 = vadd.f32 1e-07, %v243_v11  ;;  %v4014_v40 = vadd.f32 1e-07, %v244_v3  ;;  %3116 = vlog2.f32 %v994_v14  ;;  %v264_v11 = vld [vmem:[#allocation2 + $0x590] sm:$0xff] }
  0x9c   :  { %7790 = vst [vmem:[#allocation145_spill] sm:$0xff] %v4008_v31  ;;  %v4016_v22 = vpop.eup %3106  ;;  %v4018_v6 = vadd.f32 1e-07, %v245_v51  ;;  %v4020_v12 = vadd.f32 1e-07, %v246_v39  ;;  %3118 = vlog2.f32 %v995_v24  ;;  %v266_v51 = vld [vmem:[#allocation2 + $0x5a0] sm:$0xff] }
  0x9d   :  { %7791 = vst [vmem:[#allocation146_spill] sm:$0xff] %v4016_v22  ;;  %v4022_v31 = vadd.f32 1e-07, %v247_v54  ;;  %v4024_v16 = vpop.eup %3108  ;;  %v4026_v3 = vadd.f32 1e-07, %v248_v37  ;;  %3120 = vlog2.f32 %v996_v63  ;;  %v267_v39 = vld [vmem:[#allocation2 + $0x5a8] sm:$0xff] }
  0x9e   :  { %7792 = vst [vmem:[#allocation147_spill] sm:$0xff] %v4024_v16  ;;  %v4028_v14 = vadd.f32 1e-07, %v249_v25  ;;  %v4030_v22 = vadd.f32 1e-07, %v250_v30  ;;  %v4032_v10 = vpop.eup %3110  ;;  %3122 = vlog2.f32 %v3974_v58  ;;  %v269_v25 = vld [vmem:[#allocation2 + $0x5b8] sm:$0xff] }
  0x9f   :  { %7793 = vst [vmem:[#allocation148_spill] sm:$0xff] %v4032_v10  ;;  %v4034_v54 = vadd.f32 1e-07, %v251_v61  ;;  %v4036_v24 = vadd.f32 1e-07, %v252_v55  ;;  %v4041_v37 = vpop.eup %3112  ;;  %v271_v30 = vld [vmem:[#allocation2 + $0x5c8] sm:$0xff]  ;;  %3124 = vlog2.f32 %v3978_v49 }
  0xa0   :  { %v4038_v16 = vadd.f32 1e-07, %v253_v45  ;;  %7794 = vst [vmem:[#allocation149_spill] sm:$0xff] %v4041_v37  ;;  %v4045_v63 = vadd.f32 1e-07, %v255_v42  ;;  %v4050_v61 = vpop.eup %3114  ;;  %v272_v55 = vld [vmem:[#allocation2 + $0x5d0] sm:$0xff]  ;;  %3126 = vlog2.f32 %v3980_v15 }
  0xa1   :  { %v4047_v10 = vadd.f32 1e-07, %v256_v36  ;;  %7795 = vst [vmem:[#allocation150_spill] sm:$0xff] %v4050_v61  ;;  %v273_v45 = vld [vmem:[#allocation2 + $0x5d8] sm:$0xff]  ;;  %v4052_v59 = vadd.f32 1e-07, %v257_v34  ;;  %v4059_v48 = vpop.eup %3116  ;;  %3128 = vlog2.f32 %v3982_v20 }
  0xa2   :  { %v4054_v58 = vadd.f32 1e-07, %v258_v28  ;;  %v4056_v37 = vadd.f32 1e-07, %v259_v27  ;;  %7796 = vst [vmem:[#allocation151_spill] sm:$0xff] %v4059_v48  ;;  %v275_v42 = vld [vmem:[#allocation2 + $0x5e8] sm:$0xff]  ;;  %v4068_v34 = vpop.eup %3118  ;;  %3130 = vlog2.f32 %v3986_v33 }
  0xa3   :  { %v276_v36 = vld [vmem:[#allocation2 + $0x5f0] sm:$0xff]  ;;  %v4061_v53 = vadd.f32 1e-07, %v260_v21  ;;  %v4063_v49 = vadd.f32 1e-07, %v261_v17  ;;  %7797 = vst [vmem:[#allocation152_spill] sm:$0xff] %v4068_v34  ;;  %v4077_v21 = vpop.eup %3120  ;;  %3132 = vlog2.f32 %v3988_v46 }
  0xa4   :  { %v4065_v61 = vadd.f32 1e-07, %v262_v19  ;;  %v278_v28 = vld [vmem:[#allocation2 + $0x600] sm:$0xff]  ;;  %v279_v27 = vld [vmem:[#allocation2 + $0x608] sm:$0xff]  ;;  %v4070_v47 = vadd.f32 1e-07, %v263_v9  ;;  %v4086_v9 = vpop.eup %3122  ;;  %3134 = vlog2.f32 %v3990_v5 }
  0xa5   :  { %v4072_v15 = vadd.f32 1e-07, %v264_v11  ;;  %v4074_v48 = vadd.f32 1e-07, %v265_v13  ;;  %7798 = vst [vmem:[#allocation153_spill] sm:$0xff] %v4077_v21  ;;  %v281_v17 = vld [vmem:[#allocation2 + $0x618] sm:$0xff]  ;;  %3136 = vlog2.f32 %v3994_v43 }
  0xa6   :  { %v282_v19 = vld [vmem:[#allocation2 + $0x620] sm:$0xff]  ;;  %v4079_v41 = vadd.f32 1e-07, %v266_v51  ;;  %v4081_v20 = vadd.f32 1e-07, %v267_v39  ;;  %7799 = vst [vmem:[#allocation154_spill] sm:$0xff] %v4086_v9  ;;  %v4095_v51 = vpop.eup %3124  ;;  %3138 = vlog2.f32 %v3996_v52 }
  0xa7   :  { %v4083_v34 = vadd.f32 1e-07, %v268_v7  ;;  %v284_v11 = vld [vmem:[#allocation2 + $0x630] sm:$0xff]  ;;  %v285_v13 = vld [vmem:[#allocation2 + $0x638] sm:$0xff]  ;;  %v4088_v35 = vadd.f32 1e-07, %v269_v25  ;;  %v4104_v25 = vpop.eup %3126  ;;  %3140 = vlog2.f32 %v3998_v18 }
  0xa8   :  { %v4090_v33 = vadd.f32 1e-07, %v270_v4  ;;  %v4092_v21 = vadd.f32 1e-07, %v271_v30  ;;  %7800 = vst [vmem:[#allocation155_spill] sm:$0xff] %v4095_v51  ;;  %v287_v39 = vld [vmem:[#allocation2 + $0x648] sm:$0xff]  ;;  %3142 = vlog2.f32 %v4002_v57 }
  0xa9   :  { %v288_v7 = vld [vmem:[#allocation2 + $0x650] sm:$0xff]  ;;  %v4097_v29 = vadd.f32 1e-07, %v272_v55  ;;  %v4099_v46 = vadd.f32 1e-07, %v273_v45  ;;  %7803 = vst [vmem:[#allocation158_spill] sm:$0xff] %v4104_v25  ;;  %v4113_v55 = vpop.eup %3128  ;;  %3144 = vlog2.f32 %v4004_v60 }
  0xaa   :  { %v4101_v9 = vadd.f32 1e-07, %v274_v62  ;;  %v290_v4 = vld [vmem:[#allocation2 + $0x660] sm:$0xff]  ;;  %v291_v30 = vld [vmem:[#allocation2 + $0x668] sm:$0xff]  ;;  %v4106_v23 = vadd.f32 1e-07, %v275_v42  ;;  %v4122_v42 = vpop.eup %3130  ;;  %3146 = vlog2.f32 %v4006_v8 }
  0xab   :  { %7801 = vst [vmem:[#allocation156_spill] sm:$0xff] %v4099_v46  ;;  %v4108_v5 = vadd.f32 1e-07, %v276_v36  ;;  %v4110_v51 = vadd.f32 1e-07, %v277_v56  ;;  %v293_v45 = vld [vmem:[#allocation2 + $0x678] sm:$0xff]  ;;  %3148 = vlog2.f32 %v4010_v0 }
  0xac   :  { %7802 = vst [vmem:[#allocation157_spill] sm:$0xff] %v4101_v9  ;;  %v294_v62 = vld [vmem:[#allocation2 + $0x680] sm:$0xff]  ;;  %v295_v9 = vld [vmem:[#allocation2 + $0x688] sm:$0xff]  ;;  %v4115_v46 = vadd.f32 1e-07, %v278_v28  ;;  %v296_v36 = vld [vmem:[#allocation2 + $0x690] sm:$0xff]  ;;  %v4131_v28 = vpop.eup %3132  ;;  %3150 = vlog2.f32 %v4012_v2 }
  0xad   :  { %7804 = vst [vmem:[#allocation159_spill] sm:$0xff] %v4108_v5  ;;  %v4117_v43 = vadd.f32 1e-07, %v279_v27  ;;  %v4119_v25 = vadd.f32 1e-07, %v280_v50  ;;  %v297_v56 = vld [vmem:[#allocation2 + $0x698] sm:$0xff]  ;;  %3152 = vlog2.f32 %v4014_v40 }
  0xae   :  { %7805 = vst [vmem:[#allocation160_spill] sm:$0xff] %v4110_v51  ;;  %v298_v51 = vld [vmem:[#allocation2 + $0x6a0] sm:$0xff]  ;;  %v4124_v5 = vadd.f32 1e-07, %v281_v17  ;;  %v4126_v52 = vadd.f32 1e-07, %v282_v19  ;;  %v4140_v17 = vpop.eup %3134  ;;  %3154 = vlog2.f32 %v4018_v6 }
  0xaf   :  { %7806 = vst [vmem:[#allocation161_spill] sm:$0xff] %v4113_v55  ;;  %v4128_v55 = vadd.f32 1e-07, %v283_v44  ;;  %v299_v27 = vld [vmem:[#allocation2 + $0x6a8] sm:$0xff]  ;;  %v300_v50 = vld [vmem:[#allocation2 + $0x6b0] sm:$0xff]  ;;  %v302_v19 = vld [vmem:[#allocation2 + $0x6c0] sm:$0xff]  ;;  %3156 = vlog2.f32 %v4020_v12 }
  0xb0   :  { %7807 = vst [vmem:[#allocation162_spill] sm:$0xff] %v4117_v43  ;;  %v4133_v43 = vadd.f32 1e-07, %v284_v11  ;;  %v4135_v18 = vadd.f32 1e-07, %v285_v13  ;;  %v303_v44 = vld [vmem:[#allocation2 + $0x6c8] sm:$0xff]  ;;  %v4149_v11 = vpop.eup %3136  ;;  %3158 = vlog2.f32 %v4022_v31 }
  0xb1   :  { %7808 = vst [vmem:[#allocation163_spill] sm:$0xff] %v4119_v25  ;;  %v301_v25 = vld [vmem:[#allocation2 + $0x6b8] sm:$0xff]  ;;  %v4144_v57 = vadd.f32 1e-07, %v288_v7  ;;  %v4153_v60 = vadd.f32 1e-07, %v291_v30  ;;  %3160 = vlog2.f32 %v4026_v3 }
  0xb2   :  { %7809 = vst [vmem:[#allocation164_spill] sm:$0xff] %v4122_v42  ;;  %v4137_v42 = vadd.f32 1e-07, %v286_v38  ;;  %v305_v13 = vld [vmem:[#allocation2 + $0x6d8] sm:$0xff]  ;;  %v306_v38 = vld [vmem:[#allocation2 + $0x6e0] sm:$0xff]  ;;  %v308_v7 = vld [vmem:[#allocation2 + $0x6f0] sm:$0xff]  ;;  %3162 = vlog2.f32 %v4028_v14 }
  0xb3   :  { %7810 = vst [vmem:[#allocation165_spill] sm:$0xff] %v4126_v52  ;;  %v4142_v52 = vadd.f32 1e-07, %v287_v39  ;;  %v4158_v39 = vpop.eup %3138  ;;  %v4162_v8 = vadd.f32 1e-07, %v294_v62  ;;  %v311_v30 = vld [vmem:[#allocation2 + $0x708] sm:$0xff]  ;;  %3164 = vlog2.f32 %v4030_v22 }
  0xb4   :  { %7811 = vst [vmem:[#allocation166_spill] sm:$0xff] %v4128_v55  ;;  %v304_v55 = vld [vmem:[#allocation2 + $0x6d0] sm:$0xff]  ;;  %v4171_v0 = vadd.f32 1e-07, %v297_v56  ;;  %v314_v62 = vld [vmem:[#allocation2 + $0x720] sm:$0xff]  ;;  %v317_v56 = vld [vmem:[#allocation2 + $0x738] sm:$0xff]  ;;  %3166 = vlog2.f32 %v4034_v54 }
  0xb5   :  { %7812 = vst [vmem:[#allocation167_spill] sm:$0xff] %v4131_v28  ;;  %v4146_v28 = vadd.f32 1e-07, %v289_v32  ;;  %v309_v32 = vld [vmem:[#allocation2 + $0x6f8] sm:$0xff]  ;;  %v4180_v2 = vadd.f32 1e-07, %v300_v50  ;;  %3168 = vlog2.f32 %v4036_v24 }
  0xb6   :  { %7813 = vst [vmem:[#allocation168_spill] sm:$0xff] %v4135_v18  ;;  %v4151_v18 = vadd.f32 1e-07, %v290_v4  ;;  %v4167_v4 = vpop.eup %3140  ;;  %v4189_v40 = vadd.f32 1e-07, %v303_v44  ;;  %v320_v50 = vld [vmem:[#allocation2 + $0x750] sm:$0xff]  ;;  %3170 = vlog2.f32 %v4038_v16 }
  0xb7   :  { %7814 = vst [vmem:[#allocation169_spill] sm:$0xff] %v4137_v42  ;;  %v307_v42 = vld [vmem:[#allocation2 + $0x6e8] sm:$0xff]  ;;  %v4198_v6 = vadd.f32 1e-07, %v306_v38  ;;  %v4207_v12 = vadd.f32 1e-07, %v309_v32  ;;  %3172 = vlog2.f32 %v4043_v1 }
  0xb8   :  { %7815 = vst [vmem:[#allocation170_spill] sm:$0xff] %v4140_v17  ;;  %v4155_v17 = vadd.f32 1e-07, %v292_v26  ;;  %v312_v26 = vld [vmem:[#allocation2 + $0x710] sm:$0xff]  ;;  %v323_v44 = vld [vmem:[#allocation2 + $0x768] sm:$0xff]  ;;  %v326_v38 = vld [vmem:[#allocation2 + $0x780] sm:$0xff] }
  0xb9   :  { %7816 = vst [vmem:[#allocation171_spill] sm:$0xff] %v4144_v57  ;;  %v4160_v57 = vadd.f32 1e-07, %v293_v45  ;;  %v4176_v45 = vpop.eup %3142  ;;  %v4216_v31 = vadd.f32 1e-07, %v312_v26  ;;  %v329_v32 = vld [vmem:[#allocation2 + $0x798] sm:$0xff]  ;;  %3174 = vlog2.f32 %v4045_v63 }
  0xba   :  { %7817 = vst [vmem:[#allocation172_spill] sm:$0xff] %v4146_v28  ;;  %v310_v28 = vld [vmem:[#allocation2 + $0x700] sm:$0xff]  ;;  %v332_v26 = vld [vmem:[#allocation2 + $0x7b0] sm:$0xff] }
  0xbb   :  { %7818 = vst [vmem:[#allocation173_spill] sm:$0xff] %v4149_v11  ;;  %v4164_v11 = vadd.f32 1e-07, %v295_v9  ;;  %v315_v9 = vld [vmem:[#allocation2 + $0x728] sm:$0xff] }
  0xbc   :  { %7819 = vst [vmem:[#allocation174_spill] sm:$0xff] %v4153_v60  ;;  %v4169_v60 = vadd.f32 1e-07, %v296_v36  ;;  %v4185_v36 = vpop.eup %3144  ;;  %v4225_v3 = vadd.f32 1e-07, %v315_v9  ;;  %v335_v9 = vld [vmem:[#allocation2 + $0x7c8] sm:$0xff]  ;;  %3176 = vlog2.f32 %v4047_v10 }
  0xbd   :  { %7820 = vst [vmem:[#allocation175_spill] sm:$0xff] %v4155_v17  ;;  %v313_v17 = vld [vmem:[#allocation2 + $0x718] sm:$0xff] }
  0xbe   :  { %7821 = vst [vmem:[#allocation176_spill] sm:$0xff] %v4158_v39  ;;  %v4173_v39 = vadd.f32 1e-07, %v298_v51  ;;  %v318_v51 = vld [vmem:[#allocation2 + $0x740] sm:$0xff] }
  0xbf   :  { %7822 = vst [vmem:[#allocation177_spill] sm:$0xff] %v4162_v8  ;;  %v4178_v8 = vadd.f32 1e-07, %v299_v27  ;;  %v4194_v27 = vpop.eup %3146  ;;  %v4234_v14 = vadd.f32 1e-07, %v318_v51  ;;  %v338_v51 = vld [vmem:[#allocation2 + $0x7e0] sm:$0xff]  ;;  %3178 = vlog2.f32 %v4052_v59 }
  0xc0   :  { %7823 = vst [vmem:[#allocation178_spill] sm:$0xff] %v4164_v11  ;;  %v316_v11 = vld [vmem:[#allocation2 + $0x730] sm:$0xff] }
  0xc1   :  { %7824 = vst [vmem:[#allocation179_spill] sm:$0xff] %v4167_v4  ;;  %v4182_v4 = vadd.f32 1e-07, %v301_v25  ;;  %v321_v25 = vld [vmem:[#allocation2 + $0x758] sm:$0xff] }
  0xc2   :  { %7825 = vst [vmem:[#allocation180_spill] sm:$0xff] %v4171_v0  ;;  %v4187_v0 = vadd.f32 1e-07, %v302_v19  ;;  %v4203_v19 = vpop.eup %3148  ;;  %v4243_v22 = vadd.f32 1e-07, %v321_v25  ;;  %v341_v25 = vld [vmem:[#allocation2 + $0x7f8] sm:$0xff]  ;;  %3180 = vlog2.f32 %v4054_v58 }
  0xc3   :  { %7826 = vst [vmem:[#allocation181_spill] sm:$0xff] %v4173_v39  ;;  %v319_v39 = vld [vmem:[#allocation2 + $0x748] sm:$0xff] }
  0xc4   :  { %7827 = vst [vmem:[#allocation182_spill] sm:$0xff] %v4176_v45  ;;  %v4191_v45 = vadd.f32 1e-07, %v304_v55  ;;  %v324_v55 = vld [vmem:[#allocation2 + $0x770] sm:$0xff] }
  0xc5   :  { %7828 = vst [vmem:[#allocation183_spill] sm:$0xff] %v4180_v2  ;;  %v4196_v2 = vadd.f32 1e-07, %v305_v13  ;;  %v4212_v13 = vpop.eup %3150  ;;  %v4252_v54 = vadd.f32 1e-07, %v324_v55  ;;  %v344_v55 = vld [vmem:[#allocation2 + $0x810] sm:$0xff]  ;;  %3182 = vlog2.f32 %v4056_v37 }
  0xc6   :  { %7829 = vst [vmem:[#allocation184_spill] sm:$0xff] %v4182_v4  ;;  %v322_v4 = vld [vmem:[#allocation2 + $0x760] sm:$0xff] }
  0xc7   :  { %7830 = vst [vmem:[#allocation185_spill] sm:$0xff] %v4185_v36  ;;  %v4200_v36 = vadd.f32 1e-07, %v307_v42  ;;  %v327_v42 = vld [vmem:[#allocation2 + $0x788] sm:$0xff] }
  0xc8   :  { %7831 = vst [vmem:[#allocation186_spill] sm:$0xff] %v4189_v40  ;;  %v4205_v40 = vadd.f32 1e-07, %v308_v7  ;;  %v4221_v7 = vpop.eup %3152  ;;  %v4261_v24 = vadd.f32 1e-07, %v327_v42  ;;  %v347_v42 = vld [vmem:[#allocation2 + $0x828] sm:$0xff]  ;;  %3184 = vlog2.f32 %v4061_v53 }
  0xc9   :  { %7832 = vst [vmem:[#allocation187_spill] sm:$0xff] %v4191_v45  ;;  %v325_v45 = vld [vmem:[#allocation2 + $0x778] sm:$0xff] }
  0xca   :  { %7833 = vst [vmem:[#allocation188_spill] sm:$0xff] %v4194_v27  ;;  %v4209_v27 = vadd.f32 1e-07, %v310_v28  ;;  %v330_v28 = vld [vmem:[#allocation2 + $0x7a0] sm:$0xff] }
  0xcb   :  { %7834 = vst [vmem:[#allocation189_spill] sm:$0xff] %v4198_v6  ;;  %v4214_v6 = vadd.f32 1e-07, %v311_v30  ;;  %v4230_v30 = vpop.eup %3154  ;;  %v4270_v16 = vadd.f32 1e-07, %v330_v28  ;;  %v350_v28 = vld [vmem:[#allocation2 + $0x840] sm:$0xff]  ;;  %3186 = vlog2.f32 %v4063_v49 }
  0xcc   :  { %7835 = vst [vmem:[#allocation190_spill] sm:$0xff] %v4200_v36  ;;  %v328_v36 = vld [vmem:[#allocation2 + $0x790] sm:$0xff] }
  0xcd   :  { %7836 = vst [vmem:[#allocation191_spill] sm:$0xff] %v4203_v19  ;;  %v4218_v19 = vadd.f32 1e-07, %v313_v17  ;;  %v333_v17 = vld [vmem:[#allocation2 + $0x7b8] sm:$0xff] }
  0xce   :  { %7837 = vst [vmem:[#allocation192_spill] sm:$0xff] %v4207_v12  ;;  %v4223_v12 = vadd.f32 1e-07, %v314_v62  ;;  %v4239_v62 = vpop.eup %3156  ;;  %v4279_v1 = vadd.f32 1e-07, %v333_v17  ;;  %v353_v17 = vld [vmem:[#allocation2 + $0x858] sm:$0xff]  ;;  %3188 = vlog2.f32 %v4065_v61 }
  0xcf   :  { %7838 = vst [vmem:[#allocation193_spill] sm:$0xff] %v4209_v27  ;;  %v331_v27 = vld [vmem:[#allocation2 + $0x7a8] sm:$0xff] }
  0xd0   :  { %7839 = vst [vmem:[#allocation194_spill] sm:$0xff] %v4212_v13  ;;  %v4227_v13 = vadd.f32 1e-07, %v316_v11  ;;  %v336_v11 = vld [vmem:[#allocation2 + $0x7d0] sm:$0xff] }
  0xd1   :  { %7840 = vst [vmem:[#allocation195_spill] sm:$0xff] %v4216_v31  ;;  %v4232_v31 = vadd.f32 1e-07, %v317_v56  ;;  %v4248_v56 = vpop.eup %3158  ;;  %v4288_v63 = vadd.f32 1e-07, %v336_v11  ;;  %v356_v11 = vld [vmem:[#allocation2 + $0x870] sm:$0xff]  ;;  %3190 = vlog2.f32 %v4070_v47 }
  0xd2   :  { %7841 = vst [vmem:[#allocation196_spill] sm:$0xff] %v4218_v19  ;;  %v334_v19 = vld [vmem:[#allocation2 + $0x7c0] sm:$0xff] }
  0xd3   :  { %7842 = vst [vmem:[#allocation197_spill] sm:$0xff] %v4221_v7  ;;  %v4236_v7 = vadd.f32 1e-07, %v319_v39  ;;  %v339_v39 = vld [vmem:[#allocation2 + $0x7e8] sm:$0xff] }
  0xd4   :  { %7843 = vst [vmem:[#allocation198_spill] sm:$0xff] %v4225_v3  ;;  %v4241_v3 = vadd.f32 1e-07, %v320_v50  ;;  %v4257_v50 = vpop.eup %3160  ;;  %v4297_v10 = vadd.f32 1e-07, %v339_v39  ;;  %v359_v39 = vld [vmem:[#allocation2 + $0x888] sm:$0xff]  ;;  %3192 = vlog2.f32 %v4072_v15 }
  0xd5   :  { %7844 = vst [vmem:[#allocation199_spill] sm:$0xff] %v4227_v13  ;;  %v337_v13 = vld [vmem:[#allocation2 + $0x7d8] sm:$0xff] }
  0xd6   :  { %7845 = vst [vmem:[#allocation200_spill] sm:$0xff] %v4230_v30  ;;  %v4245_v30 = vadd.f32 1e-07, %v322_v4  ;;  %v342_v4 = vld [vmem:[#allocation2 + $0x800] sm:$0xff] }
  0xd7   :  { %7846 = vst [vmem:[#allocation201_spill] sm:$0xff] %v4234_v14  ;;  %v4250_v14 = vadd.f32 1e-07, %v323_v44  ;;  %v4266_v44 = vpop.eup %3162  ;;  %v4306_v59 = vadd.f32 1e-07, %v342_v4  ;;  %v362_v4 = vld [vmem:[#allocation2 + $0x8a0] sm:$0xff]  ;;  %3194 = vlog2.f32 %v4074_v48 }
  0xd8   :  { %7847 = vst [vmem:[#allocation202_spill] sm:$0xff] %v4236_v7  ;;  %v340_v7 = vld [vmem:[#allocation2 + $0x7f0] sm:$0xff] }
  0xd9   :  { %7848 = vst [vmem:[#allocation203_spill] sm:$0xff] %v4239_v62  ;;  %v4254_v62 = vadd.f32 1e-07, %v325_v45  ;;  %v345_v45 = vld [vmem:[#allocation2 + $0x818] sm:$0xff] }
  0xda   :  { %7849 = vst [vmem:[#allocation204_spill] sm:$0xff] %v4243_v22  ;;  %v4259_v22 = vadd.f32 1e-07, %v326_v38  ;;  %v4275_v38 = vpop.eup %3164  ;;  %v4315_v58 = vadd.f32 1e-07, %v345_v45  ;;  %v365_v45 = vld [vmem:[#allocation2 + $0x8b8] sm:$0xff]  ;;  %3196 = vlog2.f32 %v4079_v41 }
  0xdb   :  { %7850 = vst [vmem:[#allocation205_spill] sm:$0xff] %v4245_v30  ;;  %v343_v30 = vld [vmem:[#allocation2 + $0x808] sm:$0xff] }
  0xdc   :  { %7851 = vst [vmem:[#allocation206_spill] sm:$0xff] %v4248_v56  ;;  %v4263_v56 = vadd.f32 1e-07, %v328_v36  ;;  %v348_v36 = vld [vmem:[#allocation2 + $0x830] sm:$0xff] }
  0xdd   :  { %7852 = vst [vmem:[#allocation207_spill] sm:$0xff] %v4252_v54  ;;  %v4268_v54 = vadd.f32 1e-07, %v329_v32  ;;  %v4284_v32 = vpop.eup %3166  ;;  %v4324_v37 = vadd.f32 1e-07, %v348_v36  ;;  %v368_v36 = vld [vmem:[#allocation2 + $0x8d0] sm:$0xff]  ;;  %3198 = vlog2.f32 %v4081_v20 }
  0xde   :  { %7853 = vst [vmem:[#allocation208_spill] sm:$0xff] %v4254_v62  ;;  %v346_v62 = vld [vmem:[#allocation2 + $0x820] sm:$0xff] }
  0xdf   :  { %7854 = vst [vmem:[#allocation209_spill] sm:$0xff] %v4257_v50  ;;  %v4272_v50 = vadd.f32 1e-07, %v331_v27  ;;  %v351_v27 = vld [vmem:[#allocation2 + $0x848] sm:$0xff] }
  0xe0   :  { %7855 = vst [vmem:[#allocation210_spill] sm:$0xff] %v4261_v24  ;;  %v4277_v24 = vadd.f32 1e-07, %v332_v26  ;;  %v4293_v26 = vpop.eup %3168  ;;  %v4333_v53 = vadd.f32 1e-07, %v351_v27  ;;  %v371_v27 = vld [vmem:[#allocation2 + $0x8e8] sm:$0xff]  ;;  %3200 = vlog2.f32 %v4083_v34 }
  0xe1   :  { %7856 = vst [vmem:[#allocation211_spill] sm:$0xff] %v4263_v56  ;;  %v349_v56 = vld [vmem:[#allocation2 + $0x838] sm:$0xff] }
  0xe2   :  { %7857 = vst [vmem:[#allocation212_spill] sm:$0xff] %v4266_v44  ;;  %v4281_v44 = vadd.f32 1e-07, %v334_v19  ;;  %v354_v19 = vld [vmem:[#allocation2 + $0x860] sm:$0xff] }
  0xe3   :  { %7858 = vst [vmem:[#allocation213_spill] sm:$0xff] %v4270_v16  ;;  %v4286_v16 = vadd.f32 1e-07, %v335_v9  ;;  %v4302_v9 = vpop.eup %3170  ;;  %v4342_v49 = vadd.f32 1e-07, %v354_v19  ;;  %v374_v19 = vld [vmem:[#allocation2 + $0x900] sm:$0xff]  ;;  %3202 = vlog2.f32 %v4088_v35 }
  0xe4   :  { %7859 = vst [vmem:[#allocation214_spill] sm:$0xff] %v4272_v50  ;;  %v352_v50 = vld [vmem:[#allocation2 + $0x850] sm:$0xff] }
  0xe5   :  { %7860 = vst [vmem:[#allocation215_spill] sm:$0xff] %v4275_v38  ;;  %v4290_v38 = vadd.f32 1e-07, %v337_v13  ;;  %v357_v13 = vld [vmem:[#allocation2 + $0x878] sm:$0xff] }
  0xe6   :  { %7861 = vst [vmem:[#allocation216_spill] sm:$0xff] %v4279_v1  ;;  %v4295_v1 = vadd.f32 1e-07, %v338_v51  ;;  %v4311_v51 = vpop.eup %3172  ;;  %v4351_v61 = vadd.f32 1e-07, %v357_v13  ;;  %v377_v13 = vld [vmem:[#allocation2 + $0x918] sm:$0xff]  ;;  %3204 = vlog2.f32 %v4090_v33 }
  0xe7   :  { %7862 = vst [vmem:[#allocation217_spill] sm:$0xff] %v4281_v44  ;;  %v355_v44 = vld [vmem:[#allocation2 + $0x868] sm:$0xff] }
  0xe8   :  { %7863 = vst [vmem:[#allocation218_spill] sm:$0xff] %v4284_v32  ;;  %v4299_v32 = vadd.f32 1e-07, %v340_v7  ;;  %v360_v7 = vld [vmem:[#allocation2 + $0x890] sm:$0xff] }
  0xe9   :  { %7864 = vst [vmem:[#allocation219_spill] sm:$0xff] %v4288_v63  ;;  %v4304_v63 = vadd.f32 1e-07, %v341_v25  ;;  %v4320_v25 = vpop.eup %3174  ;;  %v4360_v47 = vadd.f32 1e-07, %v360_v7  ;;  %v380_v7 = vld [vmem:[#allocation2 + $0x930] sm:$0xff]  ;;  %3206 = vlog2.f32 %v4092_v21 }
  0xea   :  { %7865 = vst [vmem:[#allocation220_spill] sm:$0xff] %v4290_v38  ;;  %v358_v38 = vld [vmem:[#allocation2 + $0x880] sm:$0xff] }
  0xeb   :  { %7866 = vst [vmem:[#allocation221_spill] sm:$0xff] %v4293_v26  ;;  %v4308_v26 = vadd.f32 1e-07, %v343_v30  ;;  %v363_v30 = vld [vmem:[#allocation2 + $0x8a8] sm:$0xff] }
  0xec   :  { %7867 = vst [vmem:[#allocation222_spill] sm:$0xff] %v4297_v10  ;;  %v4313_v10 = vadd.f32 1e-07, %v344_v55  ;;  %v4329_v55 = vpop.eup %3176  ;;  %v4369_v15 = vadd.f32 1e-07, %v363_v30  ;;  %v383_v30 = vld [vmem:[#allocation2 + $0x948] sm:$0xff]  ;;  %3208 = vlog2.f32 %v4097_v29 }
  0xed   :  { %7868 = vst [vmem:[#allocation223_spill] sm:$0xff] %v4299_v32  ;;  %v361_v32 = vld [vmem:[#allocation2 + $0x898] sm:$0xff] }
  0xee   :  { %7869 = vst [vmem:[#allocation224_spill] sm:$0xff] %v4302_v9  ;;  %v4317_v9 = vadd.f32 1e-07, %v346_v62  ;;  %v366_v62 = vld [vmem:[#allocation2 + $0x8c0] sm:$0xff] }
  0xef   :  { %7870 = vst [vmem:[#allocation225_spill] sm:$0xff] %v4306_v59  ;;  %v4322_v59 = vadd.f32 1e-07, %v347_v42  ;;  %v4338_v42 = vpop.eup %3178  ;;  %v4378_v48 = vadd.f32 1e-07, %v366_v62  ;;  %v386_v62 = vld [vmem:[#allocation2 + $0x960] sm:$0xff] }
  0xf0   :  { %7871 = vst [vmem:[#allocation226_spill] sm:$0xff] %v4308_v26  ;;  %v364_v26 = vld [vmem:[#allocation2 + $0x8b0] sm:$0xff] }
  0xf1   :  { %7872 = vst [vmem:[#allocation227_spill] sm:$0xff] %v4311_v51  ;;  %v4326_v51 = vadd.f32 1e-07, %v349_v56  ;;  %v369_v56 = vld [vmem:[#allocation2 + $0x8d8] sm:$0xff] }
  0xf2   :  { %7873 = vst [vmem:[#allocation228_spill] sm:$0xff] %v4315_v58  ;;  %v4331_v58 = vadd.f32 1e-07, %v350_v28  ;;  %v4347_v28 = vpop.eup %3180  ;;  %v4387_v41 = vadd.f32 1e-07, %v369_v56  ;;  %v389_v56 = vld [vmem:[#allocation2 + $0x978] sm:$0xff] }
  0xf3   :  { %7874 = vst [vmem:[#allocation229_spill] sm:$0xff] %v4317_v9  ;;  %v367_v9 = vld [vmem:[#allocation2 + $0x8c8] sm:$0xff] }
  0xf4   :  { %7875 = vst [vmem:[#allocation230_spill] sm:$0xff] %v4320_v25  ;;  %v4335_v25 = vadd.f32 1e-07, %v352_v50  ;;  %v372_v50 = vld [vmem:[#allocation2 + $0x8f0] sm:$0xff] }
  0xf5   :  { %7876 = vst [vmem:[#allocation231_spill] sm:$0xff] %v4324_v37  ;;  %v4340_v37 = vadd.f32 1e-07, %v353_v17  ;;  %v4356_v17 = vpop.eup %3182  ;;  %v4396_v20 = vadd.f32 1e-07, %v372_v50  ;;  %v392_v50 = vld [vmem:[#allocation2 + $0x990] sm:$0xff] }
  0xf6   :  { %7877 = vst [vmem:[#allocation232_spill] sm:$0xff] %v4326_v51  ;;  %v370_v51 = vld [vmem:[#allocation2 + $0x8e0] sm:$0xff] }
  0xf7   :  { %7878 = vst [vmem:[#allocation233_spill] sm:$0xff] %v4329_v55  ;;  %v4344_v55 = vadd.f32 1e-07, %v355_v44  ;;  %v375_v44 = vld [vmem:[#allocation2 + $0x908] sm:$0xff] }
  0xf8   :  { %7879 = vst [vmem:[#allocation234_spill] sm:$0xff] %v4333_v53  ;;  %v4349_v53 = vadd.f32 1e-07, %v356_v11  ;;  %v4365_v11 = vpop.eup %3184  ;;  %v4405_v34 = vadd.f32 1e-07, %v375_v44  ;;  %v395_v44 = vld [vmem:[#allocation2 + $0x9a8] sm:$0xff] }
  0xf9   :  { %7880 = vst [vmem:[#allocation235_spill] sm:$0xff] %v4335_v25  ;;  %v373_v25 = vld [vmem:[#allocation2 + $0x8f8] sm:$0xff] }
  0xfa   :  { %7881 = vst [vmem:[#allocation236_spill] sm:$0xff] %v4338_v42  ;;  %v4353_v42 = vadd.f32 1e-07, %v358_v38  ;;  %v378_v38 = vld [vmem:[#allocation2 + $0x920] sm:$0xff] }
  0xfb   :  { %7882 = vst [vmem:[#allocation237_spill] sm:$0xff] %v4342_v49  ;;  %v4358_v49 = vadd.f32 1e-07, %v359_v39  ;;  %v4374_v39 = vpop.eup %3186  ;;  %v4414_v35 = vadd.f32 1e-07, %v378_v38  ;;  %v398_v38 = vld [vmem:[#allocation2 + $0x9c0] sm:$0xff] }
  0xfc   :  { %7883 = vst [vmem:[#allocation238_spill] sm:$0xff] %v4344_v55  ;;  %v376_v55 = vld [vmem:[#allocation2 + $0x910] sm:$0xff] }
  0xfd   :  { %7884 = vst [vmem:[#allocation239_spill] sm:$0xff] %v4347_v28  ;;  %v4362_v28 = vadd.f32 1e-07, %v361_v32  ;;  %v381_v32 = vld [vmem:[#allocation2 + $0x938] sm:$0xff] }
  0xfe   :  { %7885 = vst [vmem:[#allocation240_spill] sm:$0xff] %v4351_v61  ;;  %v4367_v61 = vadd.f32 1e-07, %v362_v4  ;;  %v4383_v4 = vpop.eup %3188  ;;  %v4423_v33 = vadd.f32 1e-07, %v381_v32  ;;  %v401_v32 = vld [vmem:[#allocation2 + $0x9d8] sm:$0xff] }
  0xff   :  { %7886 = vst [vmem:[#allocation241_spill] sm:$0xff] %v4353_v42  ;;  %v379_v42 = vld [vmem:[#allocation2 + $0x928] sm:$0xff] }
 0x100   :  { %7887 = vst [vmem:[#allocation242_spill] sm:$0xff] %v4356_v17  ;;  %v4371_v17 = vadd.f32 1e-07, %v364_v26  ;;  %v384_v26 = vld [vmem:[#allocation2 + $0x950] sm:$0xff] }
 0x101   :  { %7888 = vst [vmem:[#allocation243_spill] sm:$0xff] %v4360_v47  ;;  %v4376_v47 = vadd.f32 1e-07, %v365_v45  ;;  %v4392_v45 = vpop.eup %3190  ;;  %v4432_v21 = vadd.f32 1e-07, %v384_v26  ;;  %v404_v26 = vld [vmem:[#allocation2 + $0x9f0] sm:$0xff] }
 0x102   :  { %7889 = vst [vmem:[#allocation244_spill] sm:$0xff] %v4362_v28  ;;  %v382_v28 = vld [vmem:[#allocation2 + $0x940] sm:$0xff] }
 0x103   :  { %7890 = vst [vmem:[#allocation245_spill] sm:$0xff] %v4365_v11  ;;  %v4380_v11 = vadd.f32 1e-07, %v367_v9  ;;  %v387_v9 = vld [vmem:[#allocation2 + $0x968] sm:$0xff] }
 0x104   :  { %7891 = vst [vmem:[#allocation246_spill] sm:$0xff] %v4367_v61  ;;  %v4389_v61 = vadd.f32 1e-07, %v370_v51  ;;  %v390_v51 = vld [vmem:[#allocation2 + $0x980] sm:$0xff]  ;;  %v4441_v29 = vadd.f32 1e-07, %v387_v9 }
 0x105   :  { %7892 = vst [vmem:[#allocation247_spill] sm:$0xff] %v4369_v15  ;;  %v4385_v15 = vadd.f32 1e-07, %v368_v36  ;;  %v4401_v36 = vpop.eup %3192  ;;  %v407_v9 = vld [vmem:[#allocation2 + $0xa08] sm:$0xff] }
 0x106   :  { %7893 = vst [vmem:[#allocation248_spill] sm:$0xff] %v4371_v17  ;;  %v385_v17 = vld [vmem:[#allocation2 + $0x958] sm:$0xff] }
 0x107   :  { %7894 = vst [vmem:[#allocation249_spill] sm:$0xff] %v4376_v47  ;;  %v4398_v47 = vadd.f32 1e-07, %v373_v25  ;;  %v393_v25 = vld [vmem:[#allocation2 + $0x998] sm:$0xff] }
 0x108   :  { %7895 = vst [vmem:[#allocation250_spill] sm:$0xff] %v4378_v48  ;;  %v4394_v48 = vadd.f32 1e-07, %v371_v27  ;;  %v4410_v27 = vpop.eup %3194 }
 0x109   :  { %7896 = vst [vmem:[#allocation251_spill] sm:$0xff] %v4380_v11  ;;  %v388_v11 = vld [vmem:[#allocation2 + $0x970] sm:$0xff] }
 0x10a   :  { %7897 = vst [vmem:[#allocation252_spill] sm:$0xff] %v4385_v15  ;;  %v4407_v15 = vadd.f32 1e-07, %v376_v55  ;;  %v396_v55 = vld [vmem:[#allocation2 + $0x9b0] sm:$0xff] }
 0x10b   :  { %7898 = vst [vmem:[#allocation253_spill] sm:$0xff] %v4387_v41  ;;  %v4403_v41 = vadd.f32 1e-07, %v374_v19  ;;  %v4419_v19 = vpop.eup %3196 }
 0x10c   :  { %7899 = vst [vmem:[#allocation254_spill] sm:$0xff] %v4389_v61  ;;  %v391_v61 = vld [vmem:[#allocation2 + $0x988] sm:$0xff] }
 0x10d   :  { %7900 = vst [vmem:[#allocation255_spill] sm:$0xff] %v4394_v48  ;;  %v4416_v48 = vadd.f32 1e-07, %v379_v42  ;;  %v399_v42 = vld [vmem:[#allocation2 + $0x9c8] sm:$0xff] }
 0x10e   :  { %7901 = vst [vmem:[#allocation256_spill] sm:$0xff] %v4396_v20  ;;  %v4412_v20 = vadd.f32 1e-07, %v377_v13  ;;  %v4428_v13 = vpop.eup %3198 }
 0x10f   :  { %7902 = vst [vmem:[#allocation257_spill] sm:$0xff] %v4398_v47  ;;  %v394_v47 = vld [vmem:[#allocation2 + $0x9a0] sm:$0xff] }
 0x110   :  { %7903 = vst [vmem:[#allocation258_spill] sm:$0xff] %v4403_v41  ;;  %v4425_v41 = vadd.f32 1e-07, %v382_v28  ;;  %v402_v28 = vld [vmem:[#allocation2 + $0x9e0] sm:$0xff] }
 0x111   :  { %7904 = vst [vmem:[#allocation259_spill] sm:$0xff] %v4405_v34  ;;  %v4421_v34 = vadd.f32 1e-07, %v380_v7  ;;  %v4437_v7 = vpop.eup %3200 }
 0x112   :  { %7905 = vst [vmem:[#allocation260_spill] sm:$0xff] %v4407_v15  ;;  %v397_v15 = vld [vmem:[#allocation2 + $0x9b8] sm:$0xff] }
 0x113   :  { %7906 = vst [vmem:[#allocation261_spill] sm:$0xff] %v4412_v20  ;;  %v4434_v20 = vadd.f32 1e-07, %v385_v17  ;;  %v405_v17 = vld [vmem:[#allocation2 + $0x9f8] sm:$0xff] }
 0x114   :  { %7907 = vst [vmem:[#allocation262_spill] sm:$0xff] %v4414_v35  ;;  %v4430_v35 = vadd.f32 1e-07, %v383_v30  ;;  %v4446_v30 = vpop.eup %3202 }
 0x115   :  { %7908 = vst [vmem:[#allocation263_spill] sm:$0xff] %v4416_v48  ;;  %v400_v48 = vld [vmem:[#allocation2 + $0x9d0] sm:$0xff] }
 0x116   :  { %7909 = vst [vmem:[#allocation264_spill] sm:$0xff] %v4419_v19  ;;  %v7917_v19 = vld [vmem:[#allocation156_spill] sm:$0xff] }
 0x117   :  { %7910 = vst [vmem:[#allocation265_spill] sm:$0xff] %v4421_v34  ;;  %3210 = vlog2.f32 %v7917_v19  ;;  %v4443_v34 = vadd.f32 1e-07, %v388_v11  ;;  %v4450_v19 = vadd.f32 1e-07, %v390_v51  ;;  %v408_v11 = vld [vmem:[#allocation2 + $0xa10] sm:$0xff] }
 0x118   :  { %7911 = vst [vmem:[#allocation266_spill] sm:$0xff] %v4423_v33  ;;  %v4439_v33 = vadd.f32 1e-07, %v386_v62  ;;  %v4455_v62 = vpop.eup %3204  ;;  %v410_v51 = vld [vmem:[#allocation2 + $0xa20] sm:$0xff] }
 0x119   :  { %7912 = vst [vmem:[#allocation267_spill] sm:$0xff] %v4425_v41  ;;  %v403_v41 = vld [vmem:[#allocation2 + $0x9e8] sm:$0xff] }
 0x11a   :  { %7913 = vst [vmem:[#allocation268_spill] sm:$0xff] %v4428_v13  ;;  %v7921_v13 = vld [vmem:[#allocation157_spill] sm:$0xff] }
 0x11b   :  { %7914 = vst [vmem:[#allocation269_spill] sm:$0xff] %v4430_v35  ;;  %3212 = vlog2.f32 %v7921_v13  ;;  %v4452_v35 = vadd.f32 1e-07, %v391_v61  ;;  %v4459_v13 = vadd.f32 1e-07, %v393_v25  ;;  %v411_v61 = vld [vmem:[#allocation2 + $0xa28] sm:$0xff] }
 0x11c   :  { %7915 = vst [vmem:[#allocation270_spill] sm:$0xff] %v4432_v21  ;;  %v4448_v21 = vadd.f32 1e-07, %v389_v56  ;;  %3214 = vlog2.f32 %v4106_v23  ;;  %v4464_v56 = vpop.eup %3206  ;;  %v4468_v23 = vadd.f32 1e-07, %v396_v55  ;;  %v413_v25 = vld [vmem:[#allocation2 + $0xa38] sm:$0xff] }
 0x11d   :  { %7916 = vst [vmem:[#allocation271_spill] sm:$0xff] %v4434_v20  ;;  %v406_v20 = vld [vmem:[#allocation2 + $0xa00] sm:$0xff]  ;;  %v416_v55 = vld [vmem:[#allocation2 + $0xa50] sm:$0xff] }
 0x11e   :  { %7918 = vst [vmem:[#allocation156_spill] sm:$0xff] %v4439_v33  ;;  %v4461_v33 = vadd.f32 1e-07, %v394_v47  ;;  %v414_v47 = vld [vmem:[#allocation2 + $0xa40] sm:$0xff] }
 0x11f   :  { %7919 = vst [vmem:[#allocation272_spill] sm:$0xff] %v4441_v29  ;;  %v4457_v29 = vadd.f32 1e-07, %v392_v50  ;;  %v4473_v50 = vpop.eup %3208 }
 0x120   :  { %7920 = vst [vmem:[#allocation273_spill] sm:$0xff] %v4443_v34  ;;  %v409_v34 = vld [vmem:[#allocation2 + $0xa18] sm:$0xff] }
 0x121   :  { %7922 = vst [vmem:[#allocation157_spill] sm:$0xff] %v4446_v30  ;;  %v7930_v30 = vld [vmem:[#allocation159_spill] sm:$0xff] }
 0x122   :  { %7923 = vst [vmem:[#allocation274_spill] sm:$0xff] %v4448_v21  ;;  %3216 = vlog2.f32 %v7930_v30  ;;  %v4470_v21 = vadd.f32 1e-07, %v397_v15  ;;  %v4477_v30 = vadd.f32 1e-07, %v399_v42  ;;  %v417_v15 = vld [vmem:[#allocation2 + $0xa58] sm:$0xff] }
 0x123   :  { %7924 = vst [vmem:[#allocation275_spill] sm:$0xff] %v4450_v19  ;;  %v4466_v19 = vadd.f32 1e-07, %v395_v44  ;;  %v4482_v44 = vpop.eup %3210  ;;  %v419_v42 = vld [vmem:[#allocation2 + $0xa68] sm:$0xff] }
 0x124   :  { %7925 = vst [vmem:[#allocation276_spill] sm:$0xff] %v4452_v35  ;;  %v412_v35 = vld [vmem:[#allocation2 + $0xa30] sm:$0xff] }
 0x125   :  { %7926 = vst [vmem:[#allocation277_spill] sm:$0xff] %v4455_v62  ;;  %v7934_v62 = vld [vmem:[#allocation160_spill] sm:$0xff] }
 0x126   :  { %7927 = vst [vmem:[#allocation278_spill] sm:$0xff] %v4457_v29  ;;  %3218 = vlog2.f32 %v7934_v62  ;;  %v4479_v29 = vadd.f32 1e-07, %v400_v48  ;;  %v4486_v62 = vadd.f32 1e-07, %v402_v28  ;;  %v420_v48 = vld [vmem:[#allocation2 + $0xa70] sm:$0xff] }
 0x127   :  { %7928 = vst [vmem:[#allocation279_spill] sm:$0xff] %v4459_v13  ;;  %v4475_v13 = vadd.f32 1e-07, %v398_v38  ;;  %3220 = vlog2.f32 %v4115_v46  ;;  %v4491_v38 = vpop.eup %3212  ;;  %v4495_v46 = vadd.f32 1e-07, %v405_v17  ;;  %v422_v28 = vld [vmem:[#allocation2 + $0xa80] sm:$0xff] }
 0x128   :  { %7929 = vst [vmem:[#allocation280_spill] sm:$0xff] %v4461_v33  ;;  %v415_v33 = vld [vmem:[#allocation2 + $0xa48] sm:$0xff]  ;;  %v425_v17 = vld [vmem:[#allocation2 + $0xa98] sm:$0xff] }
 0x129   :  { %7931 = vst [vmem:[#allocation159_spill] sm:$0xff] %v4466_v19  ;;  %v4488_v19 = vadd.f32 1e-07, %v403_v41  ;;  %v423_v41 = vld [vmem:[#allocation2 + $0xa88] sm:$0xff] }
 0x12a   :  { %7932 = vst [vmem:[#allocation281_spill] sm:$0xff] %v4468_v23  ;;  %v4484_v23 = vadd.f32 1e-07, %v401_v32  ;;  %v4500_v32 = vpop.eup %3214 }
 0x12b   :  { %7933 = vst [vmem:[#allocation282_spill] sm:$0xff] %v4470_v21  ;;  %v418_v21 = vld [vmem:[#allocation2 + $0xa60] sm:$0xff] }
 0x12c   :  { %7935 = vst [vmem:[#allocation160_spill] sm:$0xff] %v4473_v50  ;;  %v7943_v50 = vld [vmem:[#allocation162_spill] sm:$0xff] }
 0x12d   :  { %7936 = vst [vmem:[#allocation283_spill] sm:$0xff] %v4475_v13  ;;  %3222 = vlog2.f32 %v7943_v50  ;;  %v4497_v13 = vadd.f32 1e-07, %v406_v20  ;;  %v4504_v50 = vadd.f32 1e-07, %v408_v11  ;;  %v426_v20 = vld [vmem:[#allocation2 + $0xaa0] sm:$0xff] }
 0x12e   :  { %7937 = vst [vmem:[#allocation284_spill] sm:$0xff] %v4477_v30  ;;  %v4493_v30 = vadd.f32 1e-07, %v404_v26  ;;  %v4509_v26 = vpop.eup %3216  ;;  %v428_v11 = vld [vmem:[#allocation2 + $0xab0] sm:$0xff] }
 0x12f   :  { %7938 = vst [vmem:[#allocation285_spill] sm:$0xff] %v4479_v29  ;;  %v421_v29 = vld [vmem:[#allocation2 + $0xa78] sm:$0xff] }
 0x130   :  { %7939 = vst [vmem:[#allocation286_spill] sm:$0xff] %v4482_v44  ;;  %v7947_v44 = vld [vmem:[#allocation163_spill] sm:$0xff] }
 0x131   :  { %7940 = vst [vmem:[#allocation287_spill] sm:$0xff] %v4484_v23  ;;  %3224 = vlog2.f32 %v7947_v44  ;;  %v4506_v23 = vadd.f32 1e-07, %v409_v34  ;;  %v4513_v44 = vadd.f32 1e-07, %v411_v61  ;;  %v429_v34 = vld [vmem:[#allocation2 + $0xab8] sm:$0xff] }
 0x132   :  { %7941 = vst [vmem:[#allocation288_spill] sm:$0xff] %v4486_v62  ;;  %v4502_v62 = vadd.f32 1e-07, %v407_v9  ;;  %3226 = vlog2.f32 %v4124_v5  ;;  %v4518_v9 = vpop.eup %3218  ;;  %v4522_v5 = vadd.f32 1e-07, %v414_v47  ;;  %v431_v61 = vld [vmem:[#allocation2 + $0xac8] sm:$0xff] }
 0x133   :  { %7942 = vst [vmem:[#allocation289_spill] sm:$0xff] %v4488_v19  ;;  %v424_v19 = vld [vmem:[#allocation2 + $0xa90] sm:$0xff]  ;;  %v434_v47 = vld [vmem:[#allocation2 + $0xae0] sm:$0xff] }
 0x134   :  { %7944 = vst [vmem:[#allocation162_spill] sm:$0xff] %v4493_v30  ;;  %v4515_v30 = vadd.f32 1e-07, %v412_v35  ;;  %v432_v35 = vld [vmem:[#allocation2 + $0xad0] sm:$0xff] }
 0x135   :  { %7945 = vst [vmem:[#allocation290_spill] sm:$0xff] %v4495_v46  ;;  %v4511_v46 = vadd.f32 1e-07, %v410_v51  ;;  %v4527_v51 = vpop.eup %3220 }
 0x136   :  { %7946 = vst [vmem:[#allocation291_spill] sm:$0xff] %v4497_v13  ;;  %v427_v13 = vld [vmem:[#allocation2 + $0xaa8] sm:$0xff] }
 0x137   :  { %7948 = vst [vmem:[#allocation163_spill] sm:$0xff] %v4500_v32  ;;  %v7956_v32 = vld [vmem:[#allocation165_spill] sm:$0xff] }
 0x138   :  { %7949 = vst [vmem:[#allocation292_spill] sm:$0xff] %v4502_v62  ;;  %3228 = vlog2.f32 %v7956_v32  ;;  %v4524_v62 = vadd.f32 1e-07, %v415_v33  ;;  %v4531_v32 = vadd.f32 1e-07, %v417_v15  ;;  %v435_v33 = vld [vmem:[#allocation2 + $0xae8] sm:$0xff] }
 0x139   :  { %7950 = vst [vmem:[#allocation293_spill] sm:$0xff] %v4504_v50  ;;  %v4520_v50 = vadd.f32 1e-07, %v413_v25  ;;  %v4536_v25 = vpop.eup %3222  ;;  %v437_v15 = vld [vmem:[#allocation2 + $0xaf8] sm:$0xff] }
 0x13a   :  { %7951 = vst [vmem:[#allocation294_spill] sm:$0xff] %v4506_v23  ;;  %v430_v23 = vld [vmem:[#allocation2 + $0xac0] sm:$0xff] }
 0x13b   :  { %7952 = vst [vmem:[#allocation295_spill] sm:$0xff] %v4509_v26  ;;  %v7960_v26 = vld [vmem:[#allocation166_spill] sm:$0xff] }
 0x13c   :  { %7953 = vst [vmem:[#allocation296_spill] sm:$0xff] %v4511_v46  ;;  %3230 = vlog2.f32 %v7960_v26  ;;  %v4533_v46 = vadd.f32 1e-07, %v418_v21  ;;  %v4540_v26 = vadd.f32 1e-07, %v420_v48  ;;  %v438_v21 = vld [vmem:[#allocation2 + $0xb00] sm:$0xff] }
 0x13d   :  { %7954 = vst [vmem:[#allocation297_spill] sm:$0xff] %v4513_v44  ;;  %v4529_v44 = vadd.f32 1e-07, %v416_v55  ;;  %3232 = vlog2.f32 %v4133_v43  ;;  %v4545_v55 = vpop.eup %3224  ;;  %v4549_v43 = vadd.f32 1e-07, %v423_v41  ;;  %v440_v48 = vld [vmem:[#allocation2 + $0xb10] sm:$0xff] }
 0x13e   :  { %7955 = vst [vmem:[#allocation298_spill] sm:$0xff] %v4515_v30  ;;  %v433_v30 = vld [vmem:[#allocation2 + $0xad8] sm:$0xff]  ;;  %v443_v41 = vld [vmem:[#allocation2 + $0xb28] sm:$0xff] }
 0x13f   :  { %7957 = vst [vmem:[#allocation165_spill] sm:$0xff] %v4520_v50  ;;  %v4542_v50 = vadd.f32 1e-07, %v421_v29  ;;  %v441_v29 = vld [vmem:[#allocation2 + $0xb18] sm:$0xff] }
 0x140   :  { %7958 = vst [vmem:[#allocation299_spill] sm:$0xff] %v4522_v5  ;;  %v4538_v5 = vadd.f32 1e-07, %v419_v42  ;;  %v4554_v42 = vpop.eup %3226 }
 0x141   :  { %7959 = vst [vmem:[#allocation300_spill] sm:$0xff] %v4524_v62  ;;  %v436_v62 = vld [vmem:[#allocation2 + $0xaf0] sm:$0xff] }
 0x142   :  { %7961 = vst [vmem:[#allocation166_spill] sm:$0xff] %v4527_v51  ;;  %v7969_v51 = vld [vmem:[#allocation168_spill] sm:$0xff] }
 0x143   :  { %7962 = vst [vmem:[#allocation301_spill] sm:$0xff] %v4529_v44  ;;  %3234 = vlog2.f32 %v7969_v51  ;;  %v4551_v44 = vadd.f32 1e-07, %v424_v19  ;;  %v4558_v51 = vadd.f32 1e-07, %v426_v20  ;;  %v444_v19 = vld [vmem:[#allocation2 + $0xb30] sm:$0xff] }
 0x144   :  { %7963 = vst [vmem:[#allocation302_spill] sm:$0xff] %v4531_v32  ;;  %v4547_v32 = vadd.f32 1e-07, %v422_v28  ;;  %v4563_v28 = vpop.eup %3228  ;;  %v446_v20 = vld [vmem:[#allocation2 + $0xb40] sm:$0xff] }
 0x145   :  { %7964 = vst [vmem:[#allocation303_spill] sm:$0xff] %v4533_v46  ;;  %v439_v46 = vld [vmem:[#allocation2 + $0xb08] sm:$0xff] }
 0x146   :  { %7965 = vst [vmem:[#allocation304_spill] sm:$0xff] %v4536_v25  ;;  %v7973_v25 = vld [vmem:[#allocation169_spill] sm:$0xff] }
 0x147   :  { %7966 = vst [vmem:[#allocation305_spill] sm:$0xff] %v4538_v5  ;;  %3236 = vlog2.f32 %v7973_v25  ;;  %v4560_v5 = vadd.f32 1e-07, %v427_v13  ;;  %v4567_v25 = vadd.f32 1e-07, %v429_v34  ;;  %v447_v13 = vld [vmem:[#allocation2 + $0xb48] sm:$0xff] }
 0x148   :  { %7967 = vst [vmem:[#allocation306_spill] sm:$0xff] %v4540_v26  ;;  %v4556_v26 = vadd.f32 1e-07, %v425_v17  ;;  %3238 = vlog2.f32 %v4142_v52  ;;  %v4572_v17 = vpop.eup %3230  ;;  %v4576_v52 = vadd.f32 1e-07, %v432_v35  ;;  %v449_v34 = vld [vmem:[#allocation2 + $0xb58] sm:$0xff] }
 0x149   :  { %7968 = vst [vmem:[#allocation307_spill] sm:$0xff] %v4542_v50  ;;  %v442_v50 = vld [vmem:[#allocation2 + $0xb20] sm:$0xff]  ;;  %v452_v35 = vld [vmem:[#allocation2 + $0xb70] sm:$0xff] }
 0x14a   :  { %7970 = vst [vmem:[#allocation168_spill] sm:$0xff] %v4547_v32  ;;  %v4569_v32 = vadd.f32 1e-07, %v430_v23  ;;  %v450_v23 = vld [vmem:[#allocation2 + $0xb60] sm:$0xff] }
 0x14b   :  { %7971 = vst [vmem:[#allocation308_spill] sm:$0xff] %v4549_v43  ;;  %v4565_v43 = vadd.f32 1e-07, %v428_v11  ;;  %v4581_v11 = vpop.eup %3232 }
 0x14c   :  { %7972 = vst [vmem:[#allocation309_spill] sm:$0xff] %v4551_v44  ;;  %v445_v44 = vld [vmem:[#allocation2 + $0xb38] sm:$0xff] }
 0x14d   :  { %7974 = vst [vmem:[#allocation169_spill] sm:$0xff] %v4554_v42  ;;  %v7982_v42 = vld [vmem:[#allocation171_spill] sm:$0xff] }
 0x14e   :  { %7975 = vst [vmem:[#allocation310_spill] sm:$0xff] %v4556_v26  ;;  %3240 = vlog2.f32 %v7982_v42  ;;  %v4578_v26 = vadd.f32 1e-07, %v433_v30  ;;  %v4585_v42 = vadd.f32 1e-07, %v435_v33  ;;  %v453_v30 = vld [vmem:[#allocation2 + $0xb78] sm:$0xff] }
 0x14f   :  { %7976 = vst [vmem:[#allocation311_spill] sm:$0xff] %v4558_v51  ;;  %v4574_v51 = vadd.f32 1e-07, %v431_v61  ;;  %v4590_v61 = vpop.eup %3234  ;;  %v455_v33 = vld [vmem:[#allocation2 + $0xb88] sm:$0xff] }
 0x150   :  { %7977 = vst [vmem:[#allocation312_spill] sm:$0xff] %v4560_v5  ;;  %v448_v5 = vld [vmem:[#allocation2 + $0xb50] sm:$0xff] }
 0x151   :  { %7978 = vst [vmem:[#allocation313_spill] sm:$0xff] %v4563_v28  ;;  %v7986_v28 = vld [vmem:[#allocation172_spill] sm:$0xff] }
 0x152   :  { %7979 = vst [vmem:[#allocation314_spill] sm:$0xff] %v4565_v43  ;;  %3242 = vlog2.f32 %v7986_v28  ;;  %v4587_v43 = vadd.f32 1e-07, %v436_v62  ;;  %v4594_v28 = vadd.f32 1e-07, %v438_v21  ;;  %v456_v62 = vld [vmem:[#allocation2 + $0xb90] sm:$0xff] }
 0x153   :  { %7980 = vst [vmem:[#allocation315_spill] sm:$0xff] %v4567_v25  ;;  %v4583_v25 = vadd.f32 1e-07, %v434_v47  ;;  %3244 = vlog2.f32 %v4151_v18  ;;  %v4599_v47 = vpop.eup %3236  ;;  %v4603_v18 = vadd.f32 1e-07, %v441_v29  ;;  %v458_v21 = vld [vmem:[#allocation2 + $0xba0] sm:$0xff] }
 0x154   :  { %7981 = vst [vmem:[#allocation316_spill] sm:$0xff] %v4569_v32  ;;  %v451_v32 = vld [vmem:[#allocation2 + $0xb68] sm:$0xff]  ;;  %v461_v29 = vld [vmem:[#allocation2 + $0xbb8] sm:$0xff] }
 0x155   :  { %7983 = vst [vmem:[#allocation171_spill] sm:$0xff] %v4574_v51  ;;  %v4596_v51 = vadd.f32 1e-07, %v439_v46  ;;  %v459_v46 = vld [vmem:[#allocation2 + $0xba8] sm:$0xff] }
 0x156   :  { %7984 = vst [vmem:[#allocation317_spill] sm:$0xff] %v4576_v52  ;;  %v4592_v52 = vadd.f32 1e-07, %v437_v15  ;;  %v4608_v15 = vpop.eup %3238 }
 0x157   :  { %7985 = vst [vmem:[#allocation318_spill] sm:$0xff] %v4578_v26  ;;  %v454_v26 = vld [vmem:[#allocation2 + $0xb80] sm:$0xff] }
 0x158   :  { %7987 = vst [vmem:[#allocation172_spill] sm:$0xff] %v4581_v11  ;;  %v7995_v11 = vld [vmem:[#allocation174_spill] sm:$0xff] }
 0x159   :  { %7988 = vst [vmem:[#allocation319_spill] sm:$0xff] %v4583_v25  ;;  %3246 = vlog2.f32 %v7995_v11  ;;  %v4605_v25 = vadd.f32 1e-07, %v442_v50  ;;  %v4612_v11 = vadd.f32 1e-07, %v444_v19  ;;  %v462_v50 = vld [vmem:[#allocation2 + $0xbc0] sm:$0xff] }
 0x15a   :  { %7989 = vst [vmem:[#allocation320_spill] sm:$0xff] %v4585_v42  ;;  %v4601_v42 = vadd.f32 1e-07, %v440_v48  ;;  %v4617_v48 = vpop.eup %3240  ;;  %v464_v19 = vld [vmem:[#allocation2 + $0xbd0] sm:$0xff] }
 0x15b   :  { %7990 = vst [vmem:[#allocation321_spill] sm:$0xff] %v4587_v43  ;;  %v457_v43 = vld [vmem:[#allocation2 + $0xb98] sm:$0xff] }
 0x15c   :  { %7991 = vst [vmem:[#allocation322_spill] sm:$0xff] %v4590_v61  ;;  %v7999_v61 = vld [vmem:[#allocation175_spill] sm:$0xff] }
 0x15d   :  { %7992 = vst [vmem:[#allocation323_spill] sm:$0xff] %v4592_v52  ;;  %3248 = vlog2.f32 %v7999_v61  ;;  %v4614_v52 = vadd.f32 1e-07, %v445_v44  ;;  %v4621_v61 = vadd.f32 1e-07, %v447_v13  ;;  %v465_v44 = vld [vmem:[#allocation2 + $0xbd8] sm:$0xff] }
 0x15e   :  { %7993 = vst [vmem:[#allocation324_spill] sm:$0xff] %v4594_v28  ;;  %v4610_v28 = vadd.f32 1e-07, %v443_v41  ;;  %3250 = vlog2.f32 %v4160_v57  ;;  %v4626_v41 = vpop.eup %3242  ;;  %v4630_v57 = vadd.f32 1e-07, %v450_v23  ;;  %v467_v13 = vld [vmem:[#allocation2 + $0xbe8] sm:$0xff] }
 0x15f   :  { %7994 = vst [vmem:[#allocation325_spill] sm:$0xff] %v4596_v51  ;;  %v460_v51 = vld [vmem:[#allocation2 + $0xbb0] sm:$0xff]  ;;  %v4646_v23 = vadd.f32 1e-07, %v455_v33  ;;  %v4664_v33 = vadd.f32 1e-07, %v461_v29 }
 0x160   :  { %7996 = vst [vmem:[#allocation174_spill] sm:$0xff] %v4601_v42  ;;  %v4623_v42 = vadd.f32 1e-07, %v448_v5  ;;  %v468_v5 = vld [vmem:[#allocation2 + $0xbf0] sm:$0xff]  ;;  %v4682_v29 = vadd.f32 1e-07, %v467_v13 }
 0x161   :  { %7997 = vst [vmem:[#allocation326_spill] sm:$0xff] %v4603_v18  ;;  %v4619_v18 = vadd.f32 1e-07, %v446_v20  ;;  %v4635_v20 = vpop.eup %3244 }
 0x162   :  { %7998 = vst [vmem:[#allocation327_spill] sm:$0xff] %v4605_v25  ;;  %v463_v25 = vld [vmem:[#allocation2 + $0xbc8] sm:$0xff] }
 0x163   :  { %8000 = vst [vmem:[#allocation175_spill] sm:$0xff] %v4608_v15  ;;  %v8008_v15 = vld [vmem:[#allocation177_spill] sm:$0xff] }
 0x164   :  { %8001 = vst [vmem:[#allocation328_spill] sm:$0xff] %v4610_v28  ;;  %3252 = vlog2.f32 %v8008_v15  ;;  %v4632_v28 = vadd.f32 1e-07, %v451_v32  ;;  %v4639_v15 = vadd.f32 1e-07, %v453_v30 }
 0x165   :  { %8002 = vst [vmem:[#allocation329_spill] sm:$0xff] %v4612_v11  ;;  %v4628_v11 = vadd.f32 1e-07, %v449_v34  ;;  %v4644_v34 = vpop.eup %3246  ;;  %v4648_v32 = vadd.f32 1e-07, %v456_v62 }
 0x166   :  { %8003 = vst [vmem:[#allocation330_spill] sm:$0xff] %v4614_v52  ;;  %v466_v52 = vld [vmem:[#allocation2 + $0xbe0] sm:$0xff]  ;;  %v4657_v30 = vadd.f32 1e-07, %v459_v46  ;;  %v4666_v62 = vadd.f32 1e-07, %v462_v50 }
 0x167   :  { %8004 = vst [vmem:[#allocation331_spill] sm:$0xff] %v4617_v48  ;;  %v8012_v48 = vld [vmem:[#allocation178_spill] sm:$0xff]  ;;  %v4675_v46 = vadd.f32 1e-07, %v465_v44  ;;  %v4684_v50 = vadd.f32 1e-07, %v468_v5 }
 0x168   :  { %8005 = vst [vmem:[#allocation332_spill] sm:$0xff] %v4619_v18  ;;  %3254 = vlog2.f32 %v8012_v48  ;;  %v4641_v18 = vadd.f32 1e-07, %v454_v26  ;;  %v4650_v48 = vadd.f32 1e-07, %v457_v43  ;;  %v8037_v44 = vld [vmem:[#allocation12_spill] sm:$0xff] }
 0x169   :  { %8006 = vst [vmem:[#allocation333_spill] sm:$0xff] %v4621_v61  ;;  %v4637_v61 = vadd.f32 1e-07, %v452_v35  ;;  %3256 = vlog2.f32 %v4169_v60  ;;  %v4655_v35 = vadd.f32 1e-07, %v458_v21  ;;  %v8041_v5 = vld [vmem:[#allocation14_spill] sm:$0xff] }
 0x16a   :  { %8007 = vst [vmem:[#allocation334_spill] sm:$0xff] %v4623_v42  ;;  %v469_v42 = vld [vmem:[#allocation2 + $0xbf8] sm:$0xff]  ;;  %v4659_v26 = vadd.f32 1e-07, %v460_v51  ;;  %v4668_v43 = vadd.f32 1e-07, %v463_v25 }
 0x16b   :  { %8009 = vst [vmem:[#allocation177_spill] sm:$0xff] %v4628_v11  ;;  %v4673_v21 = vadd.f32 1e-07, %v464_v19  ;;  %v4677_v51 = vadd.f32 1e-07, %v466_v52  ;;  %v8035_v19 = vld [vmem:[#allocation11_spill] sm:$0xff] }
 0x16c   :  { %8010 = vst [vmem:[#allocation335_spill] sm:$0xff] %v4630_v57  ;;  %v4653_v57 = vpop.eup %3248  ;;  %v4686_v25 = vadd.f32 1e-07, %v469_v42  ;;  %v4695_v52 = vmul.f32 0.6931472, %v8037_v44 }
 0x16d   :  { %8011 = vst [vmem:[#allocation336_spill] sm:$0xff] %v4632_v28  ;;  %v8019_v28 = vld [vmem:[#allocation180_spill] sm:$0xff]  ;;  %v4662_v60 = vpop.eup %3250  ;;  %v4704_v42 = vmul.f32 0.6931472, %v8041_v5  ;;  %v8054_v5 = vld [vmem:[#allocation187_spill] sm:$0xff] }
 0x16e   :  { %8013 = vst [vmem:[#allocation178_spill] sm:$0xff] %v4637_v61  ;;  %3258 = vlog2.f32 %v8019_v28  ;;  %v4671_v28 = vpop.eup %3252  ;;  %v8065_v61 = vld [vmem:[#allocation25_spill] sm:$0xff] }
 0x16f   :  { %8014 = vst [vmem:[#allocation337_spill] sm:$0xff] %v4639_v15  ;;  %v8063_v15 = vld [vmem:[#allocation24_spill] sm:$0xff]  ;;  %v4746_v11 = vmul.f32 0.6931472, %v8065_v61 }
 0x170   :  { %8015 = vst [vmem:[#allocation338_spill] sm:$0xff] %v4641_v18  ;;  %v8023_v18 = vld [vmem:[#allocation181_spill] sm:$0xff] }
 0x171   :  { %8016 = vst [vmem:[#allocation339_spill] sm:$0xff] %v4646_v23  ;;  %3260 = vlog2.f32 %v8023_v18  ;;  %v4680_v18 = vpop.eup %3254 }
 0x172   :  { %8017 = vst [vmem:[#allocation340_spill] sm:$0xff] %v4648_v32  ;;  %3262 = vlog2.f32 %v4178_v8  ;;  %v4689_v8 = vpop.eup %3256  ;;  %v8059_v32 = vld [vmem:[#allocation22_spill] sm:$0xff] }
 0x173   :  { %8018 = vst [vmem:[#allocation341_spill] sm:$0xff] %v4650_v48  ;;  %v8057_v48 = vld [vmem:[#allocation21_spill] sm:$0xff]  ;;  %v4734_v23 = vmul.f32 0.6931472, %v8059_v32 }
 0x174   :  { %8020 = vst [vmem:[#allocation180_spill] sm:$0xff] %v4655_v35  ;;  %v4701_v13 = vpop.eup %3258  ;;  %v8055_v35 = vld [vmem:[#allocation20_spill] sm:$0xff] }
 0x175   :  { %8021 = vst [vmem:[#allocation342_spill] sm:$0xff] %v4657_v30 }
 0x176   :  { %8022 = vst [vmem:[#allocation343_spill] sm:$0xff] %v4659_v26  ;;  %v8030_v26 = vld [vmem:[#allocation183_spill] sm:$0xff] }
 0x177   :  { %8024 = vst [vmem:[#allocation181_spill] sm:$0xff] %v4664_v33  ;;  %3264 = vlog2.f32 %v8030_v26  ;;  %v4713_v44 = vpop.eup %3260  ;;  %v8052_v33 = vld [vmem:[#allocation19_spill] sm:$0xff] }
 0x178   :  { %8025 = vst [vmem:[#allocation344_spill] sm:$0xff] %v4666_v62  ;;  %v8050_v62 = vld [vmem:[#allocation18_spill] sm:$0xff]  ;;  %v4722_v30 = vmul.f32 0.6931472, %v8052_v33 }
 0x179   :  { %8026 = vst [vmem:[#allocation345_spill] sm:$0xff] %v4668_v43  ;;  %v8034_v43 = vld [vmem:[#allocation184_spill] sm:$0xff] }
 0x17a   :  { %8027 = vst [vmem:[#allocation346_spill] sm:$0xff] %v4673_v21  ;;  %3266 = vlog2.f32 %v8034_v43  ;;  %v4692_v21 = vmul.f32 0.6931472, %v8035_v19  ;;  %v8047_v19 = vld [vmem:[#allocation186_spill] sm:$0xff] }
 0x17b   :  { %8028 = vst [vmem:[#allocation347_spill] sm:$0xff] %v4675_v46  ;;  %3268 = vlog2.f32 %v4187_v0  ;;  %v8048_v46 = vld [vmem:[#allocation17_spill] sm:$0xff]  ;;  %v4719_v0 = vmul.f32 0.6931472, %v8050_v62 }
 0x17c   :  { %8029 = vst [vmem:[#allocation348_spill] sm:$0xff] %v4677_v51  ;;  %v8039_v51 = vld [vmem:[#allocation13_spill] sm:$0xff]  ;;  %3270 = vlog2.f32 %v8047_v19  ;;  %v4731_v19 = vmul.f32 0.6931472, %v8057_v48 }
 0x17d   :  { %8031 = vst [vmem:[#allocation183_spill] sm:$0xff] %v4682_v29  ;;  %v4698_v26 = vmul.f32 0.6931472, %v8039_v51  ;;  %v4716_v51 = vmul.f32 0.6931472, %v8048_v46  ;;  %3272 = vlog2.f32 %v8054_v5  ;;  %v8061_v46 = vld [vmem:[#allocation23_spill] sm:$0xff] }
 0x17e   :  { %8032 = vst [vmem:[#allocation349_spill] sm:$0xff] %v4684_v50  ;;  %v8045_v50 = vld [vmem:[#allocation16_spill] sm:$0xff]  ;;  %3274 = vlog2.f32 %v4196_v2  ;;  %v4740_v33 = vmul.f32 0.6931472, %v8061_v46  ;;  %v4743_v5 = vmul.f32 0.6931472, %v8063_v15 }
 0x17f   :  { %8033 = vst [vmem:[#allocation350_spill] sm:$0xff] %v4686_v25  ;;  %v8043_v25 = vld [vmem:[#allocation15_spill] sm:$0xff]  ;;  %v4710_v29 = vmul.f32 0.6931472, %v8045_v50  ;;  %v4728_v50 = vmul.f32 0.6931472, %v8055_v35 }
 0x180   :  { %8036 = vst [vmem:[#allocation184_spill] sm:$0xff] %v4692_v21  ;;  %v4707_v43 = vmul.f32 0.6931472, %v8043_v25  ;;  %v4725_v25 = vpop.eup %3262  ;;  %v8067_v35 = vld [vmem:[#allocation189_spill] sm:$0xff]  ;;  %v8074_v46 = vld [vmem:[#allocation190_spill] sm:$0xff] }
 0x181   :  { %8038 = vst [vmem:[#allocation11_spill] sm:$0xff] %v4695_v52  ;;  %v4737_v62 = vpop.eup %3264  ;;  %3276 = vlog2.f32 %v8067_v35 }
 0x182   :  { %8040 = vst [vmem:[#allocation12_spill] sm:$0xff] %v4698_v26  ;;  %v4749_v48 = vpop.eup %3266  ;;  %3278 = vlog2.f32 %v8074_v46 }
 0x183   :  { %8042 = vst [vmem:[#allocation13_spill] sm:$0xff] %v4704_v42  ;;  %v4761_v15 = vpop.eup %3268  ;;  %3280 = vlog2.f32 %v4205_v40 }
 0x184   :  { %8044 = vst [vmem:[#allocation14_spill] sm:$0xff] %v4707_v43 }
 0x185   :  { %8046 = vst [vmem:[#allocation15_spill] sm:$0xff] %v4710_v29 }
 0x186   :  { %8049 = vst [vmem:[#allocation16_spill] sm:$0xff] %v4716_v51 }
 0x187   :  { %8051 = vst [vmem:[#allocation186_spill] sm:$0xff] %v4719_v0 }
 0x188   :  { %8053 = vst [vmem:[#allocation17_spill] sm:$0xff] %v4722_v30 }
 0x189   :  { %8056 = vst [vmem:[#allocation18_spill] sm:$0xff] %v4728_v50  ;;  %v8072_v50 = vld [vmem:[#allocation28_spill] sm:$0xff] }
 0x18a   :  { %8058 = vst [vmem:[#allocation19_spill] sm:$0xff] %v4731_v19  ;;  %v8068_v19 = vld [vmem:[#allocation26_spill] sm:$0xff]  ;;  %v4758_v30 = vmul.f32 0.6931472, %v8072_v50 }
 0x18b   :  { %8060 = vst [vmem:[#allocation187_spill] sm:$0xff] %v4734_v23  ;;  %v4752_v32 = vmul.f32 0.6931472, %v8068_v19  ;;  %v8070_v23 = vld [vmem:[#allocation27_spill] sm:$0xff]  ;;  %v8081_v19 = vld [vmem:[#allocation32_spill] sm:$0xff] }
 0x18c   :  { %8062 = vst [vmem:[#allocation20_spill] sm:$0xff] %v4740_v33  ;;  %v4755_v2 = vmul.f32 0.6931472, %v8070_v23  ;;  %v8079_v33 = vld [vmem:[#allocation31_spill] sm:$0xff]  ;;  %v4773_v23 = vpop.eup %3270  ;;  %v4776_v50 = vmul.f32 0.6931472, %v8081_v19 }
 0x18d   :  { %8064 = vst [vmem:[#allocation21_spill] sm:$0xff] %v4743_v5  ;;  %v8075_v5 = vld [vmem:[#allocation29_spill] sm:$0xff]  ;;  %v4770_v0 = vmul.f32 0.6931472, %v8079_v33 }
 0x18e   :  { %8066 = vst [vmem:[#allocation22_spill] sm:$0xff] %v4746_v11  ;;  %v4764_v61 = vmul.f32 0.6931472, %v8075_v5  ;;  %v8077_v11 = vld [vmem:[#allocation30_spill] sm:$0xff]  ;;  %v8087_v5 = vld [vmem:[#allocation192_spill] sm:$0xff]  ;;  %v8094_v19 = vld [vmem:[#allocation193_spill] sm:$0xff] }
 0x18f   :  { %8069 = vst [vmem:[#allocation23_spill] sm:$0xff] %v4752_v32  ;;  %v4767_v35 = vmul.f32 0.6931472, %v8077_v11  ;;  %3282 = vlog2.f32 %v8087_v5  ;;  %v4785_v11 = vpop.eup %3272 }
 0x190   :  { %8071 = vst [vmem:[#allocation24_spill] sm:$0xff] %v4755_v2  ;;  %v8085_v2 = vld [vmem:[#allocation34_spill] sm:$0xff]  ;;  %3284 = vlog2.f32 %v8094_v19 }
 0x191   :  { %8073 = vst [vmem:[#allocation25_spill] sm:$0xff] %v4758_v30  ;;  %v8083_v30 = vld [vmem:[#allocation33_spill] sm:$0xff]  ;;  %v4782_v32 = vmul.f32 0.6931472, %v8085_v2  ;;  %3286 = vlog2.f32 %v4214_v6 }
 0x192   :  { %8076 = vst [vmem:[#allocation189_spill] sm:$0xff] %v4764_v61  ;;  %v4779_v46 = vmul.f32 0.6931472, %v8083_v30  ;;  %v8092_v61 = vld [vmem:[#allocation37_spill] sm:$0xff]  ;;  %v4797_v30 = vpop.eup %3274 }
 0x193   :  { %8078 = vst [vmem:[#allocation26_spill] sm:$0xff] %v4767_v35  ;;  %v8088_v35 = vld [vmem:[#allocation35_spill] sm:$0xff]  ;;  %v4794_v51 = vmul.f32 0.6931472, %v8092_v61 }
 0x194   :  { %8080 = vst [vmem:[#allocation27_spill] sm:$0xff] %v4770_v0  ;;  %v4788_v33 = vmul.f32 0.6931472, %v8088_v35  ;;  %v8090_v0 = vld [vmem:[#allocation36_spill] sm:$0xff]  ;;  %v8101_v35 = vld [vmem:[#allocation41_spill] sm:$0xff] }
 0x195   :  { %8082 = vst [vmem:[#allocation28_spill] sm:$0xff] %v4776_v50  ;;  %v4791_v40 = vmul.f32 0.6931472, %v8090_v0  ;;  %v8099_v50 = vld [vmem:[#allocation40_spill] sm:$0xff]  ;;  %v4809_v0 = vpop.eup %3276  ;;  %v4812_v61 = vmul.f32 0.6931472, %v8101_v35 }
 0x196   :  { %8084 = vst [vmem:[#allocation190_spill] sm:$0xff] %v4779_v46  ;;  %v8095_v46 = vld [vmem:[#allocation38_spill] sm:$0xff]  ;;  %v4806_v29 = vmul.f32 0.6931472, %v8099_v50  ;;  %v8114_v35 = vld [vmem:[#allocation196_spill] sm:$0xff] }
 0x197   :  { %8086 = vst [vmem:[#allocation29_spill] sm:$0xff] %v4782_v32  ;;  %v4800_v2 = vmul.f32 0.6931472, %v8095_v46  ;;  %v8097_v32 = vld [vmem:[#allocation39_spill] sm:$0xff] }
 0x198   :  { %8089 = vst [vmem:[#allocation30_spill] sm:$0xff] %v4788_v33  ;;  %v4803_v5 = vmul.f32 0.6931472, %v8097_v32  ;;  %v8107_v46 = vld [vmem:[#allocation195_spill] sm:$0xff]  ;;  %v4821_v32 = vpop.eup %3278 }
 0x199   :  { %8091 = vst [vmem:[#allocation31_spill] sm:$0xff] %v4791_v40  ;;  %v8105_v40 = vld [vmem:[#allocation43_spill] sm:$0xff]  ;;  %3288 = vlog2.f32 %v8107_v46 }
 0x19a   :  { %8093 = vst [vmem:[#allocation32_spill] sm:$0xff] %v4794_v51  ;;  %v8103_v51 = vld [vmem:[#allocation42_spill] sm:$0xff]  ;;  %v4818_v33 = vmul.f32 0.6931472, %v8105_v40  ;;  %3290 = vlog2.f32 %v8114_v35 }
 0x19b   :  { %8096 = vst [vmem:[#allocation33_spill] sm:$0xff] %v4800_v2  ;;  %v4815_v19 = vmul.f32 0.6931472, %v8103_v51  ;;  %v8112_v2 = vld [vmem:[#allocation46_spill] sm:$0xff]  ;;  %v4833_v51 = vpop.eup %3280  ;;  %3292 = vlog2.f32 %v4223_v12 }
 0x19c   :  { %8098 = vst [vmem:[#allocation34_spill] sm:$0xff] %v4803_v5  ;;  %v8108_v5 = vld [vmem:[#allocation44_spill] sm:$0xff]  ;;  %v4830_v43 = vmul.f32 0.6931472, %v8112_v2 }
 0x19d   :  { %8100 = vst [vmem:[#allocation192_spill] sm:$0xff] %v4806_v29  ;;  %v4824_v50 = vmul.f32 0.6931472, %v8108_v5  ;;  %v8110_v29 = vld [vmem:[#allocation45_spill] sm:$0xff]  ;;  %v8121_v5 = vld [vmem:[#allocation50_spill] sm:$0xff] }
 0x19e   :  { %8102 = vst [vmem:[#allocation35_spill] sm:$0xff] %v4812_v61  ;;  %v4827_v6 = vmul.f32 0.6931472, %v8110_v29  ;;  %v8119_v61 = vld [vmem:[#allocation49_spill] sm:$0xff]  ;;  %v4845_v29 = vpop.eup %3282  ;;  %v4848_v2 = vmul.f32 0.6931472, %v8121_v5 }
 0x19f   :  { %8104 = vst [vmem:[#allocation36_spill] sm:$0xff] %v4815_v19  ;;  %v8115_v19 = vld [vmem:[#allocation47_spill] sm:$0xff]  ;;  %v4842_v42 = vmul.f32 0.6931472, %v8119_v61 }
 0x1a0   :  { %8106 = vst [vmem:[#allocation37_spill] sm:$0xff] %v4818_v33  ;;  %v4836_v40 = vmul.f32 0.6931472, %v8115_v19  ;;  %v8117_v33 = vld [vmem:[#allocation48_spill] sm:$0xff]  ;;  %v8127_v19 = vld [vmem:[#allocation198_spill] sm:$0xff]  ;;  %v8134_v5 = vld [vmem:[#allocation199_spill] sm:$0xff] }
 0x1a1   :  { %8109 = vst [vmem:[#allocation193_spill] sm:$0xff] %v4824_v50  ;;  %v4839_v46 = vmul.f32 0.6931472, %v8117_v33  ;;  %3294 = vlog2.f32 %v8127_v19  ;;  %v4857_v33 = vpop.eup %3284 }
 0x1a2   :  { %8111 = vst [vmem:[#allocation38_spill] sm:$0xff] %v4827_v6  ;;  %v8125_v6 = vld [vmem:[#allocation52_spill] sm:$0xff]  ;;  %3296 = vlog2.f32 %v8134_v5 }
 0x1a3   :  { %8113 = vst [vmem:[#allocation39_spill] sm:$0xff] %v4830_v43  ;;  %v8123_v43 = vld [vmem:[#allocation51_spill] sm:$0xff]  ;;  %v4854_v50 = vmul.f32 0.6931472, %v8125_v6  ;;  %3298 = vlog2.f32 %v4232_v31 }
 0x1a4   :  { %8116 = vst [vmem:[#allocation40_spill] sm:$0xff] %v4836_v40  ;;  %v4851_v35 = vmul.f32 0.6931472, %v8123_v43  ;;  %v8132_v40 = vld [vmem:[#allocation55_spill] sm:$0xff]  ;;  %v4869_v43 = vpop.eup %3286 }
 0x1a5   :  { %8118 = vst [vmem:[#allocation41_spill] sm:$0xff] %v4839_v46  ;;  %v8128_v46 = vld [vmem:[#allocation53_spill] sm:$0xff]  ;;  %v4866_v26 = vmul.f32 0.6931472, %v8132_v40 }
 0x1a6   :  { %8120 = vst [vmem:[#allocation42_spill] sm:$0xff] %v4842_v42  ;;  %v4860_v61 = vmul.f32 0.6931472, %v8128_v46  ;;  %v8130_v42 = vld [vmem:[#allocation54_spill] sm:$0xff]  ;;  %v8141_v46 = vld [vmem:[#allocation59_spill] sm:$0xff] }
 0x1a7   :  { %8122 = vst [vmem:[#allocation43_spill] sm:$0xff] %v4848_v2  ;;  %v4863_v12 = vmul.f32 0.6931472, %v8130_v42  ;;  %v8139_v2 = vld [vmem:[#allocation58_spill] sm:$0xff]  ;;  %v4881_v42 = vpop.eup %3288  ;;  %v4884_v40 = vmul.f32 0.6931472, %v8141_v46 }
 0x1a8   :  { %8124 = vst [vmem:[#allocation195_spill] sm:$0xff] %v4851_v35  ;;  %v8135_v35 = vld [vmem:[#allocation56_spill] sm:$0xff]  ;;  %v4878_v52 = vmul.f32 0.6931472, %v8139_v2  ;;  %v8155_v46 = vld [vmem:[#allocation202_spill] sm:$0xff] }
 0x1a9   :  { %8126 = vst [vmem:[#allocation44_spill] sm:$0xff] %v4854_v50  ;;  %v4872_v6 = vmul.f32 0.6931472, %v8135_v35  ;;  %v8137_v50 = vld [vmem:[#allocation57_spill] sm:$0xff] }
 0x1aa   :  { %8129 = vst [vmem:[#allocation45_spill] sm:$0xff] %v4860_v61  ;;  %v4875_v19 = vmul.f32 0.6931472, %v8137_v50  ;;  %v8147_v35 = vld [vmem:[#allocation201_spill] sm:$0xff]  ;;  %v4893_v50 = vpop.eup %3290 }
 0x1ab   :  { %8131 = vst [vmem:[#allocation46_spill] sm:$0xff] %v4863_v12  ;;  %v8145_v12 = vld [vmem:[#allocation61_spill] sm:$0xff]  ;;  %3300 = vlog2.f32 %v8147_v35 }
 0x1ac   :  { %8133 = vst [vmem:[#allocation196_spill] sm:$0xff] %v4866_v26  ;;  %v8143_v26 = vld [vmem:[#allocation60_spill] sm:$0xff]  ;;  %v4890_v61 = vmul.f32 0.6931472, %v8145_v12  ;;  %3302 = vlog2.f32 %v8155_v46 }
 0x1ad   :  { %8136 = vst [vmem:[#allocation47_spill] sm:$0xff] %v4872_v6  ;;  %v4887_v5 = vmul.f32 0.6931472, %v8143_v26  ;;  %v8153_v6 = vld [vmem:[#allocation64_spill] sm:$0xff]  ;;  %v4905_v26 = vpop.eup %3292  ;;  %3304 = vlog2.f32 %v4241_v3 }
 0x1ae   :  { %8138 = vst [vmem:[#allocation48_spill] sm:$0xff] %v4875_v19  ;;  %v8149_v19 = vld [vmem:[#allocation62_spill] sm:$0xff]  ;;  %v4902_v21 = vmul.f32 0.6931472, %v8153_v6 }
 0x1af   :  { %8140 = vst [vmem:[#allocation49_spill] sm:$0xff] %v4878_v52  ;;  %v4896_v2 = vmul.f32 0.6931472, %v8149_v19  ;;  %v8151_v52 = vld [vmem:[#allocation63_spill] sm:$0xff]  ;;  %v8163_v19 = vld [vmem:[#allocation68_spill] sm:$0xff] }
 0x1b0   :  { %8142 = vst [vmem:[#allocation50_spill] sm:$0xff] %v4884_v40  ;;  %v4899_v31 = vmul.f32 0.6931472, %v8151_v52  ;;  %v8160_v40 = vld [vmem:[#allocation67_spill] sm:$0xff]  ;;  %v4917_v52 = vpop.eup %3294  ;;  %v4920_v6 = vmul.f32 0.6931472, %v8163_v19 }
 0x1b1   :  { %8144 = vst [vmem:[#allocation51_spill] sm:$0xff] %v4887_v5  ;;  %v8156_v5 = vld [vmem:[#allocation65_spill] sm:$0xff] }
 0x1b2   :  { %8146 = vst [vmem:[#allocation52_spill] sm:$0xff] %v4890_v61  ;;  %v4908_v12 = vmul.f32 0.6931472, %v8156_v5  ;;  %v8158_v61 = vld [vmem:[#allocation66_spill] sm:$0xff]  ;;  %v8169_v5 = vld [vmem:[#allocation204_spill] sm:$0xff]  ;;  %v8177_v19 = vld [vmem:[#allocation205_spill] sm:$0xff] }
 0x1b3   :  { %8148 = vst [vmem:[#allocation198_spill] sm:$0xff] %v4893_v50  ;;  %v4911_v35 = vmul.f32 0.6931472, %v8158_v61  ;;  %v4914_v50 = vmul.f32 0.6931472, %v8160_v40  ;;  %3306 = vlog2.f32 %v8169_v5  ;;  %v4929_v61 = vpop.eup %3296 }
 0x1b4   :  { %8150 = vst [vmem:[#allocation53_spill] sm:$0xff] %v4896_v2  ;;  %3308 = vlog2.f32 %v8177_v19 }
 0x1b5   :  { %8152 = vst [vmem:[#allocation54_spill] sm:$0xff] %v4899_v31  ;;  %v8167_v31 = vld [vmem:[#allocation70_spill] sm:$0xff]  ;;  %3310 = vlog2.f32 %v4250_v14 }
 0x1b6   :  { %8154 = vst [vmem:[#allocation55_spill] sm:$0xff] %v4902_v21  ;;  %v8165_v21 = vld [vmem:[#allocation69_spill] sm:$0xff]  ;;  %v4926_v2 = vmul.f32 0.6931472, %v8167_v31 }
 0x1b7   :  { %8157 = vst [vmem:[#allocation199_spill] sm:$0xff] %v4908_v12  ;;  %v4923_v46 = vmul.f32 0.6931472, %v8165_v21  ;;  %v8175_v12 = vld [vmem:[#allocation73_spill] sm:$0xff]  ;;  %v4941_v21 = vpop.eup %3298 }
 0x1b8   :  { %8159 = vst [vmem:[#allocation56_spill] sm:$0xff] %v4911_v35  ;;  %v8171_v35 = vld [vmem:[#allocation71_spill] sm:$0xff] }
 0x1b9   :  { %8161 = vst [vmem:[#allocation57_spill] sm:$0xff] %v4914_v50  ;;  %v4932_v40 = vmul.f32 0.6931472, %v8171_v35  ;;  %v8173_v50 = vld [vmem:[#allocation72_spill] sm:$0xff]  ;;  %v8185_v35 = vld [vmem:[#allocation77_spill] sm:$0xff] }
 0x1ba   :  { %8162 = vst [vmem:[#allocation58_spill] sm:$0xff] %v4917_v52  ;;  %v4935_v3 = vmul.f32 0.6931472, %v8173_v50  ;;  %v4938_v52 = vmul.f32 0.6931472, %v8175_v12  ;;  %v4953_v50 = vpop.eup %3300 }
 0x1bb   :  { %8164 = vst [vmem:[#allocation59_spill] sm:$0xff] %v4920_v6  ;;  %v8182_v6 = vld [vmem:[#allocation76_spill] sm:$0xff]  ;;  %v4956_v12 = vmul.f32 0.6931472, %v8185_v35 }
 0x1bc   :  { %8166 = vst [vmem:[#allocation60_spill] sm:$0xff] %v4923_v46  ;;  %v8178_v46 = vld [vmem:[#allocation74_spill] sm:$0xff]  ;;  %v8199_v35 = vld [vmem:[#allocation208_spill] sm:$0xff] }
 0x1bd   :  { %8168 = vst [vmem:[#allocation61_spill] sm:$0xff] %v4926_v2  ;;  %v4944_v31 = vmul.f32 0.6931472, %v8178_v46  ;;  %v8180_v2 = vld [vmem:[#allocation75_spill] sm:$0xff] }
 0x1be   :  { %8170 = vst [vmem:[#allocation201_spill] sm:$0xff] %v4929_v61  ;;  %v4947_v5 = vmul.f32 0.6931472, %v8180_v2  ;;  %v4950_v61 = vmul.f32 0.6931472, %v8182_v6  ;;  %v8191_v46 = vld [vmem:[#allocation207_spill] sm:$0xff]  ;;  %v4965_v2 = vpop.eup %3302 }
 0x1bf   :  { %8172 = vst [vmem:[#allocation62_spill] sm:$0xff] %v4932_v40  ;;  %3312 = vlog2.f32 %v8191_v46 }
 0x1c0   :  { %8174 = vst [vmem:[#allocation63_spill] sm:$0xff] %v4935_v3  ;;  %v8189_v3 = vld [vmem:[#allocation79_spill] sm:$0xff]  ;;  %3314 = vlog2.f32 %v8199_v35 }
 0x1c1   :  { %8176 = vst [vmem:[#allocation64_spill] sm:$0xff] %v4938_v52  ;;  %v8187_v52 = vld [vmem:[#allocation78_spill] sm:$0xff]  ;;  %v4962_v40 = vmul.f32 0.6931472, %v8189_v3  ;;  %3316 = vlog2.f32 %v4259_v22 }
 0x1c2   :  { %8179 = vst [vmem:[#allocation202_spill] sm:$0xff] %v4944_v31  ;;  %v4959_v19 = vmul.f32 0.6931472, %v8187_v52  ;;  %v8197_v31 = vld [vmem:[#allocation82_spill] sm:$0xff]  ;;  %v4977_v52 = vpop.eup %3304 }
 0x1c3   :  { %8181 = vst [vmem:[#allocation65_spill] sm:$0xff] %v4947_v5  ;;  %v8193_v5 = vld [vmem:[#allocation80_spill] sm:$0xff] }
 0x1c4   :  { %8183 = vst [vmem:[#allocation66_spill] sm:$0xff] %v4950_v61  ;;  %v4968_v6 = vmul.f32 0.6931472, %v8193_v5  ;;  %v8195_v61 = vld [vmem:[#allocation81_spill] sm:$0xff]  ;;  %v8207_v5 = vld [vmem:[#allocation86_spill] sm:$0xff] }
 0x1c5   :  { %8184 = vst [vmem:[#allocation67_spill] sm:$0xff] %v4953_v50  ;;  %v4971_v14 = vmul.f32 0.6931472, %v8195_v61  ;;  %v4974_v50 = vmul.f32 0.6931472, %v8197_v31  ;;  %v4989_v61 = vpop.eup %3306 }
 0x1c6   :  { %8186 = vst [vmem:[#allocation68_spill] sm:$0xff] %v4956_v12  ;;  %v8204_v12 = vld [vmem:[#allocation85_spill] sm:$0xff]  ;;  %v4992_v31 = vmul.f32 0.6931472, %v8207_v5  ;;  %v8221_v5 = vld [vmem:[#allocation211_spill] sm:$0xff] }
 0x1c7   :  { %8188 = vst [vmem:[#allocation69_spill] sm:$0xff] %v4959_v19  ;;  %v8200_v19 = vld [vmem:[#allocation83_spill] sm:$0xff] }
 0x1c8   :  { %8190 = vst [vmem:[#allocation70_spill] sm:$0xff] %v4962_v40  ;;  %v4980_v3 = vmul.f32 0.6931472, %v8200_v19  ;;  %v8202_v40 = vld [vmem:[#allocation84_spill] sm:$0xff]  ;;  %v8213_v19 = vld [vmem:[#allocation210_spill] sm:$0xff] }
 0x1c9   :  { %8192 = vst [vmem:[#allocation204_spill] sm:$0xff] %v4965_v2  ;;  %v4983_v46 = vmul.f32 0.6931472, %v8202_v40  ;;  %v4986_v2 = vmul.f32 0.6931472, %v8204_v12  ;;  %3318 = vlog2.f32 %v8213_v19  ;;  %v5001_v40 = vpop.eup %3308 }
 0x1ca   :  { %8194 = vst [vmem:[#allocation71_spill] sm:$0xff] %v4968_v6  ;;  %3320 = vlog2.f32 %v8221_v5 }
 0x1cb   :  { %8196 = vst [vmem:[#allocation72_spill] sm:$0xff] %v4971_v14  ;;  %v8211_v14 = vld [vmem:[#allocation88_spill] sm:$0xff]  ;;  %3322 = vlog2.f32 %v4268_v54 }
 0x1cc   :  { %8198 = vst [vmem:[#allocation73_spill] sm:$0xff] %v4974_v50  ;;  %v8209_v50 = vld [vmem:[#allocation87_spill] sm:$0xff]  ;;  %v4998_v6 = vmul.f32 0.6931472, %v8211_v14 }
 0x1cd   :  { %8201 = vst [vmem:[#allocation205_spill] sm:$0xff] %v4980_v3  ;;  %v4995_v35 = vmul.f32 0.6931472, %v8209_v50  ;;  %v8219_v3 = vld [vmem:[#allocation91_spill] sm:$0xff]  ;;  %v5013_v50 = vpop.eup %3310 }
 0x1ce   :  { %8203 = vst [vmem:[#allocation74_spill] sm:$0xff] %v4983_v46  ;;  %v8215_v46 = vld [vmem:[#allocation89_spill] sm:$0xff] }
 0x1cf   :  { %8205 = vst [vmem:[#allocation75_spill] sm:$0xff] %v4986_v2  ;;  %v5004_v12 = vmul.f32 0.6931472, %v8215_v46  ;;  %v8217_v2 = vld [vmem:[#allocation90_spill] sm:$0xff]  ;;  %v8229_v46 = vld [vmem:[#allocation95_spill] sm:$0xff] }
 0x1d0   :  { %8206 = vst [vmem:[#allocation76_spill] sm:$0xff] %v4989_v61  ;;  %v5007_v22 = vmul.f32 0.6931472, %v8217_v2  ;;  %v5010_v61 = vmul.f32 0.6931472, %v8219_v3  ;;  %v5025_v2 = vpop.eup %3312 }
 0x1d1   :  { %8208 = vst [vmem:[#allocation77_spill] sm:$0xff] %v4992_v31  ;;  %v8226_v31 = vld [vmem:[#allocation94_spill] sm:$0xff]  ;;  %v5028_v3 = vmul.f32 0.6931472, %v8229_v46 }
 0x1d2   :  { %8210 = vst [vmem:[#allocation78_spill] sm:$0xff] %v4995_v35  ;;  %v8222_v35 = vld [vmem:[#allocation92_spill] sm:$0xff]  ;;  %v8243_v46 = vld [vmem:[#allocation214_spill] sm:$0xff] }
 0x1d3   :  { %8212 = vst [vmem:[#allocation79_spill] sm:$0xff] %v4998_v6  ;;  %v5016_v14 = vmul.f32 0.6931472, %v8222_v35  ;;  %v8224_v6 = vld [vmem:[#allocation93_spill] sm:$0xff] }
 0x1d4   :  { %8214 = vst [vmem:[#allocation207_spill] sm:$0xff] %v5001_v40  ;;  %v5019_v19 = vmul.f32 0.6931472, %v8224_v6  ;;  %v5022_v40 = vmul.f32 0.6931472, %v8226_v31  ;;  %v8235_v35 = vld [vmem:[#allocation213_spill] sm:$0xff]  ;;  %v5037_v6 = vpop.eup %3314 }
 0x1d5   :  { %8216 = vst [vmem:[#allocation80_spill] sm:$0xff] %v5004_v12  ;;  %3324 = vlog2.f32 %v8235_v35 }
 0x1d6   :  { %8218 = vst [vmem:[#allocation81_spill] sm:$0xff] %v5007_v22  ;;  %v8233_v22 = vld [vmem:[#allocation97_spill] sm:$0xff]  ;;  %3326 = vlog2.f32 %v8243_v46 }
 0x1d7   :  { %8220 = vst [vmem:[#allocation82_spill] sm:$0xff] %v5010_v61  ;;  %v8231_v61 = vld [vmem:[#allocation96_spill] sm:$0xff]  ;;  %v5034_v12 = vmul.f32 0.6931472, %v8233_v22  ;;  %3328 = vlog2.f32 %v4277_v24 }
 0x1d8   :  { %8223 = vst [vmem:[#allocation208_spill] sm:$0xff] %v5016_v14  ;;  %v5031_v5 = vmul.f32 0.6931472, %v8231_v61  ;;  %v8241_v14 = vld [vmem:[#allocation100_spill] sm:$0xff]  ;;  %v5049_v61 = vpop.eup %3316 }
 0x1d9   :  { %8225 = vst [vmem:[#allocation83_spill] sm:$0xff] %v5019_v19  ;;  %v8237_v19 = vld [vmem:[#allocation98_spill] sm:$0xff] }
 0x1da   :  { %8227 = vst [vmem:[#allocation84_spill] sm:$0xff] %v5022_v40  ;;  %v5040_v31 = vmul.f32 0.6931472, %v8237_v19  ;;  %v8239_v40 = vld [vmem:[#allocation99_spill] sm:$0xff]  ;;  %v8251_v19 = vld [vmem:[#allocation104_spill] sm:$0xff] }
 0x1db   :  { %8228 = vst [vmem:[#allocation85_spill] sm:$0xff] %v5025_v2  ;;  %v5043_v54 = vmul.f32 0.6931472, %v8239_v40  ;;  %v5046_v2 = vmul.f32 0.6931472, %v8241_v14  ;;  %v5061_v40 = vpop.eup %3318 }
 0x1dc   :  { %8230 = vst [vmem:[#allocation86_spill] sm:$0xff] %v5028_v3  ;;  %v8248_v3 = vld [vmem:[#allocation103_spill] sm:$0xff]  ;;  %v5064_v14 = vmul.f32 0.6931472, %v8251_v19  ;;  %v8265_v19 = vld [vmem:[#allocation217_spill] sm:$0xff] }
 0x1dd   :  { %8232 = vst [vmem:[#allocation87_spill] sm:$0xff] %v5031_v5  ;;  %v8244_v5 = vld [vmem:[#allocation101_spill] sm:$0xff] }
 0x1de   :  { %8234 = vst [vmem:[#allocation88_spill] sm:$0xff] %v5034_v12  ;;  %v5052_v22 = vmul.f32 0.6931472, %v8244_v5  ;;  %v8246_v12 = vld [vmem:[#allocation102_spill] sm:$0xff]  ;;  %v8257_v5 = vld [vmem:[#allocation216_spill] sm:$0xff] }
 0x1df   :  { %8236 = vst [vmem:[#allocation210_spill] sm:$0xff] %v5037_v6  ;;  %v5055_v35 = vmul.f32 0.6931472, %v8246_v12  ;;  %v5058_v6 = vmul.f32 0.6931472, %v8248_v3  ;;  %3330 = vlog2.f32 %v8257_v5  ;;  %v5073_v12 = vpop.eup %3320 }
 0x1e0   :  { %8238 = vst [vmem:[#allocation89_spill] sm:$0xff] %v5040_v31  ;;  %3332 = vlog2.f32 %v8265_v19 }
 0x1e1   :  { %8240 = vst [vmem:[#allocation90_spill] sm:$0xff] %v5043_v54  ;;  %v8255_v54 = vld [vmem:[#allocation106_spill] sm:$0xff]  ;;  %3334 = vlog2.f32 %v4286_v16 }
 0x1e2   :  { %8242 = vst [vmem:[#allocation91_spill] sm:$0xff] %v5046_v2  ;;  %v8253_v2 = vld [vmem:[#allocation105_spill] sm:$0xff]  ;;  %v5070_v31 = vmul.f32 0.6931472, %v8255_v54 }
 0x1e3   :  { %8245 = vst [vmem:[#allocation211_spill] sm:$0xff] %v5052_v22  ;;  %v5067_v46 = vmul.f32 0.6931472, %v8253_v2  ;;  %v8263_v22 = vld [vmem:[#allocation109_spill] sm:$0xff]  ;;  %v5085_v2 = vpop.eup %3322 }
 0x1e4   :  { %8247 = vst [vmem:[#allocation92_spill] sm:$0xff] %v5055_v35  ;;  %v8259_v35 = vld [vmem:[#allocation107_spill] sm:$0xff] }
 0x1e5   :  { %8249 = vst [vmem:[#allocation93_spill] sm:$0xff] %v5058_v6  ;;  %v5076_v3 = vmul.f32 0.6931472, %v8259_v35  ;;  %v8261_v6 = vld [vmem:[#allocation108_spill] sm:$0xff]  ;;  %v8273_v35 = vld [vmem:[#allocation113_spill] sm:$0xff] }
 0x1e6   :  { %8250 = vst [vmem:[#allocation94_spill] sm:$0xff] %v5061_v40  ;;  %v5079_v24 = vmul.f32 0.6931472, %v8261_v6  ;;  %v5082_v40 = vmul.f32 0.6931472, %v8263_v22  ;;  %v5097_v6 = vpop.eup %3324 }
 0x1e7   :  { %8252 = vst [vmem:[#allocation95_spill] sm:$0xff] %v5064_v14  ;;  %v8270_v14 = vld [vmem:[#allocation112_spill] sm:$0xff]  ;;  %v5100_v22 = vmul.f32 0.6931472, %v8273_v35 }
 0x1e8   :  { %8254 = vst [vmem:[#allocation96_spill] sm:$0xff] %v5067_v46  ;;  %v8266_v46 = vld [vmem:[#allocation110_spill] sm:$0xff]  ;;  %v8287_v35 = vld [vmem:[#allocation220_spill] sm:$0xff] }
 0x1e9   :  { %8256 = vst [vmem:[#allocation97_spill] sm:$0xff] %v5070_v31  ;;  %v5088_v54 = vmul.f32 0.6931472, %v8266_v46  ;;  %v8268_v31 = vld [vmem:[#allocation111_spill] sm:$0xff] }
 0x1ea   :  { %8258 = vst [vmem:[#allocation213_spill] sm:$0xff] %v5073_v12  ;;  %v5091_v5 = vmul.f32 0.6931472, %v8268_v31  ;;  %v5094_v12 = vmul.f32 0.6931472, %v8270_v14  ;;  %v8279_v46 = vld [vmem:[#allocation219_spill] sm:$0xff]  ;;  %v5109_v31 = vpop.eup %3326 }
 0x1eb   :  { %8260 = vst [vmem:[#allocation98_spill] sm:$0xff] %v5076_v3  ;;  %3336 = vlog2.f32 %v8279_v46 }
 0x1ec   :  { %8262 = vst [vmem:[#allocation99_spill] sm:$0xff] %v5079_v24  ;;  %v8277_v24 = vld [vmem:[#allocation115_spill] sm:$0xff]  ;;  %3338 = vlog2.f32 %v8287_v35 }
 0x1ed   :  { %8264 = vst [vmem:[#allocation100_spill] sm:$0xff] %v5082_v40  ;;  %v8275_v40 = vld [vmem:[#allocation114_spill] sm:$0xff]  ;;  %v5106_v3 = vmul.f32 0.6931472, %v8277_v24  ;;  %3340 = vlog2.f32 %v4295_v1 }
 0x1ee   :  { %8267 = vst [vmem:[#allocation214_spill] sm:$0xff] %v5088_v54  ;;  %v5103_v19 = vmul.f32 0.6931472, %v8275_v40  ;;  %v8285_v54 = vld [vmem:[#allocation118_spill] sm:$0xff]  ;;  %v5121_v40 = vpop.eup %3328 }
 0x1ef   :  { %8269 = vst [vmem:[#allocation101_spill] sm:$0xff] %v5091_v5  ;;  %v8281_v5 = vld [vmem:[#allocation116_spill] sm:$0xff] }
 0x1f0   :  { %8271 = vst [vmem:[#allocation102_spill] sm:$0xff] %v5094_v12  ;;  %v5112_v14 = vmul.f32 0.6931472, %v8281_v5  ;;  %v8283_v12 = vld [vmem:[#allocation117_spill] sm:$0xff]  ;;  %v8295_v5 = vld [vmem:[#allocation122_spill] sm:$0xff] }
 0x1f1   :  { %8272 = vst [vmem:[#allocation103_spill] sm:$0xff] %v5097_v6  ;;  %v5115_v16 = vmul.f32 0.6931472, %v8283_v12  ;;  %v5118_v6 = vmul.f32 0.6931472, %v8285_v54  ;;  %v5133_v12 = vpop.eup %3330 }
 0x1f2   :  { %8274 = vst [vmem:[#allocation104_spill] sm:$0xff] %v5100_v22  ;;  %v8292_v22 = vld [vmem:[#allocation121_spill] sm:$0xff]  ;;  %v5136_v54 = vmul.f32 0.6931472, %v8295_v5  ;;  %v8309_v5 = vld [vmem:[#allocation223_spill] sm:$0xff] }
 0x1f3   :  { %8276 = vst [vmem:[#allocation105_spill] sm:$0xff] %v5103_v19  ;;  %v8288_v19 = vld [vmem:[#allocation119_spill] sm:$0xff] }
 0x1f4   :  { %8278 = vst [vmem:[#allocation106_spill] sm:$0xff] %v5106_v3  ;;  %v5124_v24 = vmul.f32 0.6931472, %v8288_v19  ;;  %v8290_v3 = vld [vmem:[#allocation120_spill] sm:$0xff]  ;;  %v8301_v19 = vld [vmem:[#allocation222_spill] sm:$0xff] }
 0x1f5   :  { %8280 = vst [vmem:[#allocation216_spill] sm:$0xff] %v5109_v31  ;;  %v5127_v46 = vmul.f32 0.6931472, %v8290_v3  ;;  %v5130_v31 = vmul.f32 0.6931472, %v8292_v22  ;;  %3342 = vlog2.f32 %v8301_v19  ;;  %v5145_v3 = vpop.eup %3332 }
 0x1f6   :  { %8282 = vst [vmem:[#allocation107_spill] sm:$0xff] %v5112_v14  ;;  %3344 = vlog2.f32 %v8309_v5 }
 0x1f7   :  { %8284 = vst [vmem:[#allocation108_spill] sm:$0xff] %v5115_v16  ;;  %v8299_v16 = vld [vmem:[#allocation124_spill] sm:$0xff]  ;;  %3346 = vlog2.f32 %v4304_v63 }
 0x1f8   :  { %8286 = vst [vmem:[#allocation109_spill] sm:$0xff] %v5118_v6  ;;  %v8297_v6 = vld [vmem:[#allocation123_spill] sm:$0xff]  ;;  %v5142_v14 = vmul.f32 0.6931472, %v8299_v16 }
 0x1f9   :  { %8289 = vst [vmem:[#allocation217_spill] sm:$0xff] %v5124_v24  ;;  %v5139_v35 = vmul.f32 0.6931472, %v8297_v6  ;;  %v8307_v24 = vld [vmem:[#allocation127_spill] sm:$0xff]  ;;  %v5157_v6 = vpop.eup %3334 }
 0x1fa   :  { %8291 = vst [vmem:[#allocation110_spill] sm:$0xff] %v5127_v46  ;;  %v8303_v46 = vld [vmem:[#allocation125_spill] sm:$0xff] }
 0x1fb   :  { %8293 = vst [vmem:[#allocation111_spill] sm:$0xff] %v5130_v31  ;;  %v5148_v22 = vmul.f32 0.6931472, %v8303_v46  ;;  %v8305_v31 = vld [vmem:[#allocation126_spill] sm:$0xff]  ;;  %v8317_v46 = vld [vmem:[#allocation131_spill] sm:$0xff] }
 0x1fc   :  { %8294 = vst [vmem:[#allocation112_spill] sm:$0xff] %v5133_v12  ;;  %v5151_v1 = vmul.f32 0.6931472, %v8305_v31  ;;  %v5154_v12 = vmul.f32 0.6931472, %v8307_v24  ;;  %v5169_v31 = vpop.eup %3336 }
 0x1fd   :  { %8296 = vst [vmem:[#allocation113_spill] sm:$0xff] %v5136_v54  ;;  %v8314_v54 = vld [vmem:[#allocation130_spill] sm:$0xff]  ;;  %v5172_v24 = vmul.f32 0.6931472, %v8317_v46 }
 0x1fe   :  { %8298 = vst [vmem:[#allocation114_spill] sm:$0xff] %v5139_v35  ;;  %v8310_v35 = vld [vmem:[#allocation128_spill] sm:$0xff]  ;;  %v8331_v46 = vld [vmem:[#allocation226_spill] sm:$0xff] }
 0x1ff   :  { %8300 = vst [vmem:[#allocation115_spill] sm:$0xff] %v5142_v14  ;;  %v5160_v16 = vmul.f32 0.6931472, %v8310_v35  ;;  %v8312_v14 = vld [vmem:[#allocation129_spill] sm:$0xff] }
 0x200   :  { %8302 = vst [vmem:[#allocation219_spill] sm:$0xff] %v5145_v3  ;;  %v5163_v19 = vmul.f32 0.6931472, %v8312_v14  ;;  %v5166_v3 = vmul.f32 0.6931472, %v8314_v54  ;;  %v8323_v35 = vld [vmem:[#allocation225_spill] sm:$0xff]  ;;  %v5181_v14 = vpop.eup %3338 }
 0x201   :  { %8304 = vst [vmem:[#allocation116_spill] sm:$0xff] %v5148_v22  ;;  %3348 = vlog2.f32 %v8323_v35 }
 0x202   :  { %8306 = vst [vmem:[#allocation117_spill] sm:$0xff] %v5151_v1  ;;  %v8321_v1 = vld [vmem:[#allocation133_spill] sm:$0xff]  ;;  %3350 = vlog2.f32 %v8331_v46 }
 0x203   :  { %8308 = vst [vmem:[#allocation118_spill] sm:$0xff] %v5154_v12  ;;  %v8319_v12 = vld [vmem:[#allocation132_spill] sm:$0xff]  ;;  %v5178_v22 = vmul.f32 0.6931472, %v8321_v1  ;;  %3352 = vlog2.f32 %v4313_v10 }
 0x204   :  { %8311 = vst [vmem:[#allocation220_spill] sm:$0xff] %v5160_v16  ;;  %v5175_v5 = vmul.f32 0.6931472, %v8319_v12  ;;  %v8329_v16 = vld [vmem:[#allocation136_spill] sm:$0xff]  ;;  %v5193_v12 = vpop.eup %3340 }
 0x205   :  { %8313 = vst [vmem:[#allocation119_spill] sm:$0xff] %v5163_v19  ;;  %v8325_v19 = vld [vmem:[#allocation134_spill] sm:$0xff] }
 0x206   :  { %8315 = vst [vmem:[#allocation120_spill] sm:$0xff] %v5166_v3  ;;  %v5184_v54 = vmul.f32 0.6931472, %v8325_v19  ;;  %v8327_v3 = vld [vmem:[#allocation135_spill] sm:$0xff]  ;;  %v8339_v19 = vld [vmem:[#allocation140_spill] sm:$0xff] }
 0x207   :  { %8316 = vst [vmem:[#allocation121_spill] sm:$0xff] %v5169_v31  ;;  %v5187_v63 = vmul.f32 0.6931472, %v8327_v3  ;;  %v5190_v31 = vmul.f32 0.6931472, %v8329_v16  ;;  %v5205_v3 = vpop.eup %3342 }
 0x208   :  { %8318 = vst [vmem:[#allocation122_spill] sm:$0xff] %v5172_v24  ;;  %v8336_v24 = vld [vmem:[#allocation139_spill] sm:$0xff]  ;;  %v5208_v16 = vmul.f32 0.6931472, %v8339_v19  ;;  %v8353_v19 = vld [vmem:[#allocation229_spill] sm:$0xff] }
 0x209   :  { %8320 = vst [vmem:[#allocation123_spill] sm:$0xff] %v5175_v5  ;;  %v8332_v5 = vld [vmem:[#allocation137_spill] sm:$0xff] }
 0x20a   :  { %8322 = vst [vmem:[#allocation124_spill] sm:$0xff] %v5178_v22  ;;  %v5196_v1 = vmul.f32 0.6931472, %v8332_v5  ;;  %v8334_v22 = vld [vmem:[#allocation138_spill] sm:$0xff]  ;;  %v8345_v5 = vld [vmem:[#allocation228_spill] sm:$0xff] }
 0x20b   :  { %8324 = vst [vmem:[#allocation222_spill] sm:$0xff] %v5181_v14  ;;  %v5199_v35 = vmul.f32 0.6931472, %v8334_v22  ;;  %v5202_v14 = vmul.f32 0.6931472, %v8336_v24  ;;  %3354 = vlog2.f32 %v8345_v5  ;;  %v5217_v22 = vpop.eup %3344 }
 0x20c   :  { %8326 = vst [vmem:[#allocation125_spill] sm:$0xff] %v5184_v54  ;;  %3356 = vlog2.f32 %v8353_v19 }
 0x20d   :  { %8328 = vst [vmem:[#allocation126_spill] sm:$0xff] %v5187_v63  ;;  %v8343_v63 = vld [vmem:[#allocation142_spill] sm:$0xff]  ;;  %3358 = vlog2.f32 %v4322_v59 }
 0x20e   :  { %8330 = vst [vmem:[#allocation127_spill] sm:$0xff] %v5190_v31  ;;  %v8341_v31 = vld [vmem:[#allocation141_spill] sm:$0xff]  ;;  %v5214_v54 = vmul.f32 0.6931472, %v8343_v63 }
 0x20f   :  { %8333 = vst [vmem:[#allocation223_spill] sm:$0xff] %v5196_v1  ;;  %v5211_v46 = vmul.f32 0.6931472, %v8341_v31  ;;  %v8351_v1 = vld [vmem:[#allocation145_spill] sm:$0xff]  ;;  %v5229_v31 = vpop.eup %3346 }
 0x210   :  { %8335 = vst [vmem:[#allocation128_spill] sm:$0xff] %v5199_v35  ;;  %v8347_v35 = vld [vmem:[#allocation143_spill] sm:$0xff] }
 0x211   :  { %8337 = vst [vmem:[#allocation129_spill] sm:$0xff] %v5202_v14  ;;  %v5220_v24 = vmul.f32 0.6931472, %v8347_v35  ;;  %v8349_v14 = vld [vmem:[#allocation144_spill] sm:$0xff]  ;;  %v8361_v35 = vld [vmem:[#allocation149_spill] sm:$0xff] }
 0x212   :  { %8338 = vst [vmem:[#allocation130_spill] sm:$0xff] %v5205_v3  ;;  %v5223_v10 = vmul.f32 0.6931472, %v8349_v14  ;;  %v5226_v3 = vmul.f32 0.6931472, %v8351_v1  ;;  %v5241_v14 = vpop.eup %3348 }
 0x213   :  { %8340 = vst [vmem:[#allocation131_spill] sm:$0xff] %v5208_v16  ;;  %v8358_v16 = vld [vmem:[#allocation148_spill] sm:$0xff]  ;;  %v5244_v1 = vmul.f32 0.6931472, %v8361_v35 }
 0x214   :  { %8342 = vst [vmem:[#allocation132_spill] sm:$0xff] %v5211_v46  ;;  %v8354_v46 = vld [vmem:[#allocation146_spill] sm:$0xff]  ;;  %v8375_v35 = vld [vmem:[#allocation232_spill] sm:$0xff] }
 0x215   :  { %8344 = vst [vmem:[#allocation133_spill] sm:$0xff] %v5214_v54  ;;  %v5232_v63 = vmul.f32 0.6931472, %v8354_v46  ;;  %v8356_v54 = vld [vmem:[#allocation147_spill] sm:$0xff] }
 0x216   :  { %8346 = vst [vmem:[#allocation225_spill] sm:$0xff] %v5217_v22  ;;  %v5235_v5 = vmul.f32 0.6931472, %v8356_v54  ;;  %v5238_v22 = vmul.f32 0.6931472, %v8358_v16  ;;  %v8367_v46 = vld [vmem:[#allocation231_spill] sm:$0xff]  ;;  %v5253_v54 = vpop.eup %3350 }
 0x217   :  { %8348 = vst [vmem:[#allocation134_spill] sm:$0xff] %v5220_v24  ;;  %3360 = vlog2.f32 %v8367_v46 }
 0x218   :  { %8350 = vst [vmem:[#allocation135_spill] sm:$0xff] %v5223_v10  ;;  %v8365_v10 = vld [vmem:[#allocation151_spill] sm:$0xff]  ;;  %3362 = vlog2.f32 %v8375_v35 }
 0x219   :  { %8352 = vst [vmem:[#allocation136_spill] sm:$0xff] %v5226_v3  ;;  %v8363_v3 = vld [vmem:[#allocation150_spill] sm:$0xff]  ;;  %v5250_v24 = vmul.f32 0.6931472, %v8365_v10  ;;  %3364 = vlog2.f32 %v4331_v58 }
 0x21a   :  { %8355 = vst [vmem:[#allocation226_spill] sm:$0xff] %v5232_v63  ;;  %v5247_v19 = vmul.f32 0.6931472, %v8363_v3  ;;  %v8373_v63 = vld [vmem:[#allocation154_spill] sm:$0xff]  ;;  %v5265_v3 = vpop.eup %3352 }
 0x21b   :  { %8357 = vst [vmem:[#allocation137_spill] sm:$0xff] %v5235_v5  ;;  %v8369_v5 = vld [vmem:[#allocation152_spill] sm:$0xff] }
 0x21c   :  { %8359 = vst [vmem:[#allocation138_spill] sm:$0xff] %v5238_v22  ;;  %v5256_v16 = vmul.f32 0.6931472, %v8369_v5  ;;  %v8371_v22 = vld [vmem:[#allocation153_spill] sm:$0xff]  ;;  %v8383_v5 = vld [vmem:[#allocation164_spill] sm:$0xff] }
 0x21d   :  { %8360 = vst [vmem:[#allocation139_spill] sm:$0xff] %v5241_v14  ;;  %v5259_v59 = vmul.f32 0.6931472, %v8371_v22  ;;  %v5262_v14 = vmul.f32 0.6931472, %v8373_v63  ;;  %v5277_v22 = vpop.eup %3354 }
 0x21e   :  { %8362 = vst [vmem:[#allocation140_spill] sm:$0xff] %v5244_v1  ;;  %v8380_v1 = vld [vmem:[#allocation161_spill] sm:$0xff]  ;;  %v5280_v63 = vmul.f32 0.6931472, %v8383_v5  ;;  %v8397_v5 = vld [vmem:[#allocation235_spill] sm:$0xff] }
 0x21f   :  { %8364 = vst [vmem:[#allocation141_spill] sm:$0xff] %v5247_v19  ;;  %v8376_v19 = vld [vmem:[#allocation155_spill] sm:$0xff] }
 0x220   :  { %8366 = vst [vmem:[#allocation142_spill] sm:$0xff] %v5250_v24  ;;  %v5268_v10 = vmul.f32 0.6931472, %v8376_v19  ;;  %v8378_v24 = vld [vmem:[#allocation158_spill] sm:$0xff] }
 0x221   :  { %8368 = vst [vmem:[#allocation228_spill] sm:$0xff] %v5253_v54  ;;  %v5271_v46 = vmul.f32 0.6931472, %v8378_v24  ;;  %v5274_v54 = vmul.f32 0.6931472, %v8380_v1  ;;  %v8389_v19 = vld [vmem:[#allocation234_spill] sm:$0xff]  ;;  %v5289_v24 = vpop.eup %3356 }
 0x222   :  { %8370 = vst [vmem:[#allocation143_spill] sm:$0xff] %v5256_v16  ;;  %3366 = vlog2.f32 %v8389_v19 }
 0x223   :  { %8372 = vst [vmem:[#allocation144_spill] sm:$0xff] %v5259_v59  ;;  %v8387_v59 = vld [vmem:[#allocation170_spill] sm:$0xff]  ;;  %3368 = vlog2.f32 %v8397_v5 }
 0x224   :  { %8374 = vst [vmem:[#allocation145_spill] sm:$0xff] %v5262_v14  ;;  %v8385_v14 = vld [vmem:[#allocation167_spill] sm:$0xff]  ;;  %v5286_v16 = vmul.f32 0.6931472, %v8387_v59  ;;  %3370 = vlog2.f32 %v4340_v37 }
 0x225   :  { %8377 = vst [vmem:[#allocation229_spill] sm:$0xff] %v5268_v10  ;;  %v5283_v35 = vmul.f32 0.6931472, %v8385_v14  ;;  %v8395_v10 = vld [vmem:[#allocation179_spill] sm:$0xff]  ;;  %v5301_v14 = vpop.eup %3358 }
 0x226   :  { %8379 = vst [vmem:[#allocation146_spill] sm:$0xff] %v5271_v46  ;;  %v8391_v46 = vld [vmem:[#allocation173_spill] sm:$0xff] }
 0x227   :  { %8381 = vst [vmem:[#allocation147_spill] sm:$0xff] %v5274_v54  ;;  %v5292_v1 = vmul.f32 0.6931472, %v8391_v46  ;;  %v8393_v54 = vld [vmem:[#allocation176_spill] sm:$0xff]  ;;  %v8405_v46 = vld [vmem:[#allocation191_spill] sm:$0xff] }
 0x228   :  { %8382 = vst [vmem:[#allocation148_spill] sm:$0xff] %v5277_v22  ;;  %v5295_v58 = vmul.f32 0.6931472, %v8393_v54  ;;  %v5298_v22 = vmul.f32 0.6931472, %v8395_v10  ;;  %v5313_v54 = vpop.eup %3360 }
 0x229   :  { %8384 = vst [vmem:[#allocation149_spill] sm:$0xff] %v5280_v63  ;;  %v8402_v63 = vld [vmem:[#allocation188_spill] sm:$0xff]  ;;  %v5316_v10 = vmul.f32 0.6931472, %v8405_v46  ;;  %v8419_v46 = vld [vmem:[#allocation238_spill] sm:$0xff] }
 0x22a   :  { %8386 = vst [vmem:[#allocation150_spill] sm:$0xff] %v5283_v35  ;;  %v8398_v35 = vld [vmem:[#allocation182_spill] sm:$0xff] }
 0x22b   :  { %8388 = vst [vmem:[#allocation151_spill] sm:$0xff] %v5286_v16  ;;  %v5304_v59 = vmul.f32 0.6931472, %v8398_v35  ;;  %v8400_v16 = vld [vmem:[#allocation185_spill] sm:$0xff] }
 0x22c   :  { %8390 = vst [vmem:[#allocation231_spill] sm:$0xff] %v5289_v24  ;;  %v5307_v19 = vmul.f32 0.6931472, %v8400_v16  ;;  %v5310_v24 = vmul.f32 0.6931472, %v8402_v63  ;;  %v8411_v35 = vld [vmem:[#allocation237_spill] sm:$0xff]  ;;  %v5325_v16 = vpop.eup %3362 }
 0x22d   :  { %8392 = vst [vmem:[#allocation152_spill] sm:$0xff] %v5292_v1  ;;  %3372 = vlog2.f32 %v8411_v35 }
 0x22e   :  { %8394 = vst [vmem:[#allocation153_spill] sm:$0xff] %v5295_v58  ;;  %v8409_v58 = vld [vmem:[#allocation197_spill] sm:$0xff]  ;;  %3374 = vlog2.f32 %v8419_v46 }
 0x22f   :  { %8396 = vst [vmem:[#allocation154_spill] sm:$0xff] %v5298_v22  ;;  %v8407_v22 = vld [vmem:[#allocation194_spill] sm:$0xff]  ;;  %v5322_v1 = vmul.f32 0.6931472, %v8409_v58  ;;  %3376 = vlog2.f32 %v4349_v53 }
 0x230   :  { %8399 = vst [vmem:[#allocation232_spill] sm:$0xff] %v5304_v59  ;;  %v5319_v5 = vmul.f32 0.6931472, %v8407_v22  ;;  %v8417_v59 = vld [vmem:[#allocation206_spill] sm:$0xff]  ;;  %v5337_v22 = vpop.eup %3364 }
 0x231   :  { %8401 = vst [vmem:[#allocation155_spill] sm:$0xff] %v5307_v19  ;;  %v8413_v19 = vld [vmem:[#allocation200_spill] sm:$0xff] }
 0x232   :  { %8403 = vst [vmem:[#allocation158_spill] sm:$0xff] %v5310_v24  ;;  %v5328_v63 = vmul.f32 0.6931472, %v8413_v19  ;;  %v8415_v24 = vld [vmem:[#allocation203_spill] sm:$0xff]  ;;  %v8427_v19 = vld [vmem:[#allocation218_spill] sm:$0xff] }
 0x233   :  { %8404 = vst [vmem:[#allocation161_spill] sm:$0xff] %v5313_v54  ;;  %v5331_v37 = vmul.f32 0.6931472, %v8415_v24  ;;  %v5334_v54 = vmul.f32 0.6931472, %v8417_v59  ;;  %v5349_v24 = vpop.eup %3366 }
 0x234   :  { %8406 = vst [vmem:[#allocation164_spill] sm:$0xff] %v5316_v10  ;;  %v8424_v10 = vld [vmem:[#allocation215_spill] sm:$0xff]  ;;  %v5352_v59 = vmul.f32 0.6931472, %v8427_v19  ;;  %v8439_v19 = vld [vmem:[#allocation241_spill] sm:$0xff] }
 0x235   :  { %8408 = vst [vmem:[#allocation167_spill] sm:$0xff] %v5319_v5  ;;  %v8420_v5 = vld [vmem:[#allocation209_spill] sm:$0xff] }
 0x236   :  { %8410 = vst [vmem:[#allocation170_spill] sm:$0xff] %v5322_v1  ;;  %v5340_v58 = vmul.f32 0.6931472, %v8420_v5  ;;  %v8422_v1 = vld [vmem:[#allocation212_spill] sm:$0xff] }
 0x237   :  { %8412 = vst [vmem:[#allocation234_spill] sm:$0xff] %v5325_v16  ;;  %v5343_v35 = vmul.f32 0.6931472, %v8422_v1  ;;  %v5346_v16 = vmul.f32 0.6931472, %v8424_v10  ;;  %v8433_v5 = vld [vmem:[#allocation240_spill] sm:$0xff]  ;;  %v5361_v1 = vpop.eup %3368 }
 0x238   :  { %8414 = vst [vmem:[#allocation173_spill] sm:$0xff] %v5328_v63  ;;  %3378 = vlog2.f32 %v8433_v5 }
 0x239   :  { %8416 = vst [vmem:[#allocation176_spill] sm:$0xff] %v5331_v37  ;;  %v8431_v37 = vld [vmem:[#allocation224_spill] sm:$0xff]  ;;  %3380 = vlog2.f32 %v8439_v19  ;;  %v5391_v19 = vmul.f32 0.6931472, %v4374_v39 }
 0x23a   :  { %8418 = vst [vmem:[#allocation179_spill] sm:$0xff] %v5334_v54  ;;  %v8429_v54 = vld [vmem:[#allocation221_spill] sm:$0xff]  ;;  %v5358_v63 = vmul.f32 0.6931472, %v8431_v37  ;;  %3382 = vlog2.f32 %v4358_v49  ;;  %v5403_v49 = vmul.f32 0.6931472, %v4401_v36 }
 0x23b   :  { %8421 = vst [vmem:[#allocation235_spill] sm:$0xff] %v5340_v58  ;;  %v5355_v46 = vmul.f32 0.6931472, %v8429_v54  ;;  %v8437_v58 = vld [vmem:[#allocation233_spill] sm:$0xff]  ;;  %v5373_v54 = vpop.eup %3370 }
 0x23c   :  { %8423 = vst [vmem:[#allocation182_spill] sm:$0xff] %v5343_v35  ;;  %v8435_v35 = vld [vmem:[#allocation227_spill] sm:$0xff] }
 0x23d   :  { %8425 = vst [vmem:[#allocation185_spill] sm:$0xff] %v5346_v16  ;;  %v5364_v10 = vmul.f32 0.6931472, %v8435_v35  ;;  %v8436_v16 = vld [vmem:[#allocation230_spill] sm:$0xff]  ;;  %v8444_v35 = vld [vmem:[#allocation245_spill] sm:$0xff] }
 0x23e   :  { %8426 = vst [vmem:[#allocation188_spill] sm:$0xff] %v5349_v24  ;;  %v5367_v53 = vmul.f32 0.6931472, %v8436_v16  ;;  %v5370_v24 = vmul.f32 0.6931472, %v8437_v58  ;;  %v5385_v16 = vpop.eup %3372 }
 0x23f   :  { %8428 = vst [vmem:[#allocation191_spill] sm:$0xff] %v5352_v59  ;;  %v8442_v59 = vld [vmem:[#allocation242_spill] sm:$0xff]  ;;  %v5388_v58 = vmul.f32 0.6931472, %v8444_v35  ;;  %v8452_v35 = vld [vmem:[#allocation244_spill] sm:$0xff] }
 0x240   :  { %8430 = vst [vmem:[#allocation194_spill] sm:$0xff] %v5355_v46  ;;  %v8440_v46 = vld [vmem:[#allocation236_spill] sm:$0xff] }
 0x241   :  { %8432 = vst [vmem:[#allocation197_spill] sm:$0xff] %v5358_v63  ;;  %v5376_v37 = vmul.f32 0.6931472, %v8440_v46  ;;  %v8441_v63 = vld [vmem:[#allocation239_spill] sm:$0xff] }
 0x242   :  { %8434 = vst [vmem:[#allocation237_spill] sm:$0xff] %v5361_v1  ;;  %v5379_v5 = vmul.f32 0.6931472, %v8441_v63  ;;  %v5382_v1 = vmul.f32 0.6931472, %v8442_v59  ;;  %v8448_v46 = vld [vmem:[#allocation243_spill] sm:$0xff]  ;;  %v5397_v63 = vpop.eup %3374 }
 0x243   :  { %8438 = vst [vmem:[#allocation200_spill] sm:$0xff] %v5370_v24  ;;  %v5394_v24 = vmul.f32 0.6931472, %v4383_v4  ;;  %3384 = vlog2.f32 %v8448_v46  ;;  %v5400_v59 = vmul.f32 0.6931472, %v4392_v45  ;;  %v5409_v39 = vpop.eup %3376  ;;  %v8458_v45 = vld [vmem:[#allocation246_spill] sm:$0xff] }
 0x244   :  { %8443 = vst [vmem:[#allocation203_spill] sm:$0xff] %v5382_v1  ;;  %v5406_v1 = vmul.f32 0.6931472, %v4410_v27  ;;  %3386 = vlog2.f32 %v8452_v35  ;;  %v5421_v36 = vpop.eup %3378 }
 0x245   :  { %8445 = vst [vmem:[#allocation206_spill] sm:$0xff] %v5388_v58  ;;  %v5418_v58 = vmul.f32 0.6931472, %v4437_v7  ;;  %3388 = vlog2.f32 %v8458_v45 }
 0x246   :  { %8446 = vst [vmem:[#allocation238_spill] sm:$0xff] %v5391_v19  ;;  %v8453_v19 = vld [vmem:[#allocation264_spill] sm:$0xff] }
 0x247   :  { %8447 = vst [vmem:[#allocation209_spill] sm:$0xff] %v5394_v24  ;;  %v5412_v4 = vmul.f32 0.6931472, %v8453_v19  ;;  %v8455_v24 = vld [vmem:[#allocation268_spill] sm:$0xff]  ;;  %v8464_v19 = vld [vmem:[#allocation247_spill] sm:$0xff] }
 0x248   :  { %8449 = vst [vmem:[#allocation212_spill] sm:$0xff] %v5400_v59  ;;  %v5415_v46 = vmul.f32 0.6931472, %v8455_v24  ;;  %v5430_v59 = vmul.f32 0.6931472, %v4464_v56  ;;  %3390 = vlog2.f32 %v8464_v19  ;;  %v5433_v24 = vpop.eup %3380 }
 0x249   :  { %8450 = vst [vmem:[#allocation215_spill] sm:$0xff] %v5403_v49  ;;  %v8459_v49 = vld [vmem:[#allocation157_spill] sm:$0xff] }
 0x24a   :  { %8451 = vst [vmem:[#allocation218_spill] sm:$0xff] %v5406_v1  ;;  %v5424_v27 = vmul.f32 0.6931472, %v8459_v49  ;;  %v8461_v1 = vld [vmem:[#allocation277_spill] sm:$0xff]  ;;  %v8470_v49 = vld [vmem:[#allocation248_spill] sm:$0xff] }
 0x24b   :  { %8454 = vst [vmem:[#allocation221_spill] sm:$0xff] %v5412_v4  ;;  %v5427_v35 = vmul.f32 0.6931472, %v8461_v1  ;;  %v5442_v4 = vmul.f32 0.6931472, %v4491_v38  ;;  %3392 = vlog2.f32 %v8470_v49  ;;  %v5445_v1 = vpop.eup %3382 }
 0x24c   :  { %8456 = vst [vmem:[#allocation224_spill] sm:$0xff] %v5415_v46  ;;  %v8465_v46 = vld [vmem:[#allocation160_spill] sm:$0xff] }
 0x24d   :  { %8457 = vst [vmem:[#allocation240_spill] sm:$0xff] %v5418_v58  ;;  %v5436_v7 = vmul.f32 0.6931472, %v8465_v46  ;;  %v8467_v58 = vld [vmem:[#allocation286_spill] sm:$0xff]  ;;  %v8476_v46 = vld [vmem:[#allocation249_spill] sm:$0xff] }
 0x24e   :  { %8460 = vst [vmem:[#allocation227_spill] sm:$0xff] %v5424_v27  ;;  %v5439_v45 = vmul.f32 0.6931472, %v8467_v58  ;;  %v5454_v27 = vmul.f32 0.6931472, %v4518_v9  ;;  %3394 = vlog2.f32 %v8476_v46  ;;  %v5457_v58 = vpop.eup %3384 }
 0x24f   :  { %8462 = vst [vmem:[#allocation230_spill] sm:$0xff] %v5427_v35  ;;  %v8471_v35 = vld [vmem:[#allocation163_spill] sm:$0xff] }
 0x250   :  { %8463 = vst [vmem:[#allocation233_spill] sm:$0xff] %v5430_v59  ;;  %v5448_v56 = vmul.f32 0.6931472, %v8471_v35  ;;  %v8473_v59 = vld [vmem:[#allocation295_spill] sm:$0xff]  ;;  %v8482_v35 = vld [vmem:[#allocation250_spill] sm:$0xff] }
 0x251   :  { %8466 = vst [vmem:[#allocation241_spill] sm:$0xff] %v5436_v7  ;;  %v5451_v19 = vmul.f32 0.6931472, %v8473_v59  ;;  %v5466_v7 = vmul.f32 0.6931472, %v4545_v55  ;;  %3396 = vlog2.f32 %v8482_v35  ;;  %v5469_v59 = vpop.eup %3386 }
 0x252   :  { %8468 = vst [vmem:[#allocation236_spill] sm:$0xff] %v5439_v45  ;;  %v8477_v45 = vld [vmem:[#allocation166_spill] sm:$0xff] }
 0x253   :  { %8469 = vst [vmem:[#allocation239_spill] sm:$0xff] %v5442_v4  ;;  %v5460_v38 = vmul.f32 0.6931472, %v8477_v45  ;;  %v8479_v4 = vld [vmem:[#allocation304_spill] sm:$0xff]  ;;  %v8488_v45 = vld [vmem:[#allocation251_spill] sm:$0xff] }
 0x254   :  { %8472 = vst [vmem:[#allocation242_spill] sm:$0xff] %v5448_v56  ;;  %v5463_v49 = vmul.f32 0.6931472, %v8479_v4  ;;  %v5478_v56 = vmul.f32 0.6931472, %v4572_v17  ;;  %3398 = vlog2.f32 %v8488_v45  ;;  %v5481_v4 = vpop.eup %3388 }
 0x255   :  { %8474 = vst [vmem:[#allocation245_spill] sm:$0xff] %v5451_v19  ;;  %v8483_v19 = vld [vmem:[#allocation169_spill] sm:$0xff] }
 0x256   :  { %8475 = vst [vmem:[#allocation243_spill] sm:$0xff] %v5454_v27  ;;  %v5472_v9 = vmul.f32 0.6931472, %v8483_v19  ;;  %v8485_v27 = vld [vmem:[#allocation313_spill] sm:$0xff]  ;;  %v8492_v19 = vld [vmem:[#allocation252_spill] sm:$0xff] }
 0x257   :  { %8478 = vst [vmem:[#allocation244_spill] sm:$0xff] %v5460_v38  ;;  %v5475_v46 = vmul.f32 0.6931472, %v8485_v27  ;;  %v5490_v38 = vmul.f32 0.6931472, %v4599_v47  ;;  %3400 = vlog2.f32 %v8492_v19  ;;  %v5493_v27 = vpop.eup %3390 }
 0x258   :  { %8480 = vst [vmem:[#allocation264_spill] sm:$0xff] %v5463_v49  ;;  %v8489_v49 = vld [vmem:[#allocation172_spill] sm:$0xff]  ;;  %v5508_v47 = vmul.f32 0.6931472, %v4635_v20  ;;  %v5511_v19 = vmul.f32 0.6931472, %v4644_v34 }
 0x259   :  { %8481 = vst [vmem:[#allocation268_spill] sm:$0xff] %v5466_v7  ;;  %v5484_v55 = vmul.f32 0.6931472, %v8489_v49  ;;  %v8490_v7 = vld [vmem:[#allocation322_spill] sm:$0xff]  ;;  %v8496_v49 = vld [vmem:[#allocation253_spill] sm:$0xff]  ;;  %v8500_v20 = vld [vmem:[#allocation255_spill] sm:$0xff] }
 0x25a   :  { %8484 = vst [vmem:[#allocation246_spill] sm:$0xff] %v5472_v9  ;;  %v5487_v35 = vmul.f32 0.6931472, %v8490_v7  ;;  %v5502_v9 = vmul.f32 0.6931472, %v4626_v41  ;;  %3402 = vlog2.f32 %v8496_v49  ;;  %v5505_v7 = vpop.eup %3392 }
 0x25b   :  { %8486 = vst [vmem:[#allocation157_spill] sm:$0xff] %v5475_v46  ;;  %v8493_v46 = vld [vmem:[#allocation175_spill] sm:$0xff]  ;;  %v5520_v41 = vmul.f32 0.6931472, %v4662_v60  ;;  %v5523_v49 = vmul.f32 0.6931472, %v4671_v28 }
 0x25c   :  { %8487 = vst [vmem:[#allocation277_spill] sm:$0xff] %v5478_v56  ;;  %v5496_v17 = vmul.f32 0.6931472, %v8493_v46  ;;  %v8494_v56 = vld [vmem:[#allocation331_spill] sm:$0xff]  ;;  %v8498_v46 = vld [vmem:[#allocation254_spill] sm:$0xff]  ;;  %v8502_v60 = vld [vmem:[#allocation256_spill] sm:$0xff] }
 0x25d   :  { %8491 = vst [vmem:[#allocation247_spill] sm:$0xff] %v5490_v38  ;;  %v5499_v45 = vmul.f32 0.6931472, %v8494_v56  ;;  %v5514_v38 = vmul.f32 0.6931472, %v4653_v57  ;;  %3404 = vlog2.f32 %v8498_v46  ;;  %v5517_v56 = vpop.eup %3394 }
 0x25e   :  { %8495 = vst [vmem:[#allocation160_spill] sm:$0xff] %v5502_v9  ;;  %v5526_v9 = vmul.f32 0.6931472, %v4680_v18  ;;  %3406 = vlog2.f32 %v8500_v20  ;;  %v5529_v34 = vpop.eup %3396  ;;  %v5532_v57 = vmul.f32 0.6931472, %v4689_v8  ;;  %v8504_v8 = vld [vmem:[#allocation257_spill] sm:$0xff] }
 0x25f   :  { %8497 = vst [vmem:[#allocation286_spill] sm:$0xff] %v5514_v38  ;;  %v5535_v46 = vmul.f32 0.6931472, %v4701_v13  ;;  %v5538_v38 = vmul.f32 0.6931472, %v4713_v44  ;;  %3408 = vlog2.f32 %v8502_v60  ;;  %v5541_v28 = vpop.eup %3398 }
 0x260   :  { %8499 = vst [vmem:[#allocation248_spill] sm:$0xff] %v5526_v9  ;;  %v5544_v18 = vmul.f32 0.6931472, %v4725_v25  ;;  %v5547_v20 = vmul.f32 0.6931472, %v4737_v62  ;;  %3410 = vlog2.f32 %v8504_v8  ;;  %v5553_v13 = vpop.eup %3400  ;;  %v8506_v25 = vld [vmem:[#allocation258_spill] sm:$0xff] }
 0x261   :  { %8501 = vst [vmem:[#allocation163_spill] sm:$0xff] %v5538_v38  ;;  %v5550_v9 = vmul.f32 0.6931472, %v4749_v48  ;;  %v5556_v44 = vmul.f32 0.6931472, %v4761_v15  ;;  %3412 = vlog2.f32 %v8506_v25  ;;  %v5565_v62 = vpop.eup %3402  ;;  %v8509_v15 = vld [vmem:[#allocation259_spill] sm:$0xff] }
 0x262   :  { %v5559_v60 = vmul.f32 0.6931472, %v4773_v23  ;;  %v5562_v38 = vmul.f32 0.6931472, %v4785_v11  ;;  %v5568_v48 = vmul.f32 0.6931472, %v4797_v30  ;;  %3414 = vlog2.f32 %v8509_v15 }
 0x263   :  { %8503 = vst [vmem:[#allocation295_spill] sm:$0xff] %v5550_v9  ;;  %v5571_v8 = vmul.f32 0.6931472, %v4809_v0  ;;  %v5574_v9 = vmul.f32 0.6931472, %v4821_v32  ;;  %v5577_v23 = vpop.eup %3404  ;;  %v8513_v30 = vld [vmem:[#allocation260_spill] sm:$0xff] }
 0x264   :  { %8505 = vst [vmem:[#allocation249_spill] sm:$0xff] %v5562_v38  ;;  %v5580_v11 = vmul.f32 0.6931472, %v4833_v51  ;;  %v5583_v25 = vmul.f32 0.6931472, %v4845_v29  ;;  %3416 = vlog2.f32 %v8513_v30  ;;  %v5589_v0 = vpop.eup %3406  ;;  %v8518_v51 = vld [vmem:[#allocation261_spill] sm:$0xff] }
 0x265   :  { %8507 = vst [vmem:[#allocation166_spill] sm:$0xff] %v5571_v8  ;;  %v5586_v38 = vmul.f32 0.6931472, %v4857_v33  ;;  %v5592_v32 = vmul.f32 0.6931472, %v4869_v43  ;;  %3418 = vlog2.f32 %v8518_v51  ;;  %v5601_v29 = vpop.eup %3408  ;;  %v8524_v43 = vld [vmem:[#allocation262_spill] sm:$0xff] }
 0x266   :  { %8508 = vst [vmem:[#allocation304_spill] sm:$0xff] %v5574_v9  ;;  %v5595_v15 = vmul.f32 0.6931472, %v4881_v42  ;;  %v8516_v9 = vld [vmem:[#allocation198_spill] sm:$0xff]  ;;  %v5604_v33 = vmul.f32 0.6931472, %v4905_v26  ;;  %3420 = vlog2.f32 %v8524_v43  ;;  %v5613_v42 = vpop.eup %3410 }
 0x267   :  { %8510 = vst [vmem:[#allocation250_spill] sm:$0xff] %v5580_v11  ;;  %v5598_v8 = vmul.f32 0.6931472, %v8516_v9  ;;  %v5616_v9 = vmul.f32 0.6931472, %v4941_v21  ;;  %v8530_v26 = vld [vmem:[#allocation263_spill] sm:$0xff] }
 0x268   :  { %8511 = vst [vmem:[#allocation169_spill] sm:$0xff] %v5583_v25  ;;  %v8522_v25 = vld [vmem:[#allocation201_spill] sm:$0xff]  ;;  %3422 = vlog2.f32 %v8530_v26 }
 0x269   :  { %8512 = vst [vmem:[#allocation313_spill] sm:$0xff] %v5586_v38  ;;  %v8520_v38 = vld [vmem:[#allocation58_spill] sm:$0xff]  ;;  %v5610_v11 = vmul.f32 0.6931472, %v8522_v25  ;;  %v5628_v25 = vmul.f32 0.6931472, %v4977_v52 }
 0x26a   :  { %8514 = vst [vmem:[#allocation251_spill] sm:$0xff] %v5592_v32  ;;  %v5607_v30 = vmul.f32 0.6931472, %v8520_v38  ;;  %v5625_v38 = vpop.eup %3412  ;;  %v8536_v21 = vld [vmem:[#allocation265_spill] sm:$0xff]  ;;  %v8542_v52 = vld [vmem:[#allocation266_spill] sm:$0xff] }
 0x26b   :  { %8515 = vst [vmem:[#allocation172_spill] sm:$0xff] %v5595_v15  ;;  %v8528_v15 = vld [vmem:[#allocation204_spill] sm:$0xff]  ;;  %3424 = vlog2.f32 %v8536_v21 }
 0x26c   :  { %8517 = vst [vmem:[#allocation322_spill] sm:$0xff] %v5598_v8  ;;  %v8526_v8 = vld [vmem:[#allocation67_spill] sm:$0xff]  ;;  %v5622_v32 = vmul.f32 0.6931472, %v8528_v15  ;;  %v5640_v15 = vmul.f32 0.6931472, %v5013_v50  ;;  %3426 = vlog2.f32 %v8542_v52 }
 0x26d   :  { %8519 = vst [vmem:[#allocation252_spill] sm:$0xff] %v5604_v33  ;;  %v5619_v51 = vmul.f32 0.6931472, %v8526_v8  ;;  %v5637_v8 = vpop.eup %3414  ;;  %v8548_v50 = vld [vmem:[#allocation267_spill] sm:$0xff] }
 0x26e   :  { %8521 = vst [vmem:[#allocation175_spill] sm:$0xff] %v5607_v30  ;;  %v8534_v30 = vld [vmem:[#allocation207_spill] sm:$0xff]  ;;  %3428 = vlog2.f32 %v8548_v50 }
 0x26f   :  { %8523 = vst [vmem:[#allocation331_spill] sm:$0xff] %v5610_v11  ;;  %v8532_v11 = vld [vmem:[#allocation76_spill] sm:$0xff]  ;;  %v5634_v33 = vmul.f32 0.6931472, %v8534_v30  ;;  %v5652_v30 = vmul.f32 0.6931472, %v5049_v61 }
 0x270   :  { %8525 = vst [vmem:[#allocation253_spill] sm:$0xff] %v5616_v9  ;;  %v5631_v43 = vmul.f32 0.6931472, %v8532_v11  ;;  %v5649_v11 = vpop.eup %3416  ;;  %v8554_v61 = vld [vmem:[#allocation269_spill] sm:$0xff] }
 0x271   :  { %8527 = vst [vmem:[#allocation254_spill] sm:$0xff] %v5619_v51  ;;  %v8540_v51 = vld [vmem:[#allocation210_spill] sm:$0xff]  ;;  %3430 = vlog2.f32 %v8554_v61 }
 0x272   :  { %8529 = vst [vmem:[#allocation255_spill] sm:$0xff] %v5622_v32  ;;  %v8538_v32 = vld [vmem:[#allocation85_spill] sm:$0xff]  ;;  %v5646_v9 = vmul.f32 0.6931472, %v8540_v51  ;;  %v5664_v51 = vmul.f32 0.6931472, %v5085_v2 }
 0x273   :  { %8531 = vst [vmem:[#allocation256_spill] sm:$0xff] %v5628_v25  ;;  %v5643_v26 = vmul.f32 0.6931472, %v8538_v32  ;;  %v5661_v32 = vpop.eup %3418  ;;  %v8560_v2 = vld [vmem:[#allocation270_spill] sm:$0xff] }
 0x274   :  { %8533 = vst [vmem:[#allocation257_spill] sm:$0xff] %v5631_v43  ;;  %v8546_v43 = vld [vmem:[#allocation213_spill] sm:$0xff]  ;;  %3432 = vlog2.f32 %v8560_v2 }
 0x275   :  { %8535 = vst [vmem:[#allocation258_spill] sm:$0xff] %v5634_v33  ;;  %v8544_v33 = vld [vmem:[#allocation94_spill] sm:$0xff]  ;;  %v5658_v25 = vmul.f32 0.6931472, %v8546_v43  ;;  %v5676_v43 = vmul.f32 0.6931472, %v5121_v40 }
 0x276   :  { %8537 = vst [vmem:[#allocation259_spill] sm:$0xff] %v5640_v15  ;;  %v5655_v21 = vmul.f32 0.6931472, %v8544_v33  ;;  %v5673_v33 = vpop.eup %3420  ;;  %v8566_v40 = vld [vmem:[#allocation271_spill] sm:$0xff] }
 0x277   :  { %8539 = vst [vmem:[#allocation260_spill] sm:$0xff] %v5643_v26  ;;  %v8552_v26 = vld [vmem:[#allocation216_spill] sm:$0xff]  ;;  %3434 = vlog2.f32 %v8566_v40 }
 0x278   :  { %8541 = vst [vmem:[#allocation198_spill] sm:$0xff] %v5646_v9  ;;  %v8550_v9 = vld [vmem:[#allocation103_spill] sm:$0xff]  ;;  %v5670_v15 = vmul.f32 0.6931472, %v8552_v26  ;;  %v5688_v26 = vmul.f32 0.6931472, %v5157_v6 }
 0x279   :  { %8543 = vst [vmem:[#allocation261_spill] sm:$0xff] %v5652_v30  ;;  %v5667_v52 = vmul.f32 0.6931472, %v8550_v9  ;;  %v5685_v9 = vpop.eup %3422  ;;  %v8572_v6 = vld [vmem:[#allocation156_spill] sm:$0xff] }
 0x27a   :  { %8545 = vst [vmem:[#allocation58_spill] sm:$0xff] %v5655_v21  ;;  %v8558_v21 = vld [vmem:[#allocation219_spill] sm:$0xff]  ;;  %3436 = vlog2.f32 %v8572_v6 }
 0x27b   :  { %8547 = vst [vmem:[#allocation201_spill] sm:$0xff] %v5658_v25  ;;  %v8556_v25 = vld [vmem:[#allocation112_spill] sm:$0xff]  ;;  %v5682_v30 = vmul.f32 0.6931472, %v8558_v21  ;;  %v5700_v21 = vmul.f32 0.6931472, %v5193_v12 }
 0x27c   :  { %8549 = vst [vmem:[#allocation262_spill] sm:$0xff] %v5664_v51  ;;  %v5679_v50 = vmul.f32 0.6931472, %v8556_v25  ;;  %v5697_v25 = vpop.eup %3424  ;;  %v8578_v12 = vld [vmem:[#allocation272_spill] sm:$0xff] }
 0x27d   :  { %8551 = vst [vmem:[#allocation67_spill] sm:$0xff] %v5667_v52  ;;  %v8564_v52 = vld [vmem:[#allocation222_spill] sm:$0xff]  ;;  %3438 = vlog2.f32 %v8578_v12 }
 0x27e   :  { %8553 = vst [vmem:[#allocation204_spill] sm:$0xff] %v5670_v15  ;;  %v8562_v15 = vld [vmem:[#allocation121_spill] sm:$0xff]  ;;  %v5694_v51 = vmul.f32 0.6931472, %v8564_v52  ;;  %v5712_v52 = vmul.f32 0.6931472, %v5229_v31 }
 0x27f   :  { %8555 = vst [vmem:[#allocation263_spill] sm:$0xff] %v5676_v43  ;;  %v5691_v61 = vmul.f32 0.6931472, %v8562_v15  ;;  %v5709_v15 = vpop.eup %3426  ;;  %v8584_v31 = vld [vmem:[#allocation273_spill] sm:$0xff] }
 0x280   :  { %8557 = vst [vmem:[#allocation76_spill] sm:$0xff] %v5679_v50  ;;  %v8570_v50 = vld [vmem:[#allocation225_spill] sm:$0xff]  ;;  %3440 = vlog2.f32 %v8584_v31 }
 0x281   :  { %8559 = vst [vmem:[#allocation207_spill] sm:$0xff] %v5682_v30  ;;  %v8568_v30 = vld [vmem:[#allocation130_spill] sm:$0xff]  ;;  %v5706_v43 = vmul.f32 0.6931472, %v8570_v50  ;;  %v5724_v50 = vmul.f32 0.6931472, %v5265_v3 }
 0x282   :  { %8561 = vst [vmem:[#allocation265_spill] sm:$0xff] %v5688_v26  ;;  %v5703_v2 = vmul.f32 0.6931472, %v8568_v30  ;;  %v5721_v30 = vpop.eup %3428  ;;  %v8588_v3 = vld [vmem:[#allocation274_spill] sm:$0xff]  ;;  %v8591_v31 = vld [vmem:[#allocation237_spill] sm:$0xff] }
 0x283   :  { %8563 = vst [vmem:[#allocation85_spill] sm:$0xff] %v5691_v61  ;;  %v8576_v61 = vld [vmem:[#allocation228_spill] sm:$0xff]  ;;  %3442 = vlog2.f32 %v8588_v3  ;;  %v5762_v3 = vmul.f32 0.6931472, %v5397_v63  ;;  %v5779_v63 = vmul.f32 0.6931472, %v5457_v58 }
 0x284   :  { %8565 = vst [vmem:[#allocation210_spill] sm:$0xff] %v5694_v51  ;;  %v8574_v51 = vld [vmem:[#allocation139_spill] sm:$0xff]  ;;  %v5718_v26 = vmul.f32 0.6931472, %v8576_v61  ;;  %v5736_v61 = vmul.f32 0.6931472, %v5301_v14 }
 0x285   :  { %8567 = vst [vmem:[#allocation266_spill] sm:$0xff] %v5700_v21  ;;  %v5715_v40 = vmul.f32 0.6931472, %v8574_v51  ;;  %v5733_v51 = vpop.eup %3430  ;;  %v8592_v14 = vld [vmem:[#allocation275_spill] sm:$0xff]  ;;  %v5796_v58 = vmul.f32 0.6931472, %v5517_v56 }
 0x286   :  { %8569 = vst [vmem:[#allocation94_spill] sm:$0xff] %v5703_v2  ;;  %v8582_v2 = vld [vmem:[#allocation231_spill] sm:$0xff]  ;;  %3444 = vlog2.f32 %v8592_v14  ;;  %v5772_v14 = vmul.f32 0.6931472, %v5433_v24  ;;  %v5789_v24 = vmul.f32 0.6931472, %v5493_v27 }
 0x287   :  { %8571 = vst [vmem:[#allocation213_spill] sm:$0xff] %v5706_v43  ;;  %v8580_v43 = vld [vmem:[#allocation148_spill] sm:$0xff]  ;;  %v5730_v21 = vmul.f32 0.6931472, %v8582_v2  ;;  %v5806_v27 = vmul.f32 0.6931472, %v5553_v13 }
 0x288   :  { %8573 = vst [vmem:[#allocation267_spill] sm:$0xff] %v5712_v52  ;;  %v5727_v6 = vmul.f32 0.6931472, %v8580_v43  ;;  %v3433_v43 = vpop.eup %3432  ;;  %v8590_v2 = vld [vmem:[#allocation188_spill] sm:$0xff]  ;;  %v8615_v56 = vld [vmem:[#allocation281_spill] sm:$0xff]  ;;  %v8619_v13 = vld [vmem:[#allocation282_spill] sm:$0xff] }
 0x289   :  { %8575 = vst [vmem:[#allocation103_spill] sm:$0xff] %v5715_v40  ;;  %v8587_v40 = vld [vmem:[#allocation234_spill] sm:$0xff] }
 0x28a   :  { %8577 = vst [vmem:[#allocation216_spill] sm:$0xff] %v5718_v26  ;;  %v8586_v26 = vld [vmem:[#allocation161_spill] sm:$0xff]  ;;  %v5742_v52 = vmul.f32 0.6931472, %v8587_v40  ;;  %v5759_v40 = vmul.f32 0.6931472, %v5385_v16 }
 0x28b   :  { %8579 = vst [vmem:[#allocation269_spill] sm:$0xff] %v5724_v50  ;;  %v5739_v12 = vmul.f32 0.6931472, %v8586_v26  ;;  %v5752_v50 = vmul.f32 0.6931472, %v8591_v31 }
 0x28c   :  { %8581 = vst [vmem:[#allocation112_spill] sm:$0xff] %v5727_v6  ;;  %v5746_v6 = vmul.f32 0.6931472, %v5337_v22  ;;  %v5756_v26 = vmul.f32 0.6931472, %v5373_v54  ;;  %v8595_v22 = vld [vmem:[#allocation276_spill] sm:$0xff] }
 0x28d   :  { %8583 = vst [vmem:[#allocation219_spill] sm:$0xff] %v5730_v21  ;;  %v5749_v21 = vmul.f32 0.6931472, %v8590_v2  ;;  %3446 = vlog2.f32 %v8595_v22  ;;  %v5766_v2 = vmul.f32 0.6931472, %v5409_v39  ;;  %v8599_v54 = vld [vmem:[#allocation278_spill] sm:$0xff] }
 0x28e   :  { %8585 = vst [vmem:[#allocation270_spill] sm:$0xff] %v5736_v61  ;;  %v3435_v61 = vpop.eup %3434  ;;  %v5769_v31 = vmul.f32 0.6931472, %v5421_v36  ;;  %3448 = vlog2.f32 %v8599_v54  ;;  %v5776_v16 = vmul.f32 0.6931472, %v5445_v1  ;;  %v8603_v39 = vld [vmem:[#allocation279_spill] sm:$0xff] }
 0x28f   :  { %8589 = vst [vmem:[#allocation121_spill] sm:$0xff] %v5746_v6  ;;  %v3437_v6 = vpop.eup %3436  ;;  %v5782_v22 = vmul.f32 0.6931472, %v5469_v59  ;;  %3450 = vlog2.f32 %v8603_v39  ;;  %v5786_v36 = vmul.f32 0.6931472, %v5481_v4  ;;  %v8607_v1 = vld [vmem:[#allocation280_spill] sm:$0xff] }
 0x290   :  { %8593 = vst [vmem:[#allocation222_spill] sm:$0xff] %v5756_v26  ;;  %v3439_v26 = vpop.eup %3438  ;;  %v5792_v54 = vmul.f32 0.6931472, %v5505_v7  ;;  %3452 = vlog2.f32 %v8607_v1  ;;  %v5799_v59 = vmul.f32 0.6931472, %v5529_v34  ;;  %v8611_v4 = vld [vmem:[#allocation159_spill] sm:$0xff] }
 0x291   :  { %8594 = vst [vmem:[#allocation271_spill] sm:$0xff] %v5762_v3  ;;  %v5802_v39 = vmul.f32 0.6931472, %v5541_v28  ;;  %3454 = vlog2.f32 %v8611_v4  ;;  %v5809_v7 = vmul.f32 0.6931472, %v5565_v62 }
 0x292   :  { %8596 = vst [vmem:[#allocation130_spill] sm:$0xff] %v5766_v2  ;;  %v3441_v2 = vpop.eup %3440  ;;  %v5812_v1 = vmul.f32 0.6931472, %v5577_v23  ;;  %3456 = vlog2.f32 %v8615_v56  ;;  %v5816_v34 = vmul.f32 0.6931472, %v5589_v0  ;;  %v8623_v0 = vld [vmem:[#allocation283_spill] sm:$0xff] }
 0x293   :  { %8597 = vst [vmem:[#allocation225_spill] sm:$0xff] %v5769_v31  ;;  %v5819_v28 = vmul.f32 0.6931472, %v5601_v29  ;;  %v5822_v4 = vmul.f32 0.6931472, %v5613_v42  ;;  %3458 = vlog2.f32 %v8619_v13 }
 0x294   :  { %8598 = vst [vmem:[#allocation156_spill] sm:$0xff] %v5772_v14  ;;  %v5826_v62 = vmul.f32 0.6931472, %v5625_v38  ;;  %v5829_v23 = vmul.f32 0.6931472, %v5637_v8  ;;  %3460 = vlog2.f32 %v8623_v0  ;;  %v8627_v38 = vld [vmem:[#allocation284_spill] sm:$0xff] }
 0x295   :  { %8600 = vst [vmem:[#allocation139_spill] sm:$0xff] %v5776_v16  ;;  %v3443_v16 = vpop.eup %3442  ;;  %v5832_v56 = vmul.f32 0.6931472, %v5649_v11  ;;  %v5836_v29 = vmul.f32 0.6931472, %v5661_v32  ;;  %3462 = vlog2.f32 %v8627_v38  ;;  %v470_v8 = vld [vmem:[#allocation5] sm:$0xff] }
 0x296   :  { %8601 = vst [vmem:[#allocation228_spill] sm:$0xff] %v5779_v63  ;;  %v5839_v42 = vmul.f32 0.6931472, %v5673_v33  ;;  %v5842_v13 = vmul.f32 0.6931472, %v5685_v9  ;;  %v473_v9 = vld [vmem:[#allocation5 + $0x18] sm:$0xff] }
 0x297   :  { %8602 = vst [vmem:[#allocation272_spill] sm:$0xff] %v5782_v22  ;;  %v5846_v11 = vmul.f32 0.6931472, %v5697_v25  ;;  %v5849_v0 = vmul.f32 0.6931472, %v5709_v15  ;;  %v8635_v25 = vld [vmem:[#allocation287_spill] sm:$0xff] }
 0x298   :  { %8604 = vst [vmem:[#allocation148_spill] sm:$0xff] %v5786_v36  ;;  %v3445_v36 = vpop.eup %3444  ;;  %v5852_v32 = vmul.f32 0.6931472, %v5721_v30  ;;  %v5858_v38 = vmul.f32 0.6931472, %v3433_v43  ;;  %v474_v15 = vld [vmem:[#allocation5 + $0x20] sm:$0xff] }
 0x299   :  { %8605 = vst [vmem:[#allocation231_spill] sm:$0xff] %v5789_v24  ;;  %v5865_v30 = vmul.f32 0.6931472, %v3439_v26  ;;  %v5872_v43 = vmul.f32 0.6931472, %v3445_v36  ;;  %v8649_v36 = vld [vmem:[#allocation290_spill] sm:$0xff] }
 0x29a   :  { %8606 = vst [vmem:[#allocation273_spill] sm:$0xff] %v5792_v54  ;;  %v9047_v22 = vld [vmem:[#allocation135_spill] sm:$0xff] }
 0x29b   :  { %8608 = vst [vmem:[#allocation161_spill] sm:$0xff] %v5796_v58  ;;  %v3447_v58 = vpop.eup %3446 }
 0x29c   :  { %8609 = vst [vmem:[#allocation234_spill] sm:$0xff] %v5799_v59 }
 0x29d   :  { %8610 = vst [vmem:[#allocation274_spill] sm:$0xff] %v5802_v39 }
 0x29e   :  { %8612 = vst [vmem:[#allocation188_spill] sm:$0xff] %v5806_v27  ;;  %v3449_v27 = vpop.eup %3448 }
 0x29f   :  { %8613 = vst [vmem:[#allocation237_spill] sm:$0xff] %v5809_v7 }
 0x2a0   :  { %8614 = vst [vmem:[#allocation275_spill] sm:$0xff] %v5812_v1 }
 0x2a1   :  { %8616 = vst [vmem:[#allocation276_spill] sm:$0xff] %v5816_v34  ;;  %v3451_v34 = vpop.eup %3450 }
 0x2a2   :  { %8617 = vst [vmem:[#allocation278_spill] sm:$0xff] %v5819_v28 }
 0x2a3   :  { %8618 = vst [vmem:[#allocation279_spill] sm:$0xff] %v5822_v4  ;;  %v5863_v4 = vmul.f32 0.6931472, %v3437_v6  ;;  %v5879_v6 = vmul.f32 0.6931472, %v3451_v34  ;;  %v478_v34 = vld [vmem:[#allocation5 + $0x40] sm:$0xff] }
 0x2a4   :  { %8620 = vst [vmem:[#allocation280_spill] sm:$0xff] %v5826_v62  ;;  %v3453_v62 = vpop.eup %3452 }
 0x2a5   :  { %8621 = vst [vmem:[#allocation159_spill] sm:$0xff] %v5829_v23  ;;  %v471_v23 = vld [vmem:[#allocation5 + $0x8] sm:$0xff]  ;;  %v3455_v33 = vpop.eup %3454  ;;  %v5881_v26 = vmul.f32 0.6931472, %v3453_v62 }
 0x2a6   :  { %8622 = vst [vmem:[#allocation281_spill] sm:$0xff] %v5832_v56  ;;  %v5860_v56 = vmul.f32 0.6931472, %v3435_v61  ;;  %v5874_v61 = vmul.f32 0.6931472, %v3447_v58  ;;  %v8650_v58 = vld [vmem:[#allocation184_spill] sm:$0xff] }
 0x2a7   :  { %8624 = vst [vmem:[#allocation282_spill] sm:$0xff] %v5836_v29  ;;  %v8631_v29 = vld [vmem:[#allocation285_spill] sm:$0xff] }
 0x2a8   :  { %8625 = vst [vmem:[#allocation283_spill] sm:$0xff] %v5839_v42  ;;  %3464 = vlog2.f32 %v8631_v29  ;;  %v472_v42 = vld [vmem:[#allocation5 + $0x10] sm:$0xff]  ;;  %v5867_v29 = vmul.f32 0.6931472, %v3441_v2  ;;  %v8647_v2 = vld [vmem:[#allocation162_spill] sm:$0xff] }
 0x2a9   :  { %8626 = vst [vmem:[#allocation351_spill] sm:$0xff] %v5842_v13  ;;  %v5856_v13 = vmul.f32 0.6931472, %v5733_v51  ;;  %3466 = vlog2.f32 %v8635_v25  ;;  %v5870_v51 = vmul.f32 0.6931472, %v3443_v16 }
 0x2aa   :  { %8628 = vst [vmem:[#allocation284_spill] sm:$0xff] %v5846_v11  ;;  %v3457_v11 = vpop.eup %3456  ;;  %v5884_v16 = vmul.f32 0.6931472, %v3455_v33  ;;  %v8658_v33 = vld [vmem:[#allocation13_spill] sm:$0xff] }
 0x2ab   :  { %8629 = vst [vmem:[#allocation352_spill] sm:$0xff] %v5849_v0  ;;  %v475_v0 = vld [vmem:[#allocation5 + $0x28] sm:$0xff]  ;;  %v3459_v28 = vpop.eup %3458  ;;  %v5893_v62 = vmul.f32 0.6931472, %v3457_v11  ;;  %v8664_v11 = vld [vmem:[#allocation15_spill] sm:$0xff] }
 0x2ac   :  { %8630 = vst [vmem:[#allocation353_spill] sm:$0xff] %v5852_v32  ;;  %v8639_v32 = vld [vmem:[#allocation288_spill] sm:$0xff]  ;;  %v3461_v25 = vpop.eup %3460 }
 0x2ad   :  { %8632 = vst [vmem:[#allocation285_spill] sm:$0xff] %v5856_v13  ;;  %3468 = vlog2.f32 %v8639_v32  ;;  %v476_v32 = vld [vmem:[#allocation5 + $0x30] sm:$0xff] }
 0x2ae   :  { %8633 = vst [vmem:[#allocation354_spill] sm:$0xff] %v5858_v38  ;;  %v5877_v38 = vmul.f32 0.6931472, %v3449_v27 }
 0x2af   :  { %8634 = vst [vmem:[#allocation355_spill] sm:$0xff] %v5860_v56  ;;  %v8643_v56 = vld [vmem:[#allocation289_spill] sm:$0xff] }
 0x2b0   :  { %8636 = vst [vmem:[#allocation287_spill] sm:$0xff] %v5863_v4  ;;  %3470 = vlog2.f32 %v8643_v56  ;;  %v8652_v56 = vld [vmem:[#allocation11_spill] sm:$0xff] }
 0x2b1   :  { %8637 = vst [vmem:[#allocation356_spill] sm:$0xff] %v5865_v30  ;;  %3472 = vlog2.f32 %v8647_v2  ;;  %v477_v30 = vld [vmem:[#allocation5 + $0x38] sm:$0xff]  ;;  %v8656_v2 = vld [vmem:[#allocation12_spill] sm:$0xff] }
 0x2b2   :  { %8638 = vst [vmem:[#allocation357_spill] sm:$0xff] %v5867_v29  ;;  %v3463_v29 = vpop.eup %3462  ;;  %3474 = vlog2.f32 %v8649_v36 }
 0x2b3   :  { %8640 = vst [vmem:[#allocation288_spill] sm:$0xff] %v5870_v51  ;;  %v3465_v27 = vpop.eup %3464  ;;  %v480_v51 = vld [vmem:[#allocation5 + $0x50] sm:$0xff] }
 0x2b4   :  { %8641 = vst [vmem:[#allocation358_spill] sm:$0xff] %v5872_v43  ;;  %v5891_v43 = vmul.f32 %v8652_v56, %v471_v23  ;;  %v3467_v36 = vpop.eup %3466  ;;  %v8661_v23 = vld [vmem:[#allocation292_spill] sm:$0xff]  ;;  %v8662_v56 = vld [vmem:[#allocation14_spill] sm:$0xff] }
 0x2b5   :  { %8642 = vst [vmem:[#allocation359_spill] sm:$0xff] %v5874_v61  ;;  %v5888_v61 = vmul.f32 %v8650_v58, %v470_v8  ;;  %v481_v8 = vld [vmem:[#allocation5 + $0x58] sm:$0xff]  ;;  %v5902_v58 = vmul.f32 0.6931472, %v3459_v28 }
 0x2b6   :  { %8644 = vst [vmem:[#allocation289_spill] sm:$0xff] %v5877_v38  ;;  %v5897_v38 = vmul.f32 %v8656_v2, %v472_v42  ;;  %v483_v42 = vld [vmem:[#allocation5 + $0x68] sm:$0xff]  ;;  %v5911_v2 = vmul.f32 0.6931472, %v3461_v25  ;;  %v8670_v28 = vld [vmem:[#allocation186_spill] sm:$0xff] }
 0x2b7   :  { %8645 = vst [vmem:[#allocation360_spill] sm:$0xff] %v5879_v6  ;;  %v479_v6 = vld [vmem:[#allocation5 + $0x48] sm:$0xff]  ;;  %v8676_v25 = vld [vmem:[#allocation18_spill] sm:$0xff] }
 0x2b8   :  { %8646 = vst [vmem:[#allocation361_spill] sm:$0xff] %v5881_v26  ;;  %v8655_v26 = vld [vmem:[#allocation291_spill] sm:$0xff] }
 0x2b9   :  { %8648 = vst [vmem:[#allocation162_spill] sm:$0xff] %v5884_v16  ;;  %3476 = vlog2.f32 %v8655_v26  ;;  %v5900_v16 = vmul.f32 %v8658_v33, %v473_v9  ;;  %v3469_v26 = vpop.eup %3468  ;;  %v8667_v9 = vld [vmem:[#allocation293_spill] sm:$0xff]  ;;  %v8668_v33 = vld [vmem:[#allocation16_spill] sm:$0xff] }
 0x2ba   :  { %8651 = vst [vmem:[#allocation290_spill] sm:$0xff] %v5888_v61  ;;  %3478 = vlog2.f32 %v8661_v23  ;;  %v5909_v61 = vmul.f32 %v8664_v11, %v475_v0  ;;  %v3471_v23 = vpop.eup %3470  ;;  %v8673_v0 = vld [vmem:[#allocation294_spill] sm:$0xff]  ;;  %v8674_v11 = vld [vmem:[#allocation17_spill] sm:$0xff] }
 0x2bb   :  { %8653 = vst [vmem:[#allocation184_spill] sm:$0xff] %v5891_v43  ;;  %v5906_v43 = vmul.f32 %v8662_v56, %v474_v15  ;;  %3480 = vlog2.f32 %v8667_v9  ;;  %v485_v15 = vld [vmem:[#allocation5 + $0x78] sm:$0xff]  ;;  %v5920_v56 = vmul.f32 0.6931472, %v3463_v29  ;;  %v3473_v9 = vpop.eup %3472  ;;  %v8682_v29 = vld [vmem:[#allocation187_spill] sm:$0xff] }
 0x2bc   :  { %8654 = vst [vmem:[#allocation11_spill] sm:$0xff] %v5893_v62  ;;  %v482_v62 = vld [vmem:[#allocation5 + $0x60] sm:$0xff]  ;;  %3482 = vlog2.f32 %v8673_v0  ;;  %v3475_v0 = vpop.eup %3474 }
 0x2bd   :  { %8657 = vst [vmem:[#allocation291_spill] sm:$0xff] %v5897_v38  ;;  %v5918_v38 = vmul.f32 %v8670_v28, %v477_v30  ;;  %v8679_v30 = vld [vmem:[#allocation296_spill] sm:$0xff]  ;;  %v8680_v28 = vld [vmem:[#allocation19_spill] sm:$0xff] }
 0x2be   :  { %8659 = vst [vmem:[#allocation12_spill] sm:$0xff] %v5900_v16  ;;  %v5915_v16 = vmul.f32 %v8668_v33, %v476_v32  ;;  %v487_v32 = vld [vmem:[#allocation5 + $0x88] sm:$0xff]  ;;  %v5929_v33 = vmul.f32 0.6931472, %v3465_v27  ;;  %3484 = vlog2.f32 %v8679_v30  ;;  %v8688_v27 = vld [vmem:[#allocation21_spill] sm:$0xff] }
 0x2bf   :  { %8660 = vst [vmem:[#allocation13_spill] sm:$0xff] %v5902_v58  ;;  %v484_v58 = vld [vmem:[#allocation5 + $0x70] sm:$0xff]  ;;  %v3477_v30 = vpop.eup %3476 }
 0x2c0   :  { %8663 = vst [vmem:[#allocation292_spill] sm:$0xff] %v5906_v43  ;;  %v5927_v43 = vmul.f32 %v8676_v25, %v479_v6  ;;  %v8685_v6 = vld [vmem:[#allocation297_spill] sm:$0xff]  ;;  %v8686_v25 = vld [vmem:[#allocation20_spill] sm:$0xff] }
 0x2c1   :  { %8665 = vst [vmem:[#allocation14_spill] sm:$0xff] %v5909_v61  ;;  %v5924_v61 = vmul.f32 %v8674_v11, %v478_v34  ;;  %v489_v34 = vld [vmem:[#allocation5 + $0x98] sm:$0xff]  ;;  %v5938_v11 = vmul.f32 0.6931472, %v3467_v36  ;;  %3486 = vlog2.f32 %v8685_v6  ;;  %v8694_v36 = vld [vmem:[#allocation23_spill] sm:$0xff]  ;;  %v3479_v6 = vpop.eup %3478 }
 0x2c2   :  { %8666 = vst [vmem:[#allocation15_spill] sm:$0xff] %v5911_v2  ;;  %v486_v2 = vld [vmem:[#allocation5 + $0x80] sm:$0xff] }
 0x2c3   :  { %8669 = vst [vmem:[#allocation293_spill] sm:$0xff] %v5915_v16  ;;  %v5936_v16 = vmul.f32 %v8682_v29, %v481_v8  ;;  %v8691_v8 = vld [vmem:[#allocation298_spill] sm:$0xff] }
 0x2c4   :  { %8671 = vst [vmem:[#allocation16_spill] sm:$0xff] %v5918_v38  ;;  %v5933_v38 = vmul.f32 %v8680_v28, %v480_v51  ;;  %v491_v51 = vld [vmem:[#allocation5 + $0xa8] sm:$0xff]  ;;  %v5947_v28 = vmul.f32 0.6931472, %v3469_v26  ;;  %3488 = vlog2.f32 %v8691_v8  ;;  %v8692_v29 = vld [vmem:[#allocation22_spill] sm:$0xff]  ;;  %v8700_v26 = vld [vmem:[#allocation25_spill] sm:$0xff]  ;;  %v3481_v8 = vpop.eup %3480 }
 0x2c5   :  { %8672 = vst [vmem:[#allocation186_spill] sm:$0xff] %v5920_v56  ;;  %v488_v56 = vld [vmem:[#allocation5 + $0x90] sm:$0xff] }
 0x2c6   :  { %8675 = vst [vmem:[#allocation294_spill] sm:$0xff] %v5924_v61  ;;  %v5945_v61 = vmul.f32 %v8688_v27, %v483_v42  ;;  %v8697_v42 = vld [vmem:[#allocation165_spill] sm:$0xff]  ;;  %v8698_v27 = vld [vmem:[#allocation24_spill] sm:$0xff] }
 0x2c7   :  { %8677 = vst [vmem:[#allocation17_spill] sm:$0xff] %v5927_v43  ;;  %v5942_v43 = vmul.f32 %v8686_v25, %v482_v62  ;;  %v493_v62 = vld [vmem:[#allocation5 + $0xb8] sm:$0xff]  ;;  %v5956_v25 = vmul.f32 0.6931472, %v3471_v23  ;;  %3490 = vlog2.f32 %v8697_v42  ;;  %v3483_v42 = vpop.eup %3482 }
 0x2c8   :  { %8678 = vst [vmem:[#allocation18_spill] sm:$0xff] %v5929_v33  ;;  %v490_v33 = vld [vmem:[#allocation5 + $0xa0] sm:$0xff]  ;;  %v8706_v23 = vld [vmem:[#allocation26_spill] sm:$0xff] }
 0x2c9   :  { %8681 = vst [vmem:[#allocation296_spill] sm:$0xff] %v5933_v38  ;;  %v5954_v38 = vmul.f32 %v8694_v36, %v485_v15  ;;  %v8703_v15 = vld [vmem:[#allocation299_spill] sm:$0xff]  ;;  %v8704_v36 = vld [vmem:[#allocation189_spill] sm:$0xff] }
 0x2ca   :  { %8683 = vst [vmem:[#allocation19_spill] sm:$0xff] %v5936_v16  ;;  %v5951_v16 = vmul.f32 %v8692_v29, %v484_v58  ;;  %v495_v58 = vld [vmem:[#allocation5 + $0xc8] sm:$0xff]  ;;  %v5965_v29 = vmul.f32 0.6931472, %v3473_v9  ;;  %3492 = vlog2.f32 %v8703_v15  ;;  %v3485_v15 = vpop.eup %3484 }
 0x2cb   :  { %8684 = vst [vmem:[#allocation187_spill] sm:$0xff] %v5938_v11  ;;  %v492_v11 = vld [vmem:[#allocation5 + $0xb0] sm:$0xff]  ;;  %v8712_v9 = vld [vmem:[#allocation28_spill] sm:$0xff] }
 0x2cc   :  { %8687 = vst [vmem:[#allocation297_spill] sm:$0xff] %v5942_v43  ;;  %v5963_v43 = vmul.f32 %v8700_v26, %v487_v32  ;;  %v8709_v32 = vld [vmem:[#allocation300_spill] sm:$0xff]  ;;  %v8710_v26 = vld [vmem:[#allocation27_spill] sm:$0xff] }
 0x2cd   :  { %8689 = vst [vmem:[#allocation20_spill] sm:$0xff] %v5945_v61  ;;  %v5960_v61 = vmul.f32 %v8698_v27, %v486_v2  ;;  %v497_v2 = vld [vmem:[#allocation5 + $0xd8] sm:$0xff]  ;;  %v5974_v27 = vmul.f32 0.6931472, %v3475_v0  ;;  %3494 = vlog2.f32 %v8709_v32  ;;  %v8718_v0 = vld [vmem:[#allocation29_spill] sm:$0xff]  ;;  %v3487_v32 = vpop.eup %3486 }
 0x2ce   :  { %8690 = vst [vmem:[#allocation21_spill] sm:$0xff] %v5947_v28  ;;  %v494_v28 = vld [vmem:[#allocation5 + $0xc0] sm:$0xff] }
 0x2cf   :  { %8693 = vst [vmem:[#allocation298_spill] sm:$0xff] %v5951_v16  ;;  %v5972_v16 = vmul.f32 %v8706_v23, %v489_v34  ;;  %v8715_v34 = vld [vmem:[#allocation301_spill] sm:$0xff]  ;;  %v8716_v23 = vld [vmem:[#allocation190_spill] sm:$0xff] }
 0x2d0   :  { %8695 = vst [vmem:[#allocation22_spill] sm:$0xff] %v5954_v38  ;;  %v5969_v38 = vmul.f32 %v8704_v36, %v488_v56  ;;  %v499_v56 = vld [vmem:[#allocation5 + $0xe8] sm:$0xff]  ;;  %v5983_v36 = vmul.f32 0.6931472, %v3477_v30  ;;  %3496 = vlog2.f32 %v8715_v34  ;;  %v8724_v30 = vld [vmem:[#allocation31_spill] sm:$0xff]  ;;  %v3489_v34 = vpop.eup %3488 }
 0x2d1   :  { %8696 = vst [vmem:[#allocation23_spill] sm:$0xff] %v5956_v25  ;;  %v496_v25 = vld [vmem:[#allocation5 + $0xd0] sm:$0xff] }
 0x2d2   :  { %8699 = vst [vmem:[#allocation165_spill] sm:$0xff] %v5960_v61  ;;  %v5981_v61 = vmul.f32 %v8712_v9, %v491_v51  ;;  %v8721_v51 = vld [vmem:[#allocation302_spill] sm:$0xff] }
 0x2d3   :  { %8701 = vst [vmem:[#allocation24_spill] sm:$0xff] %v5963_v43  ;;  %v5978_v43 = vmul.f32 %v8710_v26, %v490_v33  ;;  %v501_v33 = vld [vmem:[#allocation5 + $0xf8] sm:$0xff]  ;;  %v5992_v26 = vmul.f32 0.6931472, %v3479_v6  ;;  %3498 = vlog2.f32 %v8721_v51  ;;  %v8730_v6 = vld [vmem:[#allocation33_spill] sm:$0xff]  ;;  %v3491_v51 = vpop.eup %3490 }
 0x2d4   :  { %8702 = vst [vmem:[#allocation25_spill] sm:$0xff] %v5965_v29  ;;  %v498_v29 = vld [vmem:[#allocation5 + $0xe0] sm:$0xff]  ;;  %v8722_v9 = vld [vmem:[#allocation30_spill] sm:$0xff] }
 0x2d5   :  { %8705 = vst [vmem:[#allocation299_spill] sm:$0xff] %v5969_v38  ;;  %v5990_v38 = vmul.f32 %v8718_v0, %v493_v62  ;;  %v8727_v62 = vld [vmem:[#allocation303_spill] sm:$0xff]  ;;  %v8728_v0 = vld [vmem:[#allocation32_spill] sm:$0xff] }
 0x2d6   :  { %8707 = vst [vmem:[#allocation189_spill] sm:$0xff] %v5972_v16  ;;  %v5987_v16 = vmul.f32 %v8716_v23, %v492_v11  ;;  %v503_v11 = vld [vmem:[#allocation5 + $0x108] sm:$0xff]  ;;  %v6001_v23 = vmul.f32 0.6931472, %v3481_v8  ;;  %3500 = vlog2.f32 %v8727_v62  ;;  %v3493_v62 = vpop.eup %3492 }
 0x2d7   :  { %8708 = vst [vmem:[#allocation26_spill] sm:$0xff] %v5974_v27  ;;  %v500_v27 = vld [vmem:[#allocation5 + $0xf0] sm:$0xff]  ;;  %v8736_v8 = vld [vmem:[#allocation192_spill] sm:$0xff] }
 0x2d8   :  { %8711 = vst [vmem:[#allocation300_spill] sm:$0xff] %v5978_v43  ;;  %v5999_v43 = vmul.f32 %v8724_v30, %v495_v58  ;;  %v8733_v58 = vld [vmem:[#allocation305_spill] sm:$0xff]  ;;  %v8734_v30 = vld [vmem:[#allocation34_spill] sm:$0xff] }
 0x2d9   :  { %8713 = vst [vmem:[#allocation27_spill] sm:$0xff] %v5981_v61  ;;  %v5996_v61 = vmul.f32 %v8722_v9, %v494_v28  ;;  %v505_v28 = vld [vmem:[#allocation5 + $0x118] sm:$0xff]  ;;  %v6010_v9 = vmul.f32 0.6931472, %v3483_v42  ;;  %3502 = vlog2.f32 %v8733_v58  ;;  %v8742_v42 = vld [vmem:[#allocation36_spill] sm:$0xff]  ;;  %v3495_v58 = vpop.eup %3494 }
 0x2da   :  { %8714 = vst [vmem:[#allocation28_spill] sm:$0xff] %v5983_v36  ;;  %v502_v36 = vld [vmem:[#allocation5 + $0x100] sm:$0xff] }
 0x2db   :  { %8717 = vst [vmem:[#allocation301_spill] sm:$0xff] %v5987_v16  ;;  %v6008_v16 = vmul.f32 %v8730_v6, %v497_v2  ;;  %v8739_v2 = vld [vmem:[#allocation306_spill] sm:$0xff]  ;;  %v8740_v6 = vld [vmem:[#allocation35_spill] sm:$0xff] }
 0x2dc   :  { %8719 = vst [vmem:[#allocation190_spill] sm:$0xff] %v5990_v38  ;;  %v6005_v38 = vmul.f32 %v8728_v0, %v496_v25  ;;  %v507_v25 = vld [vmem:[#allocation5 + $0x128] sm:$0xff]  ;;  %v6019_v0 = vmul.f32 0.6931472, %v3485_v15  ;;  %3504 = vlog2.f32 %v8739_v2  ;;  %v8748_v15 = vld [vmem:[#allocation193_spill] sm:$0xff]  ;;  %v3497_v2 = vpop.eup %3496 }
 0x2dd   :  { %8720 = vst [vmem:[#allocation29_spill] sm:$0xff] %v5992_v26  ;;  %v504_v26 = vld [vmem:[#allocation5 + $0x110] sm:$0xff] }
 0x2de   :  { %8723 = vst [vmem:[#allocation302_spill] sm:$0xff] %v5996_v61  ;;  %v6017_v61 = vmul.f32 %v8736_v8, %v499_v56  ;;  %v8745_v56 = vld [vmem:[#allocation307_spill] sm:$0xff]  ;;  %v8746_v8 = vld [vmem:[#allocation37_spill] sm:$0xff] }
 0x2df   :  { %8725 = vst [vmem:[#allocation30_spill] sm:$0xff] %v5999_v43  ;;  %v6014_v43 = vmul.f32 %v8734_v30, %v498_v29  ;;  %v509_v29 = vld [vmem:[#allocation5 + $0x138] sm:$0xff]  ;;  %v6028_v30 = vmul.f32 0.6931472, %v3487_v32  ;;  %3506 = vlog2.f32 %v8745_v56  ;;  %v8754_v32 = vld [vmem:[#allocation39_spill] sm:$0xff]  ;;  %v3499_v56 = vpop.eup %3498 }
 0x2e0   :  { %8726 = vst [vmem:[#allocation31_spill] sm:$0xff] %v6001_v23  ;;  %v506_v23 = vld [vmem:[#allocation5 + $0x120] sm:$0xff] }
 0x2e1   :  { %8729 = vst [vmem:[#allocation303_spill] sm:$0xff] %v6005_v38  ;;  %v6026_v38 = vmul.f32 %v8742_v42, %v501_v33  ;;  %v8751_v33 = vld [vmem:[#allocation168_spill] sm:$0xff]  ;;  %v8752_v42 = vld [vmem:[#allocation38_spill] sm:$0xff] }
 0x2e2   :  { %8731 = vst [vmem:[#allocation32_spill] sm:$0xff] %v6008_v16  ;;  %v6023_v16 = vmul.f32 %v8740_v6, %v500_v27  ;;  %v511_v27 = vld [vmem:[#allocation5 + $0x148] sm:$0xff]  ;;  %v6037_v6 = vmul.f32 0.6931472, %v3489_v34  ;;  %3508 = vlog2.f32 %v8751_v33  ;;  %v8760_v34 = vld [vmem:[#allocation41_spill] sm:$0xff]  ;;  %v3501_v33 = vpop.eup %3500 }
 0x2e3   :  { %8732 = vst [vmem:[#allocation33_spill] sm:$0xff] %v6010_v9  ;;  %v508_v9 = vld [vmem:[#allocation5 + $0x130] sm:$0xff] }
 0x2e4   :  { %8735 = vst [vmem:[#allocation305_spill] sm:$0xff] %v6014_v43  ;;  %v6035_v43 = vmul.f32 %v8748_v15, %v503_v11  ;;  %v8757_v11 = vld [vmem:[#allocation308_spill] sm:$0xff] }
 0x2e5   :  { %8737 = vst [vmem:[#allocation34_spill] sm:$0xff] %v6017_v61  ;;  %v6032_v61 = vmul.f32 %v8746_v8, %v502_v36  ;;  %v513_v36 = vld [vmem:[#allocation5 + $0x158] sm:$0xff]  ;;  %v6046_v8 = vmul.f32 0.6931472, %v3491_v51  ;;  %3510 = vlog2.f32 %v8757_v11  ;;  %v8758_v15 = vld [vmem:[#allocation40_spill] sm:$0xff]  ;;  %v8766_v51 = vld [vmem:[#allocation43_spill] sm:$0xff]  ;;  %v3503_v11 = vpop.eup %3502 }
 0x2e6   :  { %8738 = vst [vmem:[#allocation192_spill] sm:$0xff] %v6019_v0  ;;  %v510_v0 = vld [vmem:[#allocation5 + $0x140] sm:$0xff] }
 0x2e7   :  { %8741 = vst [vmem:[#allocation306_spill] sm:$0xff] %v6023_v16  ;;  %v6044_v16 = vmul.f32 %v8754_v32, %v505_v28  ;;  %v8763_v28 = vld [vmem:[#allocation309_spill] sm:$0xff]  ;;  %v8764_v32 = vld [vmem:[#allocation42_spill] sm:$0xff] }
 0x2e8   :  { %8743 = vst [vmem:[#allocation35_spill] sm:$0xff] %v6026_v38  ;;  %v6041_v38 = vmul.f32 %v8752_v42, %v504_v26  ;;  %v515_v26 = vld [vmem:[#allocation5 + $0x168] sm:$0xff]  ;;  %v6055_v42 = vmul.f32 0.6931472, %v3493_v62  ;;  %3512 = vlog2.f32 %v8763_v28  ;;  %v3505_v28 = vpop.eup %3504 }
 0x2e9   :  { %8744 = vst [vmem:[#allocation36_spill] sm:$0xff] %v6028_v30  ;;  %v512_v30 = vld [vmem:[#allocation5 + $0x150] sm:$0xff]  ;;  %v8772_v62 = vld [vmem:[#allocation44_spill] sm:$0xff] }
 0x2ea   :  { %8747 = vst [vmem:[#allocation307_spill] sm:$0xff] %v6032_v61  ;;  %v6053_v61 = vmul.f32 %v8760_v34, %v507_v25  ;;  %v8769_v25 = vld [vmem:[#allocation310_spill] sm:$0xff]  ;;  %v8770_v34 = vld [vmem:[#allocation195_spill] sm:$0xff] }
 0x2eb   :  { %8749 = vst [vmem:[#allocation37_spill] sm:$0xff] %v6035_v43  ;;  %v6050_v43 = vmul.f32 %v8758_v15, %v506_v23  ;;  %v517_v23 = vld [vmem:[#allocation5 + $0x178] sm:$0xff]  ;;  %v6064_v15 = vmul.f32 0.6931472, %v3495_v58  ;;  %3514 = vlog2.f32 %v8769_v25  ;;  %v3507_v25 = vpop.eup %3506 }
 0x2ec   :  { %8750 = vst [vmem:[#allocation193_spill] sm:$0xff] %v6037_v6  ;;  %v514_v6 = vld [vmem:[#allocation5 + $0x160] sm:$0xff]  ;;  %v8778_v58 = vld [vmem:[#allocation46_spill] sm:$0xff] }
 0x2ed   :  { %8753 = vst [vmem:[#allocation168_spill] sm:$0xff] %v6041_v38  ;;  %v6062_v38 = vmul.f32 %v8766_v51, %v509_v29  ;;  %v8775_v29 = vld [vmem:[#allocation311_spill] sm:$0xff]  ;;  %v8776_v51 = vld [vmem:[#allocation45_spill] sm:$0xff] }
 0x2ee   :  { %8755 = vst [vmem:[#allocation38_spill] sm:$0xff] %v6044_v16  ;;  %v6059_v16 = vmul.f32 %v8764_v32, %v508_v9  ;;  %v519_v9 = vld [vmem:[#allocation5 + $0x188] sm:$0xff]  ;;  %v6073_v32 = vmul.f32 0.6931472, %v3497_v2  ;;  %3516 = vlog2.f32 %v8775_v29  ;;  %v8784_v2 = vld [vmem:[#allocation47_spill] sm:$0xff]  ;;  %v3509_v29 = vpop.eup %3508 }
 0x2ef   :  { %8756 = vst [vmem:[#allocation39_spill] sm:$0xff] %v6046_v8  ;;  %v516_v8 = vld [vmem:[#allocation5 + $0x170] sm:$0xff] }
 0x2f0   :  { %8759 = vst [vmem:[#allocation308_spill] sm:$0xff] %v6050_v43  ;;  %v6071_v43 = vmul.f32 %v8772_v62, %v511_v27  ;;  %v8781_v27 = vld [vmem:[#allocation312_spill] sm:$0xff] }
 0x2f1   :  { %8761 = vst [vmem:[#allocation40_spill] sm:$0xff] %v6053_v61  ;;  %v6068_v61 = vmul.f32 %v8770_v34, %v510_v0  ;;  %v521_v0 = vld [vmem:[#allocation5 + $0x198] sm:$0xff]  ;;  %v6082_v34 = vmul.f32 0.6931472, %v3499_v56  ;;  %3518 = vlog2.f32 %v8781_v27  ;;  %v8782_v62 = vld [vmem:[#allocation196_spill] sm:$0xff]  ;;  %v8790_v56 = vld [vmem:[#allocation49_spill] sm:$0xff]  ;;  %v3511_v27 = vpop.eup %3510 }
 0x2f2   :  { %8762 = vst [vmem:[#allocation41_spill] sm:$0xff] %v6055_v42  ;;  %v518_v42 = vld [vmem:[#allocation5 + $0x180] sm:$0xff] }
 0x2f3   :  { %8765 = vst [vmem:[#allocation309_spill] sm:$0xff] %v6059_v16  ;;  %v6080_v16 = vmul.f32 %v8778_v58, %v513_v36  ;;  %v8787_v36 = vld [vmem:[#allocation314_spill] sm:$0xff]  ;;  %v8788_v58 = vld [vmem:[#allocation48_spill] sm:$0xff] }
 0x2f4   :  { %8767 = vst [vmem:[#allocation42_spill] sm:$0xff] %v6062_v38  ;;  %v6077_v38 = vmul.f32 %v8776_v51, %v512_v30  ;;  %v523_v30 = vld [vmem:[#allocation5 + $0x1a8] sm:$0xff]  ;;  %v6091_v51 = vmul.f32 0.6931472, %v3501_v33  ;;  %3520 = vlog2.f32 %v8787_v36  ;;  %v8796_v33 = vld [vmem:[#allocation51_spill] sm:$0xff]  ;;  %v3513_v36 = vpop.eup %3512 }
 0x2f5   :  { %8768 = vst [vmem:[#allocation43_spill] sm:$0xff] %v6064_v15  ;;  %v520_v15 = vld [vmem:[#allocation5 + $0x190] sm:$0xff] }
 0x2f6   :  { %8771 = vst [vmem:[#allocation310_spill] sm:$0xff] %v6068_v61  ;;  %v6089_v61 = vmul.f32 %v8784_v2, %v515_v26  ;;  %v8793_v26 = vld [vmem:[#allocation315_spill] sm:$0xff]  ;;  %v8794_v2 = vld [vmem:[#allocation50_spill] sm:$0xff] }
 0x2f7   :  { %8773 = vst [vmem:[#allocation195_spill] sm:$0xff] %v6071_v43  ;;  %v6086_v43 = vmul.f32 %v8782_v62, %v514_v6  ;;  %v525_v6 = vld [vmem:[#allocation5 + $0x1b8] sm:$0xff]  ;;  %v6100_v62 = vmul.f32 0.6931472, %v3503_v11  ;;  %3522 = vlog2.f32 %v8793_v26  ;;  %v8802_v11 = vld [vmem:[#allocation53_spill] sm:$0xff]  ;;  %v3515_v26 = vpop.eup %3514 }
 0x2f8   :  { %8774 = vst [vmem:[#allocation44_spill] sm:$0xff] %v6073_v32  ;;  %v522_v32 = vld [vmem:[#allocation5 + $0x1a0] sm:$0xff] }
 0x2f9   :  { %8777 = vst [vmem:[#allocation311_spill] sm:$0xff] %v6077_v38  ;;  %v6098_v38 = vmul.f32 %v8790_v56, %v517_v23  ;;  %v8799_v23 = vld [vmem:[#allocation316_spill] sm:$0xff] }
 0x2fa   :  { %8779 = vst [vmem:[#allocation45_spill] sm:$0xff] %v6080_v16  ;;  %v6095_v16 = vmul.f32 %v8788_v58, %v516_v8  ;;  %v527_v8 = vld [vmem:[#allocation5 + $0x1c8] sm:$0xff]  ;;  %v6109_v58 = vmul.f32 0.6931472, %v3505_v28  ;;  %3524 = vlog2.f32 %v8799_v23  ;;  %v8808_v28 = vld [vmem:[#allocation55_spill] sm:$0xff]  ;;  %v3517_v23 = vpop.eup %3516 }
 0x2fb   :  { %8780 = vst [vmem:[#allocation46_spill] sm:$0xff] %v6082_v34  ;;  %v524_v34 = vld [vmem:[#allocation5 + $0x1b0] sm:$0xff]  ;;  %v8800_v56 = vld [vmem:[#allocation52_spill] sm:$0xff] }
 0x2fc   :  { %8783 = vst [vmem:[#allocation312_spill] sm:$0xff] %v6086_v43  ;;  %v6107_v43 = vmul.f32 %v8796_v33, %v519_v9  ;;  %v8805_v9 = vld [vmem:[#allocation171_spill] sm:$0xff]  ;;  %v8806_v33 = vld [vmem:[#allocation54_spill] sm:$0xff] }
 0x2fd   :  { %8785 = vst [vmem:[#allocation196_spill] sm:$0xff] %v6089_v61  ;;  %v6104_v61 = vmul.f32 %v8794_v2, %v518_v42  ;;  %v529_v42 = vld [vmem:[#allocation5 + $0x1d8] sm:$0xff]  ;;  %v6118_v2 = vmul.f32 0.6931472, %v3507_v25  ;;  %3526 = vlog2.f32 %v8805_v9  ;;  %v8814_v25 = vld [vmem:[#allocation56_spill] sm:$0xff]  ;;  %v3519_v9 = vpop.eup %3518 }
 0x2fe   :  { %8786 = vst [vmem:[#allocation47_spill] sm:$0xff] %v6091_v51  ;;  %v526_v51 = vld [vmem:[#allocation5 + $0x1c0] sm:$0xff] }
 0x2ff   :  { %8789 = vst [vmem:[#allocation314_spill] sm:$0xff] %v6095_v16  ;;  %v6116_v16 = vmul.f32 %v8802_v11, %v521_v0  ;;  %v8811_v0 = vld [vmem:[#allocation317_spill] sm:$0xff]  ;;  %v8812_v11 = vld [vmem:[#allocation199_spill] sm:$0xff] }
 0x300   :  { %8791 = vst [vmem:[#allocation48_spill] sm:$0xff] %v6098_v38  ;;  %v6113_v38 = vmul.f32 %v8800_v56, %v520_v15  ;;  %v531_v15 = vld [vmem:[#allocation5 + $0x1e8] sm:$0xff]  ;;  %v6127_v56 = vmul.f32 0.6931472, %v3509_v29  ;;  %3528 = vlog2.f32 %v8811_v0  ;;  %v8820_v29 = vld [vmem:[#allocation59_spill] sm:$0xff]  ;;  %v3521_v0 = vpop.eup %3520 }
 0x301   :  { %8792 = vst [vmem:[#allocation49_spill] sm:$0xff] %v6100_v62  ;;  %v528_v62 = vld [vmem:[#allocation5 + $0x1d0] sm:$0xff] }
 0x302   :  { %8795 = vst [vmem:[#allocation315_spill] sm:$0xff] %v6104_v61  ;;  %v6125_v61 = vmul.f32 %v8808_v28, %v523_v30  ;;  %v8817_v30 = vld [vmem:[#allocation318_spill] sm:$0xff]  ;;  %v8818_v28 = vld [vmem:[#allocation57_spill] sm:$0xff] }
 0x303   :  { %8797 = vst [vmem:[#allocation50_spill] sm:$0xff] %v6107_v43  ;;  %v6122_v43 = vmul.f32 %v8806_v33, %v522_v32  ;;  %v533_v32 = vld [vmem:[#allocation5 + $0x1f8] sm:$0xff]  ;;  %v6136_v33 = vmul.f32 0.6931472, %v3511_v27  ;;  %3530 = vlog2.f32 %v8817_v30  ;;  %v8826_v27 = vld [vmem:[#allocation61_spill] sm:$0xff]  ;;  %v3523_v30 = vpop.eup %3522 }
 0x304   :  { %8798 = vst [vmem:[#allocation51_spill] sm:$0xff] %v6109_v58  ;;  %v530_v58 = vld [vmem:[#allocation5 + $0x1e0] sm:$0xff] }
 0x305   :  { %8801 = vst [vmem:[#allocation316_spill] sm:$0xff] %v6113_v38  ;;  %v6134_v38 = vmul.f32 %v8814_v25, %v525_v6  ;;  %v8823_v6 = vld [vmem:[#allocation319_spill] sm:$0xff]  ;;  %v8824_v25 = vld [vmem:[#allocation60_spill] sm:$0xff] }
 0x306   :  { %8803 = vst [vmem:[#allocation52_spill] sm:$0xff] %v6116_v16  ;;  %v6131_v16 = vmul.f32 %v8812_v11, %v524_v34  ;;  %v535_v34 = vld [vmem:[#allocation5 + $0x208] sm:$0xff]  ;;  %v6145_v11 = vmul.f32 0.6931472, %v3513_v36  ;;  %3532 = vlog2.f32 %v8823_v6  ;;  %v8832_v36 = vld [vmem:[#allocation63_spill] sm:$0xff]  ;;  %v3525_v6 = vpop.eup %3524 }
 0x307   :  { %8804 = vst [vmem:[#allocation53_spill] sm:$0xff] %v6118_v2  ;;  %v532_v2 = vld [vmem:[#allocation5 + $0x1f0] sm:$0xff] }
 0x308   :  { %8807 = vst [vmem:[#allocation171_spill] sm:$0xff] %v6122_v43  ;;  %v6143_v43 = vmul.f32 %v8820_v29, %v527_v8  ;;  %v8829_v8 = vld [vmem:[#allocation320_spill] sm:$0xff]  ;;  %v8830_v29 = vld [vmem:[#allocation62_spill] sm:$0xff] }
 0x309   :  { %8809 = vst [vmem:[#allocation54_spill] sm:$0xff] %v6125_v61  ;;  %v6140_v61 = vmul.f32 %v8818_v28, %v526_v51  ;;  %v537_v51 = vld [vmem:[#allocation5 + $0x218] sm:$0xff]  ;;  %v6154_v28 = vmul.f32 0.6931472, %v3515_v26  ;;  %3534 = vlog2.f32 %v8829_v8  ;;  %v3527_v8 = vpop.eup %3526 }
 0x30a   :  { %8810 = vst [vmem:[#allocation55_spill] sm:$0xff] %v6127_v56  ;;  %v534_v56 = vld [vmem:[#allocation5 + $0x200] sm:$0xff]  ;;  %v8838_v26 = vld [vmem:[#allocation202_spill] sm:$0xff] }
 0x30b   :  { %8813 = vst [vmem:[#allocation317_spill] sm:$0xff] %v6131_v16  ;;  %v6152_v16 = vmul.f32 %v8826_v27, %v529_v42  ;;  %v8835_v42 = vld [vmem:[#allocation321_spill] sm:$0xff]  ;;  %v8836_v27 = vld [vmem:[#allocation64_spill] sm:$0xff] }
 0x30c   :  { %8815 = vst [vmem:[#allocation199_spill] sm:$0xff] %v6134_v38  ;;  %v6149_v38 = vmul.f32 %v8824_v25, %v528_v62  ;;  %v539_v62 = vld [vmem:[#allocation5 + $0x228] sm:$0xff]  ;;  %v6163_v25 = vmul.f32 0.6931472, %v3517_v23  ;;  %3536 = vlog2.f32 %v8835_v42  ;;  %v8844_v23 = vld [vmem:[#allocation66_spill] sm:$0xff]  ;;  %v3529_v42 = vpop.eup %3528 }
 0x30d   :  { %8816 = vst [vmem:[#allocation56_spill] sm:$0xff] %v6136_v33  ;;  %v536_v33 = vld [vmem:[#allocation5 + $0x210] sm:$0xff] }
 0x30e   :  { %8819 = vst [vmem:[#allocation318_spill] sm:$0xff] %v6140_v61  ;;  %v6161_v61 = vmul.f32 %v8832_v36, %v531_v15  ;;  %v8841_v15 = vld [vmem:[#allocation323_spill] sm:$0xff]  ;;  %v8842_v36 = vld [vmem:[#allocation65_spill] sm:$0xff] }
 0x30f   :  { %8821 = vst [vmem:[#allocation57_spill] sm:$0xff] %v6143_v43  ;;  %v6158_v43 = vmul.f32 %v8830_v29, %v530_v58  ;;  %v541_v58 = vld [vmem:[#allocation5 + $0x238] sm:$0xff]  ;;  %v6172_v29 = vmul.f32 0.6931472, %v3519_v9  ;;  %3538 = vlog2.f32 %v8841_v15  ;;  %v8850_v9 = vld [vmem:[#allocation69_spill] sm:$0xff]  ;;  %v3531_v15 = vpop.eup %3530 }
 0x310   :  { %8822 = vst [vmem:[#allocation59_spill] sm:$0xff] %v6145_v11  ;;  %v538_v11 = vld [vmem:[#allocation5 + $0x220] sm:$0xff] }
 0x311   :  { %8825 = vst [vmem:[#allocation319_spill] sm:$0xff] %v6149_v38  ;;  %v6170_v38 = vmul.f32 %v8838_v26, %v533_v32  ;;  %v8847_v32 = vld [vmem:[#allocation324_spill] sm:$0xff] }
 0x312   :  { %8827 = vst [vmem:[#allocation60_spill] sm:$0xff] %v6152_v16  ;;  %v6167_v16 = vmul.f32 %v8836_v27, %v532_v2  ;;  %v543_v2 = vld [vmem:[#allocation5 + $0x248] sm:$0xff]  ;;  %v6181_v27 = vmul.f32 0.6931472, %v3521_v0  ;;  %3540 = vlog2.f32 %v8847_v32  ;;  %v8856_v0 = vld [vmem:[#allocation71_spill] sm:$0xff]  ;;  %v3533_v32 = vpop.eup %3532 }
 0x313   :  { %8828 = vst [vmem:[#allocation61_spill] sm:$0xff] %v6154_v28  ;;  %v540_v28 = vld [vmem:[#allocation5 + $0x230] sm:$0xff]  ;;  %v8848_v26 = vld [vmem:[#allocation68_spill] sm:$0xff] }
 0x314   :  { %8831 = vst [vmem:[#allocation320_spill] sm:$0xff] %v6158_v43  ;;  %v6179_v43 = vmul.f32 %v8844_v23, %v535_v34  ;;  %v8853_v34 = vld [vmem:[#allocation325_spill] sm:$0xff]  ;;  %v8854_v23 = vld [vmem:[#allocation70_spill] sm:$0xff] }
 0x315   :  { %8833 = vst [vmem:[#allocation62_spill] sm:$0xff] %v6161_v61  ;;  %v6176_v61 = vmul.f32 %v8842_v36, %v534_v56  ;;  %v545_v56 = vld [vmem:[#allocation5 + $0x258] sm:$0xff]  ;;  %v6190_v36 = vmul.f32 0.6931472, %v3523_v30  ;;  %3542 = vlog2.f32 %v8853_v34  ;;  %v8862_v30 = vld [vmem:[#allocation73_spill] sm:$0xff]  ;;  %v3535_v34 = vpop.eup %3534 }
 0x316   :  { %8834 = vst [vmem:[#allocation63_spill] sm:$0xff] %v6163_v25  ;;  %v542_v25 = vld [vmem:[#allocation5 + $0x240] sm:$0xff] }
 0x317   :  { %8837 = vst [vmem:[#allocation321_spill] sm:$0xff] %v6167_v16  ;;  %v6188_v16 = vmul.f32 %v8850_v9, %v537_v51  ;;  %v8859_v51 = vld [vmem:[#allocation174_spill] sm:$0xff]  ;;  %v8860_v9 = vld [vmem:[#allocation72_spill] sm:$0xff] }
 0x318   :  { %8839 = vst [vmem:[#allocation64_spill] sm:$0xff] %v6170_v38  ;;  %v6185_v38 = vmul.f32 %v8848_v26, %v536_v33  ;;  %v547_v33 = vld [vmem:[#allocation5 + $0x268] sm:$0xff]  ;;  %v6199_v26 = vmul.f32 0.6931472, %v3525_v6  ;;  %3544 = vlog2.f32 %v8859_v51  ;;  %v8868_v6 = vld [vmem:[#allocation74_spill] sm:$0xff]  ;;  %v3537_v51 = vpop.eup %3536 }
 0x319   :  { %8840 = vst [vmem:[#allocation202_spill] sm:$0xff] %v6172_v29  ;;  %v544_v29 = vld [vmem:[#allocation5 + $0x250] sm:$0xff] }
 0x31a   :  { %8843 = vst [vmem:[#allocation323_spill] sm:$0xff] %v6176_v61  ;;  %v6197_v61 = vmul.f32 %v8856_v0, %v539_v62  ;;  %v8865_v62 = vld [vmem:[#allocation326_spill] sm:$0xff]  ;;  %v8866_v0 = vld [vmem:[#allocation205_spill] sm:$0xff] }
 0x31b   :  { %8845 = vst [vmem:[#allocation65_spill] sm:$0xff] %v6179_v43  ;;  %v6194_v43 = vmul.f32 %v8854_v23, %v538_v11  ;;  %v549_v11 = vld [vmem:[#allocation5 + $0x278] sm:$0xff]  ;;  %v6208_v23 = vmul.f32 0.6931472, %v3527_v8  ;;  %3546 = vlog2.f32 %v8865_v62  ;;  %v8874_v8 = vld [vmem:[#allocation77_spill] sm:$0xff]  ;;  %v3539_v62 = vpop.eup %3538 }
 0x31c   :  { %8846 = vst [vmem:[#allocation66_spill] sm:$0xff] %v6181_v27  ;;  %v546_v27 = vld [vmem:[#allocation5 + $0x260] sm:$0xff] }
 0x31d   :  { %8849 = vst [vmem:[#allocation324_spill] sm:$0xff] %v6185_v38  ;;  %v6206_v38 = vmul.f32 %v8862_v30, %v541_v58  ;;  %v8871_v58 = vld [vmem:[#allocation327_spill] sm:$0xff] }
 0x31e   :  { %8851 = vst [vmem:[#allocation68_spill] sm:$0xff] %v6188_v16  ;;  %v6203_v16 = vmul.f32 %v8860_v9, %v540_v28  ;;  %v551_v28 = vld [vmem:[#allocation5 + $0x288] sm:$0xff]  ;;  %v6217_v9 = vmul.f32 0.6931472, %v3529_v42  ;;  %3548 = vlog2.f32 %v8871_v58  ;;  %v8872_v30 = vld [vmem:[#allocation75_spill] sm:$0xff]  ;;  %v3541_v58 = vpop.eup %3540 }
 0x31f   :  { %8852 = vst [vmem:[#allocation69_spill] sm:$0xff] %v6190_v36  ;;  %v548_v36 = vld [vmem:[#allocation5 + $0x270] sm:$0xff]  ;;  %v8880_v42 = vld [vmem:[#allocation79_spill] sm:$0xff] }
 0x320   :  { %8855 = vst [vmem:[#allocation325_spill] sm:$0xff] %v6194_v43  ;;  %v6215_v43 = vmul.f32 %v8868_v6, %v543_v2  ;;  %v8877_v2 = vld [vmem:[#allocation328_spill] sm:$0xff]  ;;  %v8878_v6 = vld [vmem:[#allocation78_spill] sm:$0xff] }
 0x321   :  { %8857 = vst [vmem:[#allocation70_spill] sm:$0xff] %v6197_v61  ;;  %v6212_v61 = vmul.f32 %v8866_v0, %v542_v25  ;;  %v553_v25 = vld [vmem:[#allocation5 + $0x298] sm:$0xff]  ;;  %v6226_v0 = vmul.f32 0.6931472, %v3531_v15  ;;  %3550 = vlog2.f32 %v8877_v2  ;;  %v8886_v15 = vld [vmem:[#allocation81_spill] sm:$0xff]  ;;  %v3543_v2 = vpop.eup %3542 }
 0x322   :  { %8858 = vst [vmem:[#allocation71_spill] sm:$0xff] %v6199_v26  ;;  %v550_v26 = vld [vmem:[#allocation5 + $0x280] sm:$0xff] }
 0x323   :  { %8861 = vst [vmem:[#allocation174_spill] sm:$0xff] %v6203_v16  ;;  %v6224_v16 = vmul.f32 %v8874_v8, %v545_v56  ;;  %v8883_v56 = vld [vmem:[#allocation329_spill] sm:$0xff]  ;;  %v8884_v8 = vld [vmem:[#allocation80_spill] sm:$0xff] }
 0x324   :  { %8863 = vst [vmem:[#allocation72_spill] sm:$0xff] %v6206_v38  ;;  %v6221_v38 = vmul.f32 %v8872_v30, %v544_v29  ;;  %v555_v29 = vld [vmem:[#allocation5 + $0x2a8] sm:$0xff]  ;;  %v6235_v30 = vmul.f32 0.6931472, %v3533_v32  ;;  %3552 = vlog2.f32 %v8883_v56  ;;  %v3545_v56 = vpop.eup %3544 }
 0x325   :  { %8864 = vst [vmem:[#allocation73_spill] sm:$0xff] %v6208_v23  ;;  %v552_v23 = vld [vmem:[#allocation5 + $0x290] sm:$0xff]  ;;  %v8892_v32 = vld [vmem:[#allocation208_spill] sm:$0xff] }
 0x326   :  { %8867 = vst [vmem:[#allocation326_spill] sm:$0xff] %v6212_v61  ;;  %v6233_v61 = vmul.f32 %v8880_v42, %v547_v33  ;;  %v8889_v33 = vld [vmem:[#allocation330_spill] sm:$0xff] }
 0x327   :  { %8869 = vst [vmem:[#allocation205_spill] sm:$0xff] %v6215_v43  ;;  %v6230_v43 = vmul.f32 %v8878_v6, %v546_v27  ;;  %v557_v27 = vld [vmem:[#allocation5 + $0x2b8] sm:$0xff]  ;;  %v6244_v6 = vmul.f32 0.6931472, %v3535_v34  ;;  %3554 = vlog2.f32 %v8889_v33  ;;  %v8898_v34 = vld [vmem:[#allocation84_spill] sm:$0xff]  ;;  %v3547_v33 = vpop.eup %3546 }
 0x328   :  { %8870 = vst [vmem:[#allocation74_spill] sm:$0xff] %v6217_v9  ;;  %v554_v9 = vld [vmem:[#allocation5 + $0x2a0] sm:$0xff]  ;;  %v8890_v42 = vld [vmem:[#allocation82_spill] sm:$0xff] }
 0x329   :  { %8873 = vst [vmem:[#allocation327_spill] sm:$0xff] %v6221_v38  ;;  %v6242_v38 = vmul.f32 %v8886_v15, %v549_v11  ;;  %v8895_v11 = vld [vmem:[#allocation332_spill] sm:$0xff]  ;;  %v8896_v15 = vld [vmem:[#allocation83_spill] sm:$0xff] }
 0x32a   :  { %8875 = vst [vmem:[#allocation75_spill] sm:$0xff] %v6224_v16  ;;  %v6239_v16 = vmul.f32 %v8884_v8, %v548_v36  ;;  %v559_v36 = vld [vmem:[#allocation5 + $0x2c8] sm:$0xff]  ;;  %v6253_v8 = vmul.f32 0.6931472, %v3537_v51  ;;  %3556 = vlog2.f32 %v8895_v11  ;;  %v8904_v51 = vld [vmem:[#allocation87_spill] sm:$0xff]  ;;  %v3549_v11 = vpop.eup %3548 }
 0x32b   :  { %8876 = vst [vmem:[#allocation77_spill] sm:$0xff] %v6226_v0  ;;  %v556_v0 = vld [vmem:[#allocation5 + $0x2b0] sm:$0xff] }
 0x32c   :  { %8879 = vst [vmem:[#allocation328_spill] sm:$0xff] %v6230_v43  ;;  %v6251_v43 = vmul.f32 %v8892_v32, %v551_v28  ;;  %v8901_v28 = vld [vmem:[#allocation333_spill] sm:$0xff]  ;;  %v8902_v32 = vld [vmem:[#allocation86_spill] sm:$0xff] }
 0x32d   :  { %8881 = vst [vmem:[#allocation78_spill] sm:$0xff] %v6233_v61  ;;  %v6248_v61 = vmul.f32 %v8890_v42, %v550_v26  ;;  %v561_v26 = vld [vmem:[#allocation5 + $0x2d8] sm:$0xff]  ;;  %v6262_v42 = vmul.f32 0.6931472, %v3539_v62  ;;  %3558 = vlog2.f32 %v8901_v28  ;;  %v8910_v62 = vld [vmem:[#allocation89_spill] sm:$0xff]  ;;  %v3551_v28 = vpop.eup %3550 }
 0x32e   :  { %8882 = vst [vmem:[#allocation79_spill] sm:$0xff] %v6235_v30  ;;  %v558_v30 = vld [vmem:[#allocation5 + $0x2c0] sm:$0xff] }
 0x32f   :  { %8885 = vst [vmem:[#allocation329_spill] sm:$0xff] %v6239_v16  ;;  %v6260_v16 = vmul.f32 %v8898_v34, %v553_v25  ;;  %v8907_v25 = vld [vmem:[#allocation334_spill] sm:$0xff]  ;;  %v8908_v34 = vld [vmem:[#allocation88_spill] sm:$0xff] }
 0x330   :  { %8887 = vst [vmem:[#allocation80_spill] sm:$0xff] %v6242_v38  ;;  %v6257_v38 = vmul.f32 %v8896_v15, %v552_v23  ;;  %v563_v23 = vld [vmem:[#allocation5 + $0x2e8] sm:$0xff]  ;;  %v6271_v15 = vmul.f32 0.6931472, %v3541_v58  ;;  %3560 = vlog2.f32 %v8907_v25  ;;  %v8916_v58 = vld [vmem:[#allocation91_spill] sm:$0xff]  ;;  %v3553_v25 = vpop.eup %3552 }
 0x331   :  { %8888 = vst [vmem:[#allocation81_spill] sm:$0xff] %v6244_v6  ;;  %v560_v6 = vld [vmem:[#allocation5 + $0x2d0] sm:$0xff] }
 0x332   :  { %8891 = vst [vmem:[#allocation330_spill] sm:$0xff] %v6248_v61  ;;  %v6269_v61 = vmul.f32 %v8904_v51, %v555_v29  ;;  %v8913_v29 = vld [vmem:[#allocation177_spill] sm:$0xff]  ;;  %v8914_v51 = vld [vmem:[#allocation90_spill] sm:$0xff] }
 0x333   :  { %8893 = vst [vmem:[#allocation82_spill] sm:$0xff] %v6251_v43  ;;  %v6266_v43 = vmul.f32 %v8902_v32, %v554_v9  ;;  %v565_v9 = vld [vmem:[#allocation5 + $0x2f8] sm:$0xff]  ;;  %v6280_v32 = vmul.f32 0.6931472, %v3543_v2  ;;  %3562 = vlog2.f32 %v8913_v29  ;;  %v8922_v2 = vld [vmem:[#allocation92_spill] sm:$0xff]  ;;  %v3555_v29 = vpop.eup %3554 }
 0x334   :  { %8894 = vst [vmem:[#allocation208_spill] sm:$0xff] %v6253_v8  ;;  %v562_v8 = vld [vmem:[#allocation5 + $0x2e0] sm:$0xff] }
 0x335   :  { %8897 = vst [vmem:[#allocation332_spill] sm:$0xff] %v6257_v38  ;;  %v6278_v38 = vmul.f32 %v8910_v62, %v557_v27  ;;  %v8919_v27 = vld [vmem:[#allocation335_spill] sm:$0xff] }
 0x336   :  { %8899 = vst [vmem:[#allocation83_spill] sm:$0xff] %v6260_v16  ;;  %v6275_v16 = vmul.f32 %v8908_v34, %v556_v0  ;;  %v567_v0 = vld [vmem:[#allocation5 + $0x308] sm:$0xff]  ;;  %v6289_v34 = vmul.f32 0.6931472, %v3545_v56  ;;  %3564 = vlog2.f32 %v8919_v27  ;;  %v8920_v62 = vld [vmem:[#allocation211_spill] sm:$0xff]  ;;  %v3557_v27 = vpop.eup %3556 }
 0x337   :  { %8900 = vst [vmem:[#allocation84_spill] sm:$0xff] %v6262_v42  ;;  %v564_v42 = vld [vmem:[#allocation5 + $0x2f0] sm:$0xff]  ;;  %v8928_v56 = vld [vmem:[#allocation95_spill] sm:$0xff] }
 0x338   :  { %8903 = vst [vmem:[#allocation333_spill] sm:$0xff] %v6266_v43  ;;  %v6287_v43 = vmul.f32 %v8916_v58, %v559_v36  ;;  %v8925_v36 = vld [vmem:[#allocation336_spill] sm:$0xff]  ;;  %v8926_v58 = vld [vmem:[#allocation93_spill] sm:$0xff] }
 0x339   :  { %8905 = vst [vmem:[#allocation86_spill] sm:$0xff] %v6269_v61  ;;  %v6284_v61 = vmul.f32 %v8914_v51, %v558_v30  ;;  %v569_v30 = vld [vmem:[#allocation5 + $0x318] sm:$0xff]  ;;  %v6298_v51 = vmul.f32 0.6931472, %v3547_v33  ;;  %3566 = vlog2.f32 %v8925_v36  ;;  %v8934_v33 = vld [vmem:[#allocation97_spill] sm:$0xff]  ;;  %v3559_v36 = vpop.eup %3558 }
 0x33a   :  { %8906 = vst [vmem:[#allocation87_spill] sm:$0xff] %v6271_v15  ;;  %v566_v15 = vld [vmem:[#allocation5 + $0x300] sm:$0xff] }
 0x33b   :  { %8909 = vst [vmem:[#allocation334_spill] sm:$0xff] %v6275_v16  ;;  %v6296_v16 = vmul.f32 %v8922_v2, %v561_v26  ;;  %v8931_v26 = vld [vmem:[#allocation178_spill] sm:$0xff]  ;;  %v8932_v2 = vld [vmem:[#allocation96_spill] sm:$0xff] }
 0x33c   :  { %8911 = vst [vmem:[#allocation88_spill] sm:$0xff] %v6278_v38  ;;  %v6293_v38 = vmul.f32 %v8920_v62, %v560_v6  ;;  %v571_v6 = vld [vmem:[#allocation5 + $0x328] sm:$0xff]  ;;  %v6307_v62 = vmul.f32 0.6931472, %v3549_v11  ;;  %3568 = vlog2.f32 %v8931_v26  ;;  %v8940_v11 = vld [vmem:[#allocation99_spill] sm:$0xff]  ;;  %v3561_v26 = vpop.eup %3560 }
 0x33d   :  { %8912 = vst [vmem:[#allocation89_spill] sm:$0xff] %v6280_v32  ;;  %v568_v32 = vld [vmem:[#allocation5 + $0x310] sm:$0xff] }
 0x33e   :  { %8915 = vst [vmem:[#allocation177_spill] sm:$0xff] %v6284_v61  ;;  %v6305_v61 = vmul.f32 %v8928_v56, %v563_v23  ;;  %v8937_v23 = vld [vmem:[#allocation337_spill] sm:$0xff]  ;;  %v8938_v56 = vld [vmem:[#allocation98_spill] sm:$0xff] }
 0x33f   :  { %8917 = vst [vmem:[#allocation90_spill] sm:$0xff] %v6287_v43  ;;  %v6302_v43 = vmul.f32 %v8926_v58, %v562_v8  ;;  %v573_v8 = vld [vmem:[#allocation5 + $0x338] sm:$0xff]  ;;  %v6316_v58 = vmul.f32 0.6931472, %v3551_v28  ;;  %3570 = vlog2.f32 %v8937_v23  ;;  %v3563_v23 = vpop.eup %3562 }
 0x340   :  { %8918 = vst [vmem:[#allocation91_spill] sm:$0xff] %v6289_v34  ;;  %v570_v34 = vld [vmem:[#allocation5 + $0x320] sm:$0xff]  ;;  %v8946_v28 = vld [vmem:[#allocation214_spill] sm:$0xff] }
 0x341   :  { %8921 = vst [vmem:[#allocation335_spill] sm:$0xff] %v6293_v38  ;;  %v6314_v38 = vmul.f32 %v8934_v33, %v565_v9  ;;  %v8943_v9 = vld [vmem:[#allocation338_spill] sm:$0xff]  ;;  %v8944_v33 = vld [vmem:[#allocation100_spill] sm:$0xff] }
 0x342   :  { %8923 = vst [vmem:[#allocation211_spill] sm:$0xff] %v6296_v16  ;;  %v6311_v16 = vmul.f32 %v8932_v2, %v564_v42  ;;  %v575_v42 = vld [vmem:[#allocation5 + $0x348] sm:$0xff]  ;;  %v6325_v2 = vmul.f32 0.6931472, %v3553_v25  ;;  %3572 = vlog2.f32 %v8943_v9  ;;  %v8952_v25 = vld [vmem:[#allocation102_spill] sm:$0xff]  ;;  %v3565_v9 = vpop.eup %3564 }
 0x343   :  { %8924 = vst [vmem:[#allocation92_spill] sm:$0xff] %v6298_v51  ;;  %v572_v51 = vld [vmem:[#allocation5 + $0x330] sm:$0xff] }
 0x344   :  { %8927 = vst [vmem:[#allocation336_spill] sm:$0xff] %v6302_v43  ;;  %v6323_v43 = vmul.f32 %v8940_v11, %v567_v0  ;;  %v8949_v0 = vld [vmem:[#allocation339_spill] sm:$0xff]  ;;  %v8950_v11 = vld [vmem:[#allocation101_spill] sm:$0xff] }
 0x345   :  { %8929 = vst [vmem:[#allocation93_spill] sm:$0xff] %v6305_v61  ;;  %v6320_v61 = vmul.f32 %v8938_v56, %v566_v15  ;;  %v577_v15 = vld [vmem:[#allocation5 + $0x358] sm:$0xff]  ;;  %v6334_v56 = vmul.f32 0.6931472, %v3555_v29  ;;  %3574 = vlog2.f32 %v8949_v0  ;;  %v8958_v29 = vld [vmem:[#allocation105_spill] sm:$0xff]  ;;  %v3567_v0 = vpop.eup %3566 }
 0x346   :  { %8930 = vst [vmem:[#allocation95_spill] sm:$0xff] %v6307_v62  ;;  %v574_v62 = vld [vmem:[#allocation5 + $0x340] sm:$0xff] }
 0x347   :  { %8933 = vst [vmem:[#allocation178_spill] sm:$0xff] %v6311_v16  ;;  %v6332_v16 = vmul.f32 %v8946_v28, %v569_v30  ;;  %v8955_v30 = vld [vmem:[#allocation340_spill] sm:$0xff] }
 0x348   :  { %8935 = vst [vmem:[#allocation96_spill] sm:$0xff] %v6314_v38  ;;  %v6329_v38 = vmul.f32 %v8944_v33, %v568_v32  ;;  %v579_v32 = vld [vmem:[#allocation5 + $0x368] sm:$0xff]  ;;  %v6343_v33 = vmul.f32 0.6931472, %v3557_v27  ;;  %3576 = vlog2.f32 %v8955_v30  ;;  %v8964_v27 = vld [vmem:[#allocation107_spill] sm:$0xff]  ;;  %v3569_v30 = vpop.eup %3568 }
 0x349   :  { %8936 = vst [vmem:[#allocation97_spill] sm:$0xff] %v6316_v58  ;;  %v576_v58 = vld [vmem:[#allocation5 + $0x350] sm:$0xff]  ;;  %v8956_v28 = vld [vmem:[#allocation104_spill] sm:$0xff] }
 0x34a   :  { %8939 = vst [vmem:[#allocation337_spill] sm:$0xff] %v6320_v61  ;;  %v6341_v61 = vmul.f32 %v8952_v25, %v571_v6  ;;  %v8961_v6 = vld [vmem:[#allocation341_spill] sm:$0xff]  ;;  %v8962_v25 = vld [vmem:[#allocation106_spill] sm:$0xff] }
 0x34b   :  { %8941 = vst [vmem:[#allocation98_spill] sm:$0xff] %v6323_v43  ;;  %v6338_v43 = vmul.f32 %v8950_v11, %v570_v34  ;;  %v581_v34 = vld [vmem:[#allocation5 + $0x378] sm:$0xff]  ;;  %v6352_v11 = vmul.f32 0.6931472, %v3559_v36  ;;  %3578 = vlog2.f32 %v8961_v6  ;;  %v8970_v36 = vld [vmem:[#allocation109_spill] sm:$0xff]  ;;  %v3571_v6 = vpop.eup %3570 }
 0x34c   :  { %8942 = vst [vmem:[#allocation99_spill] sm:$0xff] %v6325_v2  ;;  %v578_v2 = vld [vmem:[#allocation5 + $0x360] sm:$0xff] }
 0x34d   :  { %8945 = vst [vmem:[#allocation338_spill] sm:$0xff] %v6329_v38  ;;  %v6350_v38 = vmul.f32 %v8958_v29, %v573_v8  ;;  %v8967_v8 = vld [vmem:[#allocation180_spill] sm:$0xff] }
 0x34e   :  { %8947 = vst [vmem:[#allocation100_spill] sm:$0xff] %v6332_v16  ;;  %v6347_v16 = vmul.f32 %v8956_v28, %v572_v51  ;;  %v583_v51 = vld [vmem:[#allocation5 + $0x388] sm:$0xff]  ;;  %v6361_v28 = vmul.f32 0.6931472, %v3561_v26  ;;  %3580 = vlog2.f32 %v8967_v8  ;;  %v8976_v26 = vld [vmem:[#allocation110_spill] sm:$0xff]  ;;  %v3573_v8 = vpop.eup %3572 }
 0x34f   :  { %8948 = vst [vmem:[#allocation214_spill] sm:$0xff] %v6334_v56  ;;  %v580_v56 = vld [vmem:[#allocation5 + $0x370] sm:$0xff]  ;;  %v8968_v29 = vld [vmem:[#allocation108_spill] sm:$0xff] }
 0x350   :  { %8951 = vst [vmem:[#allocation339_spill] sm:$0xff] %v6338_v43  ;;  %v6359_v43 = vmul.f32 %v8964_v27, %v575_v42  ;;  %v8973_v42 = vld [vmem:[#allocation342_spill] sm:$0xff]  ;;  %v8974_v27 = vld [vmem:[#allocation217_spill] sm:$0xff] }
 0x351   :  { %8953 = vst [vmem:[#allocation101_spill] sm:$0xff] %v6341_v61  ;;  %v6356_v61 = vmul.f32 %v8962_v25, %v574_v62  ;;  %v585_v62 = vld [vmem:[#allocation5 + $0x398] sm:$0xff]  ;;  %v6370_v25 = vmul.f32 0.6931472, %v3563_v23  ;;  %3582 = vlog2.f32 %v8973_v42  ;;  %v8982_v23 = vld [vmem:[#allocation113_spill] sm:$0xff]  ;;  %v3575_v42 = vpop.eup %3574 }
 0x352   :  { %8954 = vst [vmem:[#allocation102_spill] sm:$0xff] %v6343_v33  ;;  %v582_v33 = vld [vmem:[#allocation5 + $0x380] sm:$0xff] }
 0x353   :  { %8957 = vst [vmem:[#allocation340_spill] sm:$0xff] %v6347_v16  ;;  %v6368_v16 = vmul.f32 %v8970_v36, %v577_v15  ;;  %v8979_v15 = vld [vmem:[#allocation343_spill] sm:$0xff] }
 0x354   :  { %8959 = vst [vmem:[#allocation104_spill] sm:$0xff] %v6350_v38  ;;  %v6365_v38 = vmul.f32 %v8968_v29, %v576_v58  ;;  %v587_v58 = vld [vmem:[#allocation5 + $0x3a8] sm:$0xff]  ;;  %v6379_v29 = vmul.f32 0.6931472, %v3565_v9  ;;  %3584 = vlog2.f32 %v8979_v15  ;;  %v8980_v36 = vld [vmem:[#allocation111_spill] sm:$0xff]  ;;  %v3577_v15 = vpop.eup %3576 }
 0x355   :  { %8960 = vst [vmem:[#allocation105_spill] sm:$0xff] %v6352_v11  ;;  %v584_v11 = vld [vmem:[#allocation5 + $0x390] sm:$0xff]  ;;  %v8988_v9 = vld [vmem:[#allocation115_spill] sm:$0xff] }
 0x356   :  { %8963 = vst [vmem:[#allocation341_spill] sm:$0xff] %v6356_v61  ;;  %v6377_v61 = vmul.f32 %v8976_v26, %v579_v32  ;;  %v8985_v32 = vld [vmem:[#allocation181_spill] sm:$0xff]  ;;  %v8986_v26 = vld [vmem:[#allocation114_spill] sm:$0xff] }
 0x357   :  { %8965 = vst [vmem:[#allocation106_spill] sm:$0xff] %v6359_v43  ;;  %v6374_v43 = vmul.f32 %v8974_v27, %v578_v2  ;;  %v589_v2 = vld [vmem:[#allocation5 + $0x3b8] sm:$0xff]  ;;  %v6388_v27 = vmul.f32 0.6931472, %v3567_v0  ;;  %3586 = vlog2.f32 %v8985_v32  ;;  %v8994_v0 = vld [vmem:[#allocation117_spill] sm:$0xff]  ;;  %v3579_v32 = vpop.eup %3578 }
 0x358   :  { %8966 = vst [vmem:[#allocation107_spill] sm:$0xff] %v6361_v28  ;;  %v586_v28 = vld [vmem:[#allocation5 + $0x3a0] sm:$0xff] }
 0x359   :  { %8969 = vst [vmem:[#allocation180_spill] sm:$0xff] %v6365_v38  ;;  %v6386_v38 = vmul.f32 %v8982_v23, %v581_v34  ;;  %v8991_v34 = vld [vmem:[#allocation344_spill] sm:$0xff] }
 0x35a   :  { %8971 = vst [vmem:[#allocation108_spill] sm:$0xff] %v6368_v16  ;;  %v6383_v16 = vmul.f32 %v8980_v36, %v580_v56  ;;  %v591_v56 = vld [vmem:[#allocation5 + $0x3c8] sm:$0xff]  ;;  %v592_v36 = vld [vmem:[#allocation5 + $0x3d0] sm:$0xff]  ;;  %3588 = vlog2.f32 %v8991_v34  ;;  %v3581_v34 = vpop.eup %3580 }
 0x35b   :  { %8972 = vst [vmem:[#allocation109_spill] sm:$0xff] %v6370_v25  ;;  %v588_v25 = vld [vmem:[#allocation5 + $0x3b0] sm:$0xff]  ;;  %v8992_v23 = vld [vmem:[#allocation116_spill] sm:$0xff] }
 0x35c   :  { %8975 = vst [vmem:[#allocation342_spill] sm:$0xff] %v6374_v43  ;;  %v6395_v43 = vmul.f32 %v8988_v9, %v583_v51  ;;  %v6406_v51 = vmul.f32 0.6931472, %v3571_v6  ;;  %v8997_v9 = vld [vmem:[#allocation345_spill] sm:$0xff]  ;;  %v9006_v6 = vld [vmem:[#allocation120_spill] sm:$0xff] }
 0x35d   :  { %8977 = vst [vmem:[#allocation217_spill] sm:$0xff] %v6377_v61  ;;  %v6392_v61 = vmul.f32 %v8986_v26, %v582_v33  ;;  %v593_v33 = vld [vmem:[#allocation5 + $0x3d8] sm:$0xff]  ;;  %v594_v26 = vld [vmem:[#allocation5 + $0x3e0] sm:$0xff]  ;;  %3590 = vlog2.f32 %v8997_v9  ;;  %v3583_v9 = vpop.eup %3582 }
 0x35e   :  { %8978 = vst [vmem:[#allocation110_spill] sm:$0xff] %v6379_v29  ;;  %v590_v29 = vld [vmem:[#allocation5 + $0x3c0] sm:$0xff] }
 0x35f   :  { %8981 = vst [vmem:[#allocation343_spill] sm:$0xff] %v6383_v16  ;;  %v6397_v16 = vmul.f32 0.6931472, %v3569_v30  ;;  %v9000_v30 = vld [vmem:[#allocation220_spill] sm:$0xff] }
 0x360   :  { %8983 = vst [vmem:[#allocation111_spill] sm:$0xff] %v6386_v38  ;;  %v6401_v38 = vmul.f32 %v8992_v23, %v584_v11  ;;  %v596_v11 = vld [vmem:[#allocation5 + $0x3f0] sm:$0xff]  ;;  %v597_v23 = vld [vmem:[#allocation5 + $0x3f8] sm:$0xff] }
 0x361   :  { %8984 = vst [vmem:[#allocation113_spill] sm:$0xff] %v6388_v27  ;;  %v6404_v27 = vmul.f32 %v8994_v0, %v585_v62  ;;  %v6415_v62 = vmul.f32 0.6931472, %v3573_v8  ;;  %v9003_v0 = vld [vmem:[#allocation346_spill] sm:$0xff]  ;;  %v9012_v8 = vld [vmem:[#allocation123_spill] sm:$0xff] }
 0x362   :  { %8987 = vst [vmem:[#allocation181_spill] sm:$0xff] %v6392_v61  ;;  %v595_v61 = vld [vmem:[#allocation5 + $0x3e8] sm:$0xff]  ;;  %3592 = vlog2.f32 %v9003_v0  ;;  %v3585_v0 = vpop.eup %3584 }
 0x363   :  { %8989 = vst [vmem:[#allocation114_spill] sm:$0xff] %v6395_v43  ;;  %v8998_v43 = vld [vmem:[#allocation118_spill] sm:$0xff] }
 0x364   :  { %8990 = vst [vmem:[#allocation115_spill] sm:$0xff] %v6397_v16  ;;  %v6410_v4 = vmul.f32 %v8998_v43, %v586_v28  ;;  %v6413_v16 = vmul.f32 %v9000_v30, %v587_v58  ;;  %v599_v43 = vld [vmem:[#allocation5 + $0x408] sm:$0xff]  ;;  %v600_v28 = vld [vmem:[#allocation5 + $0x410] sm:$0xff]  ;;  %v6424_v58 = vmul.f32 0.6931472, %v3575_v42  ;;  %v9009_v30 = vld [vmem:[#allocation347_spill] sm:$0xff] }
 0x365   :  { %8993 = vst [vmem:[#allocation344_spill] sm:$0xff] %v6401_v38  ;;  %v598_v38 = vld [vmem:[#allocation5 + $0x400] sm:$0xff]  ;;  %3594 = vlog2.f32 %v9009_v30  ;;  %v9018_v42 = vld [vmem:[#allocation125_spill] sm:$0xff]  ;;  %v3587_v30 = vpop.eup %3586 }
 0x366   :  { %8995 = vst [vmem:[#allocation116_spill] sm:$0xff] %v6404_v27  ;;  %v9004_v27 = vld [vmem:[#allocation119_spill] sm:$0xff] }
 0x367   :  { %8996 = vst [vmem:[#allocation117_spill] sm:$0xff] %v6406_v51  ;;  %v6419_v13 = vmul.f32 %v9004_v27, %v588_v25  ;;  %v6422_v51 = vmul.f32 %v9006_v6, %v589_v2  ;;  %v602_v25 = vld [vmem:[#allocation5 + $0x420] sm:$0xff]  ;;  %v603_v27 = vld [vmem:[#allocation5 + $0x428] sm:$0xff]  ;;  %v6433_v2 = vmul.f32 0.6931472, %v3577_v15 }
 0x368   :  { %8999 = vst [vmem:[#allocation345_spill] sm:$0xff] %v6410_v4  ;;  %v601_v4 = vld [vmem:[#allocation5 + $0x418] sm:$0xff]  ;;  %v9015_v6 = vld [vmem:[#allocation348_spill] sm:$0xff]  ;;  %v9024_v15 = vld [vmem:[#allocation127_spill] sm:$0xff] }
 0x369   :  { %9001 = vst [vmem:[#allocation118_spill] sm:$0xff] %v6413_v16  ;;  %v9010_v16 = vld [vmem:[#allocation122_spill] sm:$0xff]  ;;  %3596 = vlog2.f32 %v9015_v6  ;;  %v3589_v6 = vpop.eup %3588 }
 0x36a   :  { %9002 = vst [vmem:[#allocation220_spill] sm:$0xff] %v6415_v62  ;;  %v6428_v1 = vmul.f32 %v9010_v16, %v590_v29  ;;  %v6431_v62 = vmul.f32 %v9012_v8, %v591_v56  ;;  %v605_v16 = vld [vmem:[#allocation5 + $0x438] sm:$0xff]  ;;  %v606_v29 = vld [vmem:[#allocation5 + $0x440] sm:$0xff]  ;;  %v6442_v56 = vmul.f32 0.6931472, %v3579_v32  ;;  %v9030_v32 = vld [vmem:[#allocation128_spill] sm:$0xff] }
 0x36b   :  { %9005 = vst [vmem:[#allocation346_spill] sm:$0xff] %v6419_v13  ;;  %v604_v13 = vld [vmem:[#allocation5 + $0x430] sm:$0xff]  ;;  %v9021_v8 = vld [vmem:[#allocation183_spill] sm:$0xff] }
 0x36c   :  { %9007 = vst [vmem:[#allocation119_spill] sm:$0xff] %v6422_v51  ;;  %v9016_v51 = vld [vmem:[#allocation124_spill] sm:$0xff]  ;;  %3598 = vlog2.f32 %v9021_v8  ;;  %v3591_v8 = vpop.eup %3590 }
 0x36d   :  { %9008 = vst [vmem:[#allocation120_spill] sm:$0xff] %v6424_v58  ;;  %v6437_v7 = vmul.f32 %v9016_v51, %v592_v36  ;;  %v6440_v58 = vmul.f32 %v9018_v42, %v593_v33  ;;  %v608_v36 = vld [vmem:[#allocation5 + $0x450] sm:$0xff]  ;;  %v609_v51 = vld [vmem:[#allocation5 + $0x458] sm:$0xff]  ;;  %v6451_v33 = vmul.f32 0.6931472, %v3581_v34  ;;  %v9036_v34 = vld [vmem:[#allocation131_spill] sm:$0xff] }
 0x36e   :  { %9011 = vst [vmem:[#allocation347_spill] sm:$0xff] %v6428_v1  ;;  %v607_v1 = vld [vmem:[#allocation5 + $0x448] sm:$0xff]  ;;  %v9027_v42 = vld [vmem:[#allocation349_spill] sm:$0xff] }
 0x36f   :  { %9013 = vst [vmem:[#allocation122_spill] sm:$0xff] %v6431_v62  ;;  %v9022_v62 = vld [vmem:[#allocation126_spill] sm:$0xff]  ;;  %3600 = vlog2.f32 %v9027_v42  ;;  %v3593_v42 = vpop.eup %3592 }
 0x370   :  { %9014 = vst [vmem:[#allocation123_spill] sm:$0xff] %v6433_v2  ;;  %v6446_v39 = vmul.f32 %v9022_v62, %v594_v26  ;;  %v6449_v2 = vmul.f32 %v9024_v15, %v595_v61  ;;  %v611_v26 = vld [vmem:[#allocation5 + $0x468] sm:$0xff]  ;;  %v612_v62 = vld [vmem:[#allocation5 + $0x470] sm:$0xff]  ;;  %v6460_v61 = vmul.f32 0.6931472, %v3583_v9  ;;  %v9033_v15 = vld [vmem:[#allocation350_spill] sm:$0xff] }
 0x371   :  { %9017 = vst [vmem:[#allocation348_spill] sm:$0xff] %v6437_v7  ;;  %v610_v7 = vld [vmem:[#allocation5 + $0x460] sm:$0xff]  ;;  %3602 = vlog2.f32 %v9033_v15  ;;  %v9042_v9 = vld [vmem:[#allocation133_spill] sm:$0xff]  ;;  %v3595_v15 = vpop.eup %3594 }
 0x372   :  { %9019 = vst [vmem:[#allocation124_spill] sm:$0xff] %v6440_v58  ;;  %v9028_v58 = vld [vmem:[#allocation223_spill] sm:$0xff] }
 0x373   :  { %9020 = vst [vmem:[#allocation125_spill] sm:$0xff] %v6442_v56  ;;  %v6455_v59 = vmul.f32 %v9028_v58, %v596_v11  ;;  %v6458_v56 = vmul.f32 %v9030_v32, %v597_v23  ;;  %v614_v11 = vld [vmem:[#allocation5 + $0x480] sm:$0xff]  ;;  %v615_v58 = vld [vmem:[#allocation5 + $0x488] sm:$0xff]  ;;  %v6469_v23 = vmul.f32 0.6931472, %v3585_v0  ;;  %v6485_v0 = vmul.f32 %v9047_v22, %v603_v27 }
 0x374   :  { %9023 = vst [vmem:[#allocation183_spill] sm:$0xff] %v6446_v39  ;;  %v613_v39 = vld [vmem:[#allocation5 + $0x478] sm:$0xff]  ;;  %v6471_v32 = vmul.f32 0.6931472, %v3587_v30  ;;  %v9049_v30 = vld [vmem:[#allocation136_spill] sm:$0xff] }
 0x375   :  { %9025 = vst [vmem:[#allocation126_spill] sm:$0xff] %v6449_v2  ;;  %v9034_v2 = vld [vmem:[#allocation129_spill] sm:$0xff]  ;;  %v623_v27 = vld [vmem:[#allocation5 + $0x4c8] sm:$0xff] }
 0x376   :  { %9026 = vst [vmem:[#allocation127_spill] sm:$0xff] %v6451_v33  ;;  %v6464_v54 = vmul.f32 %v9034_v2, %v598_v38  ;;  %v6467_v33 = vmul.f32 %v9036_v34, %v599_v43  ;;  %v617_v38 = vld [vmem:[#allocation5 + $0x498] sm:$0xff]  ;;  %v618_v2 = vld [vmem:[#allocation5 + $0x4a0] sm:$0xff]  ;;  %v6479_v43 = vmul.f32 0.6931472, %v3589_v6  ;;  %v9054_v6 = vld [vmem:[#allocation137_spill] sm:$0xff] }
 0x377   :  { %9029 = vst [vmem:[#allocation349_spill] sm:$0xff] %v6455_v59  ;;  %v616_v59 = vld [vmem:[#allocation5 + $0x490] sm:$0xff]  ;;  %v9045_v34 = vld [vmem:[#allocation134_spill] sm:$0xff] }
 0x378   :  { %9031 = vst [vmem:[#allocation223_spill] sm:$0xff] %v6458_v56  ;;  %v9040_v56 = vld [vmem:[#allocation132_spill] sm:$0xff] }
 0x379   :  { %9032 = vst [vmem:[#allocation128_spill] sm:$0xff] %v6460_v61  ;;  %v6474_v24 = vmul.f32 %v9040_v56, %v600_v28  ;;  %v6477_v61 = vmul.f32 %v9042_v9, %v601_v4  ;;  %v3597_v28 = vpop.eup %3596  ;;  %v620_v56 = vld [vmem:[#allocation5 + $0x4b0] sm:$0xff]  ;;  %v622_v4 = vld [vmem:[#allocation5 + $0x4c0] sm:$0xff]  ;;  %v6490_v9 = vmul.f32 0.6931472, %v3591_v8 }
 0x37a   :  { %9035 = vst [vmem:[#allocation350_spill] sm:$0xff] %v6464_v54  ;;  %v619_v54 = vld [vmem:[#allocation5 + $0x4a8] sm:$0xff]  ;;  %v3599_v22 = vpop.eup %3598  ;;  %v9061_v8 = vld [vmem:[#allocation141_spill] sm:$0xff] }
 0x37b   :  { %9037 = vst [vmem:[#allocation129_spill] sm:$0xff] %v6467_v33  ;;  %v6482_v33 = vmul.f32 %v9045_v34, %v602_v25  ;;  %v9056_v25 = vld [vmem:[#allocation138_spill] sm:$0xff] }
 0x37c   :  { %9038 = vst [vmem:[#allocation131_spill] sm:$0xff] %v6469_v23  ;;  %v621_v23 = vld [vmem:[#allocation5 + $0x4b8] sm:$0xff]  ;;  %v6499_v34 = vmul.f32 %v9056_v25, %v607_v1  ;;  %v628_v1 = vld [vmem:[#allocation5 + $0x4f0] sm:$0xff] }
 0x37d   :  { %9039 = vst [vmem:[#allocation362_spill] sm:$0xff] %v6471_v32  ;;  %v6488_v32 = vmul.f32 %v9049_v30, %v604_v13  ;;  %v625_v13 = vld [vmem:[#allocation5 + $0x4d8] sm:$0xff]  ;;  %v6501_v30 = vmul.f32 0.6931472, %v3593_v42  ;;  %v9068_v42 = vld [vmem:[#allocation144_spill] sm:$0xff] }
 0x37e   :  { %9041 = vst [vmem:[#allocation132_spill] sm:$0xff] %v6474_v24  ;;  %v629_v25 = vld [vmem:[#allocation5 + $0x4f8] sm:$0xff] }
 0x37f   :  { %9043 = vst [vmem:[#allocation133_spill] sm:$0xff] %v6477_v61  ;;  %v9052_v61 = vld [vmem:[#allocation226_spill] sm:$0xff] }
 0x380   :  { %9044 = vst [vmem:[#allocation363_spill] sm:$0xff] %v6479_v43  ;;  %v6493_v24 = vmul.f32 %v9052_v61, %v605_v16  ;;  %v6496_v43 = vmul.f32 %v9054_v6, %v606_v29  ;;  %v9063_v16 = vld [vmem:[#allocation142_spill] sm:$0xff]  ;;  %v3601_v29 = vpop.eup %3600  ;;  %v626_v6 = vld [vmem:[#allocation5 + $0x4e0] sm:$0xff] }
 0x381   :  { %9046 = vst [vmem:[#allocation134_spill] sm:$0xff] %v6482_v33  ;;  %v6510_v61 = vmul.f32 %v9063_v16, %v610_v7  ;;  %v631_v7 = vld [vmem:[#allocation5 + $0x508] sm:$0xff]  ;;  %v632_v16 = vld [vmem:[#allocation5 + $0x510] sm:$0xff] }
 0x382   :  { %9048 = vst [vmem:[#allocation135_spill] sm:$0xff] %v6485_v0  ;;  %v624_v0 = vld [vmem:[#allocation5 + $0x4d0] sm:$0xff] }
 0x383   :  { %9050 = vst [vmem:[#allocation136_spill] sm:$0xff] %v6488_v32  ;;  %v9059_v32 = vld [vmem:[#allocation140_spill] sm:$0xff] }
 0x384   :  { %9051 = vst [vmem:[#allocation364_spill] sm:$0xff] %v6490_v9  ;;  %v6504_v33 = vmul.f32 %v9059_v32, %v608_v36  ;;  %v6507_v9 = vmul.f32 %v9061_v8, %v609_v51  ;;  %v9070_v36 = vld [vmem:[#allocation145_spill] sm:$0xff]  ;;  %v3603_v51 = vpop.eup %3602  ;;  %v630_v8 = vld [vmem:[#allocation5 + $0x500] sm:$0xff] }
 0x385   :  { %9053 = vst [vmem:[#allocation226_spill] sm:$0xff] %v6493_v24  ;;  %v9066_v24 = vld [vmem:[#allocation143_spill] sm:$0xff]  ;;  %v6521_v32 = vmul.f32 %v9070_v36, %v613_v39  ;;  %v636_v39 = vld [vmem:[#allocation5 + $0x530] sm:$0xff]  ;;  %v637_v36 = vld [vmem:[#allocation5 + $0x538] sm:$0xff] }
 0x386   :  { %9055 = vst [vmem:[#allocation137_spill] sm:$0xff] %v6496_v43  ;;  %v627_v43 = vld [vmem:[#allocation5 + $0x4e8] sm:$0xff]  ;;  %v6515_v63 = vmul.f32 %v9066_v24, %v611_v26  ;;  %v9077_v24 = vld [vmem:[#allocation147_spill] sm:$0xff] }
 0x387   :  { %9057 = vst [vmem:[#allocation138_spill] sm:$0xff] %v6499_v34  ;;  %v6512_v34 = vmul.f32 0.6931472, %v3595_v15  ;;  %v9075_v15 = vld [vmem:[#allocation146_spill] sm:$0xff]  ;;  %v6532_v26 = vmul.f32 %v9077_v24, %v616_v59  ;;  %v6545_v24 = vmul.f32 0.6931472, %v3601_v29 }
 0x388   :  { %9058 = vst [vmem:[#allocation365_spill] sm:$0xff] %v6501_v30  ;;  %v6518_v30 = vmul.f32 %v9068_v42, %v612_v62  ;;  %v634_v62 = vld [vmem:[#allocation5 + $0x520] sm:$0xff]  ;;  %v635_v42 = vld [vmem:[#allocation5 + $0x528] sm:$0xff]  ;;  %v641_v59 = vld [vmem:[#allocation5 + $0x558] sm:$0xff] }
 0x389   :  { %9060 = vst [vmem:[#allocation140_spill] sm:$0xff] %v6504_v33  ;;  %v9073_v33 = vld [vmem:[#allocation229_spill] sm:$0xff]  ;;  %v9096_v29 = vld [vmem:[#allocation155_spill] sm:$0xff] }
 0x38a   :  { %9062 = vst [vmem:[#allocation141_spill] sm:$0xff] %v6507_v9  ;;  %v6523_v9 = vmul.f32 0.6931472, %v3597_v28  ;;  %v6526_v14 = vmul.f32 %v9073_v33, %v614_v11  ;;  %v9082_v28 = vld [vmem:[#allocation150_spill] sm:$0xff]  ;;  %v9084_v33 = vld [vmem:[#allocation151_spill] sm:$0xff] }
 0x38b   :  { %9064 = vst [vmem:[#allocation142_spill] sm:$0xff] %v6510_v61  ;;  %v633_v61 = vld [vmem:[#allocation5 + $0x518] sm:$0xff]  ;;  %v6543_v11 = vmul.f32 %v9084_v33, %v619_v54  ;;  %v6556_v33 = vmul.f32 0.6931472, %v3603_v51 }
 0x38c   :  { %9065 = vst [vmem:[#allocation366_spill] sm:$0xff] %v6512_v34  ;;  %v6529_v34 = vmul.f32 %v9075_v15, %v615_v58  ;;  %v638_v58 = vld [vmem:[#allocation5 + $0x540] sm:$0xff]  ;;  %v639_v15 = vld [vmem:[#allocation5 + $0x548] sm:$0xff]  ;;  %v645_v54 = vld [vmem:[#allocation5 + $0x578] sm:$0xff] }
 0x38d   :  { %9067 = vst [vmem:[#allocation143_spill] sm:$0xff] %v6515_v63  ;;  %v9104_v51 = vld [vmem:[#allocation170_spill] sm:$0xff] }
 0x38e   :  { %9069 = vst [vmem:[#allocation144_spill] sm:$0xff] %v6518_v30  ;;  %v9080_v30 = vld [vmem:[#allocation149_spill] sm:$0xff] }
 0x38f   :  { %9071 = vst [vmem:[#allocation145_spill] sm:$0xff] %v6521_v32  ;;  %v6534_v32 = vmul.f32 0.6931472, %v3599_v22  ;;  %v6537_v63 = vmul.f32 %v9080_v30, %v617_v38  ;;  %v9089_v22 = vld [vmem:[#allocation153_spill] sm:$0xff]  ;;  %v9091_v38 = vld [vmem:[#allocation154_spill] sm:$0xff] }
 0x390   :  { %9072 = vst [vmem:[#allocation367_spill] sm:$0xff] %v6523_v9  ;;  %v6540_v9 = vmul.f32 %v9082_v28, %v618_v2  ;;  %v6554_v30 = vmul.f32 %v9091_v38, %v622_v4  ;;  %v642_v2 = vld [vmem:[#allocation5 + $0x560] sm:$0xff]  ;;  %v643_v28 = vld [vmem:[#allocation5 + $0x568] sm:$0xff]  ;;  %v649_v4 = vld [vmem:[#allocation5 + $0x598] sm:$0xff] }
 0x391   :  { %9074 = vst [vmem:[#allocation229_spill] sm:$0xff] %v6526_v14  ;;  %v9100_v38 = vld [vmem:[#allocation164_spill] sm:$0xff] }
 0x392   :  { %9076 = vst [vmem:[#allocation146_spill] sm:$0xff] %v6529_v34  ;;  %v640_v34 = vld [vmem:[#allocation5 + $0x550] sm:$0xff] }
 0x393   :  { %9078 = vst [vmem:[#allocation147_spill] sm:$0xff] %v6532_v26  ;;  %v9087_v26 = vld [vmem:[#allocation152_spill] sm:$0xff] }
 0x394   :  { %9079 = vst [vmem:[#allocation368_spill] sm:$0xff] %v6534_v32  ;;  %v6548_v14 = vmul.f32 %v9087_v26, %v620_v56  ;;  %v6551_v32 = vmul.f32 %v9089_v22, %v621_v23  ;;  %v9098_v56 = vld [vmem:[#allocation158_spill] sm:$0xff]  ;;  %v646_v23 = vld [vmem:[#allocation5 + $0x580] sm:$0xff]  ;;  %v647_v22 = vld [vmem:[#allocation5 + $0x588] sm:$0xff] }
 0x395   :  { %9081 = vst [vmem:[#allocation149_spill] sm:$0xff] %v6537_v63  ;;  %v6565_v26 = vmul.f32 %v9098_v56, %v625_v13  ;;  %v652_v13 = vld [vmem:[#allocation5 + $0x5b0] sm:$0xff]  ;;  %v653_v56 = vld [vmem:[#allocation5 + $0x5b8] sm:$0xff] }
 0x396   :  { %9083 = vst [vmem:[#allocation150_spill] sm:$0xff] %v6540_v9  ;;  %v644_v9 = vld [vmem:[#allocation5 + $0x570] sm:$0xff] }
 0x397   :  { %9085 = vst [vmem:[#allocation151_spill] sm:$0xff] %v6543_v11  ;;  %v9094_v11 = vld [vmem:[#allocation232_spill] sm:$0xff] }
 0x398   :  { %9086 = vst [vmem:[#allocation369_spill] sm:$0xff] %v6545_v24  ;;  %v6559_v63 = vmul.f32 %v9094_v11, %v623_v27  ;;  %v6562_v24 = vmul.f32 %v9096_v29, %v624_v0  ;;  %v9106_v27 = vld [vmem:[#allocation173_spill] sm:$0xff]  ;;  %v650_v0 = vld [vmem:[#allocation5 + $0x5a0] sm:$0xff]  ;;  %v651_v29 = vld [vmem:[#allocation5 + $0x5a8] sm:$0xff] }
 0x399   :  { %9088 = vst [vmem:[#allocation152_spill] sm:$0xff] %v6548_v14  ;;  %v9102_v14 = vld [vmem:[#allocation167_spill] sm:$0xff]  ;;  %v6577_v11 = vmul.f32 %v9106_v27, %v629_v25  ;;  %v656_v25 = vld [vmem:[#allocation5 + $0x5d0] sm:$0xff]  ;;  %v657_v27 = vld [vmem:[#allocation5 + $0x5d8] sm:$0xff] }
 0x39a   :  { %9090 = vst [vmem:[#allocation153_spill] sm:$0xff] %v6551_v32  ;;  %v648_v32 = vld [vmem:[#allocation5 + $0x590] sm:$0xff]  ;;  %v6571_v31 = vmul.f32 %v9102_v14, %v627_v43  ;;  %v9112_v14 = vld [vmem:[#allocation182_spill] sm:$0xff] }
 0x39b   :  { %9092 = vst [vmem:[#allocation154_spill] sm:$0xff] %v6554_v30  ;;  %v6568_v30 = vmul.f32 %v9100_v38, %v626_v6  ;;  %v9110_v6 = vld [vmem:[#allocation235_spill] sm:$0xff]  ;;  %v6589_v43 = vmul.f32 %v9112_v14, %v633_v61  ;;  %v660_v61 = vld [vmem:[#allocation5 + $0x5f0] sm:$0xff]  ;;  %v661_v14 = vld [vmem:[#allocation5 + $0x5f8] sm:$0xff] }
 0x39c   :  { %9093 = vst [vmem:[#allocation370_spill] sm:$0xff] %v6556_v33  ;;  %v6574_v33 = vmul.f32 %v9104_v51, %v628_v1  ;;  %v6586_v38 = vmul.f32 %v9110_v6, %v632_v16  ;;  %v654_v1 = vld [vmem:[#allocation5 + $0x5c0] sm:$0xff]  ;;  %v655_v51 = vld [vmem:[#allocation5 + $0x5c8] sm:$0xff] }
 0x39d   :  { %9095 = vst [vmem:[#allocation232_spill] sm:$0xff] %v6559_v63  ;;  %v9109_v63 = vld [vmem:[#allocation179_spill] sm:$0xff]  ;;  %v659_v6 = vld [vmem:[#allocation5 + $0x5e8] sm:$0xff] }
 0x39e   :  { %9097 = vst [vmem:[#allocation155_spill] sm:$0xff] %v6562_v24  ;;  %v6583_v3 = vmul.f32 %v9109_v63, %v631_v7  ;;  %v9119_v63 = vld [vmem:[#allocation197_spill] sm:$0xff]  ;;  %v658_v16 = vld [vmem:[#allocation5 + $0x5e0] sm:$0xff] }
 0x39f   :  { %9099 = vst [vmem:[#allocation158_spill] sm:$0xff] %v6565_v26  ;;  %v9108_v26 = vld [vmem:[#allocation176_spill] sm:$0xff]  ;;  %v6601_v7 = vmul.f32 %v9119_v63, %v637_v36  ;;  %v664_v36 = vld [vmem:[#allocation5 + $0x610] sm:$0xff]  ;;  %v6616_v63 = vmul.f32 %v5379_v5, %v642_v2  ;;  %v9136_v5 = vld [vmem:[#allocation215_spill] sm:$0xff] }
 0x3a0   :  { %9101 = vst [vmem:[#allocation164_spill] sm:$0xff] %v6568_v30  ;;  %v6580_v24 = vmul.f32 %v9108_v26, %v630_v8  ;;  %v9117_v8 = vld [vmem:[#allocation194_spill] sm:$0xff]  ;;  %v6634_v2 = vmul.f32 %v9136_v5, %v648_v32  ;;  %v674_v32 = vld [vmem:[#allocation5 + $0x660] sm:$0xff]  ;;  %v675_v5 = vld [vmem:[#allocation5 + $0x668] sm:$0xff] }
 0x3a1   :  { %9103 = vst [vmem:[#allocation167_spill] sm:$0xff] %v6571_v31  ;;  %v9115_v31 = vld [vmem:[#allocation191_spill] sm:$0xff]  ;;  %v6598_v26 = vmul.f32 %v9117_v8, %v636_v39  ;;  %v663_v39 = vld [vmem:[#allocation5 + $0x608] sm:$0xff]  ;;  %v665_v8 = vld [vmem:[#allocation5 + $0x618] sm:$0xff] }
 0x3a2   :  { %9105 = vst [vmem:[#allocation170_spill] sm:$0xff] %v6574_v33  ;;  %v6595_v30 = vmul.f32 %v9115_v31, %v635_v42  ;;  %v6613_v31 = vmul.f32 %v5376_v37, %v641_v59  ;;  %v662_v42 = vld [vmem:[#allocation5 + $0x600] sm:$0xff]  ;;  %v668_v37 = vld [vmem:[#allocation5 + $0x630] sm:$0xff]  ;;  %v669_v59 = vld [vmem:[#allocation5 + $0x638] sm:$0xff] }
 0x3a3   :  { %9107 = vst [vmem:[#allocation173_spill] sm:$0xff] %v6577_v11  ;;  %v9114_v11 = vld [vmem:[#allocation185_spill] sm:$0xff] }
 0x3a4   :  { %9111 = vst [vmem:[#allocation176_spill] sm:$0xff] %v6586_v38  ;;  %v6592_v33 = vmul.f32 %v9114_v11, %v634_v62  ;;  %v6607_v38 = vmul.f32 %v5367_v53, %v639_v15  ;;  %v9123_v62 = vld [vmem:[#allocation200_spill] sm:$0xff]  ;;  %v9131_v53 = vld [vmem:[#allocation238_spill] sm:$0xff] }
 0x3a5   :  { %9113 = vst [vmem:[#allocation179_spill] sm:$0xff] %v6589_v43  ;;  %v6604_v43 = vmul.f32 %v5364_v10, %v638_v58  ;;  %v6610_v11 = vmul.f32 %v9123_v62, %v640_v34  ;;  %v9129_v10 = vld [vmem:[#allocation206_spill] sm:$0xff]  ;;  %v6625_v15 = vmul.f32 %v9131_v53, %v645_v54  ;;  %v666_v34 = vld [vmem:[#allocation5 + $0x620] sm:$0xff]  ;;  %v667_v62 = vld [vmem:[#allocation5 + $0x628] sm:$0xff] }
 0x3a6   :  { %9116 = vst [vmem:[#allocation235_spill] sm:$0xff] %v6595_v30  ;;  %v6622_v58 = vmul.f32 %v9129_v10, %v644_v9  ;;  %v670_v9 = vld [vmem:[#allocation5 + $0x640] sm:$0xff]  ;;  %v671_v10 = vld [vmem:[#allocation5 + $0x648] sm:$0xff]  ;;  %v672_v54 = vld [vmem:[#allocation5 + $0x650] sm:$0xff] }
 0x3a7   :  { %9118 = vst [vmem:[#allocation182_spill] sm:$0xff] %v6598_v26  ;;  %v673_v53 = vld [vmem:[#allocation5 + $0x658] sm:$0xff] }
 0x3a8   :  { %9120 = vst [vmem:[#allocation185_spill] sm:$0xff] %v6601_v7  ;;  %v9127_v7 = vld [vmem:[#allocation203_spill] sm:$0xff] }
 0x3a9   :  { %9121 = vst [vmem:[#allocation191_spill] sm:$0xff] %v6604_v43  ;;  %v6619_v26 = vmul.f32 %v9127_v7, %v643_v28  ;;  %v9138_v28 = vld [vmem:[#allocation218_spill] sm:$0xff] }
 0x3aa   :  { %9122 = vst [vmem:[#allocation194_spill] sm:$0xff] %v6607_v38  ;;  %v9134_v38 = vld [vmem:[#allocation212_spill] sm:$0xff]  ;;  %v6637_v7 = vmul.f32 %v9138_v28, %v649_v4  ;;  %v676_v4 = vld [vmem:[#allocation5 + $0x670] sm:$0xff]  ;;  %v677_v28 = vld [vmem:[#allocation5 + $0x678] sm:$0xff] }
 0x3ab   :  { %9124 = vst [vmem:[#allocation197_spill] sm:$0xff] %v6610_v11  ;;  %v6631_v43 = vmul.f32 %v9134_v38, %v647_v22  ;;  %v9146_v22 = vld [vmem:[#allocation227_spill] sm:$0xff] }
 0x3ac   :  { %9125 = vst [vmem:[#allocation200_spill] sm:$0xff] %v6613_v31  ;;  %v9133_v31 = vld [vmem:[#allocation209_spill] sm:$0xff]  ;;  %v6649_v38 = vmul.f32 %v9146_v22, %v653_v56  ;;  %v681_v22 = vld [vmem:[#allocation5 + $0x698] sm:$0xff] }
 0x3ad   :  { %9126 = vst [vmem:[#allocation371_spill] sm:$0xff] %v6616_v63  ;;  %v6628_v11 = vmul.f32 %v9133_v31, %v646_v23  ;;  %v9144_v23 = vld [vmem:[#allocation240_spill] sm:$0xff]  ;;  %v680_v56 = vld [vmem:[#allocation5 + $0x690] sm:$0xff] }
 0x3ae   :  { %9128 = vst [vmem:[#allocation203_spill] sm:$0xff] %v6619_v26  ;;  %v9142_v26 = vld [vmem:[#allocation224_spill] sm:$0xff]  ;;  %v6646_v31 = vmul.f32 %v9144_v23, %v652_v13  ;;  %v678_v13 = vld [vmem:[#allocation5 + $0x680] sm:$0xff] }
 0x3af   :  { %9130 = vst [vmem:[#allocation206_spill] sm:$0xff] %v6622_v58  ;;  %v6643_v63 = vmul.f32 %v9142_v26, %v651_v29  ;;  %v9154_v29 = vld [vmem:[#allocation236_spill] sm:$0xff] }
 0x3b0   :  { %9132 = vst [vmem:[#allocation238_spill] sm:$0xff] %v6625_v15  ;;  %v9140_v15 = vld [vmem:[#allocation221_spill] sm:$0xff]  ;;  %v6661_v26 = vmul.f32 %v9154_v29, %v657_v27  ;;  %v679_v23 = vld [vmem:[#allocation5 + $0x688] sm:$0xff]  ;;  %v685_v29 = vld [vmem:[#allocation5 + $0x6b8] sm:$0xff] }
 0x3b1   :  { %9135 = vst [vmem:[#allocation209_spill] sm:$0xff] %v6631_v43  ;;  %v6640_v58 = vmul.f32 %v9140_v15, %v650_v0  ;;  %v9150_v43 = vld [vmem:[#allocation233_spill] sm:$0xff] }
 0x3b2   :  { %9137 = vst [vmem:[#allocation212_spill] sm:$0xff] %v6634_v2  ;;  %v6655_v30 = vmul.f32 %v9150_v43, %v655_v51  ;;  %v9152_v0 = vld [vmem:[#allocation241_spill] sm:$0xff]  ;;  %v9162_v43 = vld [vmem:[#allocation243_spill] sm:$0xff] }
 0x3b3   :  { %9139 = vst [vmem:[#allocation215_spill] sm:$0xff] %v6637_v7  ;;  %v9148_v7 = vld [vmem:[#allocation230_spill] sm:$0xff]  ;;  %v6658_v15 = vmul.f32 %v9152_v0, %v656_v25  ;;  %v6673_v51 = vmul.f32 %v9162_v43, %v661_v14  ;;  %v682_v25 = vld [vmem:[#allocation5 + $0x6a0] sm:$0xff]  ;;  %v683_v0 = vld [vmem:[#allocation5 + $0x6a8] sm:$0xff] }
 0x3b4   :  { %9141 = vst [vmem:[#allocation218_spill] sm:$0xff] %v6640_v58  ;;  %v6652_v2 = vmul.f32 %v9148_v7, %v654_v1  ;;  %v9160_v1 = vld [vmem:[#allocation245_spill] sm:$0xff]  ;;  %v689_v43 = vld [vmem:[#allocation5 + $0x6d8] sm:$0xff] }
 0x3b5   :  { %9143 = vst [vmem:[#allocation221_spill] sm:$0xff] %v6643_v63  ;;  %v9158_v63 = vld [vmem:[#allocation242_spill] sm:$0xff]  ;;  %v6670_v7 = vmul.f32 %v9160_v1, %v660_v61  ;;  %v684_v27 = vld [vmem:[#allocation5 + $0x6b0] sm:$0xff]  ;;  %v686_v61 = vld [vmem:[#allocation5 + $0x6c0] sm:$0xff] }
 0x3b6   :  { %9145 = vst [vmem:[#allocation224_spill] sm:$0xff] %v6646_v31  ;;  %v6667_v58 = vmul.f32 %v9158_v63, %v659_v6  ;;  %v9167_v6 = vld [vmem:[#allocation246_spill] sm:$0xff]  ;;  %v687_v1 = vld [vmem:[#allocation5 + $0x6c8] sm:$0xff]  ;;  %v688_v14 = vld [vmem:[#allocation5 + $0x6d0] sm:$0xff] }
 0x3b7   :  { %9147 = vst [vmem:[#allocation240_spill] sm:$0xff] %v6649_v38  ;;  %v9156_v38 = vld [vmem:[#allocation239_spill] sm:$0xff]  ;;  %v6685_v63 = vmul.f32 %v9167_v6, %v665_v8  ;;  %v692_v8 = vld [vmem:[#allocation5 + $0x6f0] sm:$0xff] }
 0x3b8   :  { %9149 = vst [vmem:[#allocation227_spill] sm:$0xff] %v6652_v2  ;;  %v6664_v31 = vmul.f32 %v9156_v38, %v658_v16  ;;  %v9166_v16 = vld [vmem:[#allocation268_spill] sm:$0xff] }
 0x3b9   :  { %9151 = vst [vmem:[#allocation230_spill] sm:$0xff] %v6655_v30  ;;  %v9165_v30 = vld [vmem:[#allocation264_spill] sm:$0xff]  ;;  %v6682_v38 = vmul.f32 %v9166_v16, %v664_v36  ;;  %v9172_v16 = vld [vmem:[#allocation247_spill] sm:$0xff] }
 0x3ba   :  { %9153 = vst [vmem:[#allocation233_spill] sm:$0xff] %v6658_v15  ;;  %v6679_v2 = vmul.f32 %v9165_v30, %v663_v39  ;;  %v6697_v30 = vmul.f32 %v5487_v35, %v669_v59  ;;  %v690_v39 = vld [vmem:[#allocation5 + $0x6e0] sm:$0xff]  ;;  %v691_v36 = vld [vmem:[#allocation5 + $0x6e8] sm:$0xff]  ;;  %v6700_v6 = vmul.f32 %v9172_v16, %v670_v9  ;;  %v696_v35 = vld [vmem:[#allocation5 + $0x710] sm:$0xff] }
 0x3bb   :  { %9155 = vst [vmem:[#allocation241_spill] sm:$0xff] %v6661_v26  ;;  %v9164_v26 = vld [vmem:[#allocation244_spill] sm:$0xff]  ;;  %v697_v59 = vld [vmem:[#allocation5 + $0x718] sm:$0xff] }
 0x3bc   :  { %9157 = vst [vmem:[#allocation236_spill] sm:$0xff] %v6664_v31  ;;  %v6676_v15 = vmul.f32 %v9164_v26, %v662_v42  ;;  %v6694_v42 = vmul.f32 %v5484_v55, %v668_v37  ;;  %v693_v26 = vld [vmem:[#allocation5 + $0x6f8] sm:$0xff]  ;;  %v694_v55 = vld [vmem:[#allocation5 + $0x700] sm:$0xff]  ;;  %v695_v37 = vld [vmem:[#allocation5 + $0x708] sm:$0xff] }
 0x3bd   :  { %9159 = vst [vmem:[#allocation239_spill] sm:$0xff] %v6667_v58  ;;  %v9170_v58 = vld [vmem:[#allocation277_spill] sm:$0xff]  ;;  %v9180_v9 = vld [vmem:[#allocation286_spill] sm:$0xff] }
 0x3be   :  { %9161 = vst [vmem:[#allocation242_spill] sm:$0xff] %v6670_v7  ;;  %v6691_v31 = vmul.f32 %v9170_v58, %v667_v62  ;;  %v9176_v58 = vld [vmem:[#allocation160_spill] sm:$0xff]  ;;  %v6718_v16 = vmul.f32 %v9180_v9, %v676_v4  ;;  %v705_v4 = vld [vmem:[#allocation5 + $0x758] sm:$0xff] }
 0x3bf   :  { %9163 = vst [vmem:[#allocation245_spill] sm:$0xff] %v6673_v51  ;;  %v9169_v51 = vld [vmem:[#allocation157_spill] sm:$0xff]  ;;  %v6709_v62 = vmul.f32 %v9176_v58, %v673_v53  ;;  %v701_v53 = vld [vmem:[#allocation5 + $0x738] sm:$0xff]  ;;  %v6724_v58 = vmul.f32 %v5523_v49, %v678_v13  ;;  %v6742_v49 = vmul.f32 %v5547_v20, %v684_v27  ;;  %v9185_v13 = vld [vmem:[#allocation295_spill] sm:$0xff] }
 0x3c0   :  { %9168 = vst [vmem:[#allocation243_spill] sm:$0xff] %v6685_v63  ;;  %v6688_v7 = vmul.f32 %v9169_v51, %v666_v34  ;;  %v6703_v63 = vmul.f32 %v5496_v17, %v671_v10  ;;  %v6706_v34 = vmul.f32 %v5499_v45, %v672_v54  ;;  %v6712_v51 = vmul.f32 %v5508_v47, %v674_v32  ;;  %v698_v45 = vld [vmem:[#allocation5 + $0x720] sm:$0xff]  ;;  %v699_v10 = vld [vmem:[#allocation5 + $0x728] sm:$0xff]  ;;  %v700_v54 = vld [vmem:[#allocation5 + $0x730] sm:$0xff] }
 0x3c1   :  { %9171 = vst [vmem:[#allocation244_spill] sm:$0xff] %v6697_v30  ;;  %v6715_v30 = vmul.f32 %v5511_v19, %v675_v5  ;;  %v6721_v17 = vmul.f32 %v5520_v41, %v677_v28  ;;  %v6730_v47 = vmul.f32 %v5532_v57, %v680_v56  ;;  %v6733_v19 = vmul.f32 %v5535_v46, %v681_v22  ;;  %v702_v32 = vld [vmem:[#allocation5 + $0x740] sm:$0xff]  ;;  %v703_v5 = vld [vmem:[#allocation5 + $0x748] sm:$0xff]  ;;  %v704_v41 = vld [vmem:[#allocation5 + $0x750] sm:$0xff] }
 0x3c2   :  { %9173 = vst [vmem:[#allocation264_spill] sm:$0xff] %v6700_v6  ;;  %v9184_v28 = vld [vmem:[#allocation163_spill] sm:$0xff]  ;;  %v707_v56 = vld [vmem:[#allocation5 + $0x768] sm:$0xff]  ;;  %v708_v46 = vld [vmem:[#allocation5 + $0x770] sm:$0xff] }
 0x3c3   :  { %9174 = vst [vmem:[#allocation268_spill] sm:$0xff] %v6703_v63  ;;  %v6736_v9 = vmul.f32 %v9184_v28, %v682_v25  ;;  %v706_v57 = vld [vmem:[#allocation5 + $0x760] sm:$0xff]  ;;  %v709_v22 = vld [vmem:[#allocation5 + $0x778] sm:$0xff]  ;;  %v9188_v25 = vld [vmem:[#allocation249_spill] sm:$0xff] }
 0x3c4   :  { %9175 = vst [vmem:[#allocation246_spill] sm:$0xff] %v6706_v34  ;;  %v6754_v28 = vmul.f32 %v9188_v25, %v688_v14  ;;  %v710_v20 = vld [vmem:[#allocation5 + $0x780] sm:$0xff]  ;;  %v712_v27 = vld [vmem:[#allocation5 + $0x790] sm:$0xff]  ;;  %v715_v25 = vld [vmem:[#allocation5 + $0x7a8] sm:$0xff] }
 0x3c5   :  { %9177 = vst [vmem:[#allocation157_spill] sm:$0xff] %v6709_v62  ;;  %v9183_v62 = vld [vmem:[#allocation248_spill] sm:$0xff]  ;;  %v714_v14 = vld [vmem:[#allocation5 + $0x7a0] sm:$0xff]  ;;  %v9214_v6 = vld [vmem:[#allocation254_spill] sm:$0xff] }
 0x3c6   :  { %9178 = vst [vmem:[#allocation277_spill] sm:$0xff] %v6712_v51  ;;  %v6727_v34 = vmul.f32 %v9183_v62, %v679_v23  ;;  %v6745_v23 = vmul.f32 %v9185_v13, %v685_v29  ;;  %v6748_v62 = vmul.f32 %v5556_v44, %v686_v61  ;;  %v713_v29 = vld [vmem:[#allocation5 + $0x798] sm:$0xff]  ;;  %v9193_v51 = vld [vmem:[#allocation304_spill] sm:$0xff] }
 0x3c7   :  { %9179 = vst [vmem:[#allocation247_spill] sm:$0xff] %v6715_v30  ;;  %v9191_v13 = vld [vmem:[#allocation166_spill] sm:$0xff]  ;;  %v6763_v63 = vmul.f32 %v9193_v51, %v691_v36 }
 0x3c8   :  { %9181 = vst [vmem:[#allocation160_spill] sm:$0xff] %v6718_v16  ;;  %v6751_v16 = vmul.f32 %v5559_v60, %v687_v1  ;;  %v6760_v30 = vmul.f32 %v9191_v13, %v690_v39  ;;  %v9195_v44 = vld [vmem:[#allocation250_spill] sm:$0xff]  ;;  %v9197_v60 = vld [vmem:[#allocation169_spill] sm:$0xff]  ;;  %v9202_v39 = vld [vmem:[#allocation172_spill] sm:$0xff] }
 0x3c9   :  { %9182 = vst [vmem:[#allocation286_spill] sm:$0xff] %v6721_v17  ;;  %v6739_v17 = vmul.f32 %v5544_v18, %v683_v0  ;;  %v6757_v18 = vmul.f32 %v5568_v48, %v689_v43  ;;  %v711_v0 = vld [vmem:[#allocation5 + $0x788] sm:$0xff]  ;;  %v6766_v61 = vmul.f32 %v9195_v44, %v692_v8  ;;  %v6769_v1 = vmul.f32 %v9197_v60, %v693_v26  ;;  %v716_v48 = vld [vmem:[#allocation5 + $0x7b0] sm:$0xff]  ;;  %v717_v43 = vld [vmem:[#allocation5 + $0x7b8] sm:$0xff] }
 0x3ca   :  { %9186 = vst [vmem:[#allocation248_spill] sm:$0xff] %v6748_v62  ;;  %v6778_v13 = vmul.f32 %v9202_v39, %v696_v35  ;;  %v9204_v36 = vld [vmem:[#allocation322_spill] sm:$0xff]  ;;  %v718_v8 = vld [vmem:[#allocation5 + $0x7c0] sm:$0xff]  ;;  %v719_v44 = vld [vmem:[#allocation5 + $0x7c8] sm:$0xff] }
 0x3cb   :  { %9187 = vst [vmem:[#allocation163_spill] sm:$0xff] %v6751_v16  ;;  %v9200_v16 = vld [vmem:[#allocation251_spill] sm:$0xff]  ;;  %v6781_v51 = vmul.f32 %v9204_v36, %v697_v59  ;;  %v720_v26 = vld [vmem:[#allocation5 + $0x7d0] sm:$0xff]  ;;  %v721_v60 = vld [vmem:[#allocation5 + $0x7d8] sm:$0xff] }
 0x3cc   :  { %9189 = vst [vmem:[#allocation295_spill] sm:$0xff] %v6754_v28  ;;  %v6775_v62 = vmul.f32 %v9200_v16, %v695_v37  ;;  %v9212_v37 = vld [vmem:[#allocation253_spill] sm:$0xff]  ;;  %v722_v35 = vld [vmem:[#allocation5 + $0x7e0] sm:$0xff]  ;;  %v723_v39 = vld [vmem:[#allocation5 + $0x7e8] sm:$0xff] }
 0x3cd   :  { %9190 = vst [vmem:[#allocation249_spill] sm:$0xff] %v6757_v18  ;;  %v9199_v18 = vld [vmem:[#allocation313_spill] sm:$0xff]  ;;  %v6793_v16 = vmul.f32 %v9212_v37, %v701_v53  ;;  %v725_v36 = vld [vmem:[#allocation5 + $0x7f8] sm:$0xff] }
 0x3ce   :  { %9192 = vst [vmem:[#allocation166_spill] sm:$0xff] %v6760_v30  ;;  %v6772_v28 = vmul.f32 %v9199_v18, %v694_v55  ;;  %v9210_v55 = vld [vmem:[#allocation331_spill] sm:$0xff]  ;;  %v724_v59 = vld [vmem:[#allocation5 + $0x7f0] sm:$0xff]  ;;  %v729_v37 = vld [vmem:[#allocation5 + $0x818] sm:$0xff] }
 0x3cf   :  { %9194 = vst [vmem:[#allocation304_spill] sm:$0xff] %v6763_v63  ;;  %v9208_v63 = vld [vmem:[#allocation175_spill] sm:$0xff]  ;;  %v6790_v18 = vmul.f32 %v9210_v55, %v700_v54  ;;  %v727_v55 = vld [vmem:[#allocation5 + $0x808] sm:$0xff]  ;;  %v728_v53 = vld [vmem:[#allocation5 + $0x810] sm:$0xff] }
 0x3d0   :  { %9196 = vst [vmem:[#allocation250_spill] sm:$0xff] %v6766_v61  ;;  %v6787_v30 = vmul.f32 %v9208_v63, %v699_v10  ;;  %v9220_v63 = vld [vmem:[#allocation257_spill] sm:$0xff]  ;;  %v726_v54 = vld [vmem:[#allocation5 + $0x800] sm:$0xff] }
 0x3d1   :  { %9198 = vst [vmem:[#allocation169_spill] sm:$0xff] %v6769_v1  ;;  %v9206_v1 = vld [vmem:[#allocation252_spill] sm:$0xff]  ;;  %v6805_v10 = vmul.f32 %v9220_v63, %v705_v4  ;;  %v732_v4 = vld [vmem:[#allocation5 + $0x830] sm:$0xff]  ;;  %v733_v63 = vld [vmem:[#allocation5 + $0x838] sm:$0xff] }
 0x3d2   :  { %9201 = vst [vmem:[#allocation313_spill] sm:$0xff] %v6775_v62  ;;  %v6784_v61 = vmul.f32 %v9206_v1, %v698_v45  ;;  %v9218_v45 = vld [vmem:[#allocation256_spill] sm:$0xff] }
 0x3d3   :  { %9203 = vst [vmem:[#allocation251_spill] sm:$0xff] %v6778_v13  ;;  %v9216_v13 = vld [vmem:[#allocation255_spill] sm:$0xff]  ;;  %v6802_v1 = vmul.f32 %v9218_v45, %v704_v41  ;;  %v731_v45 = vld [vmem:[#allocation5 + $0x828] sm:$0xff] }
 0x3d4   :  { %9205 = vst [vmem:[#allocation172_spill] sm:$0xff] %v6781_v51  ;;  %v6796_v51 = vmul.f32 %v9214_v6, %v702_v32  ;;  %v6799_v62 = vmul.f32 %v9216_v13, %v703_v5  ;;  %v9226_v6 = vld [vmem:[#allocation260_spill] sm:$0xff]  ;;  %v9228_v5 = vld [vmem:[#allocation198_spill] sm:$0xff]  ;;  %v730_v41 = vld [vmem:[#allocation5 + $0x820] sm:$0xff] }
 0x3d5   :  { %9207 = vst [vmem:[#allocation322_spill] sm:$0xff] %v6784_v61  ;;  %v6814_v32 = vmul.f32 %v9226_v6, %v708_v46  ;;  %v6817_v13 = vmul.f32 %v9228_v5, %v709_v22  ;;  %v734_v46 = vld [vmem:[#allocation5 + $0x840] sm:$0xff]  ;;  %v735_v6 = vld [vmem:[#allocation5 + $0x848] sm:$0xff]  ;;  %v736_v22 = vld [vmem:[#allocation5 + $0x850] sm:$0xff] }
 0x3d6   :  { %9209 = vst [vmem:[#allocation252_spill] sm:$0xff] %v6787_v30  ;;  %v9224_v30 = vld [vmem:[#allocation259_spill] sm:$0xff]  ;;  %v737_v5 = vld [vmem:[#allocation5 + $0x858] sm:$0xff] }
 0x3d7   :  { %9211 = vst [vmem:[#allocation175_spill] sm:$0xff] %v6790_v18  ;;  %v6811_v61 = vmul.f32 %v9224_v30, %v707_v56  ;;  %v9236_v30 = vld [vmem:[#allocation262_spill] sm:$0xff] }
 0x3d8   :  { %9213 = vst [vmem:[#allocation331_spill] sm:$0xff] %v6793_v16  ;;  %v9222_v16 = vld [vmem:[#allocation258_spill] sm:$0xff]  ;;  %v6829_v56 = vmul.f32 %v9236_v30, %v713_v29  ;;  %v740_v29 = vld [vmem:[#allocation5 + $0x870] sm:$0xff] }
 0x3d9   :  { %9215 = vst [vmem:[#allocation253_spill] sm:$0xff] %v6796_v51  ;;  %v6808_v18 = vmul.f32 %v9222_v16, %v706_v57  ;;  %v9234_v57 = vld [vmem:[#allocation201_spill] sm:$0xff]  ;;  %v741_v30 = vld [vmem:[#allocation5 + $0x878] sm:$0xff] }
 0x3da   :  { %9217 = vst [vmem:[#allocation254_spill] sm:$0xff] %v6799_v62  ;;  %v9232_v62 = vld [vmem:[#allocation58_spill] sm:$0xff]  ;;  %v6826_v16 = vmul.f32 %v9234_v57, %v712_v27  ;;  %v738_v27 = vld [vmem:[#allocation5 + $0x860] sm:$0xff]  ;;  %v739_v57 = vld [vmem:[#allocation5 + $0x868] sm:$0xff] }
 0x3db   :  { %9219 = vst [vmem:[#allocation255_spill] sm:$0xff] %v6802_v1  ;;  %v6823_v51 = vmul.f32 %v9232_v62, %v711_v0  ;;  %v9244_v62 = vld [vmem:[#allocation76_spill] sm:$0xff] }
 0x3dc   :  { %9221 = vst [vmem:[#allocation256_spill] sm:$0xff] %v6805_v10  ;;  %v9230_v10 = vld [vmem:[#allocation261_spill] sm:$0xff]  ;;  %v6841_v0 = vmul.f32 %v9244_v62, %v717_v43  ;;  %v745_v62 = vld [vmem:[#allocation5 + $0x898] sm:$0xff] }
 0x3dd   :  { %9223 = vst [vmem:[#allocation257_spill] sm:$0xff] %v6808_v18  ;;  %v6820_v1 = vmul.f32 %v9230_v10, %v710_v20  ;;  %v9242_v20 = vld [vmem:[#allocation263_spill] sm:$0xff]  ;;  %v744_v43 = vld [vmem:[#allocation5 + $0x890] sm:$0xff] }
 0x3de   :  { %9225 = vst [vmem:[#allocation258_spill] sm:$0xff] %v6811_v61  ;;  %v9240_v61 = vld [vmem:[#allocation204_spill] sm:$0xff]  ;;  %v6838_v10 = vmul.f32 %v9242_v20, %v716_v48  ;;  %v742_v48 = vld [vmem:[#allocation5 + $0x880] sm:$0xff] }
 0x3df   :  { %9227 = vst [vmem:[#allocation259_spill] sm:$0xff] %v6814_v32  ;;  %v6835_v18 = vmul.f32 %v9240_v61, %v715_v25  ;;  %v9252_v61 = vld [vmem:[#allocation210_spill] sm:$0xff]  ;;  %v743_v20 = vld [vmem:[#allocation5 + $0x888] sm:$0xff] }
 0x3e0   :  { %9229 = vst [vmem:[#allocation260_spill] sm:$0xff] %v6817_v13  ;;  %v9238_v13 = vld [vmem:[#allocation67_spill] sm:$0xff]  ;;  %v6853_v25 = vmul.f32 %v9252_v61, %v721_v60  ;;  %v748_v60 = vld [vmem:[#allocation5 + $0x8b0] sm:$0xff]  ;;  %v749_v61 = vld [vmem:[#allocation5 + $0x8b8] sm:$0xff] }
 0x3e1   :  { %9231 = vst [vmem:[#allocation198_spill] sm:$0xff] %v6820_v1  ;;  %v6832_v32 = vmul.f32 %v9238_v13, %v714_v14  ;;  %v9250_v14 = vld [vmem:[#allocation85_spill] sm:$0xff] }
 0x3e2   :  { %9233 = vst [vmem:[#allocation261_spill] sm:$0xff] %v6823_v51  ;;  %v9248_v51 = vld [vmem:[#allocation265_spill] sm:$0xff]  ;;  %v6850_v13 = vmul.f32 %v9250_v14, %v720_v26  ;;  %v746_v26 = vld [vmem:[#allocation5 + $0x8a0] sm:$0xff]  ;;  %v747_v14 = vld [vmem:[#allocation5 + $0x8a8] sm:$0xff] }
 0x3e3   :  { %9235 = vst [vmem:[#allocation58_spill] sm:$0xff] %v6826_v16  ;;  %v6847_v1 = vmul.f32 %v9248_v51, %v719_v44  ;;  %v9260_v51 = vld [vmem:[#allocation267_spill] sm:$0xff] }
 0x3e4   :  { %9237 = vst [vmem:[#allocation201_spill] sm:$0xff] %v6829_v56  ;;  %v9246_v56 = vld [vmem:[#allocation207_spill] sm:$0xff]  ;;  %v6865_v44 = vmul.f32 %v9260_v51, %v725_v36  ;;  %v752_v36 = vld [vmem:[#allocation5 + $0x8d0] sm:$0xff]  ;;  %v753_v51 = vld [vmem:[#allocation5 + $0x8d8] sm:$0xff] }
 0x3e5   :  { %9239 = vst [vmem:[#allocation262_spill] sm:$0xff] %v6832_v32  ;;  %v6844_v16 = vmul.f32 %v9246_v56, %v718_v8  ;;  %v9258_v8 = vld [vmem:[#allocation213_spill] sm:$0xff] }
 0x3e6   :  { %9241 = vst [vmem:[#allocation67_spill] sm:$0xff] %v6835_v18  ;;  %v9256_v18 = vld [vmem:[#allocation94_spill] sm:$0xff]  ;;  %v6862_v56 = vmul.f32 %v9258_v8, %v724_v59  ;;  %v750_v59 = vld [vmem:[#allocation5 + $0x8c0] sm:$0xff]  ;;  %v751_v8 = vld [vmem:[#allocation5 + $0x8c8] sm:$0xff] }
 0x3e7   :  { %9243 = vst [vmem:[#allocation204_spill] sm:$0xff] %v6838_v10  ;;  %v6859_v32 = vmul.f32 %v9256_v18, %v723_v39  ;;  %v9265_v18 = vld [vmem:[#allocation112_spill] sm:$0xff] }
 0x3e8   :  { %9245 = vst [vmem:[#allocation263_spill] sm:$0xff] %v6841_v0  ;;  %v9254_v0 = vld [vmem:[#allocation266_spill] sm:$0xff]  ;;  %v6877_v39 = vmul.f32 %v9265_v18, %v729_v37  ;;  %v756_v37 = vld [vmem:[#allocation5 + $0x8f0] sm:$0xff] }
 0x3e9   :  { %9247 = vst [vmem:[#allocation76_spill] sm:$0xff] %v6844_v16  ;;  %v6856_v10 = vmul.f32 %v9254_v0, %v722_v35  ;;  %v9264_v35 = vld [vmem:[#allocation269_spill] sm:$0xff] }
 0x3ea   :  { %9249 = vst [vmem:[#allocation207_spill] sm:$0xff] %v6847_v1  ;;  %v9263_v1 = vld [vmem:[#allocation216_spill] sm:$0xff]  ;;  %v6874_v0 = vmul.f32 %v9264_v35, %v728_v53  ;;  %v9272_v35 = vld [vmem:[#allocation121_spill] sm:$0xff] }
 0x3eb   :  { %9251 = vst [vmem:[#allocation265_spill] sm:$0xff] %v6850_v13  ;;  %v6871_v16 = vmul.f32 %v9263_v1, %v727_v55  ;;  %v6889_v1 = vmul.f32 %v5742_v52, %v733_v63  ;;  %v754_v55 = vld [vmem:[#allocation5 + $0x8e0] sm:$0xff]  ;;  %v755_v53 = vld [vmem:[#allocation5 + $0x8e8] sm:$0xff]  ;;  %v6892_v18 = vmul.f32 %v9272_v35, %v734_v46  ;;  %v760_v52 = vld [vmem:[#allocation5 + $0x910] sm:$0xff] }
 0x3ec   :  { %9253 = vst [vmem:[#allocation85_spill] sm:$0xff] %v6853_v25  ;;  %v9262_v25 = vld [vmem:[#allocation103_spill] sm:$0xff]  ;;  %v761_v63 = vld [vmem:[#allocation5 + $0x918] sm:$0xff] }
 0x3ed   :  { %9255 = vst [vmem:[#allocation210_spill] sm:$0xff] %v6856_v10  ;;  %v6868_v13 = vmul.f32 %v9262_v25, %v726_v54  ;;  %v6886_v54 = vmul.f32 %v5739_v12, %v732_v4  ;;  %v757_v25 = vld [vmem:[#allocation5 + $0x8f8] sm:$0xff]  ;;  %v758_v12 = vld [vmem:[#allocation5 + $0x900] sm:$0xff]  ;;  %v759_v4 = vld [vmem:[#allocation5 + $0x908] sm:$0xff] }
 0x3ee   :  { %9257 = vst [vmem:[#allocation266_spill] sm:$0xff] %v6859_v32  ;;  %v9268_v32 = vld [vmem:[#allocation270_spill] sm:$0xff] }
 0x3ef   :  { %9259 = vst [vmem:[#allocation94_spill] sm:$0xff] %v6862_v56  ;;  %v6883_v10 = vmul.f32 %v9268_v32, %v731_v45  ;;  %v9276_v32 = vld [vmem:[#allocation222_spill] sm:$0xff] }
 0x3f0   :  { %9261 = vst [vmem:[#allocation213_spill] sm:$0xff] %v6865_v44  ;;  %v9267_v44 = vld [vmem:[#allocation219_spill] sm:$0xff]  ;;  %v6901_v45 = vmul.f32 %v9276_v32, %v737_v5  ;;  %v9281_v46 = vld [vmem:[#allocation130_spill] sm:$0xff]  ;;  %v764_v5 = vld [vmem:[#allocation5 + $0x930] sm:$0xff] }
 0x3f1   :  { %9266 = vst [vmem:[#allocation267_spill] sm:$0xff] %v6877_v39  ;;  %v6880_v56 = vmul.f32 %v9267_v44, %v730_v41  ;;  %v6895_v39 = vmul.f32 %v5749_v21, %v735_v6  ;;  %v6898_v41 = vmul.f32 %v5752_v50, %v736_v22  ;;  %v6904_v44 = vmul.f32 %v5759_v40, %v738_v27  ;;  %v9283_v21 = vld [vmem:[#allocation225_spill] sm:$0xff]  ;;  %v762_v50 = vld [vmem:[#allocation5 + $0x920] sm:$0xff]  ;;  %v763_v22 = vld [vmem:[#allocation5 + $0x928] sm:$0xff] }
 0x3f2   :  { %9269 = vst [vmem:[#allocation103_spill] sm:$0xff] %v6883_v10  ;;  %v6910_v35 = vmul.f32 %v9281_v46, %v740_v29  ;;  %v6913_v6 = vmul.f32 %v9283_v21, %v741_v30  ;;  %v765_v32 = vld [vmem:[#allocation5 + $0x938] sm:$0xff]  ;;  %v9288_v40 = vld [vmem:[#allocation228_spill] sm:$0xff]  ;;  %v766_v29 = vld [vmem:[#allocation5 + $0x940] sm:$0xff] }
 0x3f3   :  { %9270 = vst [vmem:[#allocation216_spill] sm:$0xff] %v6886_v54  ;;  %v6922_v27 = vmul.f32 %v9288_v40, %v744_v43  ;;  %v767_v46 = vld [vmem:[#allocation5 + $0x948] sm:$0xff]  ;;  %v768_v30 = vld [vmem:[#allocation5 + $0x950] sm:$0xff]  ;;  %v769_v21 = vld [vmem:[#allocation5 + $0x958] sm:$0xff] }
 0x3f4   :  { %9271 = vst [vmem:[#allocation269_spill] sm:$0xff] %v6889_v1  ;;  %v9279_v1 = vld [vmem:[#allocation271_spill] sm:$0xff]  ;;  %v771_v40 = vld [vmem:[#allocation5 + $0x968] sm:$0xff] }
 0x3f5   :  { %9273 = vst [vmem:[#allocation112_spill] sm:$0xff] %v6892_v18  ;;  %v6907_v54 = vmul.f32 %v9279_v1, %v739_v57  ;;  %v9290_v57 = vld [vmem:[#allocation272_spill] sm:$0xff]  ;;  %v770_v43 = vld [vmem:[#allocation5 + $0x960] sm:$0xff] }
 0x3f6   :  { %9274 = vst [vmem:[#allocation219_spill] sm:$0xff] %v6895_v39  ;;  %v9286_v39 = vld [vmem:[#allocation139_spill] sm:$0xff]  ;;  %v6925_v1 = vmul.f32 %v9290_v57, %v745_v62  ;;  %v772_v62 = vld [vmem:[#allocation5 + $0x970] sm:$0xff]  ;;  %v773_v57 = vld [vmem:[#allocation5 + $0x978] sm:$0xff] }
 0x3f7   :  { %9275 = vst [vmem:[#allocation270_spill] sm:$0xff] %v6898_v41  ;;  %v6919_v18 = vmul.f32 %v9286_v39, %v743_v20  ;;  %v9298_v20 = vld [vmem:[#allocation161_spill] sm:$0xff] }
 0x3f8   :  { %9277 = vst [vmem:[#allocation121_spill] sm:$0xff] %v6901_v45  ;;  %v9285_v45 = vld [vmem:[#allocation156_spill] sm:$0xff]  ;;  %v6937_v39 = vmul.f32 %v9298_v20, %v749_v61  ;;  %v776_v61 = vld [vmem:[#allocation5 + $0x990] sm:$0xff]  ;;  %v777_v20 = vld [vmem:[#allocation5 + $0x998] sm:$0xff] }
 0x3f9   :  { %9278 = vst [vmem:[#allocation222_spill] sm:$0xff] %v6904_v44  ;;  %v6916_v41 = vmul.f32 %v9285_v45, %v742_v48  ;;  %v9296_v48 = vld [vmem:[#allocation273_spill] sm:$0xff] }
 0x3fa   :  { %9280 = vst [vmem:[#allocation271_spill] sm:$0xff] %v6907_v54  ;;  %v9294_v54 = vld [vmem:[#allocation231_spill] sm:$0xff]  ;;  %v6934_v45 = vmul.f32 %v9296_v48, %v748_v60  ;;  %v775_v48 = vld [vmem:[#allocation5 + $0x988] sm:$0xff] }
 0x3fb   :  { %9282 = vst [vmem:[#allocation130_spill] sm:$0xff] %v6910_v35  ;;  %v6931_v44 = vmul.f32 %v9294_v54, %v747_v14  ;;  %v9306_v14 = vld [vmem:[#allocation237_spill] sm:$0xff]  ;;  %v774_v60 = vld [vmem:[#allocation5 + $0x980] sm:$0xff] }
 0x3fc   :  { %9284 = vst [vmem:[#allocation225_spill] sm:$0xff] %v6913_v6  ;;  %v9292_v6 = vld [vmem:[#allocation148_spill] sm:$0xff]  ;;  %v6949_v54 = vmul.f32 %v9306_v14, %v753_v51  ;;  %v780_v51 = vld [vmem:[#allocation5 + $0x9b0] sm:$0xff]  ;;  %v781_v14 = vld [vmem:[#allocation5 + $0x9b8] sm:$0xff] }
 0x3fd   :  { %9287 = vst [vmem:[#allocation156_spill] sm:$0xff] %v6919_v18  ;;  %v6928_v35 = vmul.f32 %v9292_v6, %v746_v26  ;;  %v9302_v18 = vld [vmem:[#allocation274_spill] sm:$0xff]  ;;  %v9304_v26 = vld [vmem:[#allocation188_spill] sm:$0xff] }
 0x3fe   :  { %9289 = vst [vmem:[#allocation139_spill] sm:$0xff] %v6922_v27  ;;  %v6943_v10 = vmul.f32 %v9302_v18, %v751_v8  ;;  %v6946_v6 = vmul.f32 %v9304_v26, %v752_v36  ;;  %v9314_v8 = vld [vmem:[#allocation279_spill] sm:$0xff]  ;;  %v779_v26 = vld [vmem:[#allocation5 + $0x9a8] sm:$0xff] }
 0x3ff   :  { %9291 = vst [vmem:[#allocation228_spill] sm:$0xff] %v6925_v1  ;;  %v9300_v1 = vld [vmem:[#allocation234_spill] sm:$0xff]  ;;  %v6961_v18 = vmul.f32 %v9314_v8, %v757_v25  ;;  %v778_v36 = vld [vmem:[#allocation5 + $0x9a0] sm:$0xff]  ;;  %v784_v25 = vld [vmem:[#allocation5 + $0x9d0] sm:$0xff] }
 0x400   :  { %9293 = vst [vmem:[#allocation272_spill] sm:$0xff] %v6928_v35  ;;  %v6940_v27 = vmul.f32 %v9300_v1, %v750_v59  ;;  %v9312_v59 = vld [vmem:[#allocation278_spill] sm:$0xff] }
 0x401   :  { %9295 = vst [vmem:[#allocation148_spill] sm:$0xff] %v6931_v44  ;;  %v9310_v44 = vld [vmem:[#allocation276_spill] sm:$0xff]  ;;  %v6958_v1 = vmul.f32 %v9312_v59, %v756_v37  ;;  %v782_v37 = vld [vmem:[#allocation5 + $0x9c0] sm:$0xff]  ;;  %v785_v8 = vld [vmem:[#allocation5 + $0x9d8] sm:$0xff] }
 0x402   :  { %9297 = vst [vmem:[#allocation231_spill] sm:$0xff] %v6934_v45  ;;  %v6955_v35 = vmul.f32 %v9310_v44, %v755_v53  ;;  %v9322_v53 = vld [vmem:[#allocation282_spill] sm:$0xff]  ;;  %v783_v59 = vld [vmem:[#allocation5 + $0x9c8] sm:$0xff] }
 0x403   :  { %9299 = vst [vmem:[#allocation273_spill] sm:$0xff] %v6937_v39  ;;  %v9308_v39 = vld [vmem:[#allocation275_spill] sm:$0xff]  ;;  %v6973_v44 = vmul.f32 %v9322_v53, %v761_v63  ;;  %v788_v63 = vld [vmem:[#allocation5 + $0x9f0] sm:$0xff]  ;;  %v789_v53 = vld [vmem:[#allocation5 + $0x9f8] sm:$0xff] }
 0x404   :  { %9301 = vst [vmem:[#allocation161_spill] sm:$0xff] %v6940_v27  ;;  %v6952_v45 = vmul.f32 %v9308_v39, %v754_v55  ;;  %v9320_v55 = vld [vmem:[#allocation281_spill] sm:$0xff] }
 0x405   :  { %9303 = vst [vmem:[#allocation234_spill] sm:$0xff] %v6943_v10  ;;  %v9318_v10 = vld [vmem:[#allocation159_spill] sm:$0xff]  ;;  %v6970_v39 = vmul.f32 %v9320_v55, %v760_v52  ;;  %v787_v55 = vld [vmem:[#allocation5 + $0x9e8] sm:$0xff] }
 0x406   :  { %9305 = vst [vmem:[#allocation274_spill] sm:$0xff] %v6946_v6  ;;  %v6967_v27 = vmul.f32 %v9318_v10, %v759_v4  ;;  %v9330_v10 = vld [vmem:[#allocation352_spill] sm:$0xff]  ;;  %v786_v52 = vld [vmem:[#allocation5 + $0x9e0] sm:$0xff] }
 0x407   :  { %9307 = vst [vmem:[#allocation188_spill] sm:$0xff] %v6949_v54  ;;  %v9316_v54 = vld [vmem:[#allocation280_spill] sm:$0xff]  ;;  %v6985_v4 = vmul.f32 %v9330_v10, %v765_v32  ;;  %v792_v32 = vld [vmem:[#allocation5 + $0xa10] sm:$0xff]  ;;  %v793_v10 = vld [vmem:[#allocation5 + $0xa18] sm:$0xff] }
 0x408   :  { %9309 = vst [vmem:[#allocation237_spill] sm:$0xff] %v6952_v45  ;;  %v6964_v6 = vmul.f32 %v9316_v54, %v758_v12  ;;  %v9328_v12 = vld [vmem:[#allocation284_spill] sm:$0xff] }
 0x409   :  { %9311 = vst [vmem:[#allocation275_spill] sm:$0xff] %v6955_v35  ;;  %v9326_v35 = vld [vmem:[#allocation351_spill] sm:$0xff]  ;;  %v6982_v54 = vmul.f32 %v9328_v12, %v764_v5  ;;  %v791_v12 = vld [vmem:[#allocation5 + $0xa08] sm:$0xff] }
 0x40a   :  { %9313 = vst [vmem:[#allocation276_spill] sm:$0xff] %v6958_v1  ;;  %v6979_v45 = vmul.f32 %v9326_v35, %v763_v22  ;;  %v9338_v35 = vld [vmem:[#allocation355_spill] sm:$0xff] }
 0x40b   :  { %9315 = vst [vmem:[#allocation278_spill] sm:$0xff] %v6961_v18  ;;  %v9324_v18 = vld [vmem:[#allocation283_spill] sm:$0xff]  ;;  %v6997_v22 = vmul.f32 %v9338_v35, %v769_v21  ;;  %v796_v21 = vld [vmem:[#allocation5 + $0xa30] sm:$0xff]  ;;  %v797_v35 = vld [vmem:[#allocation5 + $0xa38] sm:$0xff] }
 0x40c   :  { %9317 = vst [vmem:[#allocation279_spill] sm:$0xff] %v6964_v6  ;;  %v6976_v1 = vmul.f32 %v9324_v18, %v762_v50  ;;  %v9336_v50 = vld [vmem:[#allocation354_spill] sm:$0xff]  ;;  %v790_v5 = vld [vmem:[#allocation5 + $0xa00] sm:$0xff] }
 0x40d   :  { %9319 = vst [vmem:[#allocation280_spill] sm:$0xff] %v6967_v27  ;;  %v9334_v27 = vld [vmem:[#allocation285_spill] sm:$0xff]  ;;  %v6994_v18 = vmul.f32 %v9336_v50, %v768_v30  ;;  %v794_v30 = vld [vmem:[#allocation5 + $0xa20] sm:$0xff]  ;;  %v795_v50 = vld [vmem:[#allocation5 + $0xa28] sm:$0xff] }
 0x40e   :  { %9321 = vst [vmem:[#allocation159_spill] sm:$0xff] %v6970_v39  ;;  %v6991_v6 = vmul.f32 %v9334_v27, %v767_v46  ;;  %v9346_v27 = vld [vmem:[#allocation288_spill] sm:$0xff] }
 0x40f   :  { %9323 = vst [vmem:[#allocation281_spill] sm:$0xff] %v6973_v44  ;;  %v9332_v44 = vld [vmem:[#allocation353_spill] sm:$0xff]  ;;  %v7009_v46 = vmul.f32 %v9346_v27, %v773_v57  ;;  %v801_v27 = vld [vmem:[#allocation5 + $0xa58] sm:$0xff] }
 0x410   :  { %9325 = vst [vmem:[#allocation282_spill] sm:$0xff] %v6976_v1  ;;  %v6988_v39 = vmul.f32 %v9332_v44, %v766_v29  ;;  %v9344_v29 = vld [vmem:[#allocation357_spill] sm:$0xff] }
 0x411   :  { %9327 = vst [vmem:[#allocation283_spill] sm:$0xff] %v6979_v45  ;;  %v9342_v45 = vld [vmem:[#allocation356_spill] sm:$0xff]  ;;  %v7006_v44 = vmul.f32 %v9344_v29, %v772_v62  ;;  %v798_v62 = vld [vmem:[#allocation5 + $0xa40] sm:$0xff]  ;;  %v800_v57 = vld [vmem:[#allocation5 + $0xa50] sm:$0xff] }
 0x412   :  { %9329 = vst [vmem:[#allocation351_spill] sm:$0xff] %v6982_v54  ;;  %v7003_v1 = vmul.f32 %v9342_v45, %v771_v40  ;;  %v9354_v45 = vld [vmem:[#allocation360_spill] sm:$0xff] }
 0x413   :  { %9331 = vst [vmem:[#allocation284_spill] sm:$0xff] %v6985_v4  ;;  %v9340_v4 = vld [vmem:[#allocation287_spill] sm:$0xff]  ;;  %v7021_v40 = vmul.f32 %v9354_v45, %v777_v20  ;;  %v799_v29 = vld [vmem:[#allocation5 + $0xa48] sm:$0xff]  ;;  %v804_v20 = vld [vmem:[#allocation5 + $0xa70] sm:$0xff] }
 0x414   :  { %9333 = vst [vmem:[#allocation352_spill] sm:$0xff] %v6988_v39  ;;  %v7000_v54 = vmul.f32 %v9340_v4, %v770_v43  ;;  %v9352_v43 = vld [vmem:[#allocation289_spill] sm:$0xff]  ;;  %v805_v45 = vld [vmem:[#allocation5 + $0xa78] sm:$0xff] }
 0x415   :  { %9335 = vst [vmem:[#allocation353_spill] sm:$0xff] %v6991_v6  ;;  %v9350_v6 = vld [vmem:[#allocation359_spill] sm:$0xff]  ;;  %v7018_v4 = vmul.f32 %v9352_v43, %v776_v61  ;;  %v803_v43 = vld [vmem:[#allocation5 + $0xa68] sm:$0xff] }
 0x416   :  { %9337 = vst [vmem:[#allocation285_spill] sm:$0xff] %v6994_v18  ;;  %v7015_v39 = vmul.f32 %v9350_v6, %v775_v48  ;;  %v9362_v6 = vld [vmem:[#allocation13_spill] sm:$0xff]  ;;  %v802_v61 = vld [vmem:[#allocation5 + $0xa60] sm:$0xff] }
 0x417   :  { %9339 = vst [vmem:[#allocation354_spill] sm:$0xff] %v6997_v22  ;;  %v9348_v22 = vld [vmem:[#allocation358_spill] sm:$0xff]  ;;  %v7033_v48 = vmul.f32 %v9362_v6, %v781_v14  ;;  %v808_v14 = vld [vmem:[#allocation5 + $0xa90] sm:$0xff] }
 0x418   :  { %9341 = vst [vmem:[#allocation355_spill] sm:$0xff] %v7000_v54  ;;  %v7012_v18 = vmul.f32 %v9348_v22, %v774_v60  ;;  %v9360_v60 = vld [vmem:[#allocation11_spill] sm:$0xff]  ;;  %v809_v6 = vld [vmem:[#allocation5 + $0xa98] sm:$0xff] }
 0x419   :  { %9343 = vst [vmem:[#allocation287_spill] sm:$0xff] %v7003_v1  ;;  %v9358_v1 = vld [vmem:[#allocation162_spill] sm:$0xff]  ;;  %v7030_v22 = vmul.f32 %v9360_v60, %v780_v51  ;;  %v806_v51 = vld [vmem:[#allocation5 + $0xa80] sm:$0xff]  ;;  %v807_v60 = vld [vmem:[#allocation5 + $0xa88] sm:$0xff] }
 0x41a   :  { %9345 = vst [vmem:[#allocation356_spill] sm:$0xff] %v7006_v44  ;;  %v7027_v54 = vmul.f32 %v9358_v1, %v779_v26  ;;  %v9370_v1 = vld [vmem:[#allocation187_spill] sm:$0xff] }
 0x41b   :  { %9347 = vst [vmem:[#allocation357_spill] sm:$0xff] %v7009_v46  ;;  %v9356_v46 = vld [vmem:[#allocation361_spill] sm:$0xff]  ;;  %v7045_v26 = vmul.f32 %v9370_v1, %v785_v8  ;;  %v9380_v1 = vld [vmem:[#allocation28_spill] sm:$0xff] }
 0x41c   :  { %9349 = vst [vmem:[#allocation288_spill] sm:$0xff] %v7012_v18  ;;  %v7024_v44 = vmul.f32 %v9356_v46, %v778_v36  ;;  %v9368_v36 = vld [vmem:[#allocation18_spill] sm:$0xff]  ;;  %v812_v8 = vld [vmem:[#allocation5 + $0xab0] sm:$0xff] }
 0x41d   :  { %9351 = vst [vmem:[#allocation358_spill] sm:$0xff] %v7015_v39  ;;  %v9366_v39 = vld [vmem:[#allocation186_spill] sm:$0xff]  ;;  %v7042_v46 = vmul.f32 %v9368_v36, %v784_v25  ;;  %v810_v25 = vld [vmem:[#allocation5 + $0xaa0] sm:$0xff]  ;;  %v811_v36 = vld [vmem:[#allocation5 + $0xaa8] sm:$0xff] }
 0x41e   :  { %9353 = vst [vmem:[#allocation359_spill] sm:$0xff] %v7018_v4  ;;  %v7039_v18 = vmul.f32 %v9366_v39, %v783_v59  ;;  %v9378_v39 = vld [vmem:[#allocation26_spill] sm:$0xff] }
 0x41f   :  { %9355 = vst [vmem:[#allocation289_spill] sm:$0xff] %v7021_v40  ;;  %v9364_v40 = vld [vmem:[#allocation15_spill] sm:$0xff]  ;;  %v7057_v59 = vmul.f32 %v9378_v39, %v789_v53  ;;  %v9385_v53 = vld [vmem:[#allocation192_spill] sm:$0xff] }
 0x420   :  { %9357 = vst [vmem:[#allocation360_spill] sm:$0xff] %v7024_v44  ;;  %v7036_v4 = vmul.f32 %v9364_v40, %v782_v37  ;;  %v9376_v37 = vld [vmem:[#allocation25_spill] sm:$0xff]  ;;  %v7072_v39 = vmul.f32 %v9385_v53, %v794_v30  ;;  %v9396_v30 = vld [vmem:[#allocation44_spill] sm:$0xff] }
 0x421   :  { %9359 = vst [vmem:[#allocation361_spill] sm:$0xff] %v7027_v54  ;;  %v9374_v54 = vld [vmem:[#allocation23_spill] sm:$0xff]  ;;  %v7054_v40 = vmul.f32 %v9376_v37, %v788_v63  ;;  %v813_v63 = vld [vmem:[#allocation5 + $0xab8] sm:$0xff]  ;;  %v7090_v53 = vmul.f32 %v9396_v30, %v800_v57  ;;  %v823_v30 = vld [vmem:[#allocation5 + $0xb08] sm:$0xff] }
 0x422   :  { %9361 = vst [vmem:[#allocation162_spill] sm:$0xff] %v7030_v22  ;;  %v7051_v44 = vmul.f32 %v9374_v54, %v787_v55  ;;  %v9383_v54 = vld [vmem:[#allocation33_spill] sm:$0xff]  ;;  %v814_v37 = vld [vmem:[#allocation5 + $0xac0] sm:$0xff] }
 0x423   :  { %9363 = vst [vmem:[#allocation11_spill] sm:$0xff] %v7033_v48  ;;  %v9372_v48 = vld [vmem:[#allocation21_spill] sm:$0xff]  ;;  %v7069_v55 = vmul.f32 %v9383_v54, %v793_v10  ;;  %v822_v57 = vld [vmem:[#allocation5 + $0xb00] sm:$0xff] }
 0x424   :  { %9365 = vst [vmem:[#allocation13_spill] sm:$0xff] %v7036_v4  ;;  %v7048_v22 = vmul.f32 %v9372_v48, %v786_v52  ;;  %v9382_v52 = vld [vmem:[#allocation31_spill] sm:$0xff]  ;;  %v9392_v10 = vld [vmem:[#allocation41_spill] sm:$0xff] }
 0x425   :  { %9367 = vst [vmem:[#allocation15_spill] sm:$0xff] %v7039_v18  ;;  %v7066_v48 = vmul.f32 %v9382_v52, %v792_v32  ;;  %v816_v32 = vld [vmem:[#allocation5 + $0xad0] sm:$0xff]  ;;  %v817_v52 = vld [vmem:[#allocation5 + $0xad8] sm:$0xff]  ;;  %v7084_v54 = vmul.f32 %v9392_v10, %v798_v62  ;;  %v9394_v4 = vld [vmem:[#allocation43_spill] sm:$0xff] }
 0x426   :  { %9369 = vst [vmem:[#allocation186_spill] sm:$0xff] %v7042_v46  ;;  %v9381_v46 = vld [vmem:[#allocation29_spill] sm:$0xff]  ;;  %v9404_v62 = vld [vmem:[#allocation51_spill] sm:$0xff] }
 0x427   :  { %9371 = vst [vmem:[#allocation18_spill] sm:$0xff] %v7045_v26  ;;  %v7060_v26 = vmul.f32 %v9380_v1, %v790_v5  ;;  %v7063_v18 = vmul.f32 %v9381_v46, %v791_v12  ;;  %v9388_v5 = vld [vmem:[#allocation193_spill] sm:$0xff]  ;;  %v9390_v12 = vld [vmem:[#allocation39_spill] sm:$0xff]  ;;  %v7102_v10 = vmul.f32 %v9404_v62, %v804_v20  ;;  %v825_v20 = vld [vmem:[#allocation5 + $0xb18] sm:$0xff] }
 0x428   :  { %9373 = vst [vmem:[#allocation187_spill] sm:$0xff] %v7048_v22  ;;  %v7078_v1 = vmul.f32 %v9388_v5, %v796_v21  ;;  %v7081_v46 = vmul.f32 %v9390_v12, %v797_v35  ;;  %v818_v22 = vld [vmem:[#allocation5 + $0xae0] sm:$0xff]  ;;  %v819_v21 = vld [vmem:[#allocation5 + $0xae8] sm:$0xff]  ;;  %v820_v5 = vld [vmem:[#allocation5 + $0xaf0] sm:$0xff] }
 0x429   :  { %9375 = vst [vmem:[#allocation21_spill] sm:$0xff] %v7051_v44  ;;  %v9400_v35 = vld [vmem:[#allocation47_spill] sm:$0xff] }
 0x42a   :  { %9377 = vst [vmem:[#allocation23_spill] sm:$0xff] %v7054_v40  ;;  %v815_v40 = vld [vmem:[#allocation5 + $0xac8] sm:$0xff]  ;;  %v7096_v12 = vmul.f32 %v9400_v35, %v802_v61  ;;  %v9410_v61 = vld [vmem:[#allocation59_spill] sm:$0xff] }
 0x42b   :  { %9379 = vst [vmem:[#allocation25_spill] sm:$0xff] %v7057_v59  ;;  %v9386_v59 = vld [vmem:[#allocation36_spill] sm:$0xff]  ;;  %v7114_v35 = vmul.f32 %v9410_v61, %v808_v14  ;;  %v826_v62 = vld [vmem:[#allocation5 + $0xb20] sm:$0xff]  ;;  %v828_v14 = vld [vmem:[#allocation5 + $0xb30] sm:$0xff] }
 0x42c   :  { %9384 = vst [vmem:[#allocation26_spill] sm:$0xff] %v7069_v55  ;;  %v7075_v44 = vmul.f32 %v9386_v59, %v795_v50  ;;  %v7087_v55 = vmul.f32 %v9394_v4, %v799_v29  ;;  %v9398_v50 = vld [vmem:[#allocation46_spill] sm:$0xff]  ;;  %v9406_v4 = vld [vmem:[#allocation53_spill] sm:$0xff] }
 0x42d   :  { %9389 = vst [vmem:[#allocation29_spill] sm:$0xff] %v7078_v1  ;;  %v7093_v59 = vmul.f32 %v9398_v50, %v801_v27  ;;  %v821_v1 = vld [vmem:[#allocation5 + $0xaf8] sm:$0xff]  ;;  %v7105_v29 = vmul.f32 %v9406_v4, %v805_v45  ;;  %v9408_v27 = vld [vmem:[#allocation55_spill] sm:$0xff] }
 0x42e   :  { %9387 = vst [vmem:[#allocation28_spill] sm:$0xff] %v7075_v44  ;;  %v7108_v50 = vmul.f32 %v9408_v27, %v806_v51  ;;  %v9413_v45 = vld [vmem:[#allocation63_spill] sm:$0xff]  ;;  %v9416_v51 = vld [vmem:[#allocation66_spill] sm:$0xff] }
 0x42f   :  { %9391 = vst [vmem:[#allocation31_spill] sm:$0xff] %v7081_v46  ;;  %v9402_v46 = vld [vmem:[#allocation49_spill] sm:$0xff]  ;;  %v7120_v4 = vmul.f32 %v9413_v45, %v810_v25  ;;  %v7126_v27 = vmul.f32 %v9416_v51, %v812_v8  ;;  %v829_v61 = vld [vmem:[#allocation5 + $0xb38] sm:$0xff]  ;;  %v831_v8 = vld [vmem:[#allocation5 + $0xb48] sm:$0xff] }
 0x430   :  { %9393 = vst [vmem:[#allocation33_spill] sm:$0xff] %v7084_v54  ;;  %v7099_v44 = vmul.f32 %v9402_v46, %v803_v43  ;;  %v9411_v43 = vld [vmem:[#allocation61_spill] sm:$0xff]  ;;  %v9424_v25 = vld [vmem:[#allocation74_spill] sm:$0xff] }
 0x431   :  { %9395 = vst [vmem:[#allocation192_spill] sm:$0xff] %v7087_v55  ;;  %v7117_v46 = vmul.f32 %v9411_v43, %v809_v6  ;;  %v9420_v6 = vld [vmem:[#allocation71_spill] sm:$0xff]  ;;  %v9422_v54 = vld [vmem:[#allocation73_spill] sm:$0xff]  ;;  %v7138_v45 = vmul.f32 %v9424_v25, %v816_v32  ;;  %v835_v25 = vld [vmem:[#allocation5 + $0xb68] sm:$0xff] }
 0x432   :  { %9397 = vst [vmem:[#allocation36_spill] sm:$0xff] %v7090_v53  ;;  %v824_v53 = vld [vmem:[#allocation5 + $0xb10] sm:$0xff]  ;;  %v7132_v43 = vmul.f32 %v9420_v6, %v814_v37  ;;  %v9432_v37 = vld [vmem:[#allocation208_spill] sm:$0xff]  ;;  %v834_v32 = vld [vmem:[#allocation5 + $0xb60] sm:$0xff] }
 0x433   :  { %9399 = vst [vmem:[#allocation193_spill] sm:$0xff] %v7093_v59  ;;  %v9409_v59 = vld [vmem:[#allocation56_spill] sm:$0xff]  ;;  %v832_v51 = vld [vmem:[#allocation5 + $0xb50] sm:$0xff]  ;;  %v7150_v6 = vmul.f32 %v9432_v37, %v820_v5  ;;  %v9441_v5 = vld [vmem:[#allocation95_spill] sm:$0xff] }
 0x434   :  { %9401 = vst [vmem:[#allocation39_spill] sm:$0xff] %v7096_v12  ;;  %v7111_v55 = vmul.f32 %v9409_v59, %v807_v60  ;;  %v9418_v60 = vld [vmem:[#allocation69_spill] sm:$0xff]  ;;  %v830_v12 = vld [vmem:[#allocation5 + $0xb40] sm:$0xff]  ;;  %v7168_v37 = vmul.f32 %v9441_v5, %v826_v62 }
 0x435   :  { %9403 = vst [vmem:[#allocation41_spill] sm:$0xff] %v7099_v44  ;;  %v7129_v59 = vmul.f32 %v9418_v60, %v813_v63  ;;  %v9428_v63 = vld [vmem:[#allocation79_spill] sm:$0xff]  ;;  %v9455_v62 = vld [vmem:[#allocation109_spill] sm:$0xff] }
 0x436   :  { %9405 = vst [vmem:[#allocation43_spill] sm:$0xff] %v7102_v10  ;;  %v827_v10 = vld [vmem:[#allocation5 + $0xb28] sm:$0xff]  ;;  %v7144_v60 = vmul.f32 %v9428_v63, %v818_v22  ;;  %v9438_v22 = vld [vmem:[#allocation91_spill] sm:$0xff] }
 0x437   :  { %9407 = vst [vmem:[#allocation44_spill] sm:$0xff] %v7105_v29  ;;  %v9414_v29 = vld [vmem:[#allocation202_spill] sm:$0xff]  ;;  %v7162_v63 = vmul.f32 %v9438_v22, %v824_v53  ;;  %v9451_v53 = vld [vmem:[#allocation105_spill] sm:$0xff] }
 0x438   :  { %9412 = vst [vmem:[#allocation46_spill] sm:$0xff] %v7117_v46  ;;  %v7123_v44 = vmul.f32 %v9414_v29, %v811_v36  ;;  %v7135_v46 = vmul.f32 %v9422_v54, %v815_v40  ;;  %v9426_v36 = vld [vmem:[#allocation77_spill] sm:$0xff]  ;;  %v9434_v40 = vld [vmem:[#allocation84_spill] sm:$0xff]  ;;  %v7183_v22 = vmul.f32 %v9451_v53, %v831_v8 }
 0x439   :  { %9417 = vst [vmem:[#allocation49_spill] sm:$0xff] %v7126_v27  ;;  %v7141_v29 = vmul.f32 %v9426_v36, %v817_v52  ;;  %v833_v27 = vld [vmem:[#allocation5 + $0xb58] sm:$0xff]  ;;  %v7153_v54 = vmul.f32 %v9434_v40, %v821_v1  ;;  %v9436_v52 = vld [vmem:[#allocation87_spill] sm:$0xff]  ;;  %v9443_v1 = vld [vmem:[#allocation97_spill] sm:$0xff] }
 0x43a   :  { %9415 = vst [vmem:[#allocation47_spill] sm:$0xff] %v7123_v44  ;;  %v7156_v36 = vmul.f32 %v9436_v52, %v822_v57  ;;  %v7171_v40 = vmul.f32 %v9443_v1, %v827_v10  ;;  %v9447_v57 = vld [vmem:[#allocation214_spill] sm:$0xff]  ;;  %v7189_v5 = vmul.f32 %v9455_v62, %v833_v27  ;;  %v9465_v8 = vld [vmem:[#allocation184_spill] sm:$0xff]  ;;  %v9470_v62 = vld [vmem:[#allocation189_spill] sm:$0xff] }
 0x43b   :  { %9419 = vst [vmem:[#allocation51_spill] sm:$0xff] %v7129_v59  ;;  %v9430_v59 = vld [vmem:[#allocation81_spill] sm:$0xff]  ;;  %v7177_v52 = vmul.f32 %v9447_v57, %v829_v61  ;;  %v9457_v10 = vld [vmem:[#allocation110_spill] sm:$0xff]  ;;  %v9461_v61 = vld [vmem:[#allocation115_spill] sm:$0xff] }
 0x43c   :  { %9421 = vst [vmem:[#allocation53_spill] sm:$0xff] %v7132_v43  ;;  %v7147_v44 = vmul.f32 %v9430_v59, %v819_v21  ;;  %v9439_v21 = vld [vmem:[#allocation92_spill] sm:$0xff]  ;;  %v7192_v1 = vmul.f32 %v9457_v10, %v834_v32 }
 0x43d   :  { %9423 = vst [vmem:[#allocation55_spill] sm:$0xff] %v7135_v46  ;;  %v7165_v59 = vmul.f32 %v9439_v21, %v825_v20  ;;  %v9453_v20 = vld [vmem:[#allocation107_spill] sm:$0xff]  ;;  %v9466_v53 = vld [vmem:[#allocation24_spill] sm:$0xff] }
 0x43e   :  { %9425 = vst [vmem:[#allocation56_spill] sm:$0xff] %v7138_v45  ;;  %v836_v45 = vld [vmem:[#allocation5 + $0xb70] sm:$0xff]  ;;  %v7186_v21 = vmul.f32 %v9453_v20, %v832_v51  ;;  %v9467_v51 = vld [vmem:[#allocation291_spill] sm:$0xff]  ;;  %v9469_v27 = vld [vmem:[#allocation12_spill] sm:$0xff] }
 0x43f   :  { %9427 = vst [vmem:[#allocation59_spill] sm:$0xff] %v7141_v29  ;;  %v9437_v29 = vld [vmem:[#allocation89_spill] sm:$0xff]  ;;  %v7198_v57 = vmul.f32 %v9461_v61, %v836_v45  ;;  %v9468_v20 = vld [vmem:[#allocation299_spill] sm:$0xff]  ;;  %v9471_v32 = vld [vmem:[#allocation292_spill] sm:$0xff] }
 0x440   :  { %9429 = vst [vmem:[#allocation61_spill] sm:$0xff] %v7144_v60  ;;  %v7159_v46 = vmul.f32 %v9437_v29, %v823_v30  ;;  %v9449_v30 = vld [vmem:[#allocation102_spill] sm:$0xff]  ;;  %v9472_v10 = vld [vmem:[#allocation300_spill] sm:$0xff]  ;;  %v9475_v45 = vld [vmem:[#allocation27_spill] sm:$0xff] }
 0x441   :  { %9431 = vst [vmem:[#allocation63_spill] sm:$0xff] %v7147_v44  ;;  %v7180_v29 = vmul.f32 %v9449_v30, %v830_v12  ;;  %v9463_v12 = vld [vmem:[#allocation290_spill] sm:$0xff]  ;;  %v9464_v30 = vld [vmem:[#allocation165_spill] sm:$0xff] }
 0x442   :  { %9433 = vst [vmem:[#allocation202_spill] sm:$0xff] %v7150_v6  ;;  %v2406_v44 = vadd.f32 %v9464_v30, %v9463_v12  ;;  %v9477_v60 = vld [vmem:[#allocation301_spill] sm:$0xff]  ;;  %v9478_v30 = vld [vmem:[#allocation16_spill] sm:$0xff] }
 0x443   :  { %9435 = vst [vmem:[#allocation66_spill] sm:$0xff] %v7153_v54  ;;  %v9445_v54 = vld [vmem:[#allocation99_spill] sm:$0xff] }
 0x444   :  { %9440 = vst [vmem:[#allocation69_spill] sm:$0xff] %v7165_v59  ;;  %v7174_v6 = vmul.f32 %v9445_v54, %v828_v14  ;;  %v9459_v14 = vld [vmem:[#allocation113_spill] sm:$0xff]  ;;  %v9489_v59 = vld [vmem:[#allocation316_spill] sm:$0xff] }
 0x445   :  { %9442 = vst [vmem:[#allocation71_spill] sm:$0xff] %v7168_v37  ;;  %v7195_v54 = vmul.f32 %v9459_v14, %v835_v25  ;;  %v9473_v25 = vld [vmem:[#allocation307_spill] sm:$0xff] }
 0x446   :  { %9444 = vst [vmem:[#allocation73_spill] sm:$0xff] %v7171_v40  ;;  %v2407_v14 = vadd.f32 %v2406_v44, %v9473_v25  ;;  %v9485_v44 = vld [vmem:[#allocation40_spill] sm:$0xff]  ;;  %v9486_v40 = vld [vmem:[#allocation309_spill] sm:$0xff] }
 0x447   :  { %9446 = vst [vmem:[#allocation74_spill] sm:$0xff] %v7174_v6  ;;  %v9482_v6 = vld [vmem:[#allocation38_spill] sm:$0xff] }
 0x448   :  { %9448 = vst [vmem:[#allocation77_spill] sm:$0xff] %v7177_v52 }
 0x449   :  { %9450 = vst [vmem:[#allocation79_spill] sm:$0xff] %v7180_v29  ;;  %v9479_v29 = vld [vmem:[#allocation190_spill] sm:$0xff] }
 0x44a   :  { %9452 = vst [vmem:[#allocation81_spill] sm:$0xff] %v7183_v22  ;;  %v2429_v22 = vadd.f32 %v9466_v53, %v9465_v8  ;;  %v2567_v8 = vadd.f32 %v9479_v29, %v9478_v30  ;;  %v9480_v53 = vld [vmem:[#allocation37_spill] sm:$0xff]  ;;  %v9490_v30 = vld [vmem:[#allocation52_spill] sm:$0xff] }
 0x44b   :  { %9454 = vst [vmem:[#allocation208_spill] sm:$0xff] %v7186_v21  ;;  %v2452_v21 = vadd.f32 %v9468_v20, %v9467_v51  ;;  %v9481_v51 = vld [vmem:[#allocation168_spill] sm:$0xff] }
 0x44c   :  { %9456 = vst [vmem:[#allocation84_spill] sm:$0xff] %v7189_v5  ;;  %v2475_v5 = vadd.f32 %v9470_v62, %v9469_v27  ;;  %v2430_v52 = vadd.f32 %v2429_v22, %v9480_v53  ;;  %v9483_v62 = vld [vmem:[#allocation308_spill] sm:$0xff]  ;;  %v9491_v53 = vld [vmem:[#allocation171_spill] sm:$0xff] }
 0x44d   :  { %9458 = vst [vmem:[#allocation87_spill] sm:$0xff] %v7192_v1  ;;  %v2498_v1 = vadd.f32 %v9472_v10, %v9471_v32  ;;  %v2453_v20 = vadd.f32 %v2452_v21, %v9481_v51  ;;  %v9484_v32 = vld [vmem:[#allocation315_spill] sm:$0xff] }
 0x44e   :  { %9460 = vst [vmem:[#allocation89_spill] sm:$0xff] %v7195_v54  ;;  %v9474_v54 = vld [vmem:[#allocation14_spill] sm:$0xff]  ;;  %v2476_v27 = vadd.f32 %v2475_v5, %v9482_v6  ;;  %v2408_v10 = vadd.f32 %v2407_v14, %v9484_v32  ;;  %v9492_v51 = vld [vmem:[#allocation323_spill] sm:$0xff] }
 0x44f   :  { %9462 = vst [vmem:[#allocation91_spill] sm:$0xff] %v7198_v57  ;;  %v2521_v61 = vadd.f32 %v9475_v45, %v9474_v54  ;;  %v9476_v57 = vld [vmem:[#allocation293_spill] sm:$0xff]  ;;  %v2499_v43 = vadd.f32 %v2498_v1, %v9483_v62  ;;  %v9487_v45 = vld [vmem:[#allocation42_spill] sm:$0xff]  ;;  %v2454_v29 = vadd.f32 %v2453_v20, %v9489_v59  ;;  %v9495_v32 = vld [vmem:[#allocation199_spill] sm:$0xff] }
 0x450   :  { %v2544_v12 = vadd.f32 %v9477_v60, %v9476_v57  ;;  %v2568_v37 = vadd.f32 %v2567_v8, %v9487_v45  ;;  %v9488_v60 = vld [vmem:[#allocation50_spill] sm:$0xff]  ;;  %v2477_v22 = vadd.f32 %v2476_v27, %v9490_v30  ;;  %v2409_v6 = vadd.f32 %v2408_v10, %v9492_v51  ;;  %v9494_v62 = vld [vmem:[#allocation317_spill] sm:$0xff]  ;;  %v9498_v45 = vld [vmem:[#allocation68_spill] sm:$0xff] }
 0x451   :  { %v2522_v25 = vadd.f32 %v2521_v61, %v9485_v44  ;;  %v2431_v57 = vadd.f32 %v2430_v52, %v9488_v60  ;;  %v2500_v21 = vadd.f32 %v2499_v43, %v9491_v53  ;;  %v9493_v5 = vld [vmem:[#allocation54_spill] sm:$0xff]  ;;  %v9496_v44 = vld [vmem:[#allocation65_spill] sm:$0xff]  ;;  %v9503_v51 = vld [vmem:[#allocation72_spill] sm:$0xff] }
 0x452   :  { %v2545_v54 = vadd.f32 %v2544_v12, %v9486_v40  ;;  %v2569_v61 = vadd.f32 %v2568_v37, %v9495_v32  ;;  %v9497_v12 = vld [vmem:[#allocation324_spill] sm:$0xff]  ;;  %v2478_v52 = vadd.f32 %v2477_v22, %v9498_v45  ;;  %v9499_v60 = vld [vmem:[#allocation325_spill] sm:$0xff]  ;;  %v9500_v20 = vld [vmem:[#allocation330_spill] sm:$0xff] }
 0x453   :  { %v2523_v1 = vadd.f32 %v2522_v25, %v9493_v5  ;;  %v2432_v40 = vadd.f32 %v2431_v57, %v9496_v44  ;;  %v2455_v8 = vadd.f32 %v2454_v29, %v9497_v12  ;;  %v2501_v59 = vadd.f32 %v2500_v21, %v9499_v60  ;;  %v9501_v30 = vld [vmem:[#allocation70_spill] sm:$0xff]  ;;  %v9506_v32 = vld [vmem:[#allocation83_spill] sm:$0xff]  ;;  %v9507_v44 = vld [vmem:[#allocation333_spill] sm:$0xff] }
 0x454   :  { %v2546_v14 = vadd.f32 %v2545_v54, %v9494_v62  ;;  %v2410_v27 = vadd.f32 %v2409_v6, %v9500_v20  ;;  %v9502_v53 = vld [vmem:[#allocation174_spill] sm:$0xff]  ;;  %v2570_v25 = vadd.f32 %v2569_v61, %v9503_v51  ;;  %v9505_v62 = vld [vmem:[#allocation332_spill] sm:$0xff]  ;;  %v2479_v57 = vadd.f32 %v2478_v52, %v9506_v32  ;;  %v9508_v12 = vld [vmem:[#allocation337_spill] sm:$0xff] }
 0x455   :  { %v2524_v43 = vadd.f32 %v2523_v1, %v9501_v30  ;;  %v9504_v5 = vld [vmem:[#allocation82_spill] sm:$0xff]  ;;  %v2456_v37 = vadd.f32 %v2455_v8, %v9505_v62  ;;  %v2502_v29 = vadd.f32 %v2501_v59, %v9507_v44  ;;  %v9511_v20 = vld [vmem:[#allocation88_spill] sm:$0xff]  ;;  %v9516_v62 = vld [vmem:[#allocation181_spill] sm:$0xff] }
 0x456   :  { %v2547_v10 = vadd.f32 %v2546_v14, %v9502_v53  ;;  %v2433_v54 = vadd.f32 %v2432_v40, %v9504_v5  ;;  %v2411_v22 = vadd.f32 %v2410_v27, %v9508_v12  ;;  %v9509_v45 = vld [vmem:[#allocation86_spill] sm:$0xff]  ;;  %v2571_v1 = vadd.f32 %v2570_v25, %v9511_v20  ;;  %v9514_v51 = vld [vmem:[#allocation100_spill] sm:$0xff]  ;;  %v9515_v5 = vld [vmem:[#allocation339_spill] sm:$0xff] }
 0x457   :  { %v2525_v21 = vadd.f32 %v2524_v43, %v9509_v45  ;;  %v9510_v60 = vld [vmem:[#allocation334_spill] sm:$0xff]  ;;  %v2480_v40 = vadd.f32 %v2479_v57, %v9514_v51  ;;  %v2503_v8 = vadd.f32 %v2502_v29, %v9515_v5  ;;  %v9517_v32 = vld [vmem:[#allocation101_spill] sm:$0xff]  ;;  %v9518_v44 = vld [vmem:[#allocation340_spill] sm:$0xff] }
 0x458   :  { %v2548_v6 = vadd.f32 %v2547_v10, %v9510_v60  ;;  %v9512_v30 = vld [vmem:[#allocation98_spill] sm:$0xff]  ;;  %v2412_v52 = vadd.f32 %v2411_v22, %v9516_v62  ;;  %v9519_v12 = vld [vmem:[#allocation104_spill] sm:$0xff]  ;;  %v9527_v62 = vld [vmem:[#allocation119_spill] sm:$0xff] }
 0x459   :  { %v2434_v14 = vadd.f32 %v2433_v54, %v9512_v30  ;;  %v9513_v53 = vld [vmem:[#allocation338_spill] sm:$0xff]  ;;  %v2526_v59 = vadd.f32 %v2525_v21, %v9517_v32  ;;  %v2572_v43 = vadd.f32 %v2571_v1, %v9519_v12  ;;  %v9521_v60 = vld [vmem:[#allocation344_spill] sm:$0xff]  ;;  %v9523_v30 = vld [vmem:[#allocation345_spill] sm:$0xff] }
 0x45a   :  { %v2457_v61 = vadd.f32 %v2456_v37, %v9513_v53  ;;  %v2549_v27 = vadd.f32 %v2548_v6, %v9518_v44  ;;  %v9520_v45 = vld [vmem:[#allocation114_spill] sm:$0xff]  ;;  %v9522_v20 = vld [vmem:[#allocation116_spill] sm:$0xff]  ;;  %v2504_v37 = vadd.f32 %v2503_v8, %v9523_v30  ;;  %v9528_v32 = vld [vmem:[#allocation129_spill] sm:$0xff] }
 0x45b   :  { %v2435_v10 = vadd.f32 %v2434_v14, %v9520_v45  ;;  %v2481_v54 = vadd.f32 %v2480_v40, %v9522_v20  ;;  %v9524_v53 = vld [vmem:[#allocation350_spill] sm:$0xff]  ;;  %v2573_v21 = vadd.f32 %v2572_v43, %v9527_v62  ;;  %v9529_v44 = vld [vmem:[#allocation132_spill] sm:$0xff]  ;;  %v9530_v12 = vld [vmem:[#allocation133_spill] sm:$0xff] }
 0x45c   :  { %v2458_v25 = vadd.f32 %v2457_v61, %v9521_v60  ;;  %v2413_v57 = vadd.f32 %v2412_v52, %v9524_v53  ;;  %v9525_v51 = vld [vmem:[#allocation118_spill] sm:$0xff]  ;;  %v9532_v60 = vld [vmem:[#allocation229_spill] sm:$0xff]  ;;  %v9533_v20 = vld [vmem:[#allocation135_spill] sm:$0xff] }
 0x45d   :  { %v2527_v29 = vadd.f32 %v2526_v59, %v9525_v51  ;;  %v9526_v5 = vld [vmem:[#allocation346_spill] sm:$0xff]  ;;  %v2436_v6 = vadd.f32 %v2435_v10, %v9528_v32  ;;  %v2482_v14 = vadd.f32 %v2481_v54, %v9530_v12  ;;  %v9534_v30 = vld [vmem:[#allocation136_spill] sm:$0xff]  ;;  %v9538_v62 = vld [vmem:[#allocation149_spill] sm:$0xff] }
 0x45e   :  { %v2550_v22 = vadd.f32 %v2549_v27, %v9526_v5  ;;  %v2459_v1 = vadd.f32 %v2458_v25, %v9529_v44  ;;  %v9531_v45 = vld [vmem:[#allocation134_spill] sm:$0xff]  ;;  %v2414_v40 = vadd.f32 %v2413_v57, %v9532_v60  ;;  %v9537_v5 = vld [vmem:[#allocation147_spill] sm:$0xff]  ;;  %v9541_v12 = vld [vmem:[#allocation152_spill] sm:$0xff] }
 0x45f   :  { %v2505_v61 = vadd.f32 %v2504_v37, %v9531_v45  ;;  %v2528_v8 = vadd.f32 %v2527_v29, %v9533_v20  ;;  %v9535_v53 = vld [vmem:[#allocation226_spill] sm:$0xff]  ;;  %v2483_v10 = vadd.f32 %v2482_v14, %v9538_v62  ;;  %v9540_v44 = vld [vmem:[#allocation151_spill] sm:$0xff]  ;;  %v9542_v45 = vld [vmem:[#allocation153_spill] sm:$0xff] }
 0x460   :  { %v2551_v52 = vadd.f32 %v2550_v22, %v9534_v30  ;;  %v2574_v59 = vadd.f32 %v2573_v21, %v9535_v53  ;;  %v9536_v51 = vld [vmem:[#allocation146_spill] sm:$0xff]  ;;  %v2460_v43 = vadd.f32 %v2459_v1, %v9537_v5  ;;  %v2415_v54 = vadd.f32 %v2414_v40, %v6580_v24  ;;  %v9543_v60 = vld [vmem:[#allocation176_spill] sm:$0xff]  ;;  %v9544_v20 = vld [vmem:[#allocation179_spill] sm:$0xff] }
 0x461   :  { %v2437_v27 = vadd.f32 %v2436_v6, %v9536_v51  ;;  %v9539_v32 = vld [vmem:[#allocation150_spill] sm:$0xff]  ;;  %v2529_v37 = vadd.f32 %v2528_v8, %v9540_v44  ;;  %v2484_v6 = vadd.f32 %v2483_v10, %v9544_v20  ;;  %v9545_v30 = vld [vmem:[#allocation235_spill] sm:$0xff]  ;;  %v9547_v40 = vld [vmem:[#allocation185_spill] sm:$0xff] }
 0x462   :  { %v2506_v25 = vadd.f32 %v2505_v61, %v9539_v32  ;;  %v2552_v57 = vadd.f32 %v2551_v52, %v9541_v12  ;;  %v2575_v29 = vadd.f32 %v2574_v59, %v9542_v45  ;;  %v2461_v21 = vadd.f32 %v2460_v43, %v9543_v60  ;;  %v9546_v53 = vld [vmem:[#allocation182_spill] sm:$0xff]  ;;  %v9548_v51 = vld [vmem:[#allocation209_spill] sm:$0xff]  ;;  %v9549_v5 = vld [vmem:[#allocation212_spill] sm:$0xff] }
 0x463   :  { %v2438_v22 = vadd.f32 %v2437_v27, %v6583_v3  ;;  %v2416_v14 = vadd.f32 %v2415_v54, %v6628_v11  ;;  %v2530_v61 = vadd.f32 %v2529_v37, %v9545_v30  ;;  %v9550_v62 = vld [vmem:[#allocation215_spill] sm:$0xff]  ;;  %v9551_v27 = vld [vmem:[#allocation218_spill] sm:$0xff]  ;;  %v9552_v32 = vld [vmem:[#allocation221_spill] sm:$0xff] }
 0x464   :  { %v2507_v1 = vadd.f32 %v2506_v25, %v6592_v33  ;;  %v2553_v24 = vadd.f32 %v2552_v57, %v9546_v53  ;;  %v2576_v8 = vadd.f32 %v2575_v29, %v9547_v40  ;;  %v2462_v59 = vadd.f32 %v2461_v21, %v9549_v5  ;;  %v9553_v25 = vld [vmem:[#allocation224_spill] sm:$0xff]  ;;  %v9555_v57 = vld [vmem:[#allocation243_spill] sm:$0xff]  ;;  %v9557_v30 = vld [vmem:[#allocation313_spill] sm:$0xff] }
 0x465   :  { %v2439_v52 = vadd.f32 %v2438_v22, %v9548_v51  ;;  %v2485_v3 = vadd.f32 %v2484_v6, %v9550_v62  ;;  %v2417_v10 = vadd.f32 %v2416_v14, %v6676_v15  ;;  %v2531_v33 = vadd.f32 %v2530_v61, %v9552_v32  ;;  %v9554_v54 = vld [vmem:[#allocation240_spill] sm:$0xff]  ;;  %v9558_v61 = vld [vmem:[#allocation251_spill] sm:$0xff]  ;;  %v9560_v40 = vld [vmem:[#allocation322_spill] sm:$0xff] }
 0x466   :  { %v2508_v43 = vadd.f32 %v2507_v1, %v9551_v27  ;;  %v2554_v11 = vadd.f32 %v2553_v24, %v9553_v25  ;;  %v2577_v44 = vadd.f32 %v2576_v8, %v9554_v54  ;;  %v2463_v12 = vadd.f32 %v2462_v59, %v6682_v38  ;;  %v9556_v21 = vld [vmem:[#allocation244_spill] sm:$0xff]  ;;  %v9561_v8 = vld [vmem:[#allocation198_spill] sm:$0xff]  ;;  %v9564_v5 = vld [vmem:[#allocation331_spill] sm:$0xff] }
 0x467   :  { %v2440_v37 = vadd.f32 %v2439_v52, %v6679_v2  ;;  %v2486_v45 = vadd.f32 %v2485_v3, %v9555_v57  ;;  %v2418_v22 = vadd.f32 %v2417_v10, %v6724_v58  ;;  %v2532_v60 = vadd.f32 %v2531_v33, %v6691_v31  ;;  %v9559_v24 = vld [vmem:[#allocation172_spill] sm:$0xff]  ;;  %v9563_v52 = vld [vmem:[#allocation175_spill] sm:$0xff]  ;;  %v9565_v59 = vld [vmem:[#allocation261_spill] sm:$0xff] }
 0x468   :  { %v2509_v29 = vadd.f32 %v2508_v43, %v6688_v7  ;;  %v2555_v15 = vadd.f32 %v2554_v11, %v6694_v42  ;;  %v2578_v20 = vadd.f32 %v2577_v44, %v9556_v21  ;;  %v2464_v1 = vadd.f32 %v2463_v12, %v6730_v47  ;;  %v9562_v51 = vld [vmem:[#allocation252_spill] sm:$0xff]  ;;  %v9566_v62 = vld [vmem:[#allocation58_spill] sm:$0xff]  ;;  %v9567_v3 = vld [vmem:[#allocation201_spill] sm:$0xff] }
 0x469   :  { %v2441_v6 = vadd.f32 %v2440_v37, %v6727_v34  ;;  %v2487_v2 = vadd.f32 %v2486_v45, %v6733_v19  ;;  %v2419_v14 = vadd.f32 %v2418_v22, %v6772_v28  ;;  %v2533_v7 = vadd.f32 %v2532_v60, %v6739_v17  ;;  %v9568_v43 = vld [vmem:[#allocation262_spill] sm:$0xff]  ;;  %v9569_v33 = vld [vmem:[#allocation67_spill] sm:$0xff]  ;;  %v9570_v11 = vld [vmem:[#allocation204_spill] sm:$0xff] }
 0x46a   :  { %v2510_v38 = vadd.f32 %v2509_v29, %v6736_v9  ;;  %v2556_v58 = vadd.f32 %v2555_v15, %v6742_v49  ;;  %v2579_v31 = vadd.f32 %v2578_v20, %v6745_v23  ;;  %v2465_v53 = vadd.f32 %v2464_v1, %v9558_v61  ;;  %v9571_v44 = vld [vmem:[#allocation263_spill] sm:$0xff]  ;;  %v9574_v20 = vld [vmem:[#allocation216_spill] sm:$0xff] }
 0x46b   :  { %v2442_v42 = vadd.f32 %v2441_v6, %v9557_v30  ;;  %v2488_v34 = vadd.f32 %v2487_v2, %v9559_v24  ;;  %v2420_v19 = vadd.f32 %v2419_v14, %v9561_v8  ;;  %v2534_v9 = vadd.f32 %v2533_v7, %v9562_v51  ;;  %v9572_v45 = vld [vmem:[#allocation267_spill] sm:$0xff]  ;;  %v9575_v6 = vld [vmem:[#allocation269_spill] sm:$0xff]  ;;  %v9576_v2 = vld [vmem:[#allocation156_spill] sm:$0xff] }
 0x46c   :  { %v2511_v47 = vadd.f32 %v2510_v38, %v9560_v40  ;;  %v2557_v28 = vadd.f32 %v2556_v58, %v9563_v52  ;;  %v2580_v17 = vadd.f32 %v2579_v31, %v9564_v5  ;;  %v2466_v23 = vadd.f32 %v2465_v53, %v9566_v62  ;;  %v9573_v15 = vld [vmem:[#allocation103_spill] sm:$0xff]  ;;  %v9578_v58 = vld [vmem:[#allocation228_spill] sm:$0xff]  ;;  %v9583_v24 = vld [vmem:[#allocation273_spill] sm:$0xff] }
 0x46d   :  { %v2443_v49 = vadd.f32 %v2442_v42, %v9565_v59  ;;  %v2489_v27 = vadd.f32 %v2488_v34, %v9567_v3  ;;  %v2421_v32 = vadd.f32 %v2420_v19, %v6868_v13  ;;  %v2535_v25 = vadd.f32 %v2534_v9, %v9569_v33  ;;  %v9577_v14 = vld [vmem:[#allocation139_spill] sm:$0xff]  ;;  %v9579_v31 = vld [vmem:[#allocation272_spill] sm:$0xff]  ;;  %v9586_v51 = vld [vmem:[#allocation281_spill] sm:$0xff] }
 0x46e   :  { %v2512_v10 = vadd.f32 %v2511_v47, %v9568_v43  ;;  %v2558_v54 = vadd.f32 %v2557_v28, %v9570_v11  ;;  %v2581_v37 = vadd.f32 %v2580_v17, %v9571_v44  ;;  %v2467_v57 = vadd.f32 %v2466_v23, %v6874_v0  ;;  %v9580_v30 = vld [vmem:[#allocation279_spill] sm:$0xff]  ;;  %v9581_v61 = vld [vmem:[#allocation148_spill] sm:$0xff]  ;;  %v9587_v52 = vld [vmem:[#allocation282_spill] sm:$0xff] }
 0x46f   :  { %v2444_v12 = vadd.f32 %v2443_v49, %v6871_v16  ;;  %v2490_v29 = vadd.f32 %v2489_v27, %v9572_v45  ;;  %v2422_v60 = vadd.f32 %v2421_v32, %v6916_v41  ;;  %v2536_v21 = vadd.f32 %v2535_v25, %v9573_v15  ;;  %v9582_v53 = vld [vmem:[#allocation231_spill] sm:$0xff]  ;;  %v9584_v40 = vld [vmem:[#allocation280_spill] sm:$0xff]  ;;  %v837_v5 = vld [vmem:[#allocation5 + $0xb78] sm:$0xff] }
 0x470   :  { %v2513_v22 = vadd.f32 %v2512_v10, %v6880_v56  ;;  %v2559_v13 = vadd.f32 %v2558_v54, %v9574_v20  ;;  %v2582_v1 = vadd.f32 %v2581_v37, %v9575_v6  ;;  %v2468_v7 = vadd.f32 %v2467_v57, %v9577_v14  ;;  %v9585_v8 = vld [vmem:[#allocation159_spill] sm:$0xff]  ;;  %v9588_v59 = vld [vmem:[#allocation288_spill] sm:$0xff]  ;;  %v840_v33 = vld [vmem:[#allocation5 + $0xb90] sm:$0xff] }
 0x471   :  { %v2445_v38 = vadd.f32 %v2444_v12, %v9576_v2  ;;  %v2491_v16 = vadd.f32 %v2490_v29, %v9578_v58  ;;  %v2423_v42 = vadd.f32 %v2422_v60, %v9580_v30  ;;  %v2537_v56 = vadd.f32 %v2536_v21, %v9581_v61  ;;  %v838_v17 = vld [vmem:[#allocation5 + $0xb80] sm:$0xff]  ;;  %v9591_v43 = vld [vmem:[#allocation284_spill] sm:$0xff]  ;;  %v841_v25 = vld [vmem:[#allocation5 + $0xb98] sm:$0xff] }
 0x472   :  { %v2514_v0 = vadd.f32 %v2513_v22, %v9579_v31  ;;  %v2560_v41 = vadd.f32 %v2559_v13, %v9582_v53  ;;  %v2583_v34 = vadd.f32 %v2582_v1, %v9583_v24  ;;  %v2469_v19 = vadd.f32 %v2468_v7, %v9585_v8  ;;  %v9589_v62 = vld [vmem:[#allocation283_spill] sm:$0xff]  ;;  %v839_v32 = vld [vmem:[#allocation5 + $0xb88] sm:$0xff]  ;;  %v9592_v11 = vld [vmem:[#allocation358_spill] sm:$0xff] }
 0x473   :  { %v2446_v47 = vadd.f32 %v2445_v38, %v9584_v40  ;;  %v2492_v9 = vadd.f32 %v2491_v16, %v9586_v51  ;;  %v2424_v49 = vadd.f32 %v2423_v42, %v9588_v59  ;;  %v2538_v23 = vadd.f32 %v2537_v56, %v9589_v62  ;;  %v9590_v3 = vld [vmem:[#allocation351_spill] sm:$0xff]  ;;  %v9594_v12 = vld [vmem:[#allocation289_spill] sm:$0xff]  ;;  %v9595_v45 = vld [vmem:[#allocation360_spill] sm:$0xff] }
 0x474   :  { %v2515_v28 = vadd.f32 %v2514_v0, %v9587_v52  ;;  %v2561_v27 = vadd.f32 %v2560_v41, %v9590_v3  ;;  %v2584_v10 = vadd.f32 %v2583_v34, %v9591_v43  ;;  %v9593_v44 = vld [vmem:[#allocation359_spill] sm:$0xff]  ;;  %v9596_v60 = vld [vmem:[#allocation361_spill] sm:$0xff]  ;;  %v9597_v21 = vld [vmem:[#allocation162_spill] sm:$0xff] }
 0x475   :  { %v2447_v54 = vadd.f32 %v2446_v47, %v9592_v11  ;;  %v2470_v37 = vadd.f32 %v2469_v19, %v9593_v44  ;;  %v2493_v57 = vadd.f32 %v2492_v9, %v9594_v12  ;;  %v2425_v22 = vadd.f32 %v2424_v49, %v7060_v26  ;;  %v9598_v13 = vld [vmem:[#allocation11_spill] sm:$0xff]  ;;  %v843_v2 = vld [vmem:[#allocation5 + $0xba8] sm:$0xff]  ;;  %v9599_v38 = vld [vmem:[#allocation117_spill] sm:$0xff] }
 0x476   :  { %v2516_v29 = vadd.f32 %v2515_v28, %v9595_v45  ;;  %v2539_v15 = vadd.f32 %v2538_v23, %v9596_v60  ;;  %v2562_v20 = vadd.f32 %v2561_v27, %v9597_v21  ;;  %v2585_v6 = vadd.f32 %v2584_v10, %v9598_v13  ;;  %v842_v1 = vld [vmem:[#allocation5 + $0xba0] sm:$0xff]  ;;  %v9600_v7 = vld [vmem:[#allocation220_spill] sm:$0xff]  ;;  %v844_v0 = vld [vmem:[#allocation5 + $0xbb0] sm:$0xff] }
 0x477   :  { %v7362_v14 = vmul.f32 %v9599_v38, %v837_v5  ;;  %v7365_v58 = vmul.f32 %v9600_v7, %v838_v17  ;;  %v2448_v16 = vadd.f32 %v2447_v54, %v7063_v18  ;;  %v2471_v31 = vadd.f32 %v2470_v37, %v7066_v48  ;;  %v845_v26 = vld [vmem:[#allocation5 + $0xbb8] sm:$0xff]  ;;  %v846_v30 = vld [vmem:[#allocation5 + $0xbc0] sm:$0xff]  ;;  %v9601_v42 = vld [vmem:[#allocation120_spill] sm:$0xff] }
 0x478   :  { %v7370_v61 = vmul.f32 %v9601_v42, %v839_v32  ;;  %v9602_v56 = vld [vmem:[#allocation123_spill] sm:$0xff]  ;;  %v9603_v41 = vld [vmem:[#allocation125_spill] sm:$0xff]  ;;  %v9604_v34 = vld [vmem:[#allocation26_spill] sm:$0xff]  ;;  %v2426_v18 = vadd.f32 %v2425_v22, %v7108_v50  ;;  %v2517_v48 = vadd.f32 %v2516_v29, %v7072_v39 }
 0x479   :  { %v7373_v53 = vmul.f32 %v9602_v56, %v840_v33  ;;  %v7376_v24 = vmul.f32 %v9603_v41, %v841_v25  ;;  %v2494_v40 = vadd.f32 %v2493_v57, %v9604_v34  ;;  %v847_v47 = vld [vmem:[#allocation5 + $0xbc8] sm:$0xff]  ;;  %v848_v8 = vld [vmem:[#allocation5 + $0xbd0] sm:$0xff]  ;;  %v849_v19 = vld [vmem:[#allocation5 + $0xbd8] sm:$0xff]  ;;  %v2449_v59 = vadd.f32 %v2448_v16, %v7111_v55 }
 0x47a   :  { %v9605_v51 = vld [vmem:[#allocation28_spill] sm:$0xff]  ;;  %v9606_v52 = vld [vmem:[#allocation29_spill] sm:$0xff]  ;;  %v9607_v5 = vld [vmem:[#allocation127_spill] sm:$0xff]  ;;  %v2472_v49 = vadd.f32 %v2471_v31, %v7114_v35  ;;  %v7414_v57 = vadd.f32 %v2426_v18, %v7156_v36  ;;  %v7417_v45 = vadd.f32 %v2517_v48, %v7120_v4 }
 0x47b   :  { %v2540_v9 = vadd.f32 %v2539_v15, %v9605_v51  ;;  %v2563_v28 = vadd.f32 %v2562_v20, %v9606_v52  ;;  %v7384_v17 = vmul.f32 %v9607_v5, %v842_v1  ;;  %v9608_v62 = vld [vmem:[#allocation31_spill] sm:$0xff]  ;;  %v9609_v3 = vld [vmem:[#allocation128_spill] sm:$0xff]  ;;  %v9611_v39 = vld [vmem:[#allocation362_spill] sm:$0xff]  ;;  %v7426_v21 = vadd.f32 %v2449_v59, %v7159_v46 }
 0x47c   :  { %v2586_v23 = vadd.f32 %v2585_v6, %v9608_v62  ;;  %v7390_v27 = vmul.f32 %v9609_v3, %v843_v2  ;;  %v9610_v43 = vld [vmem:[#allocation131_spill] sm:$0xff]  ;;  %v7396_v10 = vmul.f32 %v9611_v39, %v845_v26  ;;  %v9613_v25 = vld [vmem:[#allocation364_spill] sm:$0xff]  ;;  %v9614_v55 = vld [vmem:[#allocation365_spill] sm:$0xff]  ;;  %v7429_v20 = vadd.f32 %v2472_v49, %v7162_v63 }
 0x47d   :  { %v7393_v50 = vmul.f32 %v9610_v43, %v844_v0  ;;  %v9612_v32 = vld [vmem:[#allocation363_spill] sm:$0xff]  ;;  %v7402_v11 = vmul.f32 %v9613_v25, %v847_v47  ;;  %v7405_v54 = vmul.f32 %v9614_v55, %v848_v8  ;;  %v9615_v35 = vld [vmem:[#allocation366_spill] sm:$0xff]  ;;  %v9618_v60 = vld [vmem:[#allocation49_spill] sm:$0xff] }
 0x47e   :  { %v7399_v33 = vmul.f32 %v9612_v32, %v846_v30  ;;  %v7408_v44 = vmul.f32 %v9615_v35, %v849_v19  ;;  %v9616_v37 = vld [vmem:[#allocation46_spill] sm:$0xff]  ;;  %v9617_v29 = vld [vmem:[#allocation47_spill] sm:$0xff]  ;;  %v7423_v15 = vadd.f32 %v2563_v28, %v9618_v60  ;;  %v9622_v4 = vld [vmem:[#allocation17_spill] sm:$0xff] }
 0x47f   :  { %v7411_v12 = vadd.f32 %v2494_v40, %v9616_v37  ;;  %v7420_v22 = vadd.f32 %v2540_v9, %v9617_v29  ;;  %v9619_v13 = vld [vmem:[#allocation51_spill] sm:$0xff]  ;;  %v9620_v36 = vld [vmem:[#allocation294_spill] sm:$0xff]  ;;  %v9624_v16 = vld [vmem:[#allocation296_spill] sm:$0xff] }
 0x480   :  { %v7432_v6 = vadd.f32 %v2586_v23, %v9619_v13  ;;  %v9621_v1 = vld [vmem:[#allocation302_spill] sm:$0xff]  ;;  %v9625_v31 = vld [vmem:[#allocation303_spill] sm:$0xff]  ;;  %v9627_v30 = vld [vmem:[#allocation32_spill] sm:$0xff] }
 0x481   :  { %v2590_v2 = vadd.f32 %v9621_v1, %v9620_v36  ;;  %v9623_v38 = vld [vmem:[#allocation30_spill] sm:$0xff]  ;;  %v2636_v0 = vadd.f32 %v9625_v31, %v9624_v16  ;;  %v9626_v26 = vld [vmem:[#allocation19_spill] sm:$0xff]  ;;  %v9628_v46 = vld [vmem:[#allocation297_spill] sm:$0xff] }
 0x482   :  { %v2613_v7 = vadd.f32 %v9623_v38, %v9622_v4  ;;  %v2659_v42 = vadd.f32 %v9627_v30, %v9626_v26  ;;  %v9629_v56 = vld [vmem:[#allocation305_spill] sm:$0xff]  ;;  %v9630_v63 = vld [vmem:[#allocation310_spill] sm:$0xff]  ;;  %v9631_v40 = vld [vmem:[#allocation20_spill] sm:$0xff] }
 0x483   :  { %v2682_v41 = vadd.f32 %v9629_v56, %v9628_v46  ;;  %v2591_v34 = vadd.f32 %v2590_v2, %v9630_v63  ;;  %v9632_v47 = vld [vmem:[#allocation34_spill] sm:$0xff]  ;;  %v9636_v9 = vld [vmem:[#allocation35_spill] sm:$0xff]  ;;  %v9639_v62 = vld [vmem:[#allocation45_spill] sm:$0xff] }
 0x484   :  { %v2705_v8 = vadd.f32 %v9632_v47, %v9631_v40  ;;  %v9633_v19 = vld [vmem:[#allocation298_spill] sm:$0xff]  ;;  %v9637_v28 = vld [vmem:[#allocation195_spill] sm:$0xff]  ;;  %v2660_v23 = vadd.f32 %v2659_v42, %v9639_v62  ;;  %v9640_v3 = vld [vmem:[#allocation312_spill] sm:$0xff] }
 0x485   :  { %v9634_v18 = vld [vmem:[#allocation306_spill] sm:$0xff]  ;;  %v2614_v5 = vadd.f32 %v2613_v7, %v9637_v28  ;;  %v9638_v59 = vld [vmem:[#allocation311_spill] sm:$0xff]  ;;  %v2683_v43 = vadd.f32 %v2682_v41, %v9640_v3  ;;  %v9642_v25 = vld [vmem:[#allocation196_spill] sm:$0xff] }
 0x486   :  { %v2728_v48 = vadd.f32 %v9634_v18, %v9633_v19  ;;  %v9635_v51 = vld [vmem:[#allocation22_spill] sm:$0xff]  ;;  %v2637_v49 = vadd.f32 %v2636_v0, %v9638_v59  ;;  %v2706_v55 = vadd.f32 %v2705_v8, %v9642_v25  ;;  %v9644_v29 = vld [vmem:[#allocation48_spill] sm:$0xff]  ;;  %v9645_v13 = vld [vmem:[#allocation57_spill] sm:$0xff] }
 0x487   :  { %v2751_v52 = vadd.f32 %v9636_v9, %v9635_v51  ;;  %v9641_v39 = vld [vmem:[#allocation318_spill] sm:$0xff]  ;;  %v2615_v36 = vadd.f32 %v2614_v5, %v9645_v13  ;;  %v9646_v1 = vld [vmem:[#allocation319_spill] sm:$0xff]  ;;  %v9647_v4 = vld [vmem:[#allocation60_spill] sm:$0xff] }
 0x488   :  { %v2592_v32 = vadd.f32 %v2591_v34, %v9641_v39  ;;  %v9643_v35 = vld [vmem:[#allocation314_spill] sm:$0xff]  ;;  %v2638_v2 = vadd.f32 %v2637_v49, %v9646_v1  ;;  %v2661_v38 = vadd.f32 %v2660_v23, %v9647_v4  ;;  %v9648_v7 = vld [vmem:[#allocation320_spill] sm:$0xff]  ;;  %v9651_v42 = vld [vmem:[#allocation321_spill] sm:$0xff] }
 0x489   :  { %v2729_v37 = vadd.f32 %v2728_v48, %v9643_v35  ;;  %v2752_v60 = vadd.f32 %v2751_v52, %v9644_v29  ;;  %v2684_v16 = vadd.f32 %v2683_v43, %v9648_v7  ;;  %v9649_v31 = vld [vmem:[#allocation326_spill] sm:$0xff]  ;;  %v9652_v56 = vld [vmem:[#allocation64_spill] sm:$0xff]  ;;  %v9653_v63 = vld [vmem:[#allocation205_spill] sm:$0xff] }
 0x48a   :  { %v2593_v0 = vadd.f32 %v2592_v32, %v9649_v31  ;;  %v9650_v26 = vld [vmem:[#allocation62_spill] sm:$0xff]  ;;  %v2616_v34 = vadd.f32 %v2615_v36, %v9653_v63  ;;  %v9654_v40 = vld [vmem:[#allocation327_spill] sm:$0xff]  ;;  %v9656_v18 = vld [vmem:[#allocation328_spill] sm:$0xff] }
 0x48b   :  { %v2707_v30 = vadd.f32 %v2706_v55, %v9650_v26  ;;  %v2730_v46 = vadd.f32 %v2729_v37, %v9651_v42  ;;  %v2753_v41 = vadd.f32 %v2752_v60, %v9652_v56  ;;  %v2639_v47 = vadd.f32 %v2638_v2, %v9654_v40  ;;  %v9655_v8 = vld [vmem:[#allocation75_spill] sm:$0xff]  ;;  %v9657_v51 = vld [vmem:[#allocation177_spill] sm:$0xff]  ;;  %v9658_v52 = vld [vmem:[#allocation78_spill] sm:$0xff] }
 0x48c   :  { %v2662_v19 = vadd.f32 %v2661_v38, %v9655_v8  ;;  %v2685_v48 = vadd.f32 %v2684_v16, %v9656_v18  ;;  %v2594_v9 = vadd.f32 %v2593_v0, %v9657_v51  ;;  %v9659_v5 = vld [vmem:[#allocation329_spill] sm:$0xff]  ;;  %v9660_v49 = vld [vmem:[#allocation80_spill] sm:$0xff]  ;;  %v9661_v23 = vld [vmem:[#allocation90_spill] sm:$0xff] }
 0x48d   :  { %v2708_v28 = vadd.f32 %v2707_v30, %v9658_v52  ;;  %v2731_v59 = vadd.f32 %v2730_v46, %v9659_v5  ;;  %v2754_v62 = vadd.f32 %v2753_v41, %v9660_v49  ;;  %v2617_v3 = vadd.f32 %v2616_v34, %v9661_v23  ;;  %v9662_v43 = vld [vmem:[#allocation335_spill] sm:$0xff]  ;;  %v9664_v55 = vld [vmem:[#allocation336_spill] sm:$0xff]  ;;  %v9665_v37 = vld [vmem:[#allocation341_spill] sm:$0xff] }
 0x48e   :  { %v2640_v39 = vadd.f32 %v2639_v47, %v9662_v43  ;;  %v9663_v32 = vld [vmem:[#allocation211_spill] sm:$0xff]  ;;  %v2686_v35 = vadd.f32 %v2685_v48, %v9664_v55  ;;  %v2595_v29 = vadd.f32 %v2594_v9, %v9665_v37  ;;  %v9666_v60 = vld [vmem:[#allocation93_spill] sm:$0xff]  ;;  %v9667_v36 = vld [vmem:[#allocation178_spill] sm:$0xff] }
 0x48f   :  { %v2663_v25 = vadd.f32 %v2662_v19, %v9663_v32  ;;  %v2709_v13 = vadd.f32 %v2708_v28, %v9666_v60  ;;  %v2732_v1 = vadd.f32 %v2731_v59, %v9667_v36  ;;  %v9668_v2 = vld [vmem:[#allocation96_spill] sm:$0xff]  ;;  %v9669_v38 = vld [vmem:[#allocation106_spill] sm:$0xff]  ;;  %v9673_v46 = vld [vmem:[#allocation347_spill] sm:$0xff] }
 0x490   :  { %v2755_v4 = vadd.f32 %v2754_v62, %v9668_v2  ;;  %v2618_v7 = vadd.f32 %v2617_v3, %v9669_v38  ;;  %v9670_v16 = vld [vmem:[#allocation180_spill] sm:$0xff]  ;;  %v9672_v30 = vld [vmem:[#allocation342_spill] sm:$0xff]  ;;  %v2596_v56 = vadd.f32 %v2595_v29, %v9673_v46  ;;  %v9674_v41 = vld [vmem:[#allocation217_spill] sm:$0xff] }
 0x491   :  { %v2641_v31 = vadd.f32 %v2640_v39, %v9670_v16  ;;  %v9671_v0 = vld [vmem:[#allocation108_spill] sm:$0xff]  ;;  %v2687_v42 = vadd.f32 %v2686_v35, %v9672_v30  ;;  %v2710_v63 = vadd.f32 %v2709_v13, %v9674_v41  ;;  %v9675_v34 = vld [vmem:[#allocation343_spill] sm:$0xff]  ;;  %v9677_v19 = vld [vmem:[#allocation122_spill] sm:$0xff] }
 0x492   :  { %v2664_v26 = vadd.f32 %v2663_v25, %v9671_v0  ;;  %v2733_v40 = vadd.f32 %v2732_v1, %v9675_v34  ;;  %v9676_v47 = vld [vmem:[#allocation111_spill] sm:$0xff]  ;;  %v2619_v18 = vadd.f32 %v2618_v7, %v9677_v19  ;;  %v9678_v48 = vld [vmem:[#allocation348_spill] sm:$0xff]  ;;  %v9681_v59 = vld [vmem:[#allocation137_spill] sm:$0xff] }
 0x493   :  { %v2756_v8 = vadd.f32 %v2755_v4, %v9676_v47  ;;  %v2642_v51 = vadd.f32 %v2641_v31, %v9678_v48  ;;  %v9679_v9 = vld [vmem:[#allocation124_spill] sm:$0xff]  ;;  %v9680_v28 = vld [vmem:[#allocation183_spill] sm:$0xff]  ;;  %v2597_v49 = vadd.f32 %v2596_v56, %v9681_v59  ;;  %v9682_v62 = vld [vmem:[#allocation126_spill] sm:$0xff] }
 0x494   :  { %v2665_v52 = vadd.f32 %v2664_v26, %v9679_v9  ;;  %v2688_v5 = vadd.f32 %v2687_v42, %v9680_v28  ;;  %v2711_v23 = vadd.f32 %v2710_v63, %v9682_v62  ;;  %v9683_v3 = vld [vmem:[#allocation349_spill] sm:$0xff]  ;;  %v9684_v39 = vld [vmem:[#allocation223_spill] sm:$0xff]  ;;  %v9685_v25 = vld [vmem:[#allocation138_spill] sm:$0xff] }
 0x495   :  { %v2734_v43 = vadd.f32 %v2733_v40, %v9683_v3  ;;  %v2757_v32 = vadd.f32 %v2756_v8, %v9684_v39  ;;  %v2620_v55 = vadd.f32 %v2619_v18, %v9685_v25  ;;  %v9686_v35 = vld [vmem:[#allocation140_spill] sm:$0xff]  ;;  %v9687_v29 = vld [vmem:[#allocation141_spill] sm:$0xff]  ;;  %v9688_v13 = vld [vmem:[#allocation142_spill] sm:$0xff] }
 0x496   :  { %v2643_v37 = vadd.f32 %v2642_v51, %v9686_v35  ;;  %v2666_v60 = vadd.f32 %v2665_v52, %v9687_v29  ;;  %v2689_v36 = vadd.f32 %v2688_v5, %v9688_v13  ;;  %v9689_v1 = vld [vmem:[#allocation154_spill] sm:$0xff]  ;;  %v9690_v4 = vld [vmem:[#allocation143_spill] sm:$0xff]  ;;  %v9691_v7 = vld [vmem:[#allocation144_spill] sm:$0xff] }
 0x497   :  { %v2598_v2 = vadd.f32 %v2597_v49, %v9689_v1  ;;  %v2712_v38 = vadd.f32 %v2711_v23, %v9690_v4  ;;  %v2735_v16 = vadd.f32 %v2734_v43, %v9691_v7  ;;  %v9692_v31 = vld [vmem:[#allocation145_spill] sm:$0xff]  ;;  %v9693_v26 = vld [vmem:[#allocation232_spill] sm:$0xff]  ;;  %v9694_v42 = vld [vmem:[#allocation155_spill] sm:$0xff] }
 0x498   :  { %v2758_v0 = vadd.f32 %v2757_v32, %v9692_v31  ;;  %v2621_v30 = vadd.f32 %v2620_v55, %v9693_v26  ;;  %v2644_v46 = vadd.f32 %v2643_v37, %v9694_v42  ;;  %v9695_v56 = vld [vmem:[#allocation158_spill] sm:$0xff]  ;;  %v9696_v63 = vld [vmem:[#allocation164_spill] sm:$0xff]  ;;  %v9697_v40 = vld [vmem:[#allocation191_spill] sm:$0xff] }
 0x499   :  { %v2667_v41 = vadd.f32 %v2666_v60, %v9695_v56  ;;  %v2690_v34 = vadd.f32 %v2689_v36, %v9696_v63  ;;  %v2599_v47 = vadd.f32 %v2598_v2, %v9697_v40  ;;  %v9698_v8 = vld [vmem:[#allocation167_spill] sm:$0xff]  ;;  %v9699_v18 = vld [vmem:[#allocation170_spill] sm:$0xff]  ;;  %v9700_v51 = vld [vmem:[#allocation173_spill] sm:$0xff] }
 0x49a   :  { %v2713_v19 = vadd.f32 %v2712_v38, %v9698_v8  ;;  %v2736_v48 = vadd.f32 %v2735_v16, %v9699_v18  ;;  %v2759_v9 = vadd.f32 %v2758_v0, %v9700_v51  ;;  %v9701_v52 = vld [vmem:[#allocation194_spill] sm:$0xff]  ;;  %v9702_v5 = vld [vmem:[#allocation197_spill] sm:$0xff]  ;;  %v9703_v49 = vld [vmem:[#allocation200_spill] sm:$0xff] }
 0x49b   :  { %v2622_v28 = vadd.f32 %v2621_v30, %v9701_v52  ;;  %v2645_v59 = vadd.f32 %v2644_v46, %v9702_v5  ;;  %v2668_v62 = vadd.f32 %v2667_v41, %v9703_v49  ;;  %v9704_v23 = vld [vmem:[#allocation371_spill] sm:$0xff]  ;;  %v9707_v55 = vld [vmem:[#allocation206_spill] sm:$0xff]  ;;  %v9710_v36 = vld [vmem:[#allocation233_spill] sm:$0xff] }
 0x49c   :  { %v2691_v3 = vadd.f32 %v2690_v34, %v9704_v23  ;;  %v9705_v43 = vld [vmem:[#allocation227_spill] sm:$0xff]  ;;  %v2737_v35 = vadd.f32 %v2736_v48, %v9707_v55  ;;  %v9708_v37 = vld [vmem:[#allocation238_spill] sm:$0xff]  ;;  %v9711_v2 = vld [vmem:[#allocation241_spill] sm:$0xff] }
 0x49d   :  { %v2600_v39 = vadd.f32 %v2599_v47, %v9705_v43  ;;  %v9706_v32 = vld [vmem:[#allocation203_spill] sm:$0xff]  ;;  %v2760_v29 = vadd.f32 %v2759_v9, %v9708_v37  ;;  %v9709_v60 = vld [vmem:[#allocation230_spill] sm:$0xff]  ;;  %v2646_v1 = vadd.f32 %v2645_v59, %v9710_v36  ;;  %v2669_v4 = vadd.f32 %v2668_v62, %v9711_v2  ;;  %v9712_v38 = vld [vmem:[#allocation236_spill] sm:$0xff] }
 0x49e   :  { %v2714_v25 = vadd.f32 %v2713_v19, %v9706_v32  ;;  %v2623_v13 = vadd.f32 %v2622_v28, %v9709_v60  ;;  %v2692_v7 = vadd.f32 %v2691_v3, %v9712_v38  ;;  %v9713_v16 = vld [vmem:[#allocation264_spill] sm:$0xff]  ;;  %v9714_v0 = vld [vmem:[#allocation239_spill] sm:$0xff]  ;;  %v9715_v30 = vld [vmem:[#allocation242_spill] sm:$0xff] }
 0x49f   :  { %v2601_v31 = vadd.f32 %v2600_v39, %v9713_v16  ;;  %v2738_v42 = vadd.f32 %v2737_v35, %v9715_v30  ;;  %v9716_v46 = vld [vmem:[#allocation245_spill] sm:$0xff]  ;;  %v9717_v41 = vld [vmem:[#allocation268_spill] sm:$0xff]  ;;  %v9718_v34 = vld [vmem:[#allocation246_spill] sm:$0xff] }
 0x4a0   :  { %v2715_v26 = vadd.f32 %v2714_v25, %v9714_v0  ;;  %v2761_v56 = vadd.f32 %v2760_v29, %v9716_v46  ;;  %v2624_v63 = vadd.f32 %v2623_v13, %v9717_v41  ;;  %v2647_v40 = vadd.f32 %v2646_v1, %v9718_v34  ;;  %v9719_v47 = vld [vmem:[#allocation157_spill] sm:$0xff]  ;;  %v9721_v48 = vld [vmem:[#allocation248_spill] sm:$0xff]  ;;  %v9722_v9 = vld [vmem:[#allocation247_spill] sm:$0xff] }
 0x4a1   :  { %v2670_v8 = vadd.f32 %v2669_v4, %v9719_v47  ;;  %v9720_v19 = vld [vmem:[#allocation277_spill] sm:$0xff]  ;;  %v2602_v51 = vadd.f32 %v2601_v31, %v9721_v48  ;;  %v9723_v28 = vld [vmem:[#allocation160_spill] sm:$0xff]  ;;  %v9724_v59 = vld [vmem:[#allocation286_spill] sm:$0xff] }
 0x4a2   :  { %v2693_v18 = vadd.f32 %v2692_v7, %v9720_v19  ;;  %v2716_v52 = vadd.f32 %v2715_v26, %v9722_v9  ;;  %v2739_v5 = vadd.f32 %v2738_v42, %v9723_v28  ;;  %v2762_v49 = vadd.f32 %v2761_v56, %v9724_v59  ;;  %v9725_v62 = vld [vmem:[#allocation163_spill] sm:$0xff]  ;;  %v9727_v39 = vld [vmem:[#allocation249_spill] sm:$0xff]  ;;  %v9728_v25 = vld [vmem:[#allocation166_spill] sm:$0xff] }
 0x4a3   :  { %v2625_v23 = vadd.f32 %v2624_v63, %v9725_v62  ;;  %v9726_v3 = vld [vmem:[#allocation295_spill] sm:$0xff]  ;;  %v2671_v32 = vadd.f32 %v2670_v8, %v9727_v39  ;;  %v9729_v35 = vld [vmem:[#allocation253_spill] sm:$0xff]  ;;  %v9730_v29 = vld [vmem:[#allocation304_spill] sm:$0xff] }
 0x4a4   :  { %v2648_v43 = vadd.f32 %v2647_v40, %v9726_v3  ;;  %v2694_v55 = vadd.f32 %v2693_v18, %v9728_v25  ;;  %v2603_v37 = vadd.f32 %v2602_v51, %v9729_v35  ;;  %v2717_v60 = vadd.f32 %v2716_v52, %v9730_v29  ;;  %v9731_v13 = vld [vmem:[#allocation250_spill] sm:$0xff]  ;;  %v9732_v1 = vld [vmem:[#allocation169_spill] sm:$0xff]  ;;  %v9734_v7 = vld [vmem:[#allocation255_spill] sm:$0xff] }
 0x4a5   :  { %v2740_v36 = vadd.f32 %v2739_v5, %v9731_v13  ;;  %v2763_v2 = vadd.f32 %v2762_v49, %v9732_v1  ;;  %v9733_v4 = vld [vmem:[#allocation254_spill] sm:$0xff]  ;;  %v9735_v31 = vld [vmem:[#allocation256_spill] sm:$0xff]  ;;  %v9736_v26 = vld [vmem:[#allocation257_spill] sm:$0xff] }
 0x4a6   :  { %v2626_v38 = vadd.f32 %v2625_v23, %v9733_v4  ;;  %v2649_v16 = vadd.f32 %v2648_v43, %v9734_v7  ;;  %v2672_v0 = vadd.f32 %v2671_v32, %v9735_v31  ;;  %v2695_v30 = vadd.f32 %v2694_v55, %v9736_v26  ;;  %v9737_v42 = vld [vmem:[#allocation76_spill] sm:$0xff]  ;;  %v9738_v56 = vld [vmem:[#allocation258_spill] sm:$0xff]  ;;  %v9739_v63 = vld [vmem:[#allocation259_spill] sm:$0xff] }
 0x4a7   :  { %v2604_v46 = vadd.f32 %v2603_v37, %v9737_v42  ;;  %v2718_v41 = vadd.f32 %v2717_v60, %v9738_v56  ;;  %v2741_v34 = vadd.f32 %v2740_v36, %v9739_v63  ;;  %v9740_v40 = vld [vmem:[#allocation260_spill] sm:$0xff]  ;;  %v9741_v8 = vld [vmem:[#allocation207_spill] sm:$0xff]  ;;  %v9742_v18 = vld [vmem:[#allocation265_spill] sm:$0xff] }
 0x4a8   :  { %v2764_v47 = vadd.f32 %v2763_v2, %v9740_v40  ;;  %v2627_v19 = vadd.f32 %v2626_v38, %v9741_v8  ;;  %v2650_v48 = vadd.f32 %v2649_v16, %v9742_v18  ;;  %v9743_v51 = vld [vmem:[#allocation85_spill] sm:$0xff]  ;;  %v9744_v52 = vld [vmem:[#allocation210_spill] sm:$0xff]  ;;  %v9745_v5 = vld [vmem:[#allocation112_spill] sm:$0xff] }
 0x4a9   :  { %v2673_v9 = vadd.f32 %v2672_v0, %v9743_v51  ;;  %v2696_v28 = vadd.f32 %v2695_v30, %v9744_v52  ;;  %v2605_v59 = vadd.f32 %v2604_v46, %v9745_v5  ;;  %v9746_v49 = vld [vmem:[#allocation266_spill] sm:$0xff]  ;;  %v9748_v43 = vld [vmem:[#allocation213_spill] sm:$0xff]  ;;  %v9749_v32 = vld [vmem:[#allocation219_spill] sm:$0xff] }
 0x4aa   :  { %v2719_v62 = vadd.f32 %v2718_v41, %v9746_v49  ;;  %v9747_v23 = vld [vmem:[#allocation94_spill] sm:$0xff]  ;;  %v2765_v39 = vadd.f32 %v2764_v47, %v9748_v43  ;;  %v2628_v25 = vadd.f32 %v2627_v19, %v9749_v32  ;;  %v9751_v37 = vld [vmem:[#allocation121_spill] sm:$0xff]  ;;  %v9754_v2 = vld [vmem:[#allocation271_spill] sm:$0xff] }
 0x4ab   :  { %v2742_v3 = vadd.f32 %v2741_v34, %v9747_v23  ;;  %v9750_v55 = vld [vmem:[#allocation270_spill] sm:$0xff]  ;;  %v2674_v29 = vadd.f32 %v2673_v9, %v9751_v37  ;;  %v9753_v36 = vld [vmem:[#allocation161_spill] sm:$0xff]  ;;  %v9759_v46 = vld [vmem:[#allocation188_spill] sm:$0xff] }
 0x4ac   :  { %v2651_v35 = vadd.f32 %v2650_v48, %v9750_v55  ;;  %v9752_v60 = vld [vmem:[#allocation222_spill] sm:$0xff]  ;;  %v2606_v1 = vadd.f32 %v2605_v59, %v9753_v36  ;;  %v2720_v4 = vadd.f32 %v2719_v62, %v9754_v2  ;;  %v9756_v16 = vld [vmem:[#allocation225_spill] sm:$0xff]  ;;  %v9761_v34 = vld [vmem:[#allocation352_spill] sm:$0xff] }
 0x4ad   :  { %v2697_v13 = vadd.f32 %v2696_v28, %v9752_v60  ;;  %v9755_v38 = vld [vmem:[#allocation130_spill] sm:$0xff]  ;;  %v2766_v31 = vadd.f32 %v2765_v39, %v9756_v16  ;;  %v2675_v56 = vadd.f32 %v2674_v29, %v9759_v46  ;;  %v9760_v41 = vld [vmem:[#allocation237_spill] sm:$0xff]  ;;  %v9762_v47 = vld [vmem:[#allocation275_spill] sm:$0xff] }
 0x4ae   :  { %v2743_v7 = vadd.f32 %v2742_v3, %v9755_v38  ;;  %v9757_v0 = vld [vmem:[#allocation234_spill] sm:$0xff]  ;;  %v2607_v40 = vadd.f32 %v2606_v1, %v9761_v34  ;;  %v2721_v8 = vadd.f32 %v2720_v4, %v9762_v47  ;;  %v9763_v19 = vld [vmem:[#allocation276_spill] sm:$0xff]  ;;  %v9765_v9 = vld [vmem:[#allocation353_spill] sm:$0xff] }
 0x4af   :  { %v2629_v26 = vadd.f32 %v2628_v25, %v9757_v0  ;;  %v9758_v30 = vld [vmem:[#allocation274_spill] sm:$0xff]  ;;  %v2698_v63 = vadd.f32 %v2697_v13, %v9760_v41  ;;  %v9766_v28 = vld [vmem:[#allocation285_spill] sm:$0xff]  ;;  %v9768_v62 = vld [vmem:[#allocation355_spill] sm:$0xff] }
 0x4b0   :  { %v2652_v42 = vadd.f32 %v2651_v35, %v9758_v30  ;;  %v2744_v18 = vadd.f32 %v2743_v7, %v9763_v19  ;;  %v9764_v48 = vld [vmem:[#allocation278_spill] sm:$0xff]  ;;  %v9769_v3 = vld [vmem:[#allocation13_spill] sm:$0xff]  ;;  %v9770_v39 = vld [vmem:[#allocation287_spill] sm:$0xff] }
 0x4b1   :  { %v2767_v51 = vadd.f32 %v2766_v31, %v9764_v48  ;;  %v2630_v52 = vadd.f32 %v2629_v26, %v9765_v9  ;;  %v9767_v59 = vld [vmem:[#allocation354_spill] sm:$0xff]  ;;  %v2699_v23 = vadd.f32 %v2698_v63, %v9768_v62  ;;  %v2608_v43 = vadd.f32 %v2607_v40, %v9769_v3  ;;  %v9771_v25 = vld [vmem:[#allocation356_spill] sm:$0xff]  ;;  %v9772_v35 = vld [vmem:[#allocation357_spill] sm:$0xff] }
 0x4b2   :  { %v2653_v5 = vadd.f32 %v2652_v42, %v9766_v28  ;;  %v2676_v49 = vadd.f32 %v2675_v56, %v9767_v59  ;;  %v2722_v32 = vadd.f32 %v2721_v8, %v9770_v39  ;;  %v2745_v55 = vadd.f32 %v2744_v18, %v9771_v25  ;;  %v9773_v29 = vld [vmem:[#allocation15_spill] sm:$0xff]  ;;  %v9774_v13 = vld [vmem:[#allocation186_spill] sm:$0xff]  ;;  %v9777_v7 = vld [vmem:[#allocation33_spill] sm:$0xff] }
 0x4b3   :  { %v2768_v37 = vadd.f32 %v2767_v51, %v9772_v35  ;;  %v2631_v60 = vadd.f32 %v2630_v52, %v9773_v29  ;;  %v9775_v1 = vld [vmem:[#allocation18_spill] sm:$0xff]  ;;  %v9776_v4 = vld [vmem:[#allocation187_spill] sm:$0xff]  ;;  %v2609_v16 = vadd.f32 %v2608_v43, %v9777_v7  ;;  %v9778_v31 = vld [vmem:[#allocation21_spill] sm:$0xff] }
 0x4b4   :  { %v2654_v36 = vadd.f32 %v2653_v5, %v9774_v13  ;;  %v2677_v2 = vadd.f32 %v2676_v49, %v9775_v1  ;;  %v2700_v38 = vadd.f32 %v2699_v23, %v9776_v4  ;;  %v2723_v0 = vadd.f32 %v2722_v32, %v9778_v31  ;;  %v9779_v26 = vld [vmem:[#allocation23_spill] sm:$0xff]  ;;  %v9780_v42 = vld [vmem:[#allocation25_spill] sm:$0xff]  ;;  %v9782_v63 = vld [vmem:[#allocation192_spill] sm:$0xff] }
 0x4b5   :  { %v2746_v30 = vadd.f32 %v2745_v55, %v9779_v26  ;;  %v2769_v46 = vadd.f32 %v2768_v37, %v9780_v42  ;;  %v9781_v56 = vld [vmem:[#allocation69_spill] sm:$0xff]  ;;  %v2632_v34 = vadd.f32 %v2631_v60, %v9782_v63  ;;  %v9783_v40 = vld [vmem:[#allocation36_spill] sm:$0xff]  ;;  %v9785_v18 = vld [vmem:[#allocation71_spill] sm:$0xff]  ;;  %v2451_v60 = vadd.f32 %v7426_v21, %v7370_v61 }
 0x4b6   :  { %v2496_v41 = vadd.f32 %v7411_v12, %v9781_v56  ;;  %v2655_v47 = vadd.f32 %v2654_v36, %v9783_v40  ;;  %v9784_v8 = vld [vmem:[#allocation193_spill] sm:$0xff]  ;;  %v2519_v48 = vadd.f32 %v7417_v45, %v9785_v18  ;;  %v9788_v5 = vld [vmem:[#allocation39_spill] sm:$0xff]  ;;  %v9789_v49 = vld [vmem:[#allocation74_spill] sm:$0xff]  ;;  %v2428_v45 = vadd.f32 %v7414_v57, %v7365_v58 }
 0x4b7   :  { %v2678_v19 = vadd.f32 %v2677_v2, %v9784_v8  ;;  %v9786_v51 = vld [vmem:[#allocation73_spill] sm:$0xff]  ;;  %v2701_v59 = vadd.f32 %v2700_v38, %v9788_v5  ;;  %v2565_v62 = vadd.f32 %v7423_v15, %v9789_v49  ;;  %v9791_v3 = vld [vmem:[#allocation55_spill] sm:$0xff]  ;;  %v9793_v25 = vld [vmem:[#allocation56_spill] sm:$0xff]  ;;  %v2474_v15 = vadd.f32 %v7429_v20, %v7373_v53  ;;  %2791 = vst [vmem:[#allocation7 + $0x8] sm:$0xff] %v2451_v60 }
 0x4b8   :  { %v2542_v9 = vadd.f32 %v7420_v22, %v9786_v51  ;;  %v9787_v52 = vld [vmem:[#allocation53_spill] sm:$0xff]  ;;  %v2633_v43 = vadd.f32 %v2632_v34, %v9791_v3  ;;  %v2656_v55 = vadd.f32 %v2655_v47, %v9793_v25  ;;  %v9794_v22 = vld [vmem:[#allocation43_spill] sm:$0xff]  ;;  %v9795_v37 = vld [vmem:[#allocation44_spill] sm:$0xff]  ;;  %v2520_v1 = vadd.f32 %v2519_v48, %v7384_v17  ;;  %2790 = vst [vmem:[#allocation7] sm:$0xff] %v2428_v45 }
 0x4b9   :  { %v2610_v28 = vadd.f32 %v2609_v16, %v9787_v52  ;;  %v9790_v12 = vld [vmem:[#allocation77_spill] sm:$0xff]  ;;  %v2747_v35 = vadd.f32 %v2746_v30, %v9794_v22  ;;  %v2770_v29 = vadd.f32 %v2769_v46, %v9795_v37  ;;  %v9796_v13 = vld [vmem:[#allocation59_spill] sm:$0xff]  ;;  %v2566_v16 = vadd.f32 %v2565_v62, %v7393_v50  ;;  %v9802_v30 = vld [vmem:[#allocation202_spill] sm:$0xff]  ;;  %2792 = vst [vmem:[#allocation7 + $0x10] sm:$0xff] %v2474_v15 }
 0x4ba   :  { %v2588_v23 = vadd.f32 %v7432_v6, %v9790_v12  ;;  %v9792_v39 = vld [vmem:[#allocation41_spill] sm:$0xff]  ;;  %v2497_v6 = vadd.f32 %v2496_v41, %v7376_v24  ;;  %v2679_v36 = vadd.f32 %v2678_v19, %v9796_v13  ;;  %v2543_v58 = vadd.f32 %v2542_v9, %v7390_v27  ;;  %v9797_v57 = vld [vmem:[#allocation79_spill] sm:$0xff]  ;;  %v851_v24 = vld [vmem:[#allocation5 + $0xbe8] sm:$0xff]  ;;  %2794 = vst [vmem:[#allocation7 + $0x20] sm:$0xff] %v2520_v1 }
 0x4bb   :  { %v2724_v32 = vadd.f32 %v2723_v0, %v9792_v39  ;;  %v2611_v2 = vadd.f32 %v2610_v28, %v9797_v57  ;;  %v9798_v4 = vld [vmem:[#allocation61_spill] sm:$0xff]  ;;  %v850_v7 = vld [vmem:[#allocation5 + $0xbe0] sm:$0xff]  ;;  %v9801_v0 = vld [vmem:[#allocation208_spill] sm:$0xff]  ;;  %v2748_v17 = vadd.f32 %v2747_v35, %v9802_v30  ;;  %2796 = vst [vmem:[#allocation7 + $0x30] sm:$0xff] %v2566_v16 }
 0x4bc   :  { %v2702_v38 = vadd.f32 %v2701_v59, %v9798_v4  ;;  %v2589_v61 = vadd.f32 %v2588_v23, %v7396_v10  ;;  %v9799_v21 = vld [vmem:[#allocation81_spill] sm:$0xff]  ;;  %v9800_v53 = vld [vmem:[#allocation63_spill] sm:$0xff]  ;;  %v2657_v26 = vadd.f32 %v2656_v55, %v9801_v0  ;;  %v9803_v42 = vld [vmem:[#allocation66_spill] sm:$0xff]  ;;  %2793 = vst [vmem:[#allocation7 + $0x18] sm:$0xff] %v2497_v6 }
 0x4bd   :  { %v2634_v31 = vadd.f32 %v2633_v43, %v9799_v21  ;;  %v2725_v20 = vadd.f32 %v2724_v32, %v9800_v53  ;;  %v2771_v27 = vadd.f32 %v2770_v29, %v9803_v42  ;;  %v852_v46 = vld [vmem:[#allocation5 + $0xbf0] sm:$0xff]  ;;  %v9804_v56 = vld [vmem:[#allocation84_spill] sm:$0xff]  ;;  %v853_v63 = vld [vmem:[#allocation5 + $0xbf8] sm:$0xff]  ;;  %v2612_v50 = vadd.f32 %v2611_v2, %v7399_v33  ;;  %2795 = vst [vmem:[#allocation7 + $0x28] sm:$0xff] %v2543_v58 }
 0x4be   :  { %v2680_v41 = vadd.f32 %v2679_v36, %v9804_v56  ;;  %v9805_v34 = vld [vmem:[#allocation367_spill] sm:$0xff]  ;;  %v9807_v8 = vld [vmem:[#allocation368_spill] sm:$0xff]  ;;  %v9808_v48 = vld [vmem:[#allocation89_spill] sm:$0xff]  ;;  %v2658_v28 = vadd.f32 %v2657_v26, %v7405_v54  ;;  %2797 = vst [vmem:[#allocation7 + $0x38] sm:$0xff] %v2589_v61 }
 0x4bf   :  { %v2386_v40 = vmul.f32 %v9805_v34, %v850_v7  ;;  %v9806_v10 = vld [vmem:[#allocation87_spill] sm:$0xff]  ;;  %v2387_v19 = vmul.f32 %v9807_v8, %v851_v24  ;;  %v2635_v18 = vadd.f32 %v2634_v31, %v7402_v11  ;;  %v2726_v51 = vadd.f32 %v2725_v20, %v9808_v48  ;;  %v9809_v9 = vld [vmem:[#allocation369_spill] sm:$0xff]  ;;  %v9811_v49 = vld [vmem:[#allocation370_spill] sm:$0xff]  ;;  %2798 = vst [vmem:[#allocation7 + $0x40] sm:$0xff] %v2612_v50 }
 0x4c0   :  { %v2703_v47 = vadd.f32 %v2702_v38, %v9806_v10  ;;  %v2388_v52 = vmul.f32 %v9809_v9, %v852_v46  ;;  %v9810_v5 = vld [vmem:[#allocation91_spill] sm:$0xff]  ;;  %v2389_v62 = vmul.f32 %v9811_v49, %v853_v63  ;;  %v2681_v33 = vadd.f32 %v2680_v41, %v7408_v44  ;;  %2800 = vst [vmem:[#allocation7 + $0x50] sm:$0xff] %v2658_v28 }
 0x4c1   :  { %v2749_v59 = vadd.f32 %v2748_v17, %v9810_v5  ;;  %v2772_v12 = vadd.f32 %v2771_v27, %v7362_v14  ;;  %v2727_v11 = vadd.f32 %v2726_v51, %v2387_v19  ;;  %2799 = vst [vmem:[#allocation7 + $0x48] sm:$0xff] %v2635_v18 }
 0x4c2   :  { %v2704_v23 = vadd.f32 %v2703_v47, %v2386_v40  ;;  %2801 = vst [vmem:[#allocation7 + $0x58] sm:$0xff] %v2681_v33 }
 0x4c3   :  { %v2750_v3 = vadd.f32 %v2749_v59, %v2388_v52  ;;  %v2773_v43 = vadd.f32 %v2772_v12, %v2389_v62  ;;  %2803 = vst [vmem:[#allocation7 + $0x68] sm:$0xff] %v2727_v11 }
 0x4c4   :  { %2802 = vst [vmem:[#allocation7 + $0x60] sm:$0xff] %v2704_v23 }
 0x4c5   :  { %2804 = vst [vmem:[#allocation7 + $0x70] sm:$0xff] %v2750_v3 }
 0x4c6   :  { %2805 = vst [vmem:[#allocation7 + $0x78] sm:$0xff] %v2773_v43 }
 0x4c7   :  { %2818 = dma.vmem_to_hbm [thread:$0]  %s2811_s1, 2048, %s2813_s23, [#allocation4], %s3683_s17, %s3683_s17, %s3684_s18  }
 0x4c8   :  { %3680 = dma.done.wait [#allocation4], 2048  }
 0x4c9   :  { %3681 = vsyncadd [#allocation4], 4294965248 }
 0x4ca   :  { %2823 = vsyncpa [#allocation3], 1 }
 0x4cb   :  { %2824 = vsyncpa [#allocation6], 1 }
 0x4cc   :  { %2825 = vsyncpa [#allocation4], 1 }

</bundles_post_ra>
